<compile_context>
chip_gen: v7x
topology: tpu7x:2x2x1
jax: 0.10.0
libtpu: 0.0.40
codegen_flags: <defaults>
</compile_context>

<pallas_src>
import functools
import math

import numpy as np
import jax
import jax.numpy as jnp
from jax.experimental import pallas as pl
from jax.experimental.pallas import tpu as pltpu


# ----------------------------------------------------------------------------
# Structural (compile-time constant) 0/1 matrices: conv taps / nearest resize
# (per batch element now -- no block-diagonal batch folding)
# ----------------------------------------------------------------------------

def _conv_tap_matrices(T_in, stride, K, pad):
    """S[k, j, t] = 1  iff  j == stride*t + k - pad (in range).  Encodes pad+shift+stride."""
    T_out = (T_in + 2 * pad - K) // stride + 1
    S = np.zeros((K, T_in, T_out), np.float32)
    for k in range(K):
        for t in range(T_out):
            j = stride * t + k - pad
            if 0 <= j < T_in:
                S[k, j, t] = 1.0
    return S


def _nearest_matrix(T_src, T_dst):
    """M[floor(t*T_src/T_dst), t] = 1  (F.interpolate mode='nearest')."""
    M = np.zeros((T_src, T_dst), np.float32)
    for t in range(T_dst):
        M[(t * T_src) // T_dst, t] = 1.0
    return M


# ----------------------------------------------------------------------------
# Fused Pallas kernel: one grid program == one batch element, iterations unrolled
# ----------------------------------------------------------------------------

def _video_block_kernel(*refs, depth, K, iters, compute_dtype):
    refs = list(refs)

    def take(n):
        out = refs[:n]
        del refs[:n]
        return out

    (x_ref,) = take(1)
    (projW, proj_ba, sppw, sppb, fusew, fuseb,
     cat_dsW, cat_upW, cat_b, cat_a, l0W, l0_ba, l1W, ci_cols) = take(14)
    S = take(depth)            # per-level depthwise tap matrices (stride folded in)
    U = take(depth - 1)        # nearest resize: level l+1 -> l
    V = take(depth - 2)        # nearest resize: level i (>=2) -> level 0
    (o_ref,) = take(1)

    f32 = jnp.float32
    cd = compute_dtype
    C = projW.shape[1]

    def mm(a, b):
        return jnp.dot(a.astype(cd), b.astype(cd), preferred_element_type=f32)

    def prelu(y, a_col):
        return jnp.where(y > 0.0, y, a_col * y)

    def col(ref, it, j):                       # one packed per-channel column -> (rows, 1)
        return ref[it][:, j:j + 1]

    def dwconv(act, w_ref, it, base, b_col, s_ref):
        # depthwise conv (k=K, pad=(K-1)//2, stride folded into s_ref) + folded BatchNorm
        taps = w_ref[it]                       # (C, n_cols)
        acc = None
        for k in range(K):
            term = taps[:, base + k:base + k + 1] * mm(act, s_ref[k])
            acc = term if acc is None else acc + term
        return acc + b_col

    x = x_ref[0].astype(f32)                   # (Ci, T0)  -- VideoBlock residual `res`
    prev = x                                   # carried output, vreg-resident

    for it in range(iters):                    # static unroll: no pl.when / carry scratch
        if it == 0:
            cur = x
        else:                                  # concat_block: per-channel 1x1 conv + PReLU
            s = x + prev
            cur = prelu(col(ci_cols, it, 1) * s + col(ci_cols, it, 2),
                        col(ci_cols, it, 3))

        # proj: 1x1 conv (+folded BN) + PReLU
        h = mm(projW[it], cur) + col(proj_ba, it, 0)
        h = prelu(h, col(proj_ba, it, 1))      # (C, T0)

        # spp_dw downsample chain (level 0 stride 1, levels >=1 stride 2)
        outs = []
        pv = h
        for lvl in range(depth):
            pv = dwconv(pv, sppw, it, lvl * K, col(sppb, it, lvl), S[lvl])
            outs.append(pv)

        # per-level fusion: cat([down, same, up]) -> 1x1 conv (+BN) + PReLU
        #   [down, same] merged into one 2C-contraction matmul,
        #   "up" branch conv done at the *small* T then nearest-upsampled (commuted, exact).
        x_fuse = []
        for i in range(depth):
            if i == 0:
                z = mm(cat_dsW[it, 0][:, C:], outs[0])
            else:
                down = dwconv(outs[i - 1], fusew, it, (i - 1) * K,
                              col(fuseb, it, i - 1), S[i])
                ds = jnp.concatenate([down, outs[i]], axis=0)        # (2C, T_i)
                z = mm(cat_dsW[it, i], ds)
            if i < depth - 1:
                up_small = mm(cat_upW[it, i], outs[i + 1])           # (C, T_{i+1})
                z = z + mm(up_small, U[i][...])                      # upsample after conv
            x_fuse.append(prelu(z + col(cat_b, it, i), col(cat_a, it, i)))

        # last[0]: 1x1 conv over the depth-concat of upsampled levels (+BN) + PReLU,
        # with each per-level (C,C) matmul done at its own small T_i, upsampled afterwards.
        acc = mm(l0W[it, 0], x_fuse[0])
        for i in range(1, depth):
            small = mm(l0W[it, i], x_fuse[i])                        # (C, T_i)
            up_mat = U[0] if i == 1 else V[i - 2]
            acc = acc + mm(small, up_mat[...])
        h2 = prelu(acc + col(l0_ba, it, 0), col(l0_ba, it, 1))

        # last[1]: plain 1x1 conv + bias, then the subnetwork residual (res == cur)
        prev = mm(l1W[it], h2) + col(ci_cols, it, 0) + cur

    o_ref[0] = prev.astype(o_ref.dtype)


# ----------------------------------------------------------------------------
# Wrapper
# ----------------------------------------------------------------------------

def video_block_forward(x, params, *, compute_dtype=jnp.float32):
    """x: (B, in_chan, T) float32 -> (B, in_chan, T) float32."""
    B, Ci, T = x.shape
    I, C, _ = params['projW'].shape
    D = params['sppb'].shape[2]
    K = params['sppw'].shape[2] // D
    pad = (K - 1) // 2

    # per-level time lengths (stride-2, pad=(K-1)//2 conv output sizes)
    Ts = [T]
    for _ in range(1, D):
        Ts.append((Ts[-1] + 2 * pad - K) // 2 + 1)

    # structural matrices (compile-time constants, per batch element -> small)
    S_mats = [jnp.asarray(_conv_tap_matrices(Ts[0], 1, K, pad))]
    for l in range(1, D):
        S_mats.append(jnp.asarray(_conv_tap_matrices(Ts[l - 1], 2, K, pad)))
    U_mats = [jnp.asarray(_nearest_matrix(Ts[l + 1], Ts[l])) for l in range(D - 1)]
    V_mats = [jnp.asarray(_nearest_matrix(Ts[i], Ts[0])) for i in range(2, D)]

    weight_names = ['projW', 'proj_ba', 'sppw', 'sppb', 'fusew', 'fuseb',
                    'cat_dsW', 'cat_upW', 'cat_b', 'cat_a', 'l0W', 'l0_ba',
                    'l1W', 'ci_cols']
    weights = [params[n] for n in weight_names]
    mats = S_mats + U_mats + V_mats

    def whole(arr):        # shared weights / structural constants: whole array, fetched once
        nd = arr.ndim
        return pl.BlockSpec(arr.shape, lambda b, nd=nd: (0,) * nd)

    in_specs = ([pl.BlockSpec((1, Ci, T), lambda b: (b, 0, 0))]
                + [whole(w) for w in weights]
                + [whole(m) for m in mats])
    out_spec = pl.BlockSpec((1, Ci, T), lambda b: (b, 0, 0))

    kern = functools.partial(_video_block_kernel, depth=D, K=K, iters=I,
                             compute_dtype=compute_dtype)

    out = pl.pallas_call(
        kern,
        out_shape=jax.ShapeDtypeStruct((B, Ci, T), jnp.float32),
        grid_spec=pltpu.PrefetchScalarGridSpec(
            num_scalar_prefetch=0,
            grid=(B,),                                   # batch-parallel (v7x 2nd TC)
            in_specs=in_specs,
            out_specs=out_spec),
        compiler_params=pltpu.CompilerParams(
            dimension_semantics=("parallel",),
            vmem_limit_bytes=32 * 1024 * 1024),
    )(x, *weights, *mats)
    return out


# ----------------------------------------------------------------------------
# Parameter construction (deterministic, synthetic; BatchNorm pre-folded)
# ----------------------------------------------------------------------------

class _KeyGen:
    def __init__(self, key):
        self._key = key
        self._i = 0

    def __call__(self):
        k = jax.random.fold_in(self._key, self._i)
        self._i += 1
        return k


def init_video_block_params(key, in_chan, out_chan, depth, iters, K):
    assert depth >= 2
    kg = _KeyGen(key)
    f32 = jnp.float32
    Ci, C = in_chan, out_chan

    def rnd(shape, scale):
        return scale * jax.random.normal(kg(), shape, f32)

    def bn_fold(c):
        gamma = 1.0 + rnd((c,), 0.05)
        beta = rnd((c,), 0.05)
        mean = rnd((c,), 0.05)
        var = 1.0 + 0.1 * jnp.abs(jax.random.normal(kg(), (c,), f32))
        scale = gamma / jnp.sqrt(var + 1e-5)
        shift = beta - mean * scale
        return scale, shift

    def pw(cin, cout):          # 1x1 conv + folded BN -> (cout, cin), (cout,)
        W = rnd((cout, cin), 1.0 / math.sqrt(cin))
        b = rnd((cout,), 0.05)
        s, sh = bn_fold(cout)
        return s[:, None] * W, s * b + sh

    def dw(c):                  # depthwise conv (c, K) + folded BN
        w = rnd((c, K), 1.0 / math.sqrt(K))
        b = rnd((c,), 0.05)
        s, sh = bn_fold(c)
        return s[:, None] * w, s * b + sh

    def alpha(c):               # single shared PReLU alpha broadcast to (c,)
        a = 0.25 + rnd((), 0.02)
        return jnp.full((c,), a, f32)

    names = ['projW', 'proj_ba', 'sppw', 'sppb', 'fusew', 'fuseb', 'cat_dsW',
             'cat_upW', 'cat_b', 'cat_a', 'l0W', 'l0_ba', 'l1W', 'ci_cols']
    P = {k: [] for k in names}

    for it in range(iters):
        W, b = pw(Ci, C)
        P['projW'].append(W)
        P['proj_ba'].append(jnp.stack([b, alpha(C)], axis=1))          # (C, 2)

        sw, sb = [], []
        for _ in range(depth):
            w_, b_ = dw(C)
            sw.append(w_)
            sb.append(b_)
        P['sppw'].append(jnp.concatenate(sw, axis=1))                  # (C, depth*K)
        P['sppb'].append(jnp.stack(sb, axis=1))                        # (C, depth)

        fw, fb = [], []
        for _ in range(depth - 1):
            w_, b_ = dw(C)
            fw.append(w_)
            fb.append(b_)
        P['fusew'].append(jnp.concatenate(fw, axis=1))                 # (C, (depth-1)*K)
        P['fuseb'].append(jnp.stack(fb, axis=1))                       # (C, depth-1)

        dsW, upW, cbs, cas = [], [], [], []
        for i in range(depth):
            has_down = i > 0
            has_up = i < depth - 1
            n_in = 1 + int(has_down) + int(has_up)
            Wfull, bfull = pw(C * n_in, C)                             # concat weight [down?|same|up?]
            idx = 0
            if has_down:
                w_down = Wfull[:, idx * C:(idx + 1) * C]
                idx += 1
            else:
                w_down = jnp.zeros((C, C), f32)
            w_same = Wfull[:, idx * C:(idx + 1) * C]
            idx += 1
            if has_up:
                upW.append(Wfull[:, idx * C:(idx + 1) * C])
                idx += 1
            dsW.append(jnp.concatenate([w_down, w_same], axis=1))       # (C, 2C)
            cbs.append(bfull)
            cas.append(alpha(C))
        P['cat_dsW'].append(jnp.stack(dsW, axis=0))                    # (depth, C, 2C)
        P['cat_upW'].append(jnp.stack(upW, axis=0))                    # (depth-1, C, C)
        P['cat_b'].append(jnp.stack(cbs, axis=1))                      # (C, depth)
        P['cat_a'].append(jnp.stack(cas, axis=1))                      # (C, depth)

        W0, b0 = pw(depth * C, C)
        P['l0W'].append(jnp.stack([W0[:, i * C:(i + 1) * C] for i in range(depth)],
                                  axis=0))                             # (depth, C, C)
        P['l0_ba'].append(jnp.stack([b0, alpha(C)], axis=1))           # (C, 2)

        P['l1W'].append(rnd((Ci, C), 1.0 / math.sqrt(C)))              # plain conv (no BN)
        l1b = rnd((Ci,), 0.05)
        if it == 0:             # no concat_block at iteration 0 (values unused)
            cbw = jnp.ones((Ci,), f32)
            cbb = jnp.zeros((Ci,), f32)
            cba = jnp.ones((Ci,), f32)
        else:
            cbw = 1.0 + rnd((Ci,), 0.1)
            cbb = rnd((Ci,), 0.05)
            cba = alpha(Ci)
        P['ci_cols'].append(jnp.stack([l1b, cbw, cbb, cba], axis=1))   # (Ci, 4)

    return {k: jnp.stack(v, axis=0) for k, v in P.items()}


# ----------------------------------------------------------------------------
# Plain-JAX reference (mirrors the PyTorch forward on the same folded params)
# ----------------------------------------------------------------------------

def _prelu_ref(x, a):
    return jnp.where(x > 0, x, a * x)


def _pw_ref(x, W, b):
    y = jnp.einsum('oc,bct->bot', W, x, precision=jax.lax.Precision.HIGHEST)
    return y + b[None, :, None]


def _dw_ref(x, w, b, stride, K, pad):
    Bn, C, T = x.shape
    T_out = (T + 2 * pad - K) // stride + 1
    xp = jnp.pad(x, ((0, 0), (0, 0), (pad, pad)))
    out = jnp.zeros((Bn, C, T_out), jnp.float32)
    for k in range(K):
        sl = xp[:, :, k::stride][:, :, :T_out]
        out = out + w[None, :, k:k + 1] * sl
    return out + b[None, :, None]


def _nearest_ref(x, T_dst):
    T_src = x.shape[-1]
    idx = (jnp.arange(T_dst) * T_src) // T_dst
    return x[:, :, idx]


def _subnet_ref(x, P, it, depth, K):
    C = P['projW'].shape[1]
    pad = (K - 1) // 2
    h = _prelu_ref(_pw_ref(x, P['projW'][it], P['proj_ba'][it, :, 0]),
                   P['proj_ba'][it, :, 1][None, :, None])
    outs, prev = [], h
    for lvl in range(depth):
        stride = 1 if lvl == 0 else 2
        w = P['sppw'][it][:, lvl * K:(lvl + 1) * K]
        prev = _dw_ref(prev, w, P['sppb'][it][:, lvl], stride, K, pad)
        outs.append(prev)
    x_fuse = []
    for i in range(depth):
        parts, chunks = [], []
        if i > 0:
            w = P['fusew'][it][:, (i - 1) * K:i * K]
            parts.append(_dw_ref(outs[i - 1], w, P['fuseb'][it][:, i - 1], 2, K, pad))
            chunks.append(P['cat_dsW'][it, i][:, :C])
        parts.append(outs[i])
        chunks.append(P['cat_dsW'][it, i][:, C:])
        if i < depth - 1:
            parts.append(_nearest_ref(outs[i + 1], outs[i].shape[-1]))
            chunks.append(P['cat_upW'][it, i])
        y = jnp.concatenate(parts, axis=1)
        W = jnp.concatenate(chunks, axis=1)
        z = _pw_ref(y, W, P['cat_b'][it][:, i])
        x_fuse.append(_prelu_ref(z, P['cat_a'][it][:, i][None, :, None]))
    T0 = outs[0].shape[-1]
    ups = [x_fuse[0]] + [_nearest_ref(x_fuse[i], T0) for i in range(1, depth)]
    cat = jnp.concatenate(ups, axis=1)
    Wl0 = jnp.concatenate([P['l0W'][it, i] for i in range(depth)], axis=1)
    h2 = _prelu_ref(_pw_ref(cat, Wl0, P['l0_ba'][it, :, 0]),
                    P['l0_ba'][it, :, 1][None, :, None])
    out = _pw_ref(h2, P['l1W'][it], P['ci_cols'][it, :, 0])
    return x + out


def reference_forward(x, P, depth, iters, K):
    res0 = x
    cur = x
    for it in range(iters):
        if it == 0:
            inp = cur
        else:
            s = res0 + cur
            y = P['ci_cols'][it, :, 1][None, :, None] * s + P['ci_cols'][it, :, 2][None, :, None]
            inp = _prelu_ref(y, P['ci_cols'][it, :, 3][None, :, None])
        cur = _subnet_ref(inp, P, it, depth, K)
    return cur


# ----------------------------------------------------------------------------
# Main
# ----------------------------------------------------------------------------

if __name__ == "__main__":
    B, in_chan, out_chan, depth, iters, T, K = 2, 16, 32, 4, 2, 32, 5

    root = jax.random.PRNGKey(0)
    params = init_video_block_params(jax.random.fold_in(root, 1),
                                     in_chan, out_chan, depth, iters, K)
    x = jax.random.normal(jax.random.fold_in(root, 2), (B, in_chan, T), jnp.float32)

    fwd = jax.jit(video_block_forward)
    out = fwd(x, params)
    jax.block_until_ready(out)

    assert out.shape == (B, in_chan, T), out.shape
    assert bool(jnp.all(jnp.isfinite(out)))

    # correctness check against a plain-JAX reference of the PyTorch forward
    ref = reference_forward(x, params, depth, iters, K)
    err = float(jnp.max(jnp.abs(out - ref)))
    scale = float(jnp.max(jnp.abs(ref))) + 1e-6
    assert err / scale < 5e-3, (err, scale)

    print("KERNEL_OK")
</pallas_src>

<mosaic_0001>
module attributes {stable_mosaic.version = 11 : i64} {
  func.func @_video_block_kernel(%arg0: i32, %arg1: memref<1x16x32xf32, #tpu.memory_space<vmem>>, %arg2: memref<2x32x16xf32, #tpu.memory_space<vmem>>, %arg3: memref<2x32x2xf32, #tpu.memory_space<vmem>>, %arg4: memref<2x32x20xf32, #tpu.memory_space<vmem>>, %arg5: memref<2x32x4xf32, #tpu.memory_space<vmem>>, %arg6: memref<2x32x15xf32, #tpu.memory_space<vmem>>, %arg7: memref<2x32x3xf32, #tpu.memory_space<vmem>>, %arg8: memref<2x4x32x64xf32, #tpu.memory_space<vmem>>, %arg9: memref<2x3x32x32xf32, #tpu.memory_space<vmem>>, %arg10: memref<2x32x4xf32, #tpu.memory_space<vmem>>, %arg11: memref<2x32x4xf32, #tpu.memory_space<vmem>>, %arg12: memref<2x4x32x32xf32, #tpu.memory_space<vmem>>, %arg13: memref<2x32x2xf32, #tpu.memory_space<vmem>>, %arg14: memref<2x16x32xf32, #tpu.memory_space<vmem>>, %arg15: memref<2x16x4xf32, #tpu.memory_space<vmem>>, %arg16: memref<5x32x32xf32, #tpu.memory_space<vmem>>, %arg17: memref<5x32x16xf32, #tpu.memory_space<vmem>>, %arg18: memref<5x16x8xf32, #tpu.memory_space<vmem>>, %arg19: memref<5x8x4xf32, #tpu.memory_space<vmem>>, %arg20: memref<16x32xf32, #tpu.memory_space<vmem>>, %arg21: memref<8x16xf32, #tpu.memory_space<vmem>>, %arg22: memref<4x8xf32, #tpu.memory_space<vmem>>, %arg23: memref<8x32xf32, #tpu.memory_space<vmem>>, %arg24: memref<4x32xf32, #tpu.memory_space<vmem>>, %arg25: memref<1x16x32xf32, #tpu.memory_space<vmem>>) attributes {dimension_semantics = [#tpu.dimension_semantics<parallel>], iteration_bounds = array<i64: 2>, scalar_prefetch = 0 : i64, scratch_operands = 0 : i64, tpu.core_type = #tpu.core_type<tc>, window_params = [{transform_indices = @transform_0, window_bounds = array<i64: 1, 16, 32>}, {pipeline_mode = #tpu.pipeline_mode<synchronous>, transform_indices = @transform_1, window_bounds = array<i64: 2, 32, 16>}, {pipeline_mode = #tpu.pipeline_mode<synchronous>, transform_indices = @transform_2, window_bounds = array<i64: 2, 32, 2>}, {pipeline_mode = #tpu.pipeline_mode<synchronous>, transform_indices = @transform_3, window_bounds = array<i64: 2, 32, 20>}, {pipeline_mode = #tpu.pipeline_mode<synchronous>, transform_indices = @transform_4, window_bounds = array<i64: 2, 32, 4>}, {pipeline_mode = #tpu.pipeline_mode<synchronous>, transform_indices = @transform_5, window_bounds = array<i64: 2, 32, 15>}, {pipeline_mode = #tpu.pipeline_mode<synchronous>, transform_indices = @transform_6, window_bounds = array<i64: 2, 32, 3>}, {pipeline_mode = #tpu.pipeline_mode<synchronous>, transform_indices = @transform_7, window_bounds = array<i64: 2, 4, 32, 64>}, {pipeline_mode = #tpu.pipeline_mode<synchronous>, transform_indices = @transform_8, window_bounds = array<i64: 2, 3, 32, 32>}, {pipeline_mode = #tpu.pipeline_mode<synchronous>, transform_indices = @transform_9, window_bounds = array<i64: 2, 32, 4>}, {pipeline_mode = #tpu.pipeline_mode<synchronous>, transform_indices = @transform_10, window_bounds = array<i64: 2, 32, 4>}, {pipeline_mode = #tpu.pipeline_mode<synchronous>, transform_indices = @transform_11, window_bounds = array<i64: 2, 4, 32, 32>}, {pipeline_mode = #tpu.pipeline_mode<synchronous>, transform_indices = @transform_12, window_bounds = array<i64: 2, 32, 2>}, {pipeline_mode = #tpu.pipeline_mode<synchronous>, transform_indices = @transform_13, window_bounds = array<i64: 2, 16, 32>}, {pipeline_mode = #tpu.pipeline_mode<synchronous>, transform_indices = @transform_14, window_bounds = array<i64: 2, 16, 4>}, {pipeline_mode = #tpu.pipeline_mode<synchronous>, transform_indices = @transform_15, window_bounds = array<i64: 5, 32, 32>}, {pipeline_mode = #tpu.pipeline_mode<synchronous>, transform_indices = @transform_16, window_bounds = array<i64: 5, 32, 16>}, {pipeline_mode = #tpu.pipeline_mode<synchronous>, transform_indices = @transform_17, window_bounds = array<i64: 5, 16, 8>}, {pipeline_mode = #tpu.pipeline_mode<synchronous>, transform_indices = @transform_18, window_bounds = array<i64: 5, 8, 4>}, {pipeline_mode = #tpu.pipeline_mode<synchronous>, transform_indices = @transform_19, window_bounds = array<i64: 16, 32>}, {pipeline_mode = #tpu.pipeline_mode<synchronous>, transform_indices = @transform_20, window_bounds = array<i64: 8, 16>}, {pipeline_mode = #tpu.pipeline_mode<synchronous>, transform_indices = @transform_21, window_bounds = array<i64: 4, 8>}, {pipeline_mode = #tpu.pipeline_mode<synchronous>, transform_indices = @transform_22, window_bounds = array<i64: 8, 32>}, {pipeline_mode = #tpu.pipeline_mode<synchronous>, transform_indices = @transform_23, window_bounds = array<i64: 4, 32>}, {transform_indices = @transform_24, window_bounds = array<i64: 1, 16, 32>}]} {
    %c0 = arith.constant 0 : index
    %c0_0 = arith.constant 0 : index
    %c0_1 = arith.constant 0 : index
    %0 = vector.load %arg1[%c0, %c0_0, %c0_1] : memref<1x16x32xf32, #tpu.memory_space<vmem>>, vector<1x16x32xf32>
    %1 = vector.shape_cast %0 : vector<1x16x32xf32> to vector<16x32xf32>
    %c0_2 = arith.constant 0 : index
    %c0_3 = arith.constant 0 : index
    %c0_4 = arith.constant 0 : index
    %2 = vector.load %arg2[%c0_2, %c0_3, %c0_4] : memref<2x32x16xf32, #tpu.memory_space<vmem>>, vector<1x32x16xf32>
    %3 = vector.shape_cast %2 : vector<1x32x16xf32> to vector<32x16xf32>
    %cst = arith.constant dense<0.000000e+00> : vector<32x32xf32>
    %4 = tpu.matmul %3, %1, %cst {dimension_numbers = #tpu.dot_dimension_numbers<[1], [0], [0], [1], [0, 0, 1, 1], [], []>} : vector<32x16xf32>, vector<16x32xf32>, vector<32x32xf32> -> vector<32x32xf32>
    %c0_5 = arith.constant 0 : index
    %c0_6 = arith.constant 0 : index
    %c0_7 = arith.constant 0 : index
    %5 = vector.load %arg3[%c0_5, %c0_6, %c0_7] : memref<2x32x2xf32, #tpu.memory_space<vmem>>, vector<1x32x2xf32>
    %6 = vector.shape_cast %5 : vector<1x32x2xf32> to vector<32x2xf32>
    %7 = vector.extract_strided_slice %6 {offsets = [0, 0], sizes = [32, 1], strides = [1, 1]} : vector<32x2xf32> to vector<32x1xf32>
    %8 = vector.broadcast %7 : vector<32x1xf32> to vector<32x32xf32>
    %9 = arith.addf %4, %8 : vector<32x32xf32>
    %c0_8 = arith.constant 0 : index
    %c0_9 = arith.constant 0 : index
    %c0_10 = arith.constant 0 : index
    %10 = vector.load %arg3[%c0_8, %c0_9, %c0_10] : memref<2x32x2xf32, #tpu.memory_space<vmem>>, vector<1x32x2xf32>
    %11 = vector.shape_cast %10 : vector<1x32x2xf32> to vector<32x2xf32>
    %12 = vector.extract_strided_slice %11 {offsets = [0, 1], sizes = [32, 1], strides = [1, 1]} : vector<32x2xf32> to vector<32x1xf32>
    %cst_11 = arith.constant 0.000000e+00 : f32
    %13 = vector.broadcast %cst_11 : f32 to vector<32x32xf32>
    %14 = arith.cmpf ogt, %9, %13 : vector<32x32xf32>
    %15 = vector.broadcast %12 : vector<32x1xf32> to vector<32x32xf32>
    %16 = arith.mulf %15, %9 : vector<32x32xf32>
    %17 = arith.select %14, %9, %16 : vector<32x32xi1>, vector<32x32xf32>
    %c0_12 = arith.constant 0 : index
    %c0_13 = arith.constant 0 : index
    %c0_14 = arith.constant 0 : index
    %18 = vector.load %arg5[%c0_12, %c0_13, %c0_14] : memref<2x32x4xf32, #tpu.memory_space<vmem>>, vector<1x32x4xf32>
    %19 = vector.shape_cast %18 : vector<1x32x4xf32> to vector<32x4xf32>
    %20 = vector.extract_strided_slice %19 {offsets = [0, 0], sizes = [32, 1], strides = [1, 1]} : vector<32x4xf32> to vector<32x1xf32>
    %c0_15 = arith.constant 0 : index
    %c0_16 = arith.constant 0 : index
    %c0_17 = arith.constant 0 : index
    %21 = vector.load %arg4[%c0_15, %c0_16, %c0_17] : memref<2x32x20xf32, #tpu.memory_space<vmem>>, vector<1x32x20xf32>
    %22 = vector.shape_cast %21 : vector<1x32x20xf32> to vector<32x20xf32>
    %23 = vector.extract_strided_slice %22 {offsets = [0, 0], sizes = [32, 1], strides = [1, 1]} : vector<32x20xf32> to vector<32x1xf32>
    %c0_18 = arith.constant 0 : index
    %c0_19 = arith.constant 0 : index
    %c0_20 = arith.constant 0 : index
    %24 = vector.load %arg16[%c0_18, %c0_19, %c0_20] : memref<5x32x32xf32, #tpu.memory_space<vmem>>, vector<1x32x32xf32>
    %25 = vector.shape_cast %24 : vector<1x32x32xf32> to vector<32x32xf32>
    %cst_21 = arith.constant dense<0.000000e+00> : vector<32x32xf32>
    %26 = tpu.matmul %17, %25, %cst_21 {dimension_numbers = #tpu.dot_dimension_numbers<[1], [0], [0], [1], [0, 0, 1, 1], [], []>} : vector<32x32xf32>, vector<32x32xf32>, vector<32x32xf32> -> vector<32x32xf32>
    %27 = vector.broadcast %23 : vector<32x1xf32> to vector<32x32xf32>
    %28 = arith.mulf %27, %26 : vector<32x32xf32>
    %29 = vector.extract_strided_slice %22 {offsets = [0, 1], sizes = [32, 1], strides = [1, 1]} : vector<32x20xf32> to vector<32x1xf32>
    %c1 = arith.constant 1 : index
    %c0_22 = arith.constant 0 : index
    %c0_23 = arith.constant 0 : index
    %30 = vector.load %arg16[%c1, %c0_22, %c0_23] : memref<5x32x32xf32, #tpu.memory_space<vmem>>, vector<1x32x32xf32>
    %31 = vector.shape_cast %30 : vector<1x32x32xf32> to vector<32x32xf32>
    %cst_24 = arith.constant dense<0.000000e+00> : vector<32x32xf32>
    %32 = tpu.matmul %17, %31, %cst_24 {dimension_numbers = #tpu.dot_dimension_numbers<[1], [0], [0], [1], [0, 0, 1, 1], [], []>} : vector<32x32xf32>, vector<32x32xf32>, vector<32x32xf32> -> vector<32x32xf32>
    %33 = vector.broadcast %29 : vector<32x1xf32> to vector<32x32xf32>
    %34 = arith.mulf %33, %32 : vector<32x32xf32>
    %35 = arith.addf %28, %34 : vector<32x32xf32>
    %36 = vector.extract_strided_slice %22 {offsets = [0, 2], sizes = [32, 1], strides = [1, 1]} : vector<32x20xf32> to vector<32x1xf32>
    %c2 = arith.constant 2 : index
    %c0_25 = arith.constant 0 : index
    %c0_26 = arith.constant 0 : index
    %37 = vector.load %arg16[%c2, %c0_25, %c0_26] : memref<5x32x32xf32, #tpu.memory_space<vmem>>, vector<1x32x32xf32>
    %38 = vector.shape_cast %37 : vector<1x32x32xf32> to vector<32x32xf32>
    %cst_27 = arith.constant dense<0.000000e+00> : vector<32x32xf32>
    %39 = tpu.matmul %17, %38, %cst_27 {dimension_numbers = #tpu.dot_dimension_numbers<[1], [0], [0], [1], [0, 0, 1, 1], [], []>} : vector<32x32xf32>, vector<32x32xf32>, vector<32x32xf32> -> vector<32x32xf32>
    %40 = vector.broadcast %36 : vector<32x1xf32> to vector<32x32xf32>
    %41 = arith.mulf %40, %39 : vector<32x32xf32>
    %42 = arith.addf %35, %41 : vector<32x32xf32>
    %43 = vector.extract_strided_slice %22 {offsets = [0, 3], sizes = [32, 1], strides = [1, 1]} : vector<32x20xf32> to vector<32x1xf32>
    %c3 = arith.constant 3 : index
    %c0_28 = arith.constant 0 : index
    %c0_29 = arith.constant 0 : index
    %44 = vector.load %arg16[%c3, %c0_28, %c0_29] : memref<5x32x32xf32, #tpu.memory_space<vmem>>, vector<1x32x32xf32>
    %45 = vector.shape_cast %44 : vector<1x32x32xf32> to vector<32x32xf32>
    %cst_30 = arith.constant dense<0.000000e+00> : vector<32x32xf32>
    %46 = tpu.matmul %17, %45, %cst_30 {dimension_numbers = #tpu.dot_dimension_numbers<[1], [0], [0], [1], [0, 0, 1, 1], [], []>} : vector<32x32xf32>, vector<32x32xf32>, vector<32x32xf32> -> vector<32x32xf32>
    %47 = vector.broadcast %43 : vector<32x1xf32> to vector<32x32xf32>
    %48 = arith.mulf %47, %46 : vector<32x32xf32>
    %49 = arith.addf %42, %48 : vector<32x32xf32>
    %50 = vector.extract_strided_slice %22 {offsets = [0, 4], sizes = [32, 1], strides = [1, 1]} : vector<32x20xf32> to vector<32x1xf32>
    %c4 = arith.constant 4 : index
    %c0_31 = arith.constant 0 : index
    %c0_32 = arith.constant 0 : index
    %51 = vector.load %arg16[%c4, %c0_31, %c0_32] : memref<5x32x32xf32, #tpu.memory_space<vmem>>, vector<1x32x32xf32>
    %52 = vector.shape_cast %51 : vector<1x32x32xf32> to vector<32x32xf32>
    %cst_33 = arith.constant dense<0.000000e+00> : vector<32x32xf32>
    %53 = tpu.matmul %17, %52, %cst_33 {dimension_numbers = #tpu.dot_dimension_numbers<[1], [0], [0], [1], [0, 0, 1, 1], [], []>} : vector<32x32xf32>, vector<32x32xf32>, vector<32x32xf32> -> vector<32x32xf32>
    %54 = vector.broadcast %50 : vector<32x1xf32> to vector<32x32xf32>
    %55 = arith.mulf %54, %53 : vector<32x32xf32>
    %56 = arith.addf %49, %55 : vector<32x32xf32>
    %57 = vector.broadcast %20 : vector<32x1xf32> to vector<32x32xf32>
    %58 = arith.addf %56, %57 : vector<32x32xf32>
    %c0_34 = arith.constant 0 : index
    %c0_35 = arith.constant 0 : index
    %c0_36 = arith.constant 0 : index
    %59 = vector.load %arg5[%c0_34, %c0_35, %c0_36] : memref<2x32x4xf32, #tpu.memory_space<vmem>>, vector<1x32x4xf32>
    %60 = vector.shape_cast %59 : vector<1x32x4xf32> to vector<32x4xf32>
    %61 = vector.extract_strided_slice %60 {offsets = [0, 1], sizes = [32, 1], strides = [1, 1]} : vector<32x4xf32> to vector<32x1xf32>
    %c0_37 = arith.constant 0 : index
    %c0_38 = arith.constant 0 : index
    %c0_39 = arith.constant 0 : index
    %62 = vector.load %arg4[%c0_37, %c0_38, %c0_39] : memref<2x32x20xf32, #tpu.memory_space<vmem>>, vector<1x32x20xf32>
    %63 = vector.shape_cast %62 : vector<1x32x20xf32> to vector<32x20xf32>
    %64 = vector.extract_strided_slice %63 {offsets = [0, 5], sizes = [32, 1], strides = [1, 1]} : vector<32x20xf32> to vector<32x1xf32>
    %c0_40 = arith.constant 0 : index
    %c0_41 = arith.constant 0 : index
    %c0_42 = arith.constant 0 : index
    %65 = vector.load %arg17[%c0_40, %c0_41, %c0_42] : memref<5x32x16xf32, #tpu.memory_space<vmem>>, vector<1x32x16xf32>
    %66 = vector.shape_cast %65 : vector<1x32x16xf32> to vector<32x16xf32>
    %cst_43 = arith.constant dense<0.000000e+00> : vector<32x16xf32>
    %67 = tpu.matmul %58, %66, %cst_43 {dimension_numbers = #tpu.dot_dimension_numbers<[1], [0], [0], [1], [0, 0, 1, 1], [], []>} : vector<32x32xf32>, vector<32x16xf32>, vector<32x16xf32> -> vector<32x16xf32>
    %68 = vector.broadcast %64 : vector<32x1xf32> to vector<32x16xf32>
    %69 = arith.mulf %68, %67 : vector<32x16xf32>
    %70 = vector.extract_strided_slice %63 {offsets = [0, 6], sizes = [32, 1], strides = [1, 1]} : vector<32x20xf32> to vector<32x1xf32>
    %c1_44 = arith.constant 1 : index
    %c0_45 = arith.constant 0 : index
    %c0_46 = arith.constant 0 : index
    %71 = vector.load %arg17[%c1_44, %c0_45, %c0_46] : memref<5x32x16xf32, #tpu.memory_space<vmem>>, vector<1x32x16xf32>
    %72 = vector.shape_cast %71 : vector<1x32x16xf32> to vector<32x16xf32>
    %cst_47 = arith.constant dense<0.000000e+00> : vector<32x16xf32>
    %73 = tpu.matmul %58, %72, %cst_47 {dimension_numbers = #tpu.dot_dimension_numbers<[1], [0], [0], [1], [0, 0, 1, 1], [], []>} : vector<32x32xf32>, vector<32x16xf32>, vector<32x16xf32> -> vector<32x16xf32>
    %74 = vector.broadcast %70 : vector<32x1xf32> to vector<32x16xf32>
    %75 = arith.mulf %74, %73 : vector<32x16xf32>
    %76 = arith.addf %69, %75 : vector<32x16xf32>
    %77 = vector.extract_strided_slice %63 {offsets = [0, 7], sizes = [32, 1], strides = [1, 1]} : vector<32x20xf32> to vector<32x1xf32>
    %c2_48 = arith.constant 2 : index
    %c0_49 = arith.constant 0 : index
    %c0_50 = arith.constant 0 : index
    %78 = vector.load %arg17[%c2_48, %c0_49, %c0_50] : memref<5x32x16xf32, #tpu.memory_space<vmem>>, vector<1x32x16xf32>
    %79 = vector.shape_cast %78 : vector<1x32x16xf32> to vector<32x16xf32>
    %cst_51 = arith.constant dense<0.000000e+00> : vector<32x16xf32>
    %80 = tpu.matmul %58, %79, %cst_51 {dimension_numbers = #tpu.dot_dimension_numbers<[1], [0], [0], [1], [0, 0, 1, 1], [], []>} : vector<32x32xf32>, vector<32x16xf32>, vector<32x16xf32> -> vector<32x16xf32>
    %81 = vector.broadcast %77 : vector<32x1xf32> to vector<32x16xf32>
    %82 = arith.mulf %81, %80 : vector<32x16xf32>
    %83 = arith.addf %76, %82 : vector<32x16xf32>
    %84 = vector.extract_strided_slice %63 {offsets = [0, 8], sizes = [32, 1], strides = [1, 1]} : vector<32x20xf32> to vector<32x1xf32>
    %c3_52 = arith.constant 3 : index
    %c0_53 = arith.constant 0 : index
    %c0_54 = arith.constant 0 : index
    %85 = vector.load %arg17[%c3_52, %c0_53, %c0_54] : memref<5x32x16xf32, #tpu.memory_space<vmem>>, vector<1x32x16xf32>
    %86 = vector.shape_cast %85 : vector<1x32x16xf32> to vector<32x16xf32>
    %cst_55 = arith.constant dense<0.000000e+00> : vector<32x16xf32>
    %87 = tpu.matmul %58, %86, %cst_55 {dimension_numbers = #tpu.dot_dimension_numbers<[1], [0], [0], [1], [0, 0, 1, 1], [], []>} : vector<32x32xf32>, vector<32x16xf32>, vector<32x16xf32> -> vector<32x16xf32>
    %88 = vector.broadcast %84 : vector<32x1xf32> to vector<32x16xf32>
    %89 = arith.mulf %88, %87 : vector<32x16xf32>
    %90 = arith.addf %83, %89 : vector<32x16xf32>
    %91 = vector.extract_strided_slice %63 {offsets = [0, 9], sizes = [32, 1], strides = [1, 1]} : vector<32x20xf32> to vector<32x1xf32>
    %c4_56 = arith.constant 4 : index
    %c0_57 = arith.constant 0 : index
    %c0_58 = arith.constant 0 : index
    %92 = vector.load %arg17[%c4_56, %c0_57, %c0_58] : memref<5x32x16xf32, #tpu.memory_space<vmem>>, vector<1x32x16xf32>
    %93 = vector.shape_cast %92 : vector<1x32x16xf32> to vector<32x16xf32>
    %cst_59 = arith.constant dense<0.000000e+00> : vector<32x16xf32>
    %94 = tpu.matmul %58, %93, %cst_59 {dimension_numbers = #tpu.dot_dimension_numbers<[1], [0], [0], [1], [0, 0, 1, 1], [], []>} : vector<32x32xf32>, vector<32x16xf32>, vector<32x16xf32> -> vector<32x16xf32>
    %95 = vector.broadcast %91 : vector<32x1xf32> to vector<32x16xf32>
    %96 = arith.mulf %95, %94 : vector<32x16xf32>
    %97 = arith.addf %90, %96 : vector<32x16xf32>
    %98 = vector.broadcast %61 : vector<32x1xf32> to vector<32x16xf32>
    %99 = arith.addf %97, %98 : vector<32x16xf32>
    %c0_60 = arith.constant 0 : index
    %c0_61 = arith.constant 0 : index
    %c0_62 = arith.constant 0 : index
    %100 = vector.load %arg5[%c0_60, %c0_61, %c0_62] : memref<2x32x4xf32, #tpu.memory_space<vmem>>, vector<1x32x4xf32>
    %101 = vector.shape_cast %100 : vector<1x32x4xf32> to vector<32x4xf32>
    %102 = vector.extract_strided_slice %101 {offsets = [0, 2], sizes = [32, 1], strides = [1, 1]} : vector<32x4xf32> to vector<32x1xf32>
    %c0_63 = arith.constant 0 : index
    %c0_64 = arith.constant 0 : index
    %c0_65 = arith.constant 0 : index
    %103 = vector.load %arg4[%c0_63, %c0_64, %c0_65] : memref<2x32x20xf32, #tpu.memory_space<vmem>>, vector<1x32x20xf32>
    %104 = vector.shape_cast %103 : vector<1x32x20xf32> to vector<32x20xf32>
    %105 = vector.extract_strided_slice %104 {offsets = [0, 10], sizes = [32, 1], strides = [1, 1]} : vector<32x20xf32> to vector<32x1xf32>
    %c0_66 = arith.constant 0 : index
    %c0_67 = arith.constant 0 : index
    %c0_68 = arith.constant 0 : index
    %106 = vector.load %arg18[%c0_66, %c0_67, %c0_68] : memref<5x16x8xf32, #tpu.memory_space<vmem>>, vector<1x16x8xf32>
    %107 = vector.shape_cast %106 : vector<1x16x8xf32> to vector<16x8xf32>
    %cst_69 = arith.constant dense<0.000000e+00> : vector<32x8xf32>
    %108 = tpu.matmul %99, %107, %cst_69 {dimension_numbers = #tpu.dot_dimension_numbers<[1], [0], [0], [1], [0, 0, 1, 1], [], []>} : vector<32x16xf32>, vector<16x8xf32>, vector<32x8xf32> -> vector<32x8xf32>
    %109 = vector.broadcast %105 : vector<32x1xf32> to vector<32x8xf32>
    %110 = arith.mulf %109, %108 : vector<32x8xf32>
    %111 = vector.extract_strided_slice %104 {offsets = [0, 11], sizes = [32, 1], strides = [1, 1]} : vector<32x20xf32> to vector<32x1xf32>
    %c1_70 = arith.constant 1 : index
    %c0_71 = arith.constant 0 : index
    %c0_72 = arith.constant 0 : index
    %112 = vector.load %arg18[%c1_70, %c0_71, %c0_72] : memref<5x16x8xf32, #tpu.memory_space<vmem>>, vector<1x16x8xf32>
    %113 = vector.shape_cast %112 : vector<1x16x8xf32> to vector<16x8xf32>
    %cst_73 = arith.constant dense<0.000000e+00> : vector<32x8xf32>
    %114 = tpu.matmul %99, %113, %cst_73 {dimension_numbers = #tpu.dot_dimension_numbers<[1], [0], [0], [1], [0, 0, 1, 1], [], []>} : vector<32x16xf32>, vector<16x8xf32>, vector<32x8xf32> -> vector<32x8xf32>
    %115 = vector.broadcast %111 : vector<32x1xf32> to vector<32x8xf32>
    %116 = arith.mulf %115, %114 : vector<32x8xf32>
    %117 = arith.addf %110, %116 : vector<32x8xf32>
    %118 = vector.extract_strided_slice %104 {offsets = [0, 12], sizes = [32, 1], strides = [1, 1]} : vector<32x20xf32> to vector<32x1xf32>
    %c2_74 = arith.constant 2 : index
    %c0_75 = arith.constant 0 : index
    %c0_76 = arith.constant 0 : index
    %119 = vector.load %arg18[%c2_74, %c0_75, %c0_76] : memref<5x16x8xf32, #tpu.memory_space<vmem>>, vector<1x16x8xf32>
    %120 = vector.shape_cast %119 : vector<1x16x8xf32> to vector<16x8xf32>
    %cst_77 = arith.constant dense<0.000000e+00> : vector<32x8xf32>
    %121 = tpu.matmul %99, %120, %cst_77 {dimension_numbers = #tpu.dot_dimension_numbers<[1], [0], [0], [1], [0, 0, 1, 1], [], []>} : vector<32x16xf32>, vector<16x8xf32>, vector<32x8xf32> -> vector<32x8xf32>
    %122 = vector.broadcast %118 : vector<32x1xf32> to vector<32x8xf32>
    %123 = arith.mulf %122, %121 : vector<32x8xf32>
    %124 = arith.addf %117, %123 : vector<32x8xf32>
    %125 = vector.extract_strided_slice %104 {offsets = [0, 13], sizes = [32, 1], strides = [1, 1]} : vector<32x20xf32> to vector<32x1xf32>
    %c3_78 = arith.constant 3 : index
    %c0_79 = arith.constant 0 : index
    %c0_80 = arith.constant 0 : index
    %126 = vector.load %arg18[%c3_78, %c0_79, %c0_80] : memref<5x16x8xf32, #tpu.memory_space<vmem>>, vector<1x16x8xf32>
    %127 = vector.shape_cast %126 : vector<1x16x8xf32> to vector<16x8xf32>
    %cst_81 = arith.constant dense<0.000000e+00> : vector<32x8xf32>
    %128 = tpu.matmul %99, %127, %cst_81 {dimension_numbers = #tpu.dot_dimension_numbers<[1], [0], [0], [1], [0, 0, 1, 1], [], []>} : vector<32x16xf32>, vector<16x8xf32>, vector<32x8xf32> -> vector<32x8xf32>
    %129 = vector.broadcast %125 : vector<32x1xf32> to vector<32x8xf32>
    %130 = arith.mulf %129, %128 : vector<32x8xf32>
    %131 = arith.addf %124, %130 : vector<32x8xf32>
    %132 = vector.extract_strided_slice %104 {offsets = [0, 14], sizes = [32, 1], strides = [1, 1]} : vector<32x20xf32> to vector<32x1xf32>
    %c4_82 = arith.constant 4 : index
    %c0_83 = arith.constant 0 : index
    %c0_84 = arith.constant 0 : index
    %133 = vector.load %arg18[%c4_82, %c0_83, %c0_84] : memref<5x16x8xf32, #tpu.memory_space<vmem>>, vector<1x16x8xf32>
    %134 = vector.shape_cast %133 : vector<1x16x8xf32> to vector<16x8xf32>
    %cst_85 = arith.constant dense<0.000000e+00> : vector<32x8xf32>
    %135 = tpu.matmul %99, %134, %cst_85 {dimension_numbers = #tpu.dot_dimension_numbers<[1], [0], [0], [1], [0, 0, 1, 1], [], []>} : vector<32x16xf32>, vector<16x8xf32>, vector<32x8xf32> -> vector<32x8xf32>
    %136 = vector.broadcast %132 : vector<32x1xf32> to vector<32x8xf32>
    %137 = arith.mulf %136, %135 : vector<32x8xf32>
    %138 = arith.addf %131, %137 : vector<32x8xf32>
    %139 = vector.broadcast %102 : vector<32x1xf32> to vector<32x8xf32>
    %140 = arith.addf %138, %139 : vector<32x8xf32>
    %c0_86 = arith.constant 0 : index
    %c0_87 = arith.constant 0 : index
    %c0_88 = arith.constant 0 : index
    %141 = vector.load %arg5[%c0_86, %c0_87, %c0_88] : memref<2x32x4xf32, #tpu.memory_space<vmem>>, vector<1x32x4xf32>
    %142 = vector.shape_cast %141 : vector<1x32x4xf32> to vector<32x4xf32>
    %143 = vector.extract_strided_slice %142 {offsets = [0, 3], sizes = [32, 1], strides = [1, 1]} : vector<32x4xf32> to vector<32x1xf32>
    %c0_89 = arith.constant 0 : index
    %c0_90 = arith.constant 0 : index
    %c0_91 = arith.constant 0 : index
    %144 = vector.load %arg4[%c0_89, %c0_90, %c0_91] : memref<2x32x20xf32, #tpu.memory_space<vmem>>, vector<1x32x20xf32>
    %145 = vector.shape_cast %144 : vector<1x32x20xf32> to vector<32x20xf32>
    %146 = vector.extract_strided_slice %145 {offsets = [0, 15], sizes = [32, 1], strides = [1, 1]} : vector<32x20xf32> to vector<32x1xf32>
    %c0_92 = arith.constant 0 : index
    %c0_93 = arith.constant 0 : index
    %c0_94 = arith.constant 0 : index
    %147 = vector.load %arg19[%c0_92, %c0_93, %c0_94] : memref<5x8x4xf32, #tpu.memory_space<vmem>>, vector<1x8x4xf32>
    %148 = vector.shape_cast %147 : vector<1x8x4xf32> to vector<8x4xf32>
    %cst_95 = arith.constant dense<0.000000e+00> : vector<32x4xf32>
    %149 = tpu.matmul %140, %148, %cst_95 {dimension_numbers = #tpu.dot_dimension_numbers<[1], [0], [0], [1], [0, 0, 1, 1], [], []>} : vector<32x8xf32>, vector<8x4xf32>, vector<32x4xf32> -> vector<32x4xf32>
    %150 = vector.broadcast %146 : vector<32x1xf32> to vector<32x4xf32>
    %151 = arith.mulf %150, %149 : vector<32x4xf32>
    %152 = vector.extract_strided_slice %145 {offsets = [0, 16], sizes = [32, 1], strides = [1, 1]} : vector<32x20xf32> to vector<32x1xf32>
    %c1_96 = arith.constant 1 : index
    %c0_97 = arith.constant 0 : index
    %c0_98 = arith.constant 0 : index
    %153 = vector.load %arg19[%c1_96, %c0_97, %c0_98] : memref<5x8x4xf32, #tpu.memory_space<vmem>>, vector<1x8x4xf32>
    %154 = vector.shape_cast %153 : vector<1x8x4xf32> to vector<8x4xf32>
    %cst_99 = arith.constant dense<0.000000e+00> : vector<32x4xf32>
    %155 = tpu.matmul %140, %154, %cst_99 {dimension_numbers = #tpu.dot_dimension_numbers<[1], [0], [0], [1], [0, 0, 1, 1], [], []>} : vector<32x8xf32>, vector<8x4xf32>, vector<32x4xf32> -> vector<32x4xf32>
    %156 = vector.broadcast %152 : vector<32x1xf32> to vector<32x4xf32>
    %157 = arith.mulf %156, %155 : vector<32x4xf32>
    %158 = arith.addf %151, %157 : vector<32x4xf32>
    %159 = vector.extract_strided_slice %145 {offsets = [0, 17], sizes = [32, 1], strides = [1, 1]} : vector<32x20xf32> to vector<32x1xf32>
    %c2_100 = arith.constant 2 : index
    %c0_101 = arith.constant 0 : index
    %c0_102 = arith.constant 0 : index
    %160 = vector.load %arg19[%c2_100, %c0_101, %c0_102] : memref<5x8x4xf32, #tpu.memory_space<vmem>>, vector<1x8x4xf32>
    %161 = vector.shape_cast %160 : vector<1x8x4xf32> to vector<8x4xf32>
    %cst_103 = arith.constant dense<0.000000e+00> : vector<32x4xf32>
    %162 = tpu.matmul %140, %161, %cst_103 {dimension_numbers = #tpu.dot_dimension_numbers<[1], [0], [0], [1], [0, 0, 1, 1], [], []>} : vector<32x8xf32>, vector<8x4xf32>, vector<32x4xf32> -> vector<32x4xf32>
    %163 = vector.broadcast %159 : vector<32x1xf32> to vector<32x4xf32>
    %164 = arith.mulf %163, %162 : vector<32x4xf32>
    %165 = arith.addf %158, %164 : vector<32x4xf32>
    %166 = vector.extract_strided_slice %145 {offsets = [0, 18], sizes = [32, 1], strides = [1, 1]} : vector<32x20xf32> to vector<32x1xf32>
    %c3_104 = arith.constant 3 : index
    %c0_105 = arith.constant 0 : index
    %c0_106 = arith.constant 0 : index
    %167 = vector.load %arg19[%c3_104, %c0_105, %c0_106] : memref<5x8x4xf32, #tpu.memory_space<vmem>>, vector<1x8x4xf32>
    %168 = vector.shape_cast %167 : vector<1x8x4xf32> to vector<8x4xf32>
    %cst_107 = arith.constant dense<0.000000e+00> : vector<32x4xf32>
    %169 = tpu.matmul %140, %168, %cst_107 {dimension_numbers = #tpu.dot_dimension_numbers<[1], [0], [0], [1], [0, 0, 1, 1], [], []>} : vector<32x8xf32>, vector<8x4xf32>, vector<32x4xf32> -> vector<32x4xf32>
    %170 = vector.broadcast %166 : vector<32x1xf32> to vector<32x4xf32>
    %171 = arith.mulf %170, %169 : vector<32x4xf32>
    %172 = arith.addf %165, %171 : vector<32x4xf32>
    %173 = vector.extract_strided_slice %145 {offsets = [0, 19], sizes = [32, 1], strides = [1, 1]} : vector<32x20xf32> to vector<32x1xf32>
    %c4_108 = arith.constant 4 : index
    %c0_109 = arith.constant 0 : index
    %c0_110 = arith.constant 0 : index
    %174 = vector.load %arg19[%c4_108, %c0_109, %c0_110] : memref<5x8x4xf32, #tpu.memory_space<vmem>>, vector<1x8x4xf32>
    %175 = vector.shape_cast %174 : vector<1x8x4xf32> to vector<8x4xf32>
    %cst_111 = arith.constant dense<0.000000e+00> : vector<32x4xf32>
    %176 = tpu.matmul %140, %175, %cst_111 {dimension_numbers = #tpu.dot_dimension_numbers<[1], [0], [0], [1], [0, 0, 1, 1], [], []>} : vector<32x8xf32>, vector<8x4xf32>, vector<32x4xf32> -> vector<32x4xf32>
    %177 = vector.broadcast %173 : vector<32x1xf32> to vector<32x4xf32>
    %178 = arith.mulf %177, %176 : vector<32x4xf32>
    %179 = arith.addf %172, %178 : vector<32x4xf32>
    %180 = vector.broadcast %143 : vector<32x1xf32> to vector<32x4xf32>
    %181 = arith.addf %179, %180 : vector<32x4xf32>
    %c0_112 = arith.constant 0 : index
    %c0_113 = arith.constant 0 : index
    %c0_114 = arith.constant 0 : index
    %c0_115 = arith.constant 0 : index
    %182 = vector.load %arg8[%c0_112, %c0_113, %c0_114, %c0_115] : memref<2x4x32x64xf32, #tpu.memory_space<vmem>>, vector<1x1x32x64xf32>
    %183 = vector.shape_cast %182 : vector<1x1x32x64xf32> to vector<32x64xf32>
    %184 = vector.extract_strided_slice %183 {offsets = [0, 32], sizes = [32, 32], strides = [1, 1]} : vector<32x64xf32> to vector<32x32xf32>
    %cst_116 = arith.constant dense<0.000000e+00> : vector<32x32xf32>
    %185 = tpu.matmul %184, %58, %cst_116 {dimension_numbers = #tpu.dot_dimension_numbers<[1], [0], [0], [1], [0, 0, 1, 1], [], []>} : vector<32x32xf32>, vector<32x32xf32>, vector<32x32xf32> -> vector<32x32xf32>
    %c0_117 = arith.constant 0 : index
    %c0_118 = arith.constant 0 : index
    %c0_119 = arith.constant 0 : index
    %c0_120 = arith.constant 0 : index
    %186 = vector.load %arg9[%c0_117, %c0_118, %c0_119, %c0_120] : memref<2x3x32x32xf32, #tpu.memory_space<vmem>>, vector<1x1x32x32xf32>
    %187 = vector.shape_cast %186 : vector<1x1x32x32xf32> to vector<32x32xf32>
    %cst_121 = arith.constant dense<0.000000e+00> : vector<32x16xf32>
    %188 = tpu.matmul %187, %99, %cst_121 {dimension_numbers = #tpu.dot_dimension_numbers<[1], [0], [0], [1], [0, 0, 1, 1], [], []>} : vector<32x32xf32>, vector<32x16xf32>, vector<32x16xf32> -> vector<32x16xf32>
    %c0_122 = arith.constant 0 : index
    %c0_123 = arith.constant 0 : index
    %189 = vector.load %arg20[%c0_122, %c0_123] : memref<16x32xf32, #tpu.memory_space<vmem>>, vector<16x32xf32>
    %cst_124 = arith.constant dense<0.000000e+00> : vector<32x32xf32>
    %190 = tpu.matmul %188, %189, %cst_124 {dimension_numbers = #tpu.dot_dimension_numbers<[1], [0], [0], [1], [0, 0, 1, 1], [], []>} : vector<32x16xf32>, vector<16x32xf32>, vector<32x32xf32> -> vector<32x32xf32>
    %191 = arith.addf %185, %190 : vector<32x32xf32>
    %c0_125 = arith.constant 0 : index
    %c0_126 = arith.constant 0 : index
    %c0_127 = arith.constant 0 : index
    %192 = vector.load %arg10[%c0_125, %c0_126, %c0_127] : memref<2x32x4xf32, #tpu.memory_space<vmem>>, vector<1x32x4xf32>
    %193 = vector.shape_cast %192 : vector<1x32x4xf32> to vector<32x4xf32>
    %194 = vector.extract_strided_slice %193 {offsets = [0, 0], sizes = [32, 1], strides = [1, 1]} : vector<32x4xf32> to vector<32x1xf32>
    %195 = vector.broadcast %194 : vector<32x1xf32> to vector<32x32xf32>
    %196 = arith.addf %191, %195 : vector<32x32xf32>
    %c0_128 = arith.constant 0 : index
    %c0_129 = arith.constant 0 : index
    %c0_130 = arith.constant 0 : index
    %197 = vector.load %arg11[%c0_128, %c0_129, %c0_130] : memref<2x32x4xf32, #tpu.memory_space<vmem>>, vector<1x32x4xf32>
    %198 = vector.shape_cast %197 : vector<1x32x4xf32> to vector<32x4xf32>
    %199 = vector.extract_strided_slice %198 {offsets = [0, 0], sizes = [32, 1], strides = [1, 1]} : vector<32x4xf32> to vector<32x1xf32>
    %cst_131 = arith.constant 0.000000e+00 : f32
    %200 = vector.broadcast %cst_131 : f32 to vector<32x32xf32>
    %201 = arith.cmpf ogt, %196, %200 : vector<32x32xf32>
    %202 = vector.broadcast %199 : vector<32x1xf32> to vector<32x32xf32>
    %203 = arith.mulf %202, %196 : vector<32x32xf32>
    %204 = arith.select %201, %196, %203 : vector<32x32xi1>, vector<32x32xf32>
    %c0_132 = arith.constant 0 : index
    %c0_133 = arith.constant 0 : index
    %c0_134 = arith.constant 0 : index
    %205 = vector.load %arg7[%c0_132, %c0_133, %c0_134] : memref<2x32x3xf32, #tpu.memory_space<vmem>>, vector<1x32x3xf32>
    %206 = vector.shape_cast %205 : vector<1x32x3xf32> to vector<32x3xf32>
    %207 = vector.extract_strided_slice %206 {offsets = [0, 0], sizes = [32, 1], strides = [1, 1]} : vector<32x3xf32> to vector<32x1xf32>
    %c0_135 = arith.constant 0 : index
    %c0_136 = arith.constant 0 : index
    %c0_137 = arith.constant 0 : index
    %208 = vector.load %arg6[%c0_135, %c0_136, %c0_137] : memref<2x32x15xf32, #tpu.memory_space<vmem>>, vector<1x32x15xf32>
    %209 = vector.shape_cast %208 : vector<1x32x15xf32> to vector<32x15xf32>
    %210 = vector.extract_strided_slice %209 {offsets = [0, 0], sizes = [32, 1], strides = [1, 1]} : vector<32x15xf32> to vector<32x1xf32>
    %c0_138 = arith.constant 0 : index
    %c0_139 = arith.constant 0 : index
    %c0_140 = arith.constant 0 : index
    %211 = vector.load %arg17[%c0_138, %c0_139, %c0_140] : memref<5x32x16xf32, #tpu.memory_space<vmem>>, vector<1x32x16xf32>
    %212 = vector.shape_cast %211 : vector<1x32x16xf32> to vector<32x16xf32>
    %cst_141 = arith.constant dense<0.000000e+00> : vector<32x16xf32>
    %213 = tpu.matmul %58, %212, %cst_141 {dimension_numbers = #tpu.dot_dimension_numbers<[1], [0], [0], [1], [0, 0, 1, 1], [], []>} : vector<32x32xf32>, vector<32x16xf32>, vector<32x16xf32> -> vector<32x16xf32>
    %214 = vector.broadcast %210 : vector<32x1xf32> to vector<32x16xf32>
    %215 = arith.mulf %214, %213 : vector<32x16xf32>
    %216 = vector.extract_strided_slice %209 {offsets = [0, 1], sizes = [32, 1], strides = [1, 1]} : vector<32x15xf32> to vector<32x1xf32>
    %c1_142 = arith.constant 1 : index
    %c0_143 = arith.constant 0 : index
    %c0_144 = arith.constant 0 : index
    %217 = vector.load %arg17[%c1_142, %c0_143, %c0_144] : memref<5x32x16xf32, #tpu.memory_space<vmem>>, vector<1x32x16xf32>
    %218 = vector.shape_cast %217 : vector<1x32x16xf32> to vector<32x16xf32>
    %cst_145 = arith.constant dense<0.000000e+00> : vector<32x16xf32>
    %219 = tpu.matmul %58, %218, %cst_145 {dimension_numbers = #tpu.dot_dimension_numbers<[1], [0], [0], [1], [0, 0, 1, 1], [], []>} : vector<32x32xf32>, vector<32x16xf32>, vector<32x16xf32> -> vector<32x16xf32>
    %220 = vector.broadcast %216 : vector<32x1xf32> to vector<32x16xf32>
    %221 = arith.mulf %220, %219 : vector<32x16xf32>
    %222 = arith.addf %215, %221 : vector<32x16xf32>
    %223 = vector.extract_strided_slice %209 {offsets = [0, 2], sizes = [32, 1], strides = [1, 1]} : vector<32x15xf32> to vector<32x1xf32>
    %c2_146 = arith.constant 2 : index
    %c0_147 = arith.constant 0 : index
    %c0_148 = arith.constant 0 : index
    %224 = vector.load %arg17[%c2_146, %c0_147, %c0_148] : memref<5x32x16xf32, #tpu.memory_space<vmem>>, vector<1x32x16xf32>
    %225 = vector.shape_cast %224 : vector<1x32x16xf32> to vector<32x16xf32>
    %cst_149 = arith.constant dense<0.000000e+00> : vector<32x16xf32>
    %226 = tpu.matmul %58, %225, %cst_149 {dimension_numbers = #tpu.dot_dimension_numbers<[1], [0], [0], [1], [0, 0, 1, 1], [], []>} : vector<32x32xf32>, vector<32x16xf32>, vector<32x16xf32> -> vector<32x16xf32>
    %227 = vector.broadcast %223 : vector<32x1xf32> to vector<32x16xf32>
    %228 = arith.mulf %227, %226 : vector<32x16xf32>
    %229 = arith.addf %222, %228 : vector<32x16xf32>
    %230 = vector.extract_strided_slice %209 {offsets = [0, 3], sizes = [32, 1], strides = [1, 1]} : vector<32x15xf32> to vector<32x1xf32>
    %c3_150 = arith.constant 3 : index
    %c0_151 = arith.constant 0 : index
    %c0_152 = arith.constant 0 : index
    %231 = vector.load %arg17[%c3_150, %c0_151, %c0_152] : memref<5x32x16xf32, #tpu.memory_space<vmem>>, vector<1x32x16xf32>
    %232 = vector.shape_cast %231 : vector<1x32x16xf32> to vector<32x16xf32>
    %cst_153 = arith.constant dense<0.000000e+00> : vector<32x16xf32>
    %233 = tpu.matmul %58, %232, %cst_153 {dimension_numbers = #tpu.dot_dimension_numbers<[1], [0], [0], [1], [0, 0, 1, 1], [], []>} : vector<32x32xf32>, vector<32x16xf32>, vector<32x16xf32> -> vector<32x16xf32>
    %234 = vector.broadcast %230 : vector<32x1xf32> to vector<32x16xf32>
    %235 = arith.mulf %234, %233 : vector<32x16xf32>
    %236 = arith.addf %229, %235 : vector<32x16xf32>
    %237 = vector.extract_strided_slice %209 {offsets = [0, 4], sizes = [32, 1], strides = [1, 1]} : vector<32x15xf32> to vector<32x1xf32>
    %c4_154 = arith.constant 4 : index
    %c0_155 = arith.constant 0 : index
    %c0_156 = arith.constant 0 : index
    %238 = vector.load %arg17[%c4_154, %c0_155, %c0_156] : memref<5x32x16xf32, #tpu.memory_space<vmem>>, vector<1x32x16xf32>
    %239 = vector.shape_cast %238 : vector<1x32x16xf32> to vector<32x16xf32>
    %cst_157 = arith.constant dense<0.000000e+00> : vector<32x16xf32>
    %240 = tpu.matmul %58, %239, %cst_157 {dimension_numbers = #tpu.dot_dimension_numbers<[1], [0], [0], [1], [0, 0, 1, 1], [], []>} : vector<32x32xf32>, vector<32x16xf32>, vector<32x16xf32> -> vector<32x16xf32>
    %241 = vector.broadcast %237 : vector<32x1xf32> to vector<32x16xf32>
    %242 = arith.mulf %241, %240 : vector<32x16xf32>
    %243 = arith.addf %236, %242 : vector<32x16xf32>
    %244 = vector.broadcast %207 : vector<32x1xf32> to vector<32x16xf32>
    %245 = arith.addf %243, %244 : vector<32x16xf32>
    %246 = tpu.concatenate %245, %99 in 0 : vector<32x16xf32>, vector<32x16xf32> -> vector<64x16xf32>
    %c0_158 = arith.constant 0 : index
    %c1_159 = arith.constant 1 : index
    %c0_160 = arith.constant 0 : index
    %c0_161 = arith.constant 0 : index
    %247 = vector.load %arg8[%c0_158, %c1_159, %c0_160, %c0_161] : memref<2x4x32x64xf32, #tpu.memory_space<vmem>>, vector<1x1x32x64xf32>
    %248 = vector.shape_cast %247 : vector<1x1x32x64xf32> to vector<32x64xf32>
    %cst_162 = arith.constant dense<0.000000e+00> : vector<32x16xf32>
    %249 = tpu.matmul %248, %246, %cst_162 {dimension_numbers = #tpu.dot_dimension_numbers<[1], [0], [0], [1], [0, 0, 1, 1], [], []>} : vector<32x64xf32>, vector<64x16xf32>, vector<32x16xf32> -> vector<32x16xf32>
    %c0_163 = arith.constant 0 : index
    %c1_164 = arith.constant 1 : index
    %c0_165 = arith.constant 0 : index
    %c0_166 = arith.constant 0 : index
    %250 = vector.load %arg9[%c0_163, %c1_164, %c0_165, %c0_166] : memref<2x3x32x32xf32, #tpu.memory_space<vmem>>, vector<1x1x32x32xf32>
    %251 = vector.shape_cast %250 : vector<1x1x32x32xf32> to vector<32x32xf32>
    %cst_167 = arith.constant dense<0.000000e+00> : vector<32x8xf32>
    %252 = tpu.matmul %251, %140, %cst_167 {dimension_numbers = #tpu.dot_dimension_numbers<[1], [0], [0], [1], [0, 0, 1, 1], [], []>} : vector<32x32xf32>, vector<32x8xf32>, vector<32x8xf32> -> vector<32x8xf32>
    %c0_168 = arith.constant 0 : index
    %c0_169 = arith.constant 0 : index
    %253 = vector.load %arg21[%c0_168, %c0_169] : memref<8x16xf32, #tpu.memory_space<vmem>>, vector<8x16xf32>
    %cst_170 = arith.constant dense<0.000000e+00> : vector<32x16xf32>
    %254 = tpu.matmul %252, %253, %cst_170 {dimension_numbers = #tpu.dot_dimension_numbers<[1], [0], [0], [1], [0, 0, 1, 1], [], []>} : vector<32x8xf32>, vector<8x16xf32>, vector<32x16xf32> -> vector<32x16xf32>
    %255 = arith.addf %249, %254 : vector<32x16xf32>
    %c0_171 = arith.constant 0 : index
    %c0_172 = arith.constant 0 : index
    %c0_173 = arith.constant 0 : index
    %256 = vector.load %arg10[%c0_171, %c0_172, %c0_173] : memref<2x32x4xf32, #tpu.memory_space<vmem>>, vector<1x32x4xf32>
    %257 = vector.shape_cast %256 : vector<1x32x4xf32> to vector<32x4xf32>
    %258 = vector.extract_strided_slice %257 {offsets = [0, 1], sizes = [32, 1], strides = [1, 1]} : vector<32x4xf32> to vector<32x1xf32>
    %259 = vector.broadcast %258 : vector<32x1xf32> to vector<32x16xf32>
    %260 = arith.addf %255, %259 : vector<32x16xf32>
    %c0_174 = arith.constant 0 : index
    %c0_175 = arith.constant 0 : index
    %c0_176 = arith.constant 0 : index
    %261 = vector.load %arg11[%c0_174, %c0_175, %c0_176] : memref<2x32x4xf32, #tpu.memory_space<vmem>>, vector<1x32x4xf32>
    %262 = vector.shape_cast %261 : vector<1x32x4xf32> to vector<32x4xf32>
    %263 = vector.extract_strided_slice %262 {offsets = [0, 1], sizes = [32, 1], strides = [1, 1]} : vector<32x4xf32> to vector<32x1xf32>
    %cst_177 = arith.constant 0.000000e+00 : f32
    %264 = vector.broadcast %cst_177 : f32 to vector<32x16xf32>
    %265 = arith.cmpf ogt, %260, %264 : vector<32x16xf32>
    %266 = vector.broadcast %263 : vector<32x1xf32> to vector<32x16xf32>
    %267 = arith.mulf %266, %260 : vector<32x16xf32>
    %268 = arith.select %265, %260, %267 : vector<32x16xi1>, vector<32x16xf32>
    %c0_178 = arith.constant 0 : index
    %c0_179 = arith.constant 0 : index
    %c0_180 = arith.constant 0 : index
    %269 = vector.load %arg7[%c0_178, %c0_179, %c0_180] : memref<2x32x3xf32, #tpu.memory_space<vmem>>, vector<1x32x3xf32>
    %270 = vector.shape_cast %269 : vector<1x32x3xf32> to vector<32x3xf32>
    %271 = vector.extract_strided_slice %270 {offsets = [0, 1], sizes = [32, 1], strides = [1, 1]} : vector<32x3xf32> to vector<32x1xf32>
    %c0_181 = arith.constant 0 : index
    %c0_182 = arith.constant 0 : index
    %c0_183 = arith.constant 0 : index
    %272 = vector.load %arg6[%c0_181, %c0_182, %c0_183] : memref<2x32x15xf32, #tpu.memory_space<vmem>>, vector<1x32x15xf32>
    %273 = vector.shape_cast %272 : vector<1x32x15xf32> to vector<32x15xf32>
    %274 = vector.extract_strided_slice %273 {offsets = [0, 5], sizes = [32, 1], strides = [1, 1]} : vector<32x15xf32> to vector<32x1xf32>
    %c0_184 = arith.constant 0 : index
    %c0_185 = arith.constant 0 : index
    %c0_186 = arith.constant 0 : index
    %275 = vector.load %arg18[%c0_184, %c0_185, %c0_186] : memref<5x16x8xf32, #tpu.memory_space<vmem>>, vector<1x16x8xf32>
    %276 = vector.shape_cast %275 : vector<1x16x8xf32> to vector<16x8xf32>
    %cst_187 = arith.constant dense<0.000000e+00> : vector<32x8xf32>
    %277 = tpu.matmul %99, %276, %cst_187 {dimension_numbers = #tpu.dot_dimension_numbers<[1], [0], [0], [1], [0, 0, 1, 1], [], []>} : vector<32x16xf32>, vector<16x8xf32>, vector<32x8xf32> -> vector<32x8xf32>
    %278 = vector.broadcast %274 : vector<32x1xf32> to vector<32x8xf32>
    %279 = arith.mulf %278, %277 : vector<32x8xf32>
    %280 = vector.extract_strided_slice %273 {offsets = [0, 6], sizes = [32, 1], strides = [1, 1]} : vector<32x15xf32> to vector<32x1xf32>
    %c1_188 = arith.constant 1 : index
    %c0_189 = arith.constant 0 : index
    %c0_190 = arith.constant 0 : index
    %281 = vector.load %arg18[%c1_188, %c0_189, %c0_190] : memref<5x16x8xf32, #tpu.memory_space<vmem>>, vector<1x16x8xf32>
    %282 = vector.shape_cast %281 : vector<1x16x8xf32> to vector<16x8xf32>
    %cst_191 = arith.constant dense<0.000000e+00> : vector<32x8xf32>
    %283 = tpu.matmul %99, %282, %cst_191 {dimension_numbers = #tpu.dot_dimension_numbers<[1], [0], [0], [1], [0, 0, 1, 1], [], []>} : vector<32x16xf32>, vector<16x8xf32>, vector<32x8xf32> -> vector<32x8xf32>
    %284 = vector.broadcast %280 : vector<32x1xf32> to vector<32x8xf32>
    %285 = arith.mulf %284, %283 : vector<32x8xf32>
    %286 = arith.addf %279, %285 : vector<32x8xf32>
    %287 = vector.extract_strided_slice %273 {offsets = [0, 7], sizes = [32, 1], strides = [1, 1]} : vector<32x15xf32> to vector<32x1xf32>
    %c2_192 = arith.constant 2 : index
    %c0_193 = arith.constant 0 : index
    %c0_194 = arith.constant 0 : index
    %288 = vector.load %arg18[%c2_192, %c0_193, %c0_194] : memref<5x16x8xf32, #tpu.memory_space<vmem>>, vector<1x16x8xf32>
    %289 = vector.shape_cast %288 : vector<1x16x8xf32> to vector<16x8xf32>
    %cst_195 = arith.constant dense<0.000000e+00> : vector<32x8xf32>
    %290 = tpu.matmul %99, %289, %cst_195 {dimension_numbers = #tpu.dot_dimension_numbers<[1], [0], [0], [1], [0, 0, 1, 1], [], []>} : vector<32x16xf32>, vector<16x8xf32>, vector<32x8xf32> -> vector<32x8xf32>
    %291 = vector.broadcast %287 : vector<32x1xf32> to vector<32x8xf32>
    %292 = arith.mulf %291, %290 : vector<32x8xf32>
    %293 = arith.addf %286, %292 : vector<32x8xf32>
    %294 = vector.extract_strided_slice %273 {offsets = [0, 8], sizes = [32, 1], strides = [1, 1]} : vector<32x15xf32> to vector<32x1xf32>
    %c3_196 = arith.constant 3 : index
    %c0_197 = arith.constant 0 : index
    %c0_198 = arith.constant 0 : index
    %295 = vector.load %arg18[%c3_196, %c0_197, %c0_198] : memref<5x16x8xf32, #tpu.memory_space<vmem>>, vector<1x16x8xf32>
    %296 = vector.shape_cast %295 : vector<1x16x8xf32> to vector<16x8xf32>
    %cst_199 = arith.constant dense<0.000000e+00> : vector<32x8xf32>
    %297 = tpu.matmul %99, %296, %cst_199 {dimension_numbers = #tpu.dot_dimension_numbers<[1], [0], [0], [1], [0, 0, 1, 1], [], []>} : vector<32x16xf32>, vector<16x8xf32>, vector<32x8xf32> -> vector<32x8xf32>
    %298 = vector.broadcast %294 : vector<32x1xf32> to vector<32x8xf32>
    %299 = arith.mulf %298, %297 : vector<32x8xf32>
    %300 = arith.addf %293, %299 : vector<32x8xf32>
    %301 = vector.extract_strided_slice %273 {offsets = [0, 9], sizes = [32, 1], strides = [1, 1]} : vector<32x15xf32> to vector<32x1xf32>
    %c4_200 = arith.constant 4 : index
    %c0_201 = arith.constant 0 : index
    %c0_202 = arith.constant 0 : index
    %302 = vector.load %arg18[%c4_200, %c0_201, %c0_202] : memref<5x16x8xf32, #tpu.memory_space<vmem>>, vector<1x16x8xf32>
    %303 = vector.shape_cast %302 : vector<1x16x8xf32> to vector<16x8xf32>
    %cst_203 = arith.constant dense<0.000000e+00> : vector<32x8xf32>
    %304 = tpu.matmul %99, %303, %cst_203 {dimension_numbers = #tpu.dot_dimension_numbers<[1], [0], [0], [1], [0, 0, 1, 1], [], []>} : vector<32x16xf32>, vector<16x8xf32>, vector<32x8xf32> -> vector<32x8xf32>
    %305 = vector.broadcast %301 : vector<32x1xf32> to vector<32x8xf32>
    %306 = arith.mulf %305, %304 : vector<32x8xf32>
    %307 = arith.addf %300, %306 : vector<32x8xf32>
    %308 = vector.broadcast %271 : vector<32x1xf32> to vector<32x8xf32>
    %309 = arith.addf %307, %308 : vector<32x8xf32>
    %310 = tpu.concatenate %309, %140 in 0 : vector<32x8xf32>, vector<32x8xf32> -> vector<64x8xf32>
    %c0_204 = arith.constant 0 : index
    %c2_205 = arith.constant 2 : index
    %c0_206 = arith.constant 0 : index
    %c0_207 = arith.constant 0 : index
    %311 = vector.load %arg8[%c0_204, %c2_205, %c0_206, %c0_207] : memref<2x4x32x64xf32, #tpu.memory_space<vmem>>, vector<1x1x32x64xf32>
    %312 = vector.shape_cast %311 : vector<1x1x32x64xf32> to vector<32x64xf32>
    %cst_208 = arith.constant dense<0.000000e+00> : vector<32x8xf32>
    %313 = tpu.matmul %312, %310, %cst_208 {dimension_numbers = #tpu.dot_dimension_numbers<[1], [0], [0], [1], [0, 0, 1, 1], [], []>} : vector<32x64xf32>, vector<64x8xf32>, vector<32x8xf32> -> vector<32x8xf32>
    %c0_209 = arith.constant 0 : index
    %c2_210 = arith.constant 2 : index
    %c0_211 = arith.constant 0 : index
    %c0_212 = arith.constant 0 : index
    %314 = vector.load %arg9[%c0_209, %c2_210, %c0_211, %c0_212] : memref<2x3x32x32xf32, #tpu.memory_space<vmem>>, vector<1x1x32x32xf32>
    %315 = vector.shape_cast %314 : vector<1x1x32x32xf32> to vector<32x32xf32>
    %cst_213 = arith.constant dense<0.000000e+00> : vector<32x4xf32>
    %316 = tpu.matmul %315, %181, %cst_213 {dimension_numbers = #tpu.dot_dimension_numbers<[1], [0], [0], [1], [0, 0, 1, 1], [], []>} : vector<32x32xf32>, vector<32x4xf32>, vector<32x4xf32> -> vector<32x4xf32>
    %c0_214 = arith.constant 0 : index
    %c0_215 = arith.constant 0 : index
    %317 = vector.load %arg22[%c0_214, %c0_215] : memref<4x8xf32, #tpu.memory_space<vmem>>, vector<4x8xf32>
    %cst_216 = arith.constant dense<0.000000e+00> : vector<32x8xf32>
    %318 = tpu.matmul %316, %317, %cst_216 {dimension_numbers = #tpu.dot_dimension_numbers<[1], [0], [0], [1], [0, 0, 1, 1], [], []>} : vector<32x4xf32>, vector<4x8xf32>, vector<32x8xf32> -> vector<32x8xf32>
    %319 = arith.addf %313, %318 : vector<32x8xf32>
    %c0_217 = arith.constant 0 : index
    %c0_218 = arith.constant 0 : index
    %c0_219 = arith.constant 0 : index
    %320 = vector.load %arg10[%c0_217, %c0_218, %c0_219] : memref<2x32x4xf32, #tpu.memory_space<vmem>>, vector<1x32x4xf32>
    %321 = vector.shape_cast %320 : vector<1x32x4xf32> to vector<32x4xf32>
    %322 = vector.extract_strided_slice %321 {offsets = [0, 2], sizes = [32, 1], strides = [1, 1]} : vector<32x4xf32> to vector<32x1xf32>
    %323 = vector.broadcast %322 : vector<32x1xf32> to vector<32x8xf32>
    %324 = arith.addf %319, %323 : vector<32x8xf32>
    %c0_220 = arith.constant 0 : index
    %c0_221 = arith.constant 0 : index
    %c0_222 = arith.constant 0 : index
    %325 = vector.load %arg11[%c0_220, %c0_221, %c0_222] : memref<2x32x4xf32, #tpu.memory_space<vmem>>, vector<1x32x4xf32>
    %326 = vector.shape_cast %325 : vector<1x32x4xf32> to vector<32x4xf32>
    %327 = vector.extract_strided_slice %326 {offsets = [0, 2], sizes = [32, 1], strides = [1, 1]} : vector<32x4xf32> to vector<32x1xf32>
    %cst_223 = arith.constant 0.000000e+00 : f32
    %328 = vector.broadcast %cst_223 : f32 to vector<32x8xf32>
    %329 = arith.cmpf ogt, %324, %328 : vector<32x8xf32>
    %330 = vector.broadcast %327 : vector<32x1xf32> to vector<32x8xf32>
    %331 = arith.mulf %330, %324 : vector<32x8xf32>
    %332 = arith.select %329, %324, %331 : vector<32x8xi1>, vector<32x8xf32>
    %c0_224 = arith.constant 0 : index
    %c0_225 = arith.constant 0 : index
    %c0_226 = arith.constant 0 : index
    %333 = vector.load %arg7[%c0_224, %c0_225, %c0_226] : memref<2x32x3xf32, #tpu.memory_space<vmem>>, vector<1x32x3xf32>
    %334 = vector.shape_cast %333 : vector<1x32x3xf32> to vector<32x3xf32>
    %335 = vector.extract_strided_slice %334 {offsets = [0, 2], sizes = [32, 1], strides = [1, 1]} : vector<32x3xf32> to vector<32x1xf32>
    %c0_227 = arith.constant 0 : index
    %c0_228 = arith.constant 0 : index
    %c0_229 = arith.constant 0 : index
    %336 = vector.load %arg6[%c0_227, %c0_228, %c0_229] : memref<2x32x15xf32, #tpu.memory_space<vmem>>, vector<1x32x15xf32>
    %337 = vector.shape_cast %336 : vector<1x32x15xf32> to vector<32x15xf32>
    %338 = vector.extract_strided_slice %337 {offsets = [0, 10], sizes = [32, 1], strides = [1, 1]} : vector<32x15xf32> to vector<32x1xf32>
    %c0_230 = arith.constant 0 : index
    %c0_231 = arith.constant 0 : index
    %c0_232 = arith.constant 0 : index
    %339 = vector.load %arg19[%c0_230, %c0_231, %c0_232] : memref<5x8x4xf32, #tpu.memory_space<vmem>>, vector<1x8x4xf32>
    %340 = vector.shape_cast %339 : vector<1x8x4xf32> to vector<8x4xf32>
    %cst_233 = arith.constant dense<0.000000e+00> : vector<32x4xf32>
    %341 = tpu.matmul %140, %340, %cst_233 {dimension_numbers = #tpu.dot_dimension_numbers<[1], [0], [0], [1], [0, 0, 1, 1], [], []>} : vector<32x8xf32>, vector<8x4xf32>, vector<32x4xf32> -> vector<32x4xf32>
    %342 = vector.broadcast %338 : vector<32x1xf32> to vector<32x4xf32>
    %343 = arith.mulf %342, %341 : vector<32x4xf32>
    %344 = vector.extract_strided_slice %337 {offsets = [0, 11], sizes = [32, 1], strides = [1, 1]} : vector<32x15xf32> to vector<32x1xf32>
    %c1_234 = arith.constant 1 : index
    %c0_235 = arith.constant 0 : index
    %c0_236 = arith.constant 0 : index
    %345 = vector.load %arg19[%c1_234, %c0_235, %c0_236] : memref<5x8x4xf32, #tpu.memory_space<vmem>>, vector<1x8x4xf32>
    %346 = vector.shape_cast %345 : vector<1x8x4xf32> to vector<8x4xf32>
    %cst_237 = arith.constant dense<0.000000e+00> : vector<32x4xf32>
    %347 = tpu.matmul %140, %346, %cst_237 {dimension_numbers = #tpu.dot_dimension_numbers<[1], [0], [0], [1], [0, 0, 1, 1], [], []>} : vector<32x8xf32>, vector<8x4xf32>, vector<32x4xf32> -> vector<32x4xf32>
    %348 = vector.broadcast %344 : vector<32x1xf32> to vector<32x4xf32>
    %349 = arith.mulf %348, %347 : vector<32x4xf32>
    %350 = arith.addf %343, %349 : vector<32x4xf32>
    %351 = vector.extract_strided_slice %337 {offsets = [0, 12], sizes = [32, 1], strides = [1, 1]} : vector<32x15xf32> to vector<32x1xf32>
    %c2_238 = arith.constant 2 : index
    %c0_239 = arith.constant 0 : index
    %c0_240 = arith.constant 0 : index
    %352 = vector.load %arg19[%c2_238, %c0_239, %c0_240] : memref<5x8x4xf32, #tpu.memory_space<vmem>>, vector<1x8x4xf32>
    %353 = vector.shape_cast %352 : vector<1x8x4xf32> to vector<8x4xf32>
    %cst_241 = arith.constant dense<0.000000e+00> : vector<32x4xf32>
    %354 = tpu.matmul %140, %353, %cst_241 {dimension_numbers = #tpu.dot_dimension_numbers<[1], [0], [0], [1], [0, 0, 1, 1], [], []>} : vector<32x8xf32>, vector<8x4xf32>, vector<32x4xf32> -> vector<32x4xf32>
    %355 = vector.broadcast %351 : vector<32x1xf32> to vector<32x4xf32>
    %356 = arith.mulf %355, %354 : vector<32x4xf32>
    %357 = arith.addf %350, %356 : vector<32x4xf32>
    %358 = vector.extract_strided_slice %337 {offsets = [0, 13], sizes = [32, 1], strides = [1, 1]} : vector<32x15xf32> to vector<32x1xf32>
    %c3_242 = arith.constant 3 : index
    %c0_243 = arith.constant 0 : index
    %c0_244 = arith.constant 0 : index
    %359 = vector.load %arg19[%c3_242, %c0_243, %c0_244] : memref<5x8x4xf32, #tpu.memory_space<vmem>>, vector<1x8x4xf32>
    %360 = vector.shape_cast %359 : vector<1x8x4xf32> to vector<8x4xf32>
    %cst_245 = arith.constant dense<0.000000e+00> : vector<32x4xf32>
    %361 = tpu.matmul %140, %360, %cst_245 {dimension_numbers = #tpu.dot_dimension_numbers<[1], [0], [0], [1], [0, 0, 1, 1], [], []>} : vector<32x8xf32>, vector<8x4xf32>, vector<32x4xf32> -> vector<32x4xf32>
    %362 = vector.broadcast %358 : vector<32x1xf32> to vector<32x4xf32>
    %363 = arith.mulf %362, %361 : vector<32x4xf32>
    %364 = arith.addf %357, %363 : vector<32x4xf32>
    %365 = vector.extract_strided_slice %337 {offsets = [0, 14], sizes = [32, 1], strides = [1, 1]} : vector<32x15xf32> to vector<32x1xf32>
    %c4_246 = arith.constant 4 : index
    %c0_247 = arith.constant 0 : index
    %c0_248 = arith.constant 0 : index
    %366 = vector.load %arg19[%c4_246, %c0_247, %c0_248] : memref<5x8x4xf32, #tpu.memory_space<vmem>>, vector<1x8x4xf32>
    %367 = vector.shape_cast %366 : vector<1x8x4xf32> to vector<8x4xf32>
    %cst_249 = arith.constant dense<0.000000e+00> : vector<32x4xf32>
    %368 = tpu.matmul %140, %367, %cst_249 {dimension_numbers = #tpu.dot_dimension_numbers<[1], [0], [0], [1], [0, 0, 1, 1], [], []>} : vector<32x8xf32>, vector<8x4xf32>, vector<32x4xf32> -> vector<32x4xf32>
    %369 = vector.broadcast %365 : vector<32x1xf32> to vector<32x4xf32>
    %370 = arith.mulf %369, %368 : vector<32x4xf32>
    %371 = arith.addf %364, %370 : vector<32x4xf32>
    %372 = vector.broadcast %335 : vector<32x1xf32> to vector<32x4xf32>
    %373 = arith.addf %371, %372 : vector<32x4xf32>
    %374 = tpu.concatenate %373, %181 in 0 : vector<32x4xf32>, vector<32x4xf32> -> vector<64x4xf32>
    %c0_250 = arith.constant 0 : index
    %c3_251 = arith.constant 3 : index
    %c0_252 = arith.constant 0 : index
    %c0_253 = arith.constant 0 : index
    %375 = vector.load %arg8[%c0_250, %c3_251, %c0_252, %c0_253] : memref<2x4x32x64xf32, #tpu.memory_space<vmem>>, vector<1x1x32x64xf32>
    %376 = vector.shape_cast %375 : vector<1x1x32x64xf32> to vector<32x64xf32>
    %cst_254 = arith.constant dense<0.000000e+00> : vector<32x4xf32>
    %377 = tpu.matmul %376, %374, %cst_254 {dimension_numbers = #tpu.dot_dimension_numbers<[1], [0], [0], [1], [0, 0, 1, 1], [], []>} : vector<32x64xf32>, vector<64x4xf32>, vector<32x4xf32> -> vector<32x4xf32>
    %c0_255 = arith.constant 0 : index
    %c0_256 = arith.constant 0 : index
    %c0_257 = arith.constant 0 : index
    %378 = vector.load %arg10[%c0_255, %c0_256, %c0_257] : memref<2x32x4xf32, #tpu.memory_space<vmem>>, vector<1x32x4xf32>
    %379 = vector.shape_cast %378 : vector<1x32x4xf32> to vector<32x4xf32>
    %380 = vector.extract_strided_slice %379 {offsets = [0, 3], sizes = [32, 1], strides = [1, 1]} : vector<32x4xf32> to vector<32x1xf32>
    %381 = vector.broadcast %380 : vector<32x1xf32> to vector<32x4xf32>
    %382 = arith.addf %377, %381 : vector<32x4xf32>
    %c0_258 = arith.constant 0 : index
    %c0_259 = arith.constant 0 : index
    %c0_260 = arith.constant 0 : index
    %383 = vector.load %arg11[%c0_258, %c0_259, %c0_260] : memref<2x32x4xf32, #tpu.memory_space<vmem>>, vector<1x32x4xf32>
    %384 = vector.shape_cast %383 : vector<1x32x4xf32> to vector<32x4xf32>
    %385 = vector.extract_strided_slice %384 {offsets = [0, 3], sizes = [32, 1], strides = [1, 1]} : vector<32x4xf32> to vector<32x1xf32>
    %cst_261 = arith.constant 0.000000e+00 : f32
    %386 = vector.broadcast %cst_261 : f32 to vector<32x4xf32>
    %387 = arith.cmpf ogt, %382, %386 : vector<32x4xf32>
    %388 = vector.broadcast %385 : vector<32x1xf32> to vector<32x4xf32>
    %389 = arith.mulf %388, %382 : vector<32x4xf32>
    %390 = arith.select %387, %382, %389 : vector<32x4xi1>, vector<32x4xf32>
    %c0_262 = arith.constant 0 : index
    %c0_263 = arith.constant 0 : index
    %c0_264 = arith.constant 0 : index
    %c0_265 = arith.constant 0 : index
    %391 = vector.load %arg12[%c0_262, %c0_263, %c0_264, %c0_265] : memref<2x4x32x32xf32, #tpu.memory_space<vmem>>, vector<1x1x32x32xf32>
    %392 = vector.shape_cast %391 : vector<1x1x32x32xf32> to vector<32x32xf32>
    %cst_266 = arith.constant dense<0.000000e+00> : vector<32x32xf32>
    %393 = tpu.matmul %392, %204, %cst_266 {dimension_numbers = #tpu.dot_dimension_numbers<[1], [0], [0], [1], [0, 0, 1, 1], [], []>} : vector<32x32xf32>, vector<32x32xf32>, vector<32x32xf32> -> vector<32x32xf32>
    %c0_267 = arith.constant 0 : index
    %c1_268 = arith.constant 1 : index
    %c0_269 = arith.constant 0 : index
    %c0_270 = arith.constant 0 : index
    %394 = vector.load %arg12[%c0_267, %c1_268, %c0_269, %c0_270] : memref<2x4x32x32xf32, #tpu.memory_space<vmem>>, vector<1x1x32x32xf32>
    %395 = vector.shape_cast %394 : vector<1x1x32x32xf32> to vector<32x32xf32>
    %cst_271 = arith.constant dense<0.000000e+00> : vector<32x16xf32>
    %396 = tpu.matmul %395, %268, %cst_271 {dimension_numbers = #tpu.dot_dimension_numbers<[1], [0], [0], [1], [0, 0, 1, 1], [], []>} : vector<32x32xf32>, vector<32x16xf32>, vector<32x16xf32> -> vector<32x16xf32>
    %c0_272 = arith.constant 0 : index
    %c0_273 = arith.constant 0 : index
    %397 = vector.load %arg20[%c0_272, %c0_273] : memref<16x32xf32, #tpu.memory_space<vmem>>, vector<16x32xf32>
    %cst_274 = arith.constant dense<0.000000e+00> : vector<32x32xf32>
    %398 = tpu.matmul %396, %397, %cst_274 {dimension_numbers = #tpu.dot_dimension_numbers<[1], [0], [0], [1], [0, 0, 1, 1], [], []>} : vector<32x16xf32>, vector<16x32xf32>, vector<32x32xf32> -> vector<32x32xf32>
    %399 = arith.addf %393, %398 : vector<32x32xf32>
    %c0_275 = arith.constant 0 : index
    %c2_276 = arith.constant 2 : index
    %c0_277 = arith.constant 0 : index
    %c0_278 = arith.constant 0 : index
    %400 = vector.load %arg12[%c0_275, %c2_276, %c0_277, %c0_278] : memref<2x4x32x32xf32, #tpu.memory_space<vmem>>, vector<1x1x32x32xf32>
    %401 = vector.shape_cast %400 : vector<1x1x32x32xf32> to vector<32x32xf32>
    %cst_279 = arith.constant dense<0.000000e+00> : vector<32x8xf32>
    %402 = tpu.matmul %401, %332, %cst_279 {dimension_numbers = #tpu.dot_dimension_numbers<[1], [0], [0], [1], [0, 0, 1, 1], [], []>} : vector<32x32xf32>, vector<32x8xf32>, vector<32x8xf32> -> vector<32x8xf32>
    %c0_280 = arith.constant 0 : index
    %c0_281 = arith.constant 0 : index
    %403 = vector.load %arg23[%c0_280, %c0_281] : memref<8x32xf32, #tpu.memory_space<vmem>>, vector<8x32xf32>
    %cst_282 = arith.constant dense<0.000000e+00> : vector<32x32xf32>
    %404 = tpu.matmul %402, %403, %cst_282 {dimension_numbers = #tpu.dot_dimension_numbers<[1], [0], [0], [1], [0, 0, 1, 1], [], []>} : vector<32x8xf32>, vector<8x32xf32>, vector<32x32xf32> -> vector<32x32xf32>
    %405 = arith.addf %399, %404 : vector<32x32xf32>
    %c0_283 = arith.constant 0 : index
    %c3_284 = arith.constant 3 : index
    %c0_285 = arith.constant 0 : index
    %c0_286 = arith.constant 0 : index
    %406 = vector.load %arg12[%c0_283, %c3_284, %c0_285, %c0_286] : memref<2x4x32x32xf32, #tpu.memory_space<vmem>>, vector<1x1x32x32xf32>
    %407 = vector.shape_cast %406 : vector<1x1x32x32xf32> to vector<32x32xf32>
    %cst_287 = arith.constant dense<0.000000e+00> : vector<32x4xf32>
    %408 = tpu.matmul %407, %390, %cst_287 {dimension_numbers = #tpu.dot_dimension_numbers<[1], [0], [0], [1], [0, 0, 1, 1], [], []>} : vector<32x32xf32>, vector<32x4xf32>, vector<32x4xf32> -> vector<32x4xf32>
    %c0_288 = arith.constant 0 : index
    %c0_289 = arith.constant 0 : index
    %409 = vector.load %arg24[%c0_288, %c0_289] : memref<4x32xf32, #tpu.memory_space<vmem>>, vector<4x32xf32>
    %cst_290 = arith.constant dense<0.000000e+00> : vector<32x32xf32>
    %410 = tpu.matmul %408, %409, %cst_290 {dimension_numbers = #tpu.dot_dimension_numbers<[1], [0], [0], [1], [0, 0, 1, 1], [], []>} : vector<32x4xf32>, vector<4x32xf32>, vector<32x32xf32> -> vector<32x32xf32>
    %411 = arith.addf %405, %410 : vector<32x32xf32>
    %c0_291 = arith.constant 0 : index
    %c0_292 = arith.constant 0 : index
    %c0_293 = arith.constant 0 : index
    %412 = vector.load %arg13[%c0_291, %c0_292, %c0_293] : memref<2x32x2xf32, #tpu.memory_space<vmem>>, vector<1x32x2xf32>
    %413 = vector.shape_cast %412 : vector<1x32x2xf32> to vector<32x2xf32>
    %414 = vector.extract_strided_slice %413 {offsets = [0, 0], sizes = [32, 1], strides = [1, 1]} : vector<32x2xf32> to vector<32x1xf32>
    %415 = vector.broadcast %414 : vector<32x1xf32> to vector<32x32xf32>
    %416 = arith.addf %411, %415 : vector<32x32xf32>
    %c0_294 = arith.constant 0 : index
    %c0_295 = arith.constant 0 : index
    %c0_296 = arith.constant 0 : index
    %417 = vector.load %arg13[%c0_294, %c0_295, %c0_296] : memref<2x32x2xf32, #tpu.memory_space<vmem>>, vector<1x32x2xf32>
    %418 = vector.shape_cast %417 : vector<1x32x2xf32> to vector<32x2xf32>
    %419 = vector.extract_strided_slice %418 {offsets = [0, 1], sizes = [32, 1], strides = [1, 1]} : vector<32x2xf32> to vector<32x1xf32>
    %cst_297 = arith.constant 0.000000e+00 : f32
    %420 = vector.broadcast %cst_297 : f32 to vector<32x32xf32>
    %421 = arith.cmpf ogt, %416, %420 : vector<32x32xf32>
    %422 = vector.broadcast %419 : vector<32x1xf32> to vector<32x32xf32>
    %423 = arith.mulf %422, %416 : vector<32x32xf32>
    %424 = arith.select %421, %416, %423 : vector<32x32xi1>, vector<32x32xf32>
    %c0_298 = arith.constant 0 : index
    %c0_299 = arith.constant 0 : index
    %c0_300 = arith.constant 0 : index
    %425 = vector.load %arg14[%c0_298, %c0_299, %c0_300] : memref<2x16x32xf32, #tpu.memory_space<vmem>>, vector<1x16x32xf32>
    %426 = vector.shape_cast %425 : vector<1x16x32xf32> to vector<16x32xf32>
    %cst_301 = arith.constant dense<0.000000e+00> : vector<16x32xf32>
    %427 = tpu.matmul %426, %424, %cst_301 {dimension_numbers = #tpu.dot_dimension_numbers<[1], [0], [0], [1], [0, 0, 1, 1], [], []>} : vector<16x32xf32>, vector<32x32xf32>, vector<16x32xf32> -> vector<16x32xf32>
    %c0_302 = arith.constant 0 : index
    %c0_303 = arith.constant 0 : index
    %c0_304 = arith.constant 0 : index
    %428 = vector.load %arg15[%c0_302, %c0_303, %c0_304] : memref<2x16x4xf32, #tpu.memory_space<vmem>>, vector<1x16x4xf32>
    %429 = vector.shape_cast %428 : vector<1x16x4xf32> to vector<16x4xf32>
    %430 = vector.extract_strided_slice %429 {offsets = [0, 0], sizes = [16, 1], strides = [1, 1]} : vector<16x4xf32> to vector<16x1xf32>
    %431 = vector.broadcast %430 : vector<16x1xf32> to vector<16x32xf32>
    %432 = arith.addf %427, %431 : vector<16x32xf32>
    %433 = arith.addf %432, %1 : vector<16x32xf32>
    %434 = arith.addf %1, %433 : vector<16x32xf32>
    %c1_305 = arith.constant 1 : index
    %c0_306 = arith.constant 0 : index
    %c0_307 = arith.constant 0 : index
    %435 = vector.load %arg15[%c1_305, %c0_306, %c0_307] : memref<2x16x4xf32, #tpu.memory_space<vmem>>, vector<1x16x4xf32>
    %436 = vector.shape_cast %435 : vector<1x16x4xf32> to vector<16x4xf32>
    %437 = vector.extract_strided_slice %436 {offsets = [0, 1], sizes = [16, 1], strides = [1, 1]} : vector<16x4xf32> to vector<16x1xf32>
    %438 = vector.broadcast %437 : vector<16x1xf32> to vector<16x32xf32>
    %439 = arith.mulf %438, %434 : vector<16x32xf32>
    %c1_308 = arith.constant 1 : index
    %c0_309 = arith.constant 0 : index
    %c0_310 = arith.constant 0 : index
    %440 = vector.load %arg15[%c1_308, %c0_309, %c0_310] : memref<2x16x4xf32, #tpu.memory_space<vmem>>, vector<1x16x4xf32>
    %441 = vector.shape_cast %440 : vector<1x16x4xf32> to vector<16x4xf32>
    %442 = vector.extract_strided_slice %441 {offsets = [0, 2], sizes = [16, 1], strides = [1, 1]} : vector<16x4xf32> to vector<16x1xf32>
    %443 = vector.broadcast %442 : vector<16x1xf32> to vector<16x32xf32>
    %444 = arith.addf %439, %443 : vector<16x32xf32>
    %c1_311 = arith.constant 1 : index
    %c0_312 = arith.constant 0 : index
    %c0_313 = arith.constant 0 : index
    %445 = vector.load %arg15[%c1_311, %c0_312, %c0_313] : memref<2x16x4xf32, #tpu.memory_space<vmem>>, vector<1x16x4xf32>
    %446 = vector.shape_cast %445 : vector<1x16x4xf32> to vector<16x4xf32>
    %447 = vector.extract_strided_slice %446 {offsets = [0, 3], sizes = [16, 1], strides = [1, 1]} : vector<16x4xf32> to vector<16x1xf32>
    %cst_314 = arith.constant 0.000000e+00 : f32
    %448 = vector.broadcast %cst_314 : f32 to vector<16x32xf32>
    %449 = arith.cmpf ogt, %444, %448 : vector<16x32xf32>
    %450 = vector.broadcast %447 : vector<16x1xf32> to vector<16x32xf32>
    %451 = arith.mulf %450, %444 : vector<16x32xf32>
    %452 = arith.select %449, %444, %451 : vector<16x32xi1>, vector<16x32xf32>
    %c1_315 = arith.constant 1 : index
    %c0_316 = arith.constant 0 : index
    %c0_317 = arith.constant 0 : index
    %453 = vector.load %arg2[%c1_315, %c0_316, %c0_317] : memref<2x32x16xf32, #tpu.memory_space<vmem>>, vector<1x32x16xf32>
    %454 = vector.shape_cast %453 : vector<1x32x16xf32> to vector<32x16xf32>
    %cst_318 = arith.constant dense<0.000000e+00> : vector<32x32xf32>
    %455 = tpu.matmul %454, %452, %cst_318 {dimension_numbers = #tpu.dot_dimension_numbers<[1], [0], [0], [1], [0, 0, 1, 1], [], []>} : vector<32x16xf32>, vector<16x32xf32>, vector<32x32xf32> -> vector<32x32xf32>
    %c1_319 = arith.constant 1 : index
    %c0_320 = arith.constant 0 : index
    %c0_321 = arith.constant 0 : index
    %456 = vector.load %arg3[%c1_319, %c0_320, %c0_321] : memref<2x32x2xf32, #tpu.memory_space<vmem>>, vector<1x32x2xf32>
    %457 = vector.shape_cast %456 : vector<1x32x2xf32> to vector<32x2xf32>
    %458 = vector.extract_strided_slice %457 {offsets = [0, 0], sizes = [32, 1], strides = [1, 1]} : vector<32x2xf32> to vector<32x1xf32>
    %459 = vector.broadcast %458 : vector<32x1xf32> to vector<32x32xf32>
    %460 = arith.addf %455, %459 : vector<32x32xf32>
    %c1_322 = arith.constant 1 : index
    %c0_323 = arith.constant 0 : index
    %c0_324 = arith.constant 0 : index
    %461 = vector.load %arg3[%c1_322, %c0_323, %c0_324] : memref<2x32x2xf32, #tpu.memory_space<vmem>>, vector<1x32x2xf32>
    %462 = vector.shape_cast %461 : vector<1x32x2xf32> to vector<32x2xf32>
    %463 = vector.extract_strided_slice %462 {offsets = [0, 1], sizes = [32, 1], strides = [1, 1]} : vector<32x2xf32> to vector<32x1xf32>
    %cst_325 = arith.constant 0.000000e+00 : f32
    %464 = vector.broadcast %cst_325 : f32 to vector<32x32xf32>
    %465 = arith.cmpf ogt, %460, %464 : vector<32x32xf32>
    %466 = vector.broadcast %463 : vector<32x1xf32> to vector<32x32xf32>
    %467 = arith.mulf %466, %460 : vector<32x32xf32>
    %468 = arith.select %465, %460, %467 : vector<32x32xi1>, vector<32x32xf32>
    %c1_326 = arith.constant 1 : index
    %c0_327 = arith.constant 0 : index
    %c0_328 = arith.constant 0 : index
    %469 = vector.load %arg5[%c1_326, %c0_327, %c0_328] : memref<2x32x4xf32, #tpu.memory_space<vmem>>, vector<1x32x4xf32>
    %470 = vector.shape_cast %469 : vector<1x32x4xf32> to vector<32x4xf32>
    %471 = vector.extract_strided_slice %470 {offsets = [0, 0], sizes = [32, 1], strides = [1, 1]} : vector<32x4xf32> to vector<32x1xf32>
    %c1_329 = arith.constant 1 : index
    %c0_330 = arith.constant 0 : index
    %c0_331 = arith.constant 0 : index
    %472 = vector.load %arg4[%c1_329, %c0_330, %c0_331] : memref<2x32x20xf32, #tpu.memory_space<vmem>>, vector<1x32x20xf32>
    %473 = vector.shape_cast %472 : vector<1x32x20xf32> to vector<32x20xf32>
    %474 = vector.extract_strided_slice %473 {offsets = [0, 0], sizes = [32, 1], strides = [1, 1]} : vector<32x20xf32> to vector<32x1xf32>
    %c0_332 = arith.constant 0 : index
    %c0_333 = arith.constant 0 : index
    %c0_334 = arith.constant 0 : index
    %475 = vector.load %arg16[%c0_332, %c0_333, %c0_334] : memref<5x32x32xf32, #tpu.memory_space<vmem>>, vector<1x32x32xf32>
    %476 = vector.shape_cast %475 : vector<1x32x32xf32> to vector<32x32xf32>
    %cst_335 = arith.constant dense<0.000000e+00> : vector<32x32xf32>
    %477 = tpu.matmul %468, %476, %cst_335 {dimension_numbers = #tpu.dot_dimension_numbers<[1], [0], [0], [1], [0, 0, 1, 1], [], []>} : vector<32x32xf32>, vector<32x32xf32>, vector<32x32xf32> -> vector<32x32xf32>
    %478 = vector.broadcast %474 : vector<32x1xf32> to vector<32x32xf32>
    %479 = arith.mulf %478, %477 : vector<32x32xf32>
    %480 = vector.extract_strided_slice %473 {offsets = [0, 1], sizes = [32, 1], strides = [1, 1]} : vector<32x20xf32> to vector<32x1xf32>
    %c1_336 = arith.constant 1 : index
    %c0_337 = arith.constant 0 : index
    %c0_338 = arith.constant 0 : index
    %481 = vector.load %arg16[%c1_336, %c0_337, %c0_338] : memref<5x32x32xf32, #tpu.memory_space<vmem>>, vector<1x32x32xf32>
    %482 = vector.shape_cast %481 : vector<1x32x32xf32> to vector<32x32xf32>
    %cst_339 = arith.constant dense<0.000000e+00> : vector<32x32xf32>
    %483 = tpu.matmul %468, %482, %cst_339 {dimension_numbers = #tpu.dot_dimension_numbers<[1], [0], [0], [1], [0, 0, 1, 1], [], []>} : vector<32x32xf32>, vector<32x32xf32>, vector<32x32xf32> -> vector<32x32xf32>
    %484 = vector.broadcast %480 : vector<32x1xf32> to vector<32x32xf32>
    %485 = arith.mulf %484, %483 : vector<32x32xf32>
    %486 = arith.addf %479, %485 : vector<32x32xf32>
    %487 = vector.extract_strided_slice %473 {offsets = [0, 2], sizes = [32, 1], strides = [1, 1]} : vector<32x20xf32> to vector<32x1xf32>
    %c2_340 = arith.constant 2 : index
    %c0_341 = arith.constant 0 : index
    %c0_342 = arith.constant 0 : index
    %488 = vector.load %arg16[%c2_340, %c0_341, %c0_342] : memref<5x32x32xf32, #tpu.memory_space<vmem>>, vector<1x32x32xf32>
    %489 = vector.shape_cast %488 : vector<1x32x32xf32> to vector<32x32xf32>
    %cst_343 = arith.constant dense<0.000000e+00> : vector<32x32xf32>
    %490 = tpu.matmul %468, %489, %cst_343 {dimension_numbers = #tpu.dot_dimension_numbers<[1], [0], [0], [1], [0, 0, 1, 1], [], []>} : vector<32x32xf32>, vector<32x32xf32>, vector<32x32xf32> -> vector<32x32xf32>
    %491 = vector.broadcast %487 : vector<32x1xf32> to vector<32x32xf32>
    %492 = arith.mulf %491, %490 : vector<32x32xf32>
    %493 = arith.addf %486, %492 : vector<32x32xf32>
    %494 = vector.extract_strided_slice %473 {offsets = [0, 3], sizes = [32, 1], strides = [1, 1]} : vector<32x20xf32> to vector<32x1xf32>
    %c3_344 = arith.constant 3 : index
    %c0_345 = arith.constant 0 : index
    %c0_346 = arith.constant 0 : index
    %495 = vector.load %arg16[%c3_344, %c0_345, %c0_346] : memref<5x32x32xf32, #tpu.memory_space<vmem>>, vector<1x32x32xf32>
    %496 = vector.shape_cast %495 : vector<1x32x32xf32> to vector<32x32xf32>
    %cst_347 = arith.constant dense<0.000000e+00> : vector<32x32xf32>
    %497 = tpu.matmul %468, %496, %cst_347 {dimension_numbers = #tpu.dot_dimension_numbers<[1], [0], [0], [1], [0, 0, 1, 1], [], []>} : vector<32x32xf32>, vector<32x32xf32>, vector<32x32xf32> -> vector<32x32xf32>
    %498 = vector.broadcast %494 : vector<32x1xf32> to vector<32x32xf32>
    %499 = arith.mulf %498, %497 : vector<32x32xf32>
    %500 = arith.addf %493, %499 : vector<32x32xf32>
    %501 = vector.extract_strided_slice %473 {offsets = [0, 4], sizes = [32, 1], strides = [1, 1]} : vector<32x20xf32> to vector<32x1xf32>
    %c4_348 = arith.constant 4 : index
    %c0_349 = arith.constant 0 : index
    %c0_350 = arith.constant 0 : index
    %502 = vector.load %arg16[%c4_348, %c0_349, %c0_350] : memref<5x32x32xf32, #tpu.memory_space<vmem>>, vector<1x32x32xf32>
    %503 = vector.shape_cast %502 : vector<1x32x32xf32> to vector<32x32xf32>
    %cst_351 = arith.constant dense<0.000000e+00> : vector<32x32xf32>
    %504 = tpu.matmul %468, %503, %cst_351 {dimension_numbers = #tpu.dot_dimension_numbers<[1], [0], [0], [1], [0, 0, 1, 1], [], []>} : vector<32x32xf32>, vector<32x32xf32>, vector<32x32xf32> -> vector<32x32xf32>
    %505 = vector.broadcast %501 : vector<32x1xf32> to vector<32x32xf32>
    %506 = arith.mulf %505, %504 : vector<32x32xf32>
    %507 = arith.addf %500, %506 : vector<32x32xf32>
    %508 = vector.broadcast %471 : vector<32x1xf32> to vector<32x32xf32>
    %509 = arith.addf %507, %508 : vector<32x32xf32>
    %c1_352 = arith.constant 1 : index
    %c0_353 = arith.constant 0 : index
    %c0_354 = arith.constant 0 : index
    %510 = vector.load %arg5[%c1_352, %c0_353, %c0_354] : memref<2x32x4xf32, #tpu.memory_space<vmem>>, vector<1x32x4xf32>
    %511 = vector.shape_cast %510 : vector<1x32x4xf32> to vector<32x4xf32>
    %512 = vector.extract_strided_slice %511 {offsets = [0, 1], sizes = [32, 1], strides = [1, 1]} : vector<32x4xf32> to vector<32x1xf32>
    %c1_355 = arith.constant 1 : index
    %c0_356 = arith.constant 0 : index
    %c0_357 = arith.constant 0 : index
    %513 = vector.load %arg4[%c1_355, %c0_356, %c0_357] : memref<2x32x20xf32, #tpu.memory_space<vmem>>, vector<1x32x20xf32>
    %514 = vector.shape_cast %513 : vector<1x32x20xf32> to vector<32x20xf32>
    %515 = vector.extract_strided_slice %514 {offsets = [0, 5], sizes = [32, 1], strides = [1, 1]} : vector<32x20xf32> to vector<32x1xf32>
    %c0_358 = arith.constant 0 : index
    %c0_359 = arith.constant 0 : index
    %c0_360 = arith.constant 0 : index
    %516 = vector.load %arg17[%c0_358, %c0_359, %c0_360] : memref<5x32x16xf32, #tpu.memory_space<vmem>>, vector<1x32x16xf32>
    %517 = vector.shape_cast %516 : vector<1x32x16xf32> to vector<32x16xf32>
    %cst_361 = arith.constant dense<0.000000e+00> : vector<32x16xf32>
    %518 = tpu.matmul %509, %517, %cst_361 {dimension_numbers = #tpu.dot_dimension_numbers<[1], [0], [0], [1], [0, 0, 1, 1], [], []>} : vector<32x32xf32>, vector<32x16xf32>, vector<32x16xf32> -> vector<32x16xf32>
    %519 = vector.broadcast %515 : vector<32x1xf32> to vector<32x16xf32>
    %520 = arith.mulf %519, %518 : vector<32x16xf32>
    %521 = vector.extract_strided_slice %514 {offsets = [0, 6], sizes = [32, 1], strides = [1, 1]} : vector<32x20xf32> to vector<32x1xf32>
    %c1_362 = arith.constant 1 : index
    %c0_363 = arith.constant 0 : index
    %c0_364 = arith.constant 0 : index
    %522 = vector.load %arg17[%c1_362, %c0_363, %c0_364] : memref<5x32x16xf32, #tpu.memory_space<vmem>>, vector<1x32x16xf32>
    %523 = vector.shape_cast %522 : vector<1x32x16xf32> to vector<32x16xf32>
    %cst_365 = arith.constant dense<0.000000e+00> : vector<32x16xf32>
    %524 = tpu.matmul %509, %523, %cst_365 {dimension_numbers = #tpu.dot_dimension_numbers<[1], [0], [0], [1], [0, 0, 1, 1], [], []>} : vector<32x32xf32>, vector<32x16xf32>, vector<32x16xf32> -> vector<32x16xf32>
    %525 = vector.broadcast %521 : vector<32x1xf32> to vector<32x16xf32>
    %526 = arith.mulf %525, %524 : vector<32x16xf32>
    %527 = arith.addf %520, %526 : vector<32x16xf32>
    %528 = vector.extract_strided_slice %514 {offsets = [0, 7], sizes = [32, 1], strides = [1, 1]} : vector<32x20xf32> to vector<32x1xf32>
    %c2_366 = arith.constant 2 : index
    %c0_367 = arith.constant 0 : index
    %c0_368 = arith.constant 0 : index
    %529 = vector.load %arg17[%c2_366, %c0_367, %c0_368] : memref<5x32x16xf32, #tpu.memory_space<vmem>>, vector<1x32x16xf32>
    %530 = vector.shape_cast %529 : vector<1x32x16xf32> to vector<32x16xf32>
    %cst_369 = arith.constant dense<0.000000e+00> : vector<32x16xf32>
    %531 = tpu.matmul %509, %530, %cst_369 {dimension_numbers = #tpu.dot_dimension_numbers<[1], [0], [0], [1], [0, 0, 1, 1], [], []>} : vector<32x32xf32>, vector<32x16xf32>, vector<32x16xf32> -> vector<32x16xf32>
    %532 = vector.broadcast %528 : vector<32x1xf32> to vector<32x16xf32>
    %533 = arith.mulf %532, %531 : vector<32x16xf32>
    %534 = arith.addf %527, %533 : vector<32x16xf32>
    %535 = vector.extract_strided_slice %514 {offsets = [0, 8], sizes = [32, 1], strides = [1, 1]} : vector<32x20xf32> to vector<32x1xf32>
    %c3_370 = arith.constant 3 : index
    %c0_371 = arith.constant 0 : index
    %c0_372 = arith.constant 0 : index
    %536 = vector.load %arg17[%c3_370, %c0_371, %c0_372] : memref<5x32x16xf32, #tpu.memory_space<vmem>>, vector<1x32x16xf32>
    %537 = vector.shape_cast %536 : vector<1x32x16xf32> to vector<32x16xf32>
    %cst_373 = arith.constant dense<0.000000e+00> : vector<32x16xf32>
    %538 = tpu.matmul %509, %537, %cst_373 {dimension_numbers = #tpu.dot_dimension_numbers<[1], [0], [0], [1], [0, 0, 1, 1], [], []>} : vector<32x32xf32>, vector<32x16xf32>, vector<32x16xf32> -> vector<32x16xf32>
    %539 = vector.broadcast %535 : vector<32x1xf32> to vector<32x16xf32>
    %540 = arith.mulf %539, %538 : vector<32x16xf32>
    %541 = arith.addf %534, %540 : vector<32x16xf32>
    %542 = vector.extract_strided_slice %514 {offsets = [0, 9], sizes = [32, 1], strides = [1, 1]} : vector<32x20xf32> to vector<32x1xf32>
    %c4_374 = arith.constant 4 : index
    %c0_375 = arith.constant 0 : index
    %c0_376 = arith.constant 0 : index
    %543 = vector.load %arg17[%c4_374, %c0_375, %c0_376] : memref<5x32x16xf32, #tpu.memory_space<vmem>>, vector<1x32x16xf32>
    %544 = vector.shape_cast %543 : vector<1x32x16xf32> to vector<32x16xf32>
    %cst_377 = arith.constant dense<0.000000e+00> : vector<32x16xf32>
    %545 = tpu.matmul %509, %544, %cst_377 {dimension_numbers = #tpu.dot_dimension_numbers<[1], [0], [0], [1], [0, 0, 1, 1], [], []>} : vector<32x32xf32>, vector<32x16xf32>, vector<32x16xf32> -> vector<32x16xf32>
    %546 = vector.broadcast %542 : vector<32x1xf32> to vector<32x16xf32>
    %547 = arith.mulf %546, %545 : vector<32x16xf32>
    %548 = arith.addf %541, %547 : vector<32x16xf32>
    %549 = vector.broadcast %512 : vector<32x1xf32> to vector<32x16xf32>
    %550 = arith.addf %548, %549 : vector<32x16xf32>
    %c1_378 = arith.constant 1 : index
    %c0_379 = arith.constant 0 : index
    %c0_380 = arith.constant 0 : index
    %551 = vector.load %arg5[%c1_378, %c0_379, %c0_380] : memref<2x32x4xf32, #tpu.memory_space<vmem>>, vector<1x32x4xf32>
    %552 = vector.shape_cast %551 : vector<1x32x4xf32> to vector<32x4xf32>
    %553 = vector.extract_strided_slice %552 {offsets = [0, 2], sizes = [32, 1], strides = [1, 1]} : vector<32x4xf32> to vector<32x1xf32>
    %c1_381 = arith.constant 1 : index
    %c0_382 = arith.constant 0 : index
    %c0_383 = arith.constant 0 : index
    %554 = vector.load %arg4[%c1_381, %c0_382, %c0_383] : memref<2x32x20xf32, #tpu.memory_space<vmem>>, vector<1x32x20xf32>
    %555 = vector.shape_cast %554 : vector<1x32x20xf32> to vector<32x20xf32>
    %556 = vector.extract_strided_slice %555 {offsets = [0, 10], sizes = [32, 1], strides = [1, 1]} : vector<32x20xf32> to vector<32x1xf32>
    %c0_384 = arith.constant 0 : index
    %c0_385 = arith.constant 0 : index
    %c0_386 = arith.constant 0 : index
    %557 = vector.load %arg18[%c0_384, %c0_385, %c0_386] : memref<5x16x8xf32, #tpu.memory_space<vmem>>, vector<1x16x8xf32>
    %558 = vector.shape_cast %557 : vector<1x16x8xf32> to vector<16x8xf32>
    %cst_387 = arith.constant dense<0.000000e+00> : vector<32x8xf32>
    %559 = tpu.matmul %550, %558, %cst_387 {dimension_numbers = #tpu.dot_dimension_numbers<[1], [0], [0], [1], [0, 0, 1, 1], [], []>} : vector<32x16xf32>, vector<16x8xf32>, vector<32x8xf32> -> vector<32x8xf32>
    %560 = vector.broadcast %556 : vector<32x1xf32> to vector<32x8xf32>
    %561 = arith.mulf %560, %559 : vector<32x8xf32>
    %562 = vector.extract_strided_slice %555 {offsets = [0, 11], sizes = [32, 1], strides = [1, 1]} : vector<32x20xf32> to vector<32x1xf32>
    %c1_388 = arith.constant 1 : index
    %c0_389 = arith.constant 0 : index
    %c0_390 = arith.constant 0 : index
    %563 = vector.load %arg18[%c1_388, %c0_389, %c0_390] : memref<5x16x8xf32, #tpu.memory_space<vmem>>, vector<1x16x8xf32>
    %564 = vector.shape_cast %563 : vector<1x16x8xf32> to vector<16x8xf32>
    %cst_391 = arith.constant dense<0.000000e+00> : vector<32x8xf32>
    %565 = tpu.matmul %550, %564, %cst_391 {dimension_numbers = #tpu.dot_dimension_numbers<[1], [0], [0], [1], [0, 0, 1, 1], [], []>} : vector<32x16xf32>, vector<16x8xf32>, vector<32x8xf32> -> vector<32x8xf32>
    %566 = vector.broadcast %562 : vector<32x1xf32> to vector<32x8xf32>
    %567 = arith.mulf %566, %565 : vector<32x8xf32>
    %568 = arith.addf %561, %567 : vector<32x8xf32>
    %569 = vector.extract_strided_slice %555 {offsets = [0, 12], sizes = [32, 1], strides = [1, 1]} : vector<32x20xf32> to vector<32x1xf32>
    %c2_392 = arith.constant 2 : index
    %c0_393 = arith.constant 0 : index
    %c0_394 = arith.constant 0 : index
    %570 = vector.load %arg18[%c2_392, %c0_393, %c0_394] : memref<5x16x8xf32, #tpu.memory_space<vmem>>, vector<1x16x8xf32>
    %571 = vector.shape_cast %570 : vector<1x16x8xf32> to vector<16x8xf32>
    %cst_395 = arith.constant dense<0.000000e+00> : vector<32x8xf32>
    %572 = tpu.matmul %550, %571, %cst_395 {dimension_numbers = #tpu.dot_dimension_numbers<[1], [0], [0], [1], [0, 0, 1, 1], [], []>} : vector<32x16xf32>, vector<16x8xf32>, vector<32x8xf32> -> vector<32x8xf32>
    %573 = vector.broadcast %569 : vector<32x1xf32> to vector<32x8xf32>
    %574 = arith.mulf %573, %572 : vector<32x8xf32>
    %575 = arith.addf %568, %574 : vector<32x8xf32>
    %576 = vector.extract_strided_slice %555 {offsets = [0, 13], sizes = [32, 1], strides = [1, 1]} : vector<32x20xf32> to vector<32x1xf32>
    %c3_396 = arith.constant 3 : index
    %c0_397 = arith.constant 0 : index
    %c0_398 = arith.constant 0 : index
    %577 = vector.load %arg18[%c3_396, %c0_397, %c0_398] : memref<5x16x8xf32, #tpu.memory_space<vmem>>, vector<1x16x8xf32>
    %578 = vector.shape_cast %577 : vector<1x16x8xf32> to vector<16x8xf32>
    %cst_399 = arith.constant dense<0.000000e+00> : vector<32x8xf32>
    %579 = tpu.matmul %550, %578, %cst_399 {dimension_numbers = #tpu.dot_dimension_numbers<[1], [0], [0], [1], [0, 0, 1, 1], [], []>} : vector<32x16xf32>, vector<16x8xf32>, vector<32x8xf32> -> vector<32x8xf32>
    %580 = vector.broadcast %576 : vector<32x1xf32> to vector<32x8xf32>
    %581 = arith.mulf %580, %579 : vector<32x8xf32>
    %582 = arith.addf %575, %581 : vector<32x8xf32>
    %583 = vector.extract_strided_slice %555 {offsets = [0, 14], sizes = [32, 1], strides = [1, 1]} : vector<32x20xf32> to vector<32x1xf32>
    %c4_400 = arith.constant 4 : index
    %c0_401 = arith.constant 0 : index
    %c0_402 = arith.constant 0 : index
    %584 = vector.load %arg18[%c4_400, %c0_401, %c0_402] : memref<5x16x8xf32, #tpu.memory_space<vmem>>, vector<1x16x8xf32>
    %585 = vector.shape_cast %584 : vector<1x16x8xf32> to vector<16x8xf32>
    %cst_403 = arith.constant dense<0.000000e+00> : vector<32x8xf32>
    %586 = tpu.matmul %550, %585, %cst_403 {dimension_numbers = #tpu.dot_dimension_numbers<[1], [0], [0], [1], [0, 0, 1, 1], [], []>} : vector<32x16xf32>, vector<16x8xf32>, vector<32x8xf32> -> vector<32x8xf32>
    %587 = vector.broadcast %583 : vector<32x1xf32> to vector<32x8xf32>
    %588 = arith.mulf %587, %586 : vector<32x8xf32>
    %589 = arith.addf %582, %588 : vector<32x8xf32>
    %590 = vector.broadcast %553 : vector<32x1xf32> to vector<32x8xf32>
    %591 = arith.addf %589, %590 : vector<32x8xf32>
    %c1_404 = arith.constant 1 : index
    %c0_405 = arith.constant 0 : index
    %c0_406 = arith.constant 0 : index
    %592 = vector.load %arg5[%c1_404, %c0_405, %c0_406] : memref<2x32x4xf32, #tpu.memory_space<vmem>>, vector<1x32x4xf32>
    %593 = vector.shape_cast %592 : vector<1x32x4xf32> to vector<32x4xf32>
    %594 = vector.extract_strided_slice %593 {offsets = [0, 3], sizes = [32, 1], strides = [1, 1]} : vector<32x4xf32> to vector<32x1xf32>
    %c1_407 = arith.constant 1 : index
    %c0_408 = arith.constant 0 : index
    %c0_409 = arith.constant 0 : index
    %595 = vector.load %arg4[%c1_407, %c0_408, %c0_409] : memref<2x32x20xf32, #tpu.memory_space<vmem>>, vector<1x32x20xf32>
    %596 = vector.shape_cast %595 : vector<1x32x20xf32> to vector<32x20xf32>
    %597 = vector.extract_strided_slice %596 {offsets = [0, 15], sizes = [32, 1], strides = [1, 1]} : vector<32x20xf32> to vector<32x1xf32>
    %c0_410 = arith.constant 0 : index
    %c0_411 = arith.constant 0 : index
    %c0_412 = arith.constant 0 : index
    %598 = vector.load %arg19[%c0_410, %c0_411, %c0_412] : memref<5x8x4xf32, #tpu.memory_space<vmem>>, vector<1x8x4xf32>
    %599 = vector.shape_cast %598 : vector<1x8x4xf32> to vector<8x4xf32>
    %cst_413 = arith.constant dense<0.000000e+00> : vector<32x4xf32>
    %600 = tpu.matmul %591, %599, %cst_413 {dimension_numbers = #tpu.dot_dimension_numbers<[1], [0], [0], [1], [0, 0, 1, 1], [], []>} : vector<32x8xf32>, vector<8x4xf32>, vector<32x4xf32> -> vector<32x4xf32>
    %601 = vector.broadcast %597 : vector<32x1xf32> to vector<32x4xf32>
    %602 = arith.mulf %601, %600 : vector<32x4xf32>
    %603 = vector.extract_strided_slice %596 {offsets = [0, 16], sizes = [32, 1], strides = [1, 1]} : vector<32x20xf32> to vector<32x1xf32>
    %c1_414 = arith.constant 1 : index
    %c0_415 = arith.constant 0 : index
    %c0_416 = arith.constant 0 : index
    %604 = vector.load %arg19[%c1_414, %c0_415, %c0_416] : memref<5x8x4xf32, #tpu.memory_space<vmem>>, vector<1x8x4xf32>
    %605 = vector.shape_cast %604 : vector<1x8x4xf32> to vector<8x4xf32>
    %cst_417 = arith.constant dense<0.000000e+00> : vector<32x4xf32>
    %606 = tpu.matmul %591, %605, %cst_417 {dimension_numbers = #tpu.dot_dimension_numbers<[1], [0], [0], [1], [0, 0, 1, 1], [], []>} : vector<32x8xf32>, vector<8x4xf32>, vector<32x4xf32> -> vector<32x4xf32>
    %607 = vector.broadcast %603 : vector<32x1xf32> to vector<32x4xf32>
    %608 = arith.mulf %607, %606 : vector<32x4xf32>
    %609 = arith.addf %602, %608 : vector<32x4xf32>
    %610 = vector.extract_strided_slice %596 {offsets = [0, 17], sizes = [32, 1], strides = [1, 1]} : vector<32x20xf32> to vector<32x1xf32>
    %c2_418 = arith.constant 2 : index
    %c0_419 = arith.constant 0 : index
    %c0_420 = arith.constant 0 : index
    %611 = vector.load %arg19[%c2_418, %c0_419, %c0_420] : memref<5x8x4xf32, #tpu.memory_space<vmem>>, vector<1x8x4xf32>
    %612 = vector.shape_cast %611 : vector<1x8x4xf32> to vector<8x4xf32>
    %cst_421 = arith.constant dense<0.000000e+00> : vector<32x4xf32>
    %613 = tpu.matmul %591, %612, %cst_421 {dimension_numbers = #tpu.dot_dimension_numbers<[1], [0], [0], [1], [0, 0, 1, 1], [], []>} : vector<32x8xf32>, vector<8x4xf32>, vector<32x4xf32> -> vector<32x4xf32>
    %614 = vector.broadcast %610 : vector<32x1xf32> to vector<32x4xf32>
    %615 = arith.mulf %614, %613 : vector<32x4xf32>
    %616 = arith.addf %609, %615 : vector<32x4xf32>
    %617 = vector.extract_strided_slice %596 {offsets = [0, 18], sizes = [32, 1], strides = [1, 1]} : vector<32x20xf32> to vector<32x1xf32>
    %c3_422 = arith.constant 3 : index
    %c0_423 = arith.constant 0 : index
    %c0_424 = arith.constant 0 : index
    %618 = vector.load %arg19[%c3_422, %c0_423, %c0_424] : memref<5x8x4xf32, #tpu.memory_space<vmem>>, vector<1x8x4xf32>
    %619 = vector.shape_cast %618 : vector<1x8x4xf32> to vector<8x4xf32>
    %cst_425 = arith.constant dense<0.000000e+00> : vector<32x4xf32>
    %620 = tpu.matmul %591, %619, %cst_425 {dimension_numbers = #tpu.dot_dimension_numbers<[1], [0], [0], [1], [0, 0, 1, 1], [], []>} : vector<32x8xf32>, vector<8x4xf32>, vector<32x4xf32> -> vector<32x4xf32>
    %621 = vector.broadcast %617 : vector<32x1xf32> to vector<32x4xf32>
    %622 = arith.mulf %621, %620 : vector<32x4xf32>
    %623 = arith.addf %616, %622 : vector<32x4xf32>
    %624 = vector.extract_strided_slice %596 {offsets = [0, 19], sizes = [32, 1], strides = [1, 1]} : vector<32x20xf32> to vector<32x1xf32>
    %c4_426 = arith.constant 4 : index
    %c0_427 = arith.constant 0 : index
    %c0_428 = arith.constant 0 : index
    %625 = vector.load %arg19[%c4_426, %c0_427, %c0_428] : memref<5x8x4xf32, #tpu.memory_space<vmem>>, vector<1x8x4xf32>
    %626 = vector.shape_cast %625 : vector<1x8x4xf32> to vector<8x4xf32>
    %cst_429 = arith.constant dense<0.000000e+00> : vector<32x4xf32>
    %627 = tpu.matmul %591, %626, %cst_429 {dimension_numbers = #tpu.dot_dimension_numbers<[1], [0], [0], [1], [0, 0, 1, 1], [], []>} : vector<32x8xf32>, vector<8x4xf32>, vector<32x4xf32> -> vector<32x4xf32>
    %628 = vector.broadcast %624 : vector<32x1xf32> to vector<32x4xf32>
    %629 = arith.mulf %628, %627 : vector<32x4xf32>
    %630 = arith.addf %623, %629 : vector<32x4xf32>
    %631 = vector.broadcast %594 : vector<32x1xf32> to vector<32x4xf32>
    %632 = arith.addf %630, %631 : vector<32x4xf32>
    %c1_430 = arith.constant 1 : index
    %c0_431 = arith.constant 0 : index
    %c0_432 = arith.constant 0 : index
    %c0_433 = arith.constant 0 : index
    %633 = vector.load %arg8[%c1_430, %c0_431, %c0_432, %c0_433] : memref<2x4x32x64xf32, #tpu.memory_space<vmem>>, vector<1x1x32x64xf32>
    %634 = vector.shape_cast %633 : vector<1x1x32x64xf32> to vector<32x64xf32>
    %635 = vector.extract_strided_slice %634 {offsets = [0, 32], sizes = [32, 32], strides = [1, 1]} : vector<32x64xf32> to vector<32x32xf32>
    %cst_434 = arith.constant dense<0.000000e+00> : vector<32x32xf32>
    %636 = tpu.matmul %635, %509, %cst_434 {dimension_numbers = #tpu.dot_dimension_numbers<[1], [0], [0], [1], [0, 0, 1, 1], [], []>} : vector<32x32xf32>, vector<32x32xf32>, vector<32x32xf32> -> vector<32x32xf32>
    %c1_435 = arith.constant 1 : index
    %c0_436 = arith.constant 0 : index
    %c0_437 = arith.constant 0 : index
    %c0_438 = arith.constant 0 : index
    %637 = vector.load %arg9[%c1_435, %c0_436, %c0_437, %c0_438] : memref<2x3x32x32xf32, #tpu.memory_space<vmem>>, vector<1x1x32x32xf32>
    %638 = vector.shape_cast %637 : vector<1x1x32x32xf32> to vector<32x32xf32>
    %cst_439 = arith.constant dense<0.000000e+00> : vector<32x16xf32>
    %639 = tpu.matmul %638, %550, %cst_439 {dimension_numbers = #tpu.dot_dimension_numbers<[1], [0], [0], [1], [0, 0, 1, 1], [], []>} : vector<32x32xf32>, vector<32x16xf32>, vector<32x16xf32> -> vector<32x16xf32>
    %c0_440 = arith.constant 0 : index
    %c0_441 = arith.constant 0 : index
    %640 = vector.load %arg20[%c0_440, %c0_441] : memref<16x32xf32, #tpu.memory_space<vmem>>, vector<16x32xf32>
    %cst_442 = arith.constant dense<0.000000e+00> : vector<32x32xf32>
    %641 = tpu.matmul %639, %640, %cst_442 {dimension_numbers = #tpu.dot_dimension_numbers<[1], [0], [0], [1], [0, 0, 1, 1], [], []>} : vector<32x16xf32>, vector<16x32xf32>, vector<32x32xf32> -> vector<32x32xf32>
    %642 = arith.addf %636, %641 : vector<32x32xf32>
    %c1_443 = arith.constant 1 : index
    %c0_444 = arith.constant 0 : index
    %c0_445 = arith.constant 0 : index
    %643 = vector.load %arg10[%c1_443, %c0_444, %c0_445] : memref<2x32x4xf32, #tpu.memory_space<vmem>>, vector<1x32x4xf32>
    %644 = vector.shape_cast %643 : vector<1x32x4xf32> to vector<32x4xf32>
    %645 = vector.extract_strided_slice %644 {offsets = [0, 0], sizes = [32, 1], strides = [1, 1]} : vector<32x4xf32> to vector<32x1xf32>
    %646 = vector.broadcast %645 : vector<32x1xf32> to vector<32x32xf32>
    %647 = arith.addf %642, %646 : vector<32x32xf32>
    %c1_446 = arith.constant 1 : index
    %c0_447 = arith.constant 0 : index
    %c0_448 = arith.constant 0 : index
    %648 = vector.load %arg11[%c1_446, %c0_447, %c0_448] : memref<2x32x4xf32, #tpu.memory_space<vmem>>, vector<1x32x4xf32>
    %649 = vector.shape_cast %648 : vector<1x32x4xf32> to vector<32x4xf32>
    %650 = vector.extract_strided_slice %649 {offsets = [0, 0], sizes = [32, 1], strides = [1, 1]} : vector<32x4xf32> to vector<32x1xf32>
    %cst_449 = arith.constant 0.000000e+00 : f32
    %651 = vector.broadcast %cst_449 : f32 to vector<32x32xf32>
    %652 = arith.cmpf ogt, %647, %651 : vector<32x32xf32>
    %653 = vector.broadcast %650 : vector<32x1xf32> to vector<32x32xf32>
    %654 = arith.mulf %653, %647 : vector<32x32xf32>
    %655 = arith.select %652, %647, %654 : vector<32x32xi1>, vector<32x32xf32>
    %c1_450 = arith.constant 1 : index
    %c0_451 = arith.constant 0 : index
    %c0_452 = arith.constant 0 : index
    %656 = vector.load %arg7[%c1_450, %c0_451, %c0_452] : memref<2x32x3xf32, #tpu.memory_space<vmem>>, vector<1x32x3xf32>
    %657 = vector.shape_cast %656 : vector<1x32x3xf32> to vector<32x3xf32>
    %658 = vector.extract_strided_slice %657 {offsets = [0, 0], sizes = [32, 1], strides = [1, 1]} : vector<32x3xf32> to vector<32x1xf32>
    %c1_453 = arith.constant 1 : index
    %c0_454 = arith.constant 0 : index
    %c0_455 = arith.constant 0 : index
    %659 = vector.load %arg6[%c1_453, %c0_454, %c0_455] : memref<2x32x15xf32, #tpu.memory_space<vmem>>, vector<1x32x15xf32>
    %660 = vector.shape_cast %659 : vector<1x32x15xf32> to vector<32x15xf32>
    %661 = vector.extract_strided_slice %660 {offsets = [0, 0], sizes = [32, 1], strides = [1, 1]} : vector<32x15xf32> to vector<32x1xf32>
    %c0_456 = arith.constant 0 : index
    %c0_457 = arith.constant 0 : index
    %c0_458 = arith.constant 0 : index
    %662 = vector.load %arg17[%c0_456, %c0_457, %c0_458] : memref<5x32x16xf32, #tpu.memory_space<vmem>>, vector<1x32x16xf32>
    %663 = vector.shape_cast %662 : vector<1x32x16xf32> to vector<32x16xf32>
    %cst_459 = arith.constant dense<0.000000e+00> : vector<32x16xf32>
    %664 = tpu.matmul %509, %663, %cst_459 {dimension_numbers = #tpu.dot_dimension_numbers<[1], [0], [0], [1], [0, 0, 1, 1], [], []>} : vector<32x32xf32>, vector<32x16xf32>, vector<32x16xf32> -> vector<32x16xf32>
    %665 = vector.broadcast %661 : vector<32x1xf32> to vector<32x16xf32>
    %666 = arith.mulf %665, %664 : vector<32x16xf32>
    %667 = vector.extract_strided_slice %660 {offsets = [0, 1], sizes = [32, 1], strides = [1, 1]} : vector<32x15xf32> to vector<32x1xf32>
    %c1_460 = arith.constant 1 : index
    %c0_461 = arith.constant 0 : index
    %c0_462 = arith.constant 0 : index
    %668 = vector.load %arg17[%c1_460, %c0_461, %c0_462] : memref<5x32x16xf32, #tpu.memory_space<vmem>>, vector<1x32x16xf32>
    %669 = vector.shape_cast %668 : vector<1x32x16xf32> to vector<32x16xf32>
    %cst_463 = arith.constant dense<0.000000e+00> : vector<32x16xf32>
    %670 = tpu.matmul %509, %669, %cst_463 {dimension_numbers = #tpu.dot_dimension_numbers<[1], [0], [0], [1], [0, 0, 1, 1], [], []>} : vector<32x32xf32>, vector<32x16xf32>, vector<32x16xf32> -> vector<32x16xf32>
    %671 = vector.broadcast %667 : vector<32x1xf32> to vector<32x16xf32>
    %672 = arith.mulf %671, %670 : vector<32x16xf32>
    %673 = arith.addf %666, %672 : vector<32x16xf32>
    %674 = vector.extract_strided_slice %660 {offsets = [0, 2], sizes = [32, 1], strides = [1, 1]} : vector<32x15xf32> to vector<32x1xf32>
    %c2_464 = arith.constant 2 : index
    %c0_465 = arith.constant 0 : index
    %c0_466 = arith.constant 0 : index
    %675 = vector.load %arg17[%c2_464, %c0_465, %c0_466] : memref<5x32x16xf32, #tpu.memory_space<vmem>>, vector<1x32x16xf32>
    %676 = vector.shape_cast %675 : vector<1x32x16xf32> to vector<32x16xf32>
    %cst_467 = arith.constant dense<0.000000e+00> : vector<32x16xf32>
    %677 = tpu.matmul %509, %676, %cst_467 {dimension_numbers = #tpu.dot_dimension_numbers<[1], [0], [0], [1], [0, 0, 1, 1], [], []>} : vector<32x32xf32>, vector<32x16xf32>, vector<32x16xf32> -> vector<32x16xf32>
    %678 = vector.broadcast %674 : vector<32x1xf32> to vector<32x16xf32>
    %679 = arith.mulf %678, %677 : vector<32x16xf32>
    %680 = arith.addf %673, %679 : vector<32x16xf32>
    %681 = vector.extract_strided_slice %660 {offsets = [0, 3], sizes = [32, 1], strides = [1, 1]} : vector<32x15xf32> to vector<32x1xf32>
    %c3_468 = arith.constant 3 : index
    %c0_469 = arith.constant 0 : index
    %c0_470 = arith.constant 0 : index
    %682 = vector.load %arg17[%c3_468, %c0_469, %c0_470] : memref<5x32x16xf32, #tpu.memory_space<vmem>>, vector<1x32x16xf32>
    %683 = vector.shape_cast %682 : vector<1x32x16xf32> to vector<32x16xf32>
    %cst_471 = arith.constant dense<0.000000e+00> : vector<32x16xf32>
    %684 = tpu.matmul %509, %683, %cst_471 {dimension_numbers = #tpu.dot_dimension_numbers<[1], [0], [0], [1], [0, 0, 1, 1], [], []>} : vector<32x32xf32>, vector<32x16xf32>, vector<32x16xf32> -> vector<32x16xf32>
    %685 = vector.broadcast %681 : vector<32x1xf32> to vector<32x16xf32>
    %686 = arith.mulf %685, %684 : vector<32x16xf32>
    %687 = arith.addf %680, %686 : vector<32x16xf32>
    %688 = vector.extract_strided_slice %660 {offsets = [0, 4], sizes = [32, 1], strides = [1, 1]} : vector<32x15xf32> to vector<32x1xf32>
    %c4_472 = arith.constant 4 : index
    %c0_473 = arith.constant 0 : index
    %c0_474 = arith.constant 0 : index
    %689 = vector.load %arg17[%c4_472, %c0_473, %c0_474] : memref<5x32x16xf32, #tpu.memory_space<vmem>>, vector<1x32x16xf32>
    %690 = vector.shape_cast %689 : vector<1x32x16xf32> to vector<32x16xf32>
    %cst_475 = arith.constant dense<0.000000e+00> : vector<32x16xf32>
    %691 = tpu.matmul %509, %690, %cst_475 {dimension_numbers = #tpu.dot_dimension_numbers<[1], [0], [0], [1], [0, 0, 1, 1], [], []>} : vector<32x32xf32>, vector<32x16xf32>, vector<32x16xf32> -> vector<32x16xf32>
    %692 = vector.broadcast %688 : vector<32x1xf32> to vector<32x16xf32>
    %693 = arith.mulf %692, %691 : vector<32x16xf32>
    %694 = arith.addf %687, %693 : vector<32x16xf32>
    %695 = vector.broadcast %658 : vector<32x1xf32> to vector<32x16xf32>
    %696 = arith.addf %694, %695 : vector<32x16xf32>
    %697 = tpu.concatenate %696, %550 in 0 : vector<32x16xf32>, vector<32x16xf32> -> vector<64x16xf32>
    %c1_476 = arith.constant 1 : index
    %c1_477 = arith.constant 1 : index
    %c0_478 = arith.constant 0 : index
    %c0_479 = arith.constant 0 : index
    %698 = vector.load %arg8[%c1_476, %c1_477, %c0_478, %c0_479] : memref<2x4x32x64xf32, #tpu.memory_space<vmem>>, vector<1x1x32x64xf32>
    %699 = vector.shape_cast %698 : vector<1x1x32x64xf32> to vector<32x64xf32>
    %cst_480 = arith.constant dense<0.000000e+00> : vector<32x16xf32>
    %700 = tpu.matmul %699, %697, %cst_480 {dimension_numbers = #tpu.dot_dimension_numbers<[1], [0], [0], [1], [0, 0, 1, 1], [], []>} : vector<32x64xf32>, vector<64x16xf32>, vector<32x16xf32> -> vector<32x16xf32>
    %c1_481 = arith.constant 1 : index
    %c1_482 = arith.constant 1 : index
    %c0_483 = arith.constant 0 : index
    %c0_484 = arith.constant 0 : index
    %701 = vector.load %arg9[%c1_481, %c1_482, %c0_483, %c0_484] : memref<2x3x32x32xf32, #tpu.memory_space<vmem>>, vector<1x1x32x32xf32>
    %702 = vector.shape_cast %701 : vector<1x1x32x32xf32> to vector<32x32xf32>
    %cst_485 = arith.constant dense<0.000000e+00> : vector<32x8xf32>
    %703 = tpu.matmul %702, %591, %cst_485 {dimension_numbers = #tpu.dot_dimension_numbers<[1], [0], [0], [1], [0, 0, 1, 1], [], []>} : vector<32x32xf32>, vector<32x8xf32>, vector<32x8xf32> -> vector<32x8xf32>
    %c0_486 = arith.constant 0 : index
    %c0_487 = arith.constant 0 : index
    %704 = vector.load %arg21[%c0_486, %c0_487] : memref<8x16xf32, #tpu.memory_space<vmem>>, vector<8x16xf32>
    %cst_488 = arith.constant dense<0.000000e+00> : vector<32x16xf32>
    %705 = tpu.matmul %703, %704, %cst_488 {dimension_numbers = #tpu.dot_dimension_numbers<[1], [0], [0], [1], [0, 0, 1, 1], [], []>} : vector<32x8xf32>, vector<8x16xf32>, vector<32x16xf32> -> vector<32x16xf32>
    %706 = arith.addf %700, %705 : vector<32x16xf32>
    %c1_489 = arith.constant 1 : index
    %c0_490 = arith.constant 0 : index
    %c0_491 = arith.constant 0 : index
    %707 = vector.load %arg10[%c1_489, %c0_490, %c0_491] : memref<2x32x4xf32, #tpu.memory_space<vmem>>, vector<1x32x4xf32>
    %708 = vector.shape_cast %707 : vector<1x32x4xf32> to vector<32x4xf32>
    %709 = vector.extract_strided_slice %708 {offsets = [0, 1], sizes = [32, 1], strides = [1, 1]} : vector<32x4xf32> to vector<32x1xf32>
    %710 = vector.broadcast %709 : vector<32x1xf32> to vector<32x16xf32>
    %711 = arith.addf %706, %710 : vector<32x16xf32>
    %c1_492 = arith.constant 1 : index
    %c0_493 = arith.constant 0 : index
    %c0_494 = arith.constant 0 : index
    %712 = vector.load %arg11[%c1_492, %c0_493, %c0_494] : memref<2x32x4xf32, #tpu.memory_space<vmem>>, vector<1x32x4xf32>
    %713 = vector.shape_cast %712 : vector<1x32x4xf32> to vector<32x4xf32>
    %714 = vector.extract_strided_slice %713 {offsets = [0, 1], sizes = [32, 1], strides = [1, 1]} : vector<32x4xf32> to vector<32x1xf32>
    %cst_495 = arith.constant 0.000000e+00 : f32
    %715 = vector.broadcast %cst_495 : f32 to vector<32x16xf32>
    %716 = arith.cmpf ogt, %711, %715 : vector<32x16xf32>
    %717 = vector.broadcast %714 : vector<32x1xf32> to vector<32x16xf32>
    %718 = arith.mulf %717, %711 : vector<32x16xf32>
    %719 = arith.select %716, %711, %718 : vector<32x16xi1>, vector<32x16xf32>
    %c1_496 = arith.constant 1 : index
    %c0_497 = arith.constant 0 : index
    %c0_498 = arith.constant 0 : index
    %720 = vector.load %arg7[%c1_496, %c0_497, %c0_498] : memref<2x32x3xf32, #tpu.memory_space<vmem>>, vector<1x32x3xf32>
    %721 = vector.shape_cast %720 : vector<1x32x3xf32> to vector<32x3xf32>
    %722 = vector.extract_strided_slice %721 {offsets = [0, 1], sizes = [32, 1], strides = [1, 1]} : vector<32x3xf32> to vector<32x1xf32>
    %c1_499 = arith.constant 1 : index
    %c0_500 = arith.constant 0 : index
    %c0_501 = arith.constant 0 : index
    %723 = vector.load %arg6[%c1_499, %c0_500, %c0_501] : memref<2x32x15xf32, #tpu.memory_space<vmem>>, vector<1x32x15xf32>
    %724 = vector.shape_cast %723 : vector<1x32x15xf32> to vector<32x15xf32>
    %725 = vector.extract_strided_slice %724 {offsets = [0, 5], sizes = [32, 1], strides = [1, 1]} : vector<32x15xf32> to vector<32x1xf32>
    %c0_502 = arith.constant 0 : index
    %c0_503 = arith.constant 0 : index
    %c0_504 = arith.constant 0 : index
    %726 = vector.load %arg18[%c0_502, %c0_503, %c0_504] : memref<5x16x8xf32, #tpu.memory_space<vmem>>, vector<1x16x8xf32>
    %727 = vector.shape_cast %726 : vector<1x16x8xf32> to vector<16x8xf32>
    %cst_505 = arith.constant dense<0.000000e+00> : vector<32x8xf32>
    %728 = tpu.matmul %550, %727, %cst_505 {dimension_numbers = #tpu.dot_dimension_numbers<[1], [0], [0], [1], [0, 0, 1, 1], [], []>} : vector<32x16xf32>, vector<16x8xf32>, vector<32x8xf32> -> vector<32x8xf32>
    %729 = vector.broadcast %725 : vector<32x1xf32> to vector<32x8xf32>
    %730 = arith.mulf %729, %728 : vector<32x8xf32>
    %731 = vector.extract_strided_slice %724 {offsets = [0, 6], sizes = [32, 1], strides = [1, 1]} : vector<32x15xf32> to vector<32x1xf32>
    %c1_506 = arith.constant 1 : index
    %c0_507 = arith.constant 0 : index
    %c0_508 = arith.constant 0 : index
    %732 = vector.load %arg18[%c1_506, %c0_507, %c0_508] : memref<5x16x8xf32, #tpu.memory_space<vmem>>, vector<1x16x8xf32>
    %733 = vector.shape_cast %732 : vector<1x16x8xf32> to vector<16x8xf32>
    %cst_509 = arith.constant dense<0.000000e+00> : vector<32x8xf32>
    %734 = tpu.matmul %550, %733, %cst_509 {dimension_numbers = #tpu.dot_dimension_numbers<[1], [0], [0], [1], [0, 0, 1, 1], [], []>} : vector<32x16xf32>, vector<16x8xf32>, vector<32x8xf32> -> vector<32x8xf32>
    %735 = vector.broadcast %731 : vector<32x1xf32> to vector<32x8xf32>
    %736 = arith.mulf %735, %734 : vector<32x8xf32>
    %737 = arith.addf %730, %736 : vector<32x8xf32>
    %738 = vector.extract_strided_slice %724 {offsets = [0, 7], sizes = [32, 1], strides = [1, 1]} : vector<32x15xf32> to vector<32x1xf32>
    %c2_510 = arith.constant 2 : index
    %c0_511 = arith.constant 0 : index
    %c0_512 = arith.constant 0 : index
    %739 = vector.load %arg18[%c2_510, %c0_511, %c0_512] : memref<5x16x8xf32, #tpu.memory_space<vmem>>, vector<1x16x8xf32>
    %740 = vector.shape_cast %739 : vector<1x16x8xf32> to vector<16x8xf32>
    %cst_513 = arith.constant dense<0.000000e+00> : vector<32x8xf32>
    %741 = tpu.matmul %550, %740, %cst_513 {dimension_numbers = #tpu.dot_dimension_numbers<[1], [0], [0], [1], [0, 0, 1, 1], [], []>} : vector<32x16xf32>, vector<16x8xf32>, vector<32x8xf32> -> vector<32x8xf32>
    %742 = vector.broadcast %738 : vector<32x1xf32> to vector<32x8xf32>
    %743 = arith.mulf %742, %741 : vector<32x8xf32>
    %744 = arith.addf %737, %743 : vector<32x8xf32>
    %745 = vector.extract_strided_slice %724 {offsets = [0, 8], sizes = [32, 1], strides = [1, 1]} : vector<32x15xf32> to vector<32x1xf32>
    %c3_514 = arith.constant 3 : index
    %c0_515 = arith.constant 0 : index
    %c0_516 = arith.constant 0 : index
    %746 = vector.load %arg18[%c3_514, %c0_515, %c0_516] : memref<5x16x8xf32, #tpu.memory_space<vmem>>, vector<1x16x8xf32>
    %747 = vector.shape_cast %746 : vector<1x16x8xf32> to vector<16x8xf32>
    %cst_517 = arith.constant dense<0.000000e+00> : vector<32x8xf32>
    %748 = tpu.matmul %550, %747, %cst_517 {dimension_numbers = #tpu.dot_dimension_numbers<[1], [0], [0], [1], [0, 0, 1, 1], [], []>} : vector<32x16xf32>, vector<16x8xf32>, vector<32x8xf32> -> vector<32x8xf32>
    %749 = vector.broadcast %745 : vector<32x1xf32> to vector<32x8xf32>
    %750 = arith.mulf %749, %748 : vector<32x8xf32>
    %751 = arith.addf %744, %750 : vector<32x8xf32>
    %752 = vector.extract_strided_slice %724 {offsets = [0, 9], sizes = [32, 1], strides = [1, 1]} : vector<32x15xf32> to vector<32x1xf32>
    %c4_518 = arith.constant 4 : index
    %c0_519 = arith.constant 0 : index
    %c0_520 = arith.constant 0 : index
    %753 = vector.load %arg18[%c4_518, %c0_519, %c0_520] : memref<5x16x8xf32, #tpu.memory_space<vmem>>, vector<1x16x8xf32>
    %754 = vector.shape_cast %753 : vector<1x16x8xf32> to vector<16x8xf32>
    %cst_521 = arith.constant dense<0.000000e+00> : vector<32x8xf32>
    %755 = tpu.matmul %550, %754, %cst_521 {dimension_numbers = #tpu.dot_dimension_numbers<[1], [0], [0], [1], [0, 0, 1, 1], [], []>} : vector<32x16xf32>, vector<16x8xf32>, vector<32x8xf32> -> vector<32x8xf32>
    %756 = vector.broadcast %752 : vector<32x1xf32> to vector<32x8xf32>
    %757 = arith.mulf %756, %755 : vector<32x8xf32>
    %758 = arith.addf %751, %757 : vector<32x8xf32>
    %759 = vector.broadcast %722 : vector<32x1xf32> to vector<32x8xf32>
    %760 = arith.addf %758, %759 : vector<32x8xf32>
    %761 = tpu.concatenate %760, %591 in 0 : vector<32x8xf32>, vector<32x8xf32> -> vector<64x8xf32>
    %c1_522 = arith.constant 1 : index
    %c2_523 = arith.constant 2 : index
    %c0_524 = arith.constant 0 : index
    %c0_525 = arith.constant 0 : index
    %762 = vector.load %arg8[%c1_522, %c2_523, %c0_524, %c0_525] : memref<2x4x32x64xf32, #tpu.memory_space<vmem>>, vector<1x1x32x64xf32>
    %763 = vector.shape_cast %762 : vector<1x1x32x64xf32> to vector<32x64xf32>
    %cst_526 = arith.constant dense<0.000000e+00> : vector<32x8xf32>
    %764 = tpu.matmul %763, %761, %cst_526 {dimension_numbers = #tpu.dot_dimension_numbers<[1], [0], [0], [1], [0, 0, 1, 1], [], []>} : vector<32x64xf32>, vector<64x8xf32>, vector<32x8xf32> -> vector<32x8xf32>
    %c1_527 = arith.constant 1 : index
    %c2_528 = arith.constant 2 : index
    %c0_529 = arith.constant 0 : index
    %c0_530 = arith.constant 0 : index
    %765 = vector.load %arg9[%c1_527, %c2_528, %c0_529, %c0_530] : memref<2x3x32x32xf32, #tpu.memory_space<vmem>>, vector<1x1x32x32xf32>
    %766 = vector.shape_cast %765 : vector<1x1x32x32xf32> to vector<32x32xf32>
    %cst_531 = arith.constant dense<0.000000e+00> : vector<32x4xf32>
    %767 = tpu.matmul %766, %632, %cst_531 {dimension_numbers = #tpu.dot_dimension_numbers<[1], [0], [0], [1], [0, 0, 1, 1], [], []>} : vector<32x32xf32>, vector<32x4xf32>, vector<32x4xf32> -> vector<32x4xf32>
    %c0_532 = arith.constant 0 : index
    %c0_533 = arith.constant 0 : index
    %768 = vector.load %arg22[%c0_532, %c0_533] : memref<4x8xf32, #tpu.memory_space<vmem>>, vector<4x8xf32>
    %cst_534 = arith.constant dense<0.000000e+00> : vector<32x8xf32>
    %769 = tpu.matmul %767, %768, %cst_534 {dimension_numbers = #tpu.dot_dimension_numbers<[1], [0], [0], [1], [0, 0, 1, 1], [], []>} : vector<32x4xf32>, vector<4x8xf32>, vector<32x8xf32> -> vector<32x8xf32>
    %770 = arith.addf %764, %769 : vector<32x8xf32>
    %c1_535 = arith.constant 1 : index
    %c0_536 = arith.constant 0 : index
    %c0_537 = arith.constant 0 : index
    %771 = vector.load %arg10[%c1_535, %c0_536, %c0_537] : memref<2x32x4xf32, #tpu.memory_space<vmem>>, vector<1x32x4xf32>
    %772 = vector.shape_cast %771 : vector<1x32x4xf32> to vector<32x4xf32>
    %773 = vector.extract_strided_slice %772 {offsets = [0, 2], sizes = [32, 1], strides = [1, 1]} : vector<32x4xf32> to vector<32x1xf32>
    %774 = vector.broadcast %773 : vector<32x1xf32> to vector<32x8xf32>
    %775 = arith.addf %770, %774 : vector<32x8xf32>
    %c1_538 = arith.constant 1 : index
    %c0_539 = arith.constant 0 : index
    %c0_540 = arith.constant 0 : index
    %776 = vector.load %arg11[%c1_538, %c0_539, %c0_540] : memref<2x32x4xf32, #tpu.memory_space<vmem>>, vector<1x32x4xf32>
    %777 = vector.shape_cast %776 : vector<1x32x4xf32> to vector<32x4xf32>
    %778 = vector.extract_strided_slice %777 {offsets = [0, 2], sizes = [32, 1], strides = [1, 1]} : vector<32x4xf32> to vector<32x1xf32>
    %cst_541 = arith.constant 0.000000e+00 : f32
    %779 = vector.broadcast %cst_541 : f32 to vector<32x8xf32>
    %780 = arith.cmpf ogt, %775, %779 : vector<32x8xf32>
    %781 = vector.broadcast %778 : vector<32x1xf32> to vector<32x8xf32>
    %782 = arith.mulf %781, %775 : vector<32x8xf32>
    %783 = arith.select %780, %775, %782 : vector<32x8xi1>, vector<32x8xf32>
    %c1_542 = arith.constant 1 : index
    %c0_543 = arith.constant 0 : index
    %c0_544 = arith.constant 0 : index
    %784 = vector.load %arg7[%c1_542, %c0_543, %c0_544] : memref<2x32x3xf32, #tpu.memory_space<vmem>>, vector<1x32x3xf32>
    %785 = vector.shape_cast %784 : vector<1x32x3xf32> to vector<32x3xf32>
    %786 = vector.extract_strided_slice %785 {offsets = [0, 2], sizes = [32, 1], strides = [1, 1]} : vector<32x3xf32> to vector<32x1xf32>
    %c1_545 = arith.constant 1 : index
    %c0_546 = arith.constant 0 : index
    %c0_547 = arith.constant 0 : index
    %787 = vector.load %arg6[%c1_545, %c0_546, %c0_547] : memref<2x32x15xf32, #tpu.memory_space<vmem>>, vector<1x32x15xf32>
    %788 = vector.shape_cast %787 : vector<1x32x15xf32> to vector<32x15xf32>
    %789 = vector.extract_strided_slice %788 {offsets = [0, 10], sizes = [32, 1], strides = [1, 1]} : vector<32x15xf32> to vector<32x1xf32>
    %c0_548 = arith.constant 0 : index
    %c0_549 = arith.constant 0 : index
    %c0_550 = arith.constant 0 : index
    %790 = vector.load %arg19[%c0_548, %c0_549, %c0_550] : memref<5x8x4xf32, #tpu.memory_space<vmem>>, vector<1x8x4xf32>
    %791 = vector.shape_cast %790 : vector<1x8x4xf32> to vector<8x4xf32>
    %cst_551 = arith.constant dense<0.000000e+00> : vector<32x4xf32>
    %792 = tpu.matmul %591, %791, %cst_551 {dimension_numbers = #tpu.dot_dimension_numbers<[1], [0], [0], [1], [0, 0, 1, 1], [], []>} : vector<32x8xf32>, vector<8x4xf32>, vector<32x4xf32> -> vector<32x4xf32>
    %793 = vector.broadcast %789 : vector<32x1xf32> to vector<32x4xf32>
    %794 = arith.mulf %793, %792 : vector<32x4xf32>
    %795 = vector.extract_strided_slice %788 {offsets = [0, 11], sizes = [32, 1], strides = [1, 1]} : vector<32x15xf32> to vector<32x1xf32>
    %c1_552 = arith.constant 1 : index
    %c0_553 = arith.constant 0 : index
    %c0_554 = arith.constant 0 : index
    %796 = vector.load %arg19[%c1_552, %c0_553, %c0_554] : memref<5x8x4xf32, #tpu.memory_space<vmem>>, vector<1x8x4xf32>
    %797 = vector.shape_cast %796 : vector<1x8x4xf32> to vector<8x4xf32>
    %cst_555 = arith.constant dense<0.000000e+00> : vector<32x4xf32>
    %798 = tpu.matmul %591, %797, %cst_555 {dimension_numbers = #tpu.dot_dimension_numbers<[1], [0], [0], [1], [0, 0, 1, 1], [], []>} : vector<32x8xf32>, vector<8x4xf32>, vector<32x4xf32> -> vector<32x4xf32>
    %799 = vector.broadcast %795 : vector<32x1xf32> to vector<32x4xf32>
    %800 = arith.mulf %799, %798 : vector<32x4xf32>
    %801 = arith.addf %794, %800 : vector<32x4xf32>
    %802 = vector.extract_strided_slice %788 {offsets = [0, 12], sizes = [32, 1], strides = [1, 1]} : vector<32x15xf32> to vector<32x1xf32>
    %c2_556 = arith.constant 2 : index
    %c0_557 = arith.constant 0 : index
    %c0_558 = arith.constant 0 : index
    %803 = vector.load %arg19[%c2_556, %c0_557, %c0_558] : memref<5x8x4xf32, #tpu.memory_space<vmem>>, vector<1x8x4xf32>
    %804 = vector.shape_cast %803 : vector<1x8x4xf32> to vector<8x4xf32>
    %cst_559 = arith.constant dense<0.000000e+00> : vector<32x4xf32>
    %805 = tpu.matmul %591, %804, %cst_559 {dimension_numbers = #tpu.dot_dimension_numbers<[1], [0], [0], [1], [0, 0, 1, 1], [], []>} : vector<32x8xf32>, vector<8x4xf32>, vector<32x4xf32> -> vector<32x4xf32>
    %806 = vector.broadcast %802 : vector<32x1xf32> to vector<32x4xf32>
    %807 = arith.mulf %806, %805 : vector<32x4xf32>
    %808 = arith.addf %801, %807 : vector<32x4xf32>
    %809 = vector.extract_strided_slice %788 {offsets = [0, 13], sizes = [32, 1], strides = [1, 1]} : vector<32x15xf32> to vector<32x1xf32>
    %c3_560 = arith.constant 3 : index
    %c0_561 = arith.constant 0 : index
    %c0_562 = arith.constant 0 : index
    %810 = vector.load %arg19[%c3_560, %c0_561, %c0_562] : memref<5x8x4xf32, #tpu.memory_space<vmem>>, vector<1x8x4xf32>
    %811 = vector.shape_cast %810 : vector<1x8x4xf32> to vector<8x4xf32>
    %cst_563 = arith.constant dense<0.000000e+00> : vector<32x4xf32>
    %812 = tpu.matmul %591, %811, %cst_563 {dimension_numbers = #tpu.dot_dimension_numbers<[1], [0], [0], [1], [0, 0, 1, 1], [], []>} : vector<32x8xf32>, vector<8x4xf32>, vector<32x4xf32> -> vector<32x4xf32>
    %813 = vector.broadcast %809 : vector<32x1xf32> to vector<32x4xf32>
    %814 = arith.mulf %813, %812 : vector<32x4xf32>
    %815 = arith.addf %808, %814 : vector<32x4xf32>
    %816 = vector.extract_strided_slice %788 {offsets = [0, 14], sizes = [32, 1], strides = [1, 1]} : vector<32x15xf32> to vector<32x1xf32>
    %c4_564 = arith.constant 4 : index
    %c0_565 = arith.constant 0 : index
    %c0_566 = arith.constant 0 : index
    %817 = vector.load %arg19[%c4_564, %c0_565, %c0_566] : memref<5x8x4xf32, #tpu.memory_space<vmem>>, vector<1x8x4xf32>
    %818 = vector.shape_cast %817 : vector<1x8x4xf32> to vector<8x4xf32>
    %cst_567 = arith.constant dense<0.000000e+00> : vector<32x4xf32>
    %819 = tpu.matmul %591, %818, %cst_567 {dimension_numbers = #tpu.dot_dimension_numbers<[1], [0], [0], [1], [0, 0, 1, 1], [], []>} : vector<32x8xf32>, vector<8x4xf32>, vector<32x4xf32> -> vector<32x4xf32>
    %820 = vector.broadcast %816 : vector<32x1xf32> to vector<32x4xf32>
    %821 = arith.mulf %820, %819 : vector<32x4xf32>
    %822 = arith.addf %815, %821 : vector<32x4xf32>
    %823 = vector.broadcast %786 : vector<32x1xf32> to vector<32x4xf32>
    %824 = arith.addf %822, %823 : vector<32x4xf32>
    %825 = tpu.concatenate %824, %632 in 0 : vector<32x4xf32>, vector<32x4xf32> -> vector<64x4xf32>
    %c1_568 = arith.constant 1 : index
    %c3_569 = arith.constant 3 : index
    %c0_570 = arith.constant 0 : index
    %c0_571 = arith.constant 0 : index
    %826 = vector.load %arg8[%c1_568, %c3_569, %c0_570, %c0_571] : memref<2x4x32x64xf32, #tpu.memory_space<vmem>>, vector<1x1x32x64xf32>
    %827 = vector.shape_cast %826 : vector<1x1x32x64xf32> to vector<32x64xf32>
    %cst_572 = arith.constant dense<0.000000e+00> : vector<32x4xf32>
    %828 = tpu.matmul %827, %825, %cst_572 {dimension_numbers = #tpu.dot_dimension_numbers<[1], [0], [0], [1], [0, 0, 1, 1], [], []>} : vector<32x64xf32>, vector<64x4xf32>, vector<32x4xf32> -> vector<32x4xf32>
    %c1_573 = arith.constant 1 : index
    %c0_574 = arith.constant 0 : index
    %c0_575 = arith.constant 0 : index
    %829 = vector.load %arg10[%c1_573, %c0_574, %c0_575] : memref<2x32x4xf32, #tpu.memory_space<vmem>>, vector<1x32x4xf32>
    %830 = vector.shape_cast %829 : vector<1x32x4xf32> to vector<32x4xf32>
    %831 = vector.extract_strided_slice %830 {offsets = [0, 3], sizes = [32, 1], strides = [1, 1]} : vector<32x4xf32> to vector<32x1xf32>
    %832 = vector.broadcast %831 : vector<32x1xf32> to vector<32x4xf32>
    %833 = arith.addf %828, %832 : vector<32x4xf32>
    %c1_576 = arith.constant 1 : index
    %c0_577 = arith.constant 0 : index
    %c0_578 = arith.constant 0 : index
    %834 = vector.load %arg11[%c1_576, %c0_577, %c0_578] : memref<2x32x4xf32, #tpu.memory_space<vmem>>, vector<1x32x4xf32>
    %835 = vector.shape_cast %834 : vector<1x32x4xf32> to vector<32x4xf32>
    %836 = vector.extract_strided_slice %835 {offsets = [0, 3], sizes = [32, 1], strides = [1, 1]} : vector<32x4xf32> to vector<32x1xf32>
    %cst_579 = arith.constant 0.000000e+00 : f32
    %837 = vector.broadcast %cst_579 : f32 to vector<32x4xf32>
    %838 = arith.cmpf ogt, %833, %837 : vector<32x4xf32>
    %839 = vector.broadcast %836 : vector<32x1xf32> to vector<32x4xf32>
    %840 = arith.mulf %839, %833 : vector<32x4xf32>
    %841 = arith.select %838, %833, %840 : vector<32x4xi1>, vector<32x4xf32>
    %c1_580 = arith.constant 1 : index
    %c0_581 = arith.constant 0 : index
    %c0_582 = arith.constant 0 : index
    %c0_583 = arith.constant 0 : index
    %842 = vector.load %arg12[%c1_580, %c0_581, %c0_582, %c0_583] : memref<2x4x32x32xf32, #tpu.memory_space<vmem>>, vector<1x1x32x32xf32>
    %843 = vector.shape_cast %842 : vector<1x1x32x32xf32> to vector<32x32xf32>
    %cst_584 = arith.constant dense<0.000000e+00> : vector<32x32xf32>
    %844 = tpu.matmul %843, %655, %cst_584 {dimension_numbers = #tpu.dot_dimension_numbers<[1], [0], [0], [1], [0, 0, 1, 1], [], []>} : vector<32x32xf32>, vector<32x32xf32>, vector<32x32xf32> -> vector<32x32xf32>
    %c1_585 = arith.constant 1 : index
    %c1_586 = arith.constant 1 : index
    %c0_587 = arith.constant 0 : index
    %c0_588 = arith.constant 0 : index
    %845 = vector.load %arg12[%c1_585, %c1_586, %c0_587, %c0_588] : memref<2x4x32x32xf32, #tpu.memory_space<vmem>>, vector<1x1x32x32xf32>
    %846 = vector.shape_cast %845 : vector<1x1x32x32xf32> to vector<32x32xf32>
    %cst_589 = arith.constant dense<0.000000e+00> : vector<32x16xf32>
    %847 = tpu.matmul %846, %719, %cst_589 {dimension_numbers = #tpu.dot_dimension_numbers<[1], [0], [0], [1], [0, 0, 1, 1], [], []>} : vector<32x32xf32>, vector<32x16xf32>, vector<32x16xf32> -> vector<32x16xf32>
    %c0_590 = arith.constant 0 : index
    %c0_591 = arith.constant 0 : index
    %848 = vector.load %arg20[%c0_590, %c0_591] : memref<16x32xf32, #tpu.memory_space<vmem>>, vector<16x32xf32>
    %cst_592 = arith.constant dense<0.000000e+00> : vector<32x32xf32>
    %849 = tpu.matmul %847, %848, %cst_592 {dimension_numbers = #tpu.dot_dimension_numbers<[1], [0], [0], [1], [0, 0, 1, 1], [], []>} : vector<32x16xf32>, vector<16x32xf32>, vector<32x32xf32> -> vector<32x32xf32>
    %850 = arith.addf %844, %849 : vector<32x32xf32>
    %c1_593 = arith.constant 1 : index
    %c2_594 = arith.constant 2 : index
    %c0_595 = arith.constant 0 : index
    %c0_596 = arith.constant 0 : index
    %851 = vector.load %arg12[%c1_593, %c2_594, %c0_595, %c0_596] : memref<2x4x32x32xf32, #tpu.memory_space<vmem>>, vector<1x1x32x32xf32>
    %852 = vector.shape_cast %851 : vector<1x1x32x32xf32> to vector<32x32xf32>
    %cst_597 = arith.constant dense<0.000000e+00> : vector<32x8xf32>
    %853 = tpu.matmul %852, %783, %cst_597 {dimension_numbers = #tpu.dot_dimension_numbers<[1], [0], [0], [1], [0, 0, 1, 1], [], []>} : vector<32x32xf32>, vector<32x8xf32>, vector<32x8xf32> -> vector<32x8xf32>
    %c0_598 = arith.constant 0 : index
    %c0_599 = arith.constant 0 : index
    %854 = vector.load %arg23[%c0_598, %c0_599] : memref<8x32xf32, #tpu.memory_space<vmem>>, vector<8x32xf32>
    %cst_600 = arith.constant dense<0.000000e+00> : vector<32x32xf32>
    %855 = tpu.matmul %853, %854, %cst_600 {dimension_numbers = #tpu.dot_dimension_numbers<[1], [0], [0], [1], [0, 0, 1, 1], [], []>} : vector<32x8xf32>, vector<8x32xf32>, vector<32x32xf32> -> vector<32x32xf32>
    %856 = arith.addf %850, %855 : vector<32x32xf32>
    %c1_601 = arith.constant 1 : index
    %c3_602 = arith.constant 3 : index
    %c0_603 = arith.constant 0 : index
    %c0_604 = arith.constant 0 : index
    %857 = vector.load %arg12[%c1_601, %c3_602, %c0_603, %c0_604] : memref<2x4x32x32xf32, #tpu.memory_space<vmem>>, vector<1x1x32x32xf32>
    %858 = vector.shape_cast %857 : vector<1x1x32x32xf32> to vector<32x32xf32>
    %cst_605 = arith.constant dense<0.000000e+00> : vector<32x4xf32>
    %859 = tpu.matmul %858, %841, %cst_605 {dimension_numbers = #tpu.dot_dimension_numbers<[1], [0], [0], [1], [0, 0, 1, 1], [], []>} : vector<32x32xf32>, vector<32x4xf32>, vector<32x4xf32> -> vector<32x4xf32>
    %c0_606 = arith.constant 0 : index
    %c0_607 = arith.constant 0 : index
    %860 = vector.load %arg24[%c0_606, %c0_607] : memref<4x32xf32, #tpu.memory_space<vmem>>, vector<4x32xf32>
    %cst_608 = arith.constant dense<0.000000e+00> : vector<32x32xf32>
    %861 = tpu.matmul %859, %860, %cst_608 {dimension_numbers = #tpu.dot_dimension_numbers<[1], [0], [0], [1], [0, 0, 1, 1], [], []>} : vector<32x4xf32>, vector<4x32xf32>, vector<32x32xf32> -> vector<32x32xf32>
    %862 = arith.addf %856, %861 : vector<32x32xf32>
    %c1_609 = arith.constant 1 : index
    %c0_610 = arith.constant 0 : index
    %c0_611 = arith.constant 0 : index
    %863 = vector.load %arg13[%c1_609, %c0_610, %c0_611] : memref<2x32x2xf32, #tpu.memory_space<vmem>>, vector<1x32x2xf32>
    %864 = vector.shape_cast %863 : vector<1x32x2xf32> to vector<32x2xf32>
    %865 = vector.extract_strided_slice %864 {offsets = [0, 0], sizes = [32, 1], strides = [1, 1]} : vector<32x2xf32> to vector<32x1xf32>
    %866 = vector.broadcast %865 : vector<32x1xf32> to vector<32x32xf32>
    %867 = arith.addf %862, %866 : vector<32x32xf32>
    %c1_612 = arith.constant 1 : index
    %c0_613 = arith.constant 0 : index
    %c0_614 = arith.constant 0 : index
    %868 = vector.load %arg13[%c1_612, %c0_613, %c0_614] : memref<2x32x2xf32, #tpu.memory_space<vmem>>, vector<1x32x2xf32>
    %869 = vector.shape_cast %868 : vector<1x32x2xf32> to vector<32x2xf32>
    %870 = vector.extract_strided_slice %869 {offsets = [0, 1], sizes = [32, 1], strides = [1, 1]} : vector<32x2xf32> to vector<32x1xf32>
    %cst_615 = arith.constant 0.000000e+00 : f32
    %871 = vector.broadcast %cst_615 : f32 to vector<32x32xf32>
    %872 = arith.cmpf ogt, %867, %871 : vector<32x32xf32>
    %873 = vector.broadcast %870 : vector<32x1xf32> to vector<32x32xf32>
    %874 = arith.mulf %873, %867 : vector<32x32xf32>
    %875 = arith.select %872, %867, %874 : vector<32x32xi1>, vector<32x32xf32>
    %c1_616 = arith.constant 1 : index
    %c0_617 = arith.constant 0 : index
    %c0_618 = arith.constant 0 : index
    %876 = vector.load %arg14[%c1_616, %c0_617, %c0_618] : memref<2x16x32xf32, #tpu.memory_space<vmem>>, vector<1x16x32xf32>
    %877 = vector.shape_cast %876 : vector<1x16x32xf32> to vector<16x32xf32>
    %cst_619 = arith.constant dense<0.000000e+00> : vector<16x32xf32>
    %878 = tpu.matmul %877, %875, %cst_619 {dimension_numbers = #tpu.dot_dimension_numbers<[1], [0], [0], [1], [0, 0, 1, 1], [], []>} : vector<16x32xf32>, vector<32x32xf32>, vector<16x32xf32> -> vector<16x32xf32>
    %c1_620 = arith.constant 1 : index
    %c0_621 = arith.constant 0 : index
    %c0_622 = arith.constant 0 : index
    %879 = vector.load %arg15[%c1_620, %c0_621, %c0_622] : memref<2x16x4xf32, #tpu.memory_space<vmem>>, vector<1x16x4xf32>
    %880 = vector.shape_cast %879 : vector<1x16x4xf32> to vector<16x4xf32>
    %881 = vector.extract_strided_slice %880 {offsets = [0, 0], sizes = [16, 1], strides = [1, 1]} : vector<16x4xf32> to vector<16x1xf32>
    %882 = vector.broadcast %881 : vector<16x1xf32> to vector<16x32xf32>
    %883 = arith.addf %878, %882 : vector<16x32xf32>
    %884 = arith.addf %883, %452 : vector<16x32xf32>
    %c0_623 = arith.constant 0 : index
    %c0_624 = arith.constant 0 : index
    %c0_625 = arith.constant 0 : index
    %885 = vector.load %arg25[%c0_623, %c0_624, %c0_625] : memref<1x16x32xf32, #tpu.memory_space<vmem>>, vector<1x16x32xf32>
    %886 = vector.shape_cast %885 : vector<1x16x32xf32> to vector<16x32xf32>
    %887 = vector.shape_cast %884 : vector<16x32xf32> to vector<1x16x32xf32>
    tpu.vector_store %arg25[%c0_623, %c0_624, %c0_625], %887 {strides = array<i32>} : memref<1x16x32xf32, #tpu.memory_space<vmem>>, vector<1x16x32xf32>,
    return
  }
  func.func @transform_0(%arg0: i32) -> (i32, i32, i32) {
    %c0_i32 = arith.constant 0 : i32
    %c0_i32_0 = arith.constant 0 : i32
    %c0_i32_1 = arith.constant 0 : i32
    return %arg0, %c0_i32, %c0_i32_0 : i32, i32, i32
  }
  func.func @transform_1(%arg0: i32) -> (i32, i32, i32) {
    %c0_i32 = arith.constant 0 : i32
    %c0_i32_0 = arith.constant 0 : i32
    %c0_i32_1 = arith.constant 0 : i32
    %c0_i32_2 = arith.constant 0 : i32
    return %c0_i32, %c0_i32_0, %c0_i32_1 : i32, i32, i32
  }
  func.func @transform_2(%arg0: i32) -> (i32, i32, i32) {
    %c0_i32 = arith.constant 0 : i32
    %c0_i32_0 = arith.constant 0 : i32
    %c0_i32_1 = arith.constant 0 : i32
    %c0_i32_2 = arith.constant 0 : i32
    return %c0_i32, %c0_i32_0, %c0_i32_1 : i32, i32, i32
  }
  func.func @transform_3(%arg0: i32) -> (i32, i32, i32) {
    %c0_i32 = arith.constant 0 : i32
    %c0_i32_0 = arith.constant 0 : i32
    %c0_i32_1 = arith.constant 0 : i32
    %c0_i32_2 = arith.constant 0 : i32
    return %c0_i32, %c0_i32_0, %c0_i32_1 : i32, i32, i32
  }
  func.func @transform_4(%arg0: i32) -> (i32, i32, i32) {
    %c0_i32 = arith.constant 0 : i32
    %c0_i32_0 = arith.constant 0 : i32
    %c0_i32_1 = arith.constant 0 : i32
    %c0_i32_2 = arith.constant 0 : i32
    return %c0_i32, %c0_i32_0, %c0_i32_1 : i32, i32, i32
  }
  func.func @transform_5(%arg0: i32) -> (i32, i32, i32) {
    %c0_i32 = arith.constant 0 : i32
    %c0_i32_0 = arith.constant 0 : i32
    %c0_i32_1 = arith.constant 0 : i32
    %c0_i32_2 = arith.constant 0 : i32
    return %c0_i32, %c0_i32_0, %c0_i32_1 : i32, i32, i32
  }
  func.func @transform_6(%arg0: i32) -> (i32, i32, i32) {
    %c0_i32 = arith.constant 0 : i32
    %c0_i32_0 = arith.constant 0 : i32
    %c0_i32_1 = arith.constant 0 : i32
    %c0_i32_2 = arith.constant 0 : i32
    return %c0_i32, %c0_i32_0, %c0_i32_1 : i32, i32, i32
  }
  func.func @transform_7(%arg0: i32) -> (i32, i32, i32, i32) {
    %c0_i32 = arith.constant 0 : i32
    %c0_i32_0 = arith.constant 0 : i32
    %c0_i32_1 = arith.constant 0 : i32
    %c0_i32_2 = arith.constant 0 : i32
    %c0_i32_3 = arith.constant 0 : i32
    return %c0_i32, %c0_i32_0, %c0_i32_1, %c0_i32_2 : i32, i32, i32, i32
  }
  func.func @transform_8(%arg0: i32) -> (i32, i32, i32, i32) {
    %c0_i32 = arith.constant 0 : i32
    %c0_i32_0 = arith.constant 0 : i32
    %c0_i32_1 = arith.constant 0 : i32
    %c0_i32_2 = arith.constant 0 : i32
    %c0_i32_3 = arith.constant 0 : i32
    return %c0_i32, %c0_i32_0, %c0_i32_1, %c0_i32_2 : i32, i32, i32, i32
  }
  func.func @transform_9(%arg0: i32) -> (i32, i32, i32) {
    %c0_i32 = arith.constant 0 : i32
    %c0_i32_0 = arith.constant 0 : i32
    %c0_i32_1 = arith.constant 0 : i32
    %c0_i32_2 = arith.constant 0 : i32
    return %c0_i32, %c0_i32_0, %c0_i32_1 : i32, i32, i32
  }
  func.func @transform_10(%arg0: i32) -> (i32, i32, i32) {
    %c0_i32 = arith.constant 0 : i32
    %c0_i32_0 = arith.constant 0 : i32
    %c0_i32_1 = arith.constant 0 : i32
    %c0_i32_2 = arith.constant 0 : i32
    return %c0_i32, %c0_i32_0, %c0_i32_1 : i32, i32, i32
  }
  func.func @transform_11(%arg0: i32) -> (i32, i32, i32, i32) {
    %c0_i32 = arith.constant 0 : i32
    %c0_i32_0 = arith.constant 0 : i32
    %c0_i32_1 = arith.constant 0 : i32
    %c0_i32_2 = arith.constant 0 : i32
    %c0_i32_3 = arith.constant 0 : i32
    return %c0_i32, %c0_i32_0, %c0_i32_1, %c0_i32_2 : i32, i32, i32, i32
  }
  func.func @transform_12(%arg0: i32) -> (i32, i32, i32) {
    %c0_i32 = arith.constant 0 : i32
    %c0_i32_0 = arith.constant 0 : i32
    %c0_i32_1 = arith.constant 0 : i32
    %c0_i32_2 = arith.constant 0 : i32
    return %c0_i32, %c0_i32_0, %c0_i32_1 : i32, i32, i32
  }
  func.func @transform_13(%arg0: i32) -> (i32, i32, i32) {
    %c0_i32 = arith.constant 0 : i32
    %c0_i32_0 = arith.constant 0 : i32
    %c0_i32_1 = arith.constant 0 : i32
    %c0_i32_2 = arith.constant 0 : i32
    return %c0_i32, %c0_i32_0, %c0_i32_1 : i32, i32, i32
  }
  func.func @transform_14(%arg0: i32) -> (i32, i32, i32) {
    %c0_i32 = arith.constant 0 : i32
    %c0_i32_0 = arith.constant 0 : i32
    %c0_i32_1 = arith.constant 0 : i32
    %c0_i32_2 = arith.constant 0 : i32
    return %c0_i32, %c0_i32_0, %c0_i32_1 : i32, i32, i32
  }
  func.func @transform_15(%arg0: i32) -> (i32, i32, i32) {
    %c0_i32 = arith.constant 0 : i32
    %c0_i32_0 = arith.constant 0 : i32
    %c0_i32_1 = arith.constant 0 : i32
    %c0_i32_2 = arith.constant 0 : i32
    return %c0_i32, %c0_i32_0, %c0_i32_1 : i32, i32, i32
  }
  func.func @transform_16(%arg0: i32) -> (i32, i32, i32) {
    %c0_i32 = arith.constant 0 : i32
    %c0_i32_0 = arith.constant 0 : i32
    %c0_i32_1 = arith.constant 0 : i32
    %c0_i32_2 = arith.constant 0 : i32
    return %c0_i32, %c0_i32_0, %c0_i32_1 : i32, i32, i32
  }
  func.func @transform_17(%arg0: i32) -> (i32, i32, i32) {
    %c0_i32 = arith.constant 0 : i32
    %c0_i32_0 = arith.constant 0 : i32
    %c0_i32_1 = arith.constant 0 : i32
    %c0_i32_2 = arith.constant 0 : i32
    return %c0_i32, %c0_i32_0, %c0_i32_1 : i32, i32, i32
  }
  func.func @transform_18(%arg0: i32) -> (i32, i32, i32) {
    %c0_i32 = arith.constant 0 : i32
    %c0_i32_0 = arith.constant 0 : i32
    %c0_i32_1 = arith.constant 0 : i32
    %c0_i32_2 = arith.constant 0 : i32
    return %c0_i32, %c0_i32_0, %c0_i32_1 : i32, i32, i32
  }
  func.func @transform_19(%arg0: i32) -> (i32, i32) {
    %c0_i32 = arith.constant 0 : i32
    %c0_i32_0 = arith.constant 0 : i32
    %c0_i32_1 = arith.constant 0 : i32
    return %c0_i32, %c0_i32_0 : i32, i32
  }
  func.func @transform_20(%arg0: i32) -> (i32, i32) {
    %c0_i32 = arith.constant 0 : i32
    %c0_i32_0 = arith.constant 0 : i32
    %c0_i32_1 = arith.constant 0 : i32
    return %c0_i32, %c0_i32_0 : i32, i32
  }
  func.func @transform_21(%arg0: i32) -> (i32, i32) {
    %c0_i32 = arith.constant 0 : i32
    %c0_i32_0 = arith.constant 0 : i32
    %c0_i32_1 = arith.constant 0 : i32
    return %c0_i32, %c0_i32_0 : i32, i32
  }
  func.func @transform_22(%arg0: i32) -> (i32, i32) {
    %c0_i32 = arith.constant 0 : i32
    %c0_i32_0 = arith.constant 0 : i32
    %c0_i32_1 = arith.constant 0 : i32
    return %c0_i32, %c0_i32_0 : i32, i32
  }
  func.func @transform_23(%arg0: i32) -> (i32, i32) {
    %c0_i32 = arith.constant 0 : i32
    %c0_i32_0 = arith.constant 0 : i32
    %c0_i32_1 = arith.constant 0 : i32
    return %c0_i32, %c0_i32_0 : i32, i32
  }
  func.func @transform_24(%arg0: i32) -> (i32, i32, i32) {
    %c0_i32 = arith.constant 0 : i32
    %c0_i32_0 = arith.constant 0 : i32
    %c0_i32_1 = arith.constant 0 : i32
    return %arg0, %c0_i32, %c0_i32_0 : i32, i32, i32
  }
}

</mosaic_0001>

<bundles_post_ra>
// kernel: video_block_forward.1
= control target key start
LH: loop header
LB: loop body
LE: loop exit
PB: predicated region body
PF: predicated region fallthrough
CT: control target
= control target key end

     0   :  { %s17597_s0 = inlined_call_operand.hbm [shape: f32[2,16,32], index: 0, kind: input, shape index: {}]   ;;  %s17598_s1 = inlined_call_operand.vmem [shape: f32[2,32,16], index: 1, kind: input, shape index: {}]   ;;  %s17599_s2 = inlined_call_operand.vmem [shape: f32[2,32,2], index: 2, kind: input, shape index: {}]   ;;  %s17600_s3 = inlined_call_operand.vmem [shape: f32[2,32,20], index: 3, kind: input, shape index: {}]   ;;  %s17601_s4 = inlined_call_operand.vmem [shape: f32[2,32,4], index: 4, kind: input, shape index: {}]   ;;  %s17602_s5 = inlined_call_operand.vmem [shape: f32[2,32,15], index: 5, kind: input, shape index: {}]   ;;  %s17603_s6 = inlined_call_operand.vmem [shape: f32[2,32,3], index: 6, kind: input, shape index: {}]   ;;  %s17604_s7 = inlined_call_operand.vmem [shape: f32[2,4,32,64], index: 7, kind: input, shape index: {}]   ;;  %s17605_s8 = inlined_call_operand.vmem [shape: f32[2,3,32,32], index: 8, kind: input, shape index: {}]   ;;  %s17606_s9 = inlined_call_operand.vmem [shape: f32[2,32,4], index: 9, kind: input, shape index: {}]   ;;  %s17607_s10 = inlined_call_operand.vmem [shape: f32[2,32,4], index: 10, kind: input, shape index: {}]   ;;  %s17608_s11 = inlined_call_operand.vmem [shape: f32[2,4,32,32], index: 11, kind: input, shape index: {}]   ;;  %s17609_s12 = inlined_call_operand.vmem [shape: f32[2,32,2], index: 12, kind: input, shape index: {}]   ;;  %s17610_s13 = inlined_call_operand.hbm [shape: f32[2,16,32], index: 13, kind: input, shape index: {}]   ;;  %s17611_s14 = inlined_call_operand.vmem [shape: f32[2,16,4], index: 14, kind: input, shape index: {}]   ;;  %s17612_s15 = inlined_call_operand.hbm [shape: f32[5,32,32], index: 15, kind: input, shape index: {}]   ;;  %s17613_s16 = inlined_call_operand.hbm [shape: f32[5,32,16], index: 16, kind: input, shape index: {}]   ;;  %s17614_s17 = inlined_call_operand.vmem [shape: f32[5,16,8], index: 17, kind: input, shape index: {}]   ;;  %s17615_s18 = inlined_call_operand.vmem [shape: f32[5,8,4], index: 18, kind: input, shape index: {}]   ;;  %s17616_s19 = inlined_call_operand.hbm [shape: f32[16,32], index: 19, kind: input, shape index: {}]   ;;  %s17617_s20 = inlined_call_operand.hbm [shape: f32[8,16], index: 20, kind: input, shape index: {}]   ;;  %s17618_s21 = inlined_call_operand.hbm [shape: f32[4,8], index: 21, kind: input, shape index: {}]   ;;  %s17619_s22 = inlined_call_operand.vmem [shape: f32[8,32], index: 22, kind: input, shape index: {}]   ;;  %s17620_s23 = inlined_call_operand.hbm [shape: f32[4,32], index: 23, kind: input, shape index: {}]   ;;  %s17621_s24 = inlined_call_operand.hbm [shape: f32[2,16,32], index: 24, kind: output, shape index: {}]  }
   0x1   :  { %17763 = sst [smem:[#allocation101_spill]] %s17597_s0 }
   0x2   :  { %17764 = sst [smem:[#allocation102_spill]] %s17598_s1 }
   0x3   :  { %17765 = sst [smem:[#allocation103_spill]] %s17599_s2 }
   0x4   :  { %17766 = sst [smem:[#allocation104_spill]] %s17600_s3 }
   0x5   :  { %17767 = sst [smem:[#allocation105_spill]] %s17601_s4 }
   0x6   :  { %17768 = sst [smem:[#allocation106_spill]] %s17602_s5 }
   0x7   :  { %17769 = sst [smem:[#allocation107_spill]] %s17603_s6 }
   0x8   :  { %17770 = sst [smem:[#allocation108_spill]] %s17604_s7 }
   0x9   :  { %17771 = sst [smem:[#allocation109_spill]] %s17605_s8 }
   0xa   :  { %17772 = sst [smem:[#allocation110_spill]] %s17606_s9 }
   0xb   :  { %17773 = sst [smem:[#allocation111_spill]] %s17607_s10 }
   0xc   :  { %17774 = sst [smem:[#allocation112_spill]] %s17608_s11 }
   0xd   :  { %17775 = sst [smem:[#allocation113_spill]] %s17609_s12 }
   0xe   :  { %17776 = sst [smem:[#allocation114_spill]] %s17610_s13 }
   0xf   :  { %17777 = sst [smem:[#allocation115_spill]] %s17611_s14 }
  0x10   :  { %17778 = sst [smem:[#allocation116_spill]] %s17612_s15 }
  0x11   :  { %17779 = sst [smem:[#allocation117_spill]] %s17613_s16 }
  0x12   :  { %17780 = sst [smem:[#allocation118_spill]] %s17614_s17 }
  0x13   :  { %17781 = sst [smem:[#allocation119_spill]] %s17616_s19 }
  0x14   :  { %17782 = sst [smem:[#allocation120_spill]] %s17617_s20 }
  0x15   :  { %17783 = sst [smem:[#allocation121_spill]] %s17618_s21 }
  0x16   :  { %17784 = sst [smem:[#allocation122_spill]] %s17619_s22 }
  0x17   :  { %17785 = sst [smem:[#allocation123_spill]] %s17620_s23 }
  0x18   :  { %17786 = sst [smem:[#allocation124_spill]] %s17621_s24 }
  0x19   :  { %29 = vsyncpa [#allocation3], 0 }
  0x1a   :  { %31 = vsyncpa [#allocation3 + $0x1], 0 }
  0x1b   :  { %32 = vsyncpa [#allocation6], 0 }
  0x1c   :  { %33 = vsyncpa [#allocation9], 0 }
  0x1d   :  { %34 = vsyncpa [#allocation12], 0 }
  0x1e   :  { %35 = vsyncpa [#allocation15], 0 }
  0x1f   :  { %36 = vsyncpa [#allocation4], 0 }
  0x20   :  { %38 = vsyncpa [#allocation4 + $0x1], 0  ;;  %s14463_s5 = smov 0   ;;  %s14465_s26 = smov 0  }
  0x21   :  { %s14467_s27 = smov 0   ;;  %s14469_s28 = smov 0  }
  0x22 LB: > { %17787 = sst [smem:[#allocation23_spill]] %s14294_s26  ;;  %s14304_s6 = smov [#allocation5]   ;;  %s14302_s28 = sphi %s14469_s28, %s18148_s28   ;;  %s14298_s27 = sphi %s14467_s27, %s18147_s27   ;;  %s14294_s26 = sphi %s14465_s26, %s18146_s26   ;;  %s14290_s5 = sphi %s14463_s5, %s18145_s5  }
  0x23   : > { %17788 = sst [smem:[#allocation24_spill]] %s14298_s27  ;;  %s632_s2 = sshll.u32 %s14304_s6, 4  ;;  %s14489_s2 = int_to_ptr.vmem [resolvable:$true] %s632_s2 }
  0x24   : > { %s14484_s29 = sadd.s32 4294967295, %s14302_s28   ;;  %p11068_p0 = scmp.ge.s32.totalorder %s14302_s28, 1 }
  0x25   : > { %p17640_p1 = scmp.eq.s32.totalorder %s14484_s29, 0  ;;  %p584_p2 = scmp.lt.s32.totalorder %s14302_s28, 3 }
  0x26   : > { %s14305_s7 = smov [#allocation8]   ;;  %s14306_s25 = smov [#allocation11]  }
  0x27   : > { %p14491_p3 = pnand %p11068_p0, %p584_p2  ;;  %s661_s30 = sshll.u32 %s14305_s7, 4  ;;  %s14504_s30 = int_to_ptr.vmem [resolvable:$true] %s661_s30 }
  0x28   : > { %s694_s8 = sshll.u32 %s14306_s25, 4  ;;  %s17791_s13 = sld [smem:[#allocation114_spill]]  ;;  %s14506_s8 = int_to_ptr.vmem [resolvable:$true] %s694_s8 }
  0x29   : > { %s17789_s0 = scalar_select %p14491_p3, 1, 0 }
  0x2a   : > { %p13599_p5 = pneg %p14491_p3 }
  0x2c   : > { %p14500_p6 = pnand %p13599_p5, %p17640_p1 }
  0x2e   : > { %s13994_s6 = scalar_lea.hbm %s17791_s13, 512  ;;  %p14516_p8 = pneg %p14500_p6 }
  0x2f   : > { %p13995_p7 = scmp.ne.s32.totalorder %s17791_s13, %s13994_s6  ;;  %p14001_p11 = scmp.lt.u32.totalorder %s13994_s6, %s17791_s13 }
  0x31   : > { %p13997_p9 = pnand %p14516_p8, %p13995_p7 }
  0x33   : > { %p13998_p10 = pneg %p13997_p9 }
  0x35   : > { %p14003_p12 = pnand %p14001_p11, %p13998_p10 }
  0x37   : > { %14006 = shalt.err (!%p14003_p12)
}
  0x38   : > { %s14007_s14 = scalar_lea.vmem %s14489_s2, 512  ;;  %p14015_p5 = scmp.lt.s32.totalorder %s14489_s2, %s14489_s2 }
  0x39   : > { %p14008_p13 = scmp.ne.s32.totalorder %s14489_s2, %s14007_s14  ;;  %p14016_p4 = scmp.lt.s32.totalorder %s14007_s14, %s14007_s14 }
  0x3b   : > { %p14010_p0 = pnand %p14008_p13, %p14516_p8  ;;  %p14017_p7 = por %p14016_p4, %p14015_p5 }
  0x3d   : > { %p14011_p2 = pneg %p14010_p0 }
  0x3f   : > { %p14018_p9 = pnand %p14017_p7, %p14011_p2 }
  0x41   : > { %14021 = shalt.err (!%p14018_p9)
}
  0x42   : > { %s17638_s24 = smov 128   ;;  %s17642_s22 = smov 8  }
  0x43   : > { %13602 = dma.hbm_to_vmem [thread:$0]  (!%p14500_p6), %s17791_s13, 512, %s14489_s2, [#allocation6], %s17638_s24, %s17638_s24, %s17642_s22  }
  0x44   : > { %s17793_s16 = sld [smem:[#allocation117_spill]] }
  0x4a   : > { %s14022_s14 = scalar_lea.hbm %s17793_s16, 2560 }
  0x4b   : > { %p14023_p4 = scmp.ne.s32.totalorder %s17793_s16, %s14022_s14  ;;  %p14029_p12 = scmp.lt.u32.totalorder %s14022_s14, %s17793_s16 }
  0x4d   : > { %p14025_p10 = pnand %p14023_p4, %p14516_p8 }
  0x4f   : > { %p14026_p11 = pneg %p14025_p10 }
  0x51   : > { %p14031_p13 = pnand %p14029_p12, %p14026_p11 }
  0x53   : > { %14034 = shalt.err (!%p14031_p13)
}
  0x54   : > { %s14035_s2 = scalar_lea.vmem %s14504_s30, 2560  ;;  %p14043_p7 = scmp.lt.s32.totalorder %s14504_s30, %s14504_s30 }
  0x55   : > { %p14036_p0 = scmp.ne.s32.totalorder %s14504_s30, %s14035_s2  ;;  %p14044_p9 = scmp.lt.s32.totalorder %s14035_s2, %s14035_s2 }
  0x57   : > { %p14038_p2 = pnand %p14036_p0, %p14516_p8  ;;  %p14045_p4 = por %p14044_p9, %p14043_p7 }
  0x59   : > { %p14039_p5 = pneg %p14038_p2 }
  0x5b   : > { %p14046_p10 = pnand %p14045_p4, %p14039_p5 }
  0x5d   : > { %14049 = shalt.err (!%p14046_p10)
}
  0x5e   : > { %13608 = dma.hbm_to_vmem [thread:$0]  (!%p14500_p6), %s17793_s16, 2560, %s14504_s30, [#allocation9], %s17638_s24, %s17638_s24, %s17642_s22  }
  0x5f   : > { %s17794_s20 = sld [smem:[#allocation120_spill]] }
  0x65   : > { %s14050_s4 = scalar_lea.hbm %s17794_s20, 128 }
  0x66   : > { %p14051_p11 = scmp.ne.s32.totalorder %s17794_s20, %s14050_s4  ;;  %p14057_p0 = scmp.lt.u32.totalorder %s14050_s4, %s17794_s20 }
  0x68   : > { %p14053_p12 = pnand %p14051_p11, %p14516_p8 }
  0x6a   : > { %p14054_p13 = pneg %p14053_p12 }
  0x6c   : > { %p14059_p2 = pnand %p14057_p0, %p14054_p13 }
  0x6e   : > { %14062 = shalt.err (!%p14059_p2)
}
  0x6f   : > { %s14063_s30 = scalar_lea.vmem %s14506_s8, 128  ;;  %p14071_p4 = scmp.lt.s32.totalorder %s14506_s8, %s14506_s8 }
  0x70   : > { %p14064_p5 = scmp.ne.s32.totalorder %s14506_s8, %s14063_s30  ;;  %p14072_p10 = scmp.lt.s32.totalorder %s14063_s30, %s14063_s30 }
  0x72   : > { %p14066_p7 = pnand %p14064_p5, %p14516_p8  ;;  %p14073_p11 = por %p14072_p10, %p14071_p4 }
  0x74   : > { %p14067_p9 = pneg %p14066_p7 }
  0x76   : > { %p14074_p12 = pnand %p14073_p11, %p14067_p9 }
  0x78   : > { %14077 = shalt.err (!%p14074_p12)
}
  0x79   : > { %13614 = dma.hbm_to_vmem [thread:$0]  (!%p14500_p6), %s17794_s20, 128, %s14506_s8, [#allocation12]  }
  0x7a   : > { %s14309_s10 = smov [#allocation7]   ;;  %s14310_s12 = smov [#allocation10]  }
  0x7b   : > { %s648_s11 = sshll.u32 %s14309_s10, 4  ;;  %s680_s4 = sshll.u32 %s14310_s12, 4  ;;  %s649_s11 = int_to_ptr.vmem [resolvable:$true] %s648_s11  ;;  %s681_s4 = int_to_ptr.vmem [resolvable:$true] %s680_s4 }
  0x7c   : > { %s17795_s15 = sld [smem:[#allocation116_spill]] }
  0x82   : > { %s14078_s25 = scalar_lea.hbm %s17795_s15, 2560 }
  0x83   : > { %p14079_p13 = scmp.ne.s32.totalorder %s17795_s15, %s14078_s25  ;;  %p14085_p5 = scmp.lt.u32.totalorder %s14078_s25, %s17795_s15 }
  0x85   : > { %p14081_p0 = pnand %p14079_p13, %p14516_p8 }
  0x87   : > { %p14082_p2 = pneg %p14081_p0 }
  0x89   : > { %p14087_p7 = pnand %p14085_p5, %p14082_p2 }
  0x8b   : > { %14090 = shalt.err (!%p14087_p7)
}
  0x8c   : > { %s14091_s8 = scalar_lea.vmem %s649_s11, 2560  ;;  %p14099_p11 = scmp.lt.s32.totalorder %s649_s11, %s649_s11 }
  0x8d   : > { %p14092_p9 = scmp.ne.s32.totalorder %s649_s11, %s14091_s8  ;;  %p14100_p12 = scmp.lt.s32.totalorder %s14091_s8, %s14091_s8 }
  0x8f   : > { %p14094_p4 = pnand %p14092_p9, %p14516_p8  ;;  %p14101_p1 = por %p14100_p12, %p14099_p11 }
  0x91   : > { %p14095_p10 = pneg %p14094_p4 }
  0x93   : > { %p14102_p3 = pnand %p14101_p1, %p14095_p10 }
  0x95   : > { %14105 = shalt.err (!%p14102_p3)
}
  0x96   : > { %s17796_s9 = smov 128   ;;  %s17797_s19 = sld [smem:[#allocation119_spill]] }
  0x97   : > { %13605 = dma.hbm_to_vmem [thread:$0]  (!%p14500_p6), %s17795_s15, 2560, %s649_s11, [#allocation6], %s17796_s9, %s17796_s9, %s17642_s22  }
  0x9c   : > { %s14106_s6 = scalar_lea.hbm %s17797_s19, 256 }
  0x9d   : > { %p14107_p1 = scmp.ne.s32.totalorder %s17797_s19, %s14106_s6  ;;  %p14113_p0 = scmp.lt.u32.totalorder %s14106_s6, %s17797_s19 }
  0x9f   : > { %p14109_p3 = pnand %p14107_p1, %p14516_p8 }
  0xa1   : > { %p14110_p13 = pneg %p14109_p3 }
  0xa3   : > { %p14115_p2 = pnand %p14113_p0, %p14110_p13 }
  0xa5   : > { %14118 = shalt.err (!%p14115_p2)
}
  0xa6   : > { %s14119_s8 = scalar_lea.vmem %s681_s4, 256  ;;  %p14127_p4 = scmp.lt.s32.totalorder %s681_s4, %s681_s4 }
  0xa7   : > { %p14120_p5 = scmp.ne.s32.totalorder %s681_s4, %s14119_s8  ;;  %p14128_p10 = scmp.lt.s32.totalorder %s14119_s8, %s14119_s8 }
  0xa9   : > { %p14122_p7 = pnand %p14120_p5, %p14516_p8  ;;  %p14129_p11 = por %p14128_p10, %p14127_p4 }
  0xab   : > { %p14123_p9 = pneg %p14122_p7 }
  0xad   : > { %p14130_p12 = pnand %p14129_p11, %p14123_p9 }
  0xaf   : > { %14133 = shalt.err (!%p14130_p12)
}
  0xb0   : > { %13611 = dma.hbm_to_vmem [thread:$0]  (!%p14500_p6), %s17797_s19, 256, %s681_s4, [#allocation9], %s17796_s9, %s17796_s9, %s17642_s22  }
  0xb1   : > { %s14311_s10 = smov [#allocation13]   ;;  %s14312_s1 = smov [#allocation14]  }
  0xb2   : > { %s705_s12 = sshll.u32 %s14311_s10, 4  ;;  %s719_s6 = sshll.u32 %s14312_s1, 4  ;;  %s706_s12 = int_to_ptr.vmem [resolvable:$true] %s705_s12  ;;  %s720_s6 = int_to_ptr.vmem [resolvable:$true] %s719_s6 }
  0xb3   : > { %s17798_s21 = sld [smem:[#allocation121_spill]] }
  0xb9   : > { %s14134_s30 = scalar_lea.hbm %s17798_s21, 64 }
  0xba   : > { %p14135_p1 = scmp.ne.s32.totalorder %s17798_s21, %s14134_s30  ;;  %p14141_p0 = scmp.lt.u32.totalorder %s14134_s30, %s17798_s21 }
  0xbc   : > { %p14137_p3 = pnand %p14135_p1, %p14516_p8 }
  0xbe   : > { %p14138_p13 = pneg %p14137_p3 }
  0xc0   : > { %p14143_p2 = pnand %p14141_p0, %p14138_p13 }
  0xc2   : > { %14146 = shalt.err (!%p14143_p2)
}
  0xc3   : > { %s14147_s4 = scalar_lea.vmem %s706_s12, 64  ;;  %p14155_p4 = scmp.lt.s32.totalorder %s706_s12, %s706_s12 }
  0xc4   : > { %p14148_p5 = scmp.ne.s32.totalorder %s706_s12, %s14147_s4  ;;  %p14156_p10 = scmp.lt.s32.totalorder %s14147_s4, %s14147_s4 }
  0xc6   : > { %p14150_p7 = pnand %p14148_p5, %p14516_p8  ;;  %p14157_p11 = por %p14156_p10, %p14155_p4 }
  0xc8   : > { %p14151_p9 = pneg %p14150_p7 }
  0xca   : > { %p14158_p12 = pnand %p14157_p11, %p14151_p9 }
  0xcc   : > { %14161 = shalt.err (!%p14158_p12)
}
  0xcd   : > { %13617 = dma.hbm_to_vmem [thread:$0]  (!%p14500_p6), %s17798_s21, 64, %s706_s12, [#allocation12]  }
  0xce   : > { %s17799_s23 = sld [smem:[#allocation123_spill]] }
  0xd4   : > { %s14162_s25 = scalar_lea.hbm %s17799_s23, 64 }
  0xd5   : > { %p14163_p1 = scmp.ne.s32.totalorder %s17799_s23, %s14162_s25  ;;  %p14169_p0 = scmp.lt.u32.totalorder %s14162_s25, %s17799_s23 }
  0xd7   : > { %p14165_p3 = pnand %p14163_p1, %p14516_p8 }
  0xd9   : > { %p14166_p13 = pneg %p14165_p3 }
  0xdb   : > { %p14171_p2 = pnand %p14169_p0, %p14166_p13 }
  0xdd   : > { %14174 = shalt.err (!%p14171_p2)
}
  0xde   : > { %s14175_s11 = scalar_lea.vmem %s720_s6, 64  ;;  %p14183_p4 = scmp.lt.s32.totalorder %s720_s6, %s720_s6 }
  0xdf   : > { %p14176_p5 = scmp.ne.s32.totalorder %s720_s6, %s14175_s11  ;;  %p14184_p10 = scmp.lt.s32.totalorder %s14175_s11, %s14175_s11 }
  0xe1   : > { %p14178_p7 = pnand %p14176_p5, %p14516_p8  ;;  %p14185_p11 = por %p14184_p10, %p14183_p4 }
  0xe3   : > { %p14179_p9 = pneg %p14178_p7 }
  0xe5   : > { %p14186_p12 = pnand %p14185_p11, %p14179_p9 }
  0xe7   : > { %14189 = shalt.err (!%p14186_p12)
}
  0xe8   : > { %13620 = dma.hbm_to_vmem [thread:$0]  (!%p14500_p6), %s17799_s23, 64, %s720_s6, [#allocation15]  }
  0xe9   : > { %s11067_s7 = sadd.s32 4294967294, %s14302_s28   ;;  %s14669_s3 = sadd.s32 1, %s14302_s28  }
  0xea   : > { %s51_s24 = sadd.s32 1, %s14298_s27  ;;  %s48_s10 = ssub.s32 %s14302_s28, %s14669_s3 }
  0xeb   : > { %p58_p8 = scmp.ne.s32.totalorder %s14298_s27, %s14294_s26  ;;  %p49_p1 = scmp.eq.s32.totalorder %s48_s10, 0 }
  0xec   : > { %p59_p3 = scmp.eq.s32.totalorder %s14302_s28, 0  ;;  %p64_p13 = scmp.ne.s32.totalorder %s14294_s26, %s14290_s5 }
  0xed   : > { %p571_p0 = scmp.eq.s32.totalorder %s14484_s29, 1  ;;  %p17801_p5 = scmp.eq.s32.totalorder %s14484_s29, 0 }
  0xee   : > { %s14681_s13 = scalar_select %p49_p1, %s14298_s27, %s51_s24  }
  0xef   : > { %p60_p2 = por %p59_p3, %p58_p8  ;;  %p14685_p7 = por %p17801_p5, %p64_p13 }
  0xf0   : > { %17800 = sst [smem:[#allocation25_spill]] %s14681_s13  ;;  %p14689_p6 = por %p571_p0, %p58_p8 }
  0xf1   : > { %p577_p9 = scmp.eq.s32.totalorder %s11067_s7, 1  ;;  %p13636_p4 = scmp.lt.s32.totalorder %s14302_s28, 2 }
  0xf2   : > { %s17803_s6 = scalar_select %p14689_p6, 1, 0 }
  0xf3   : > { %s730_s25 = sand.u32 1, %s14298_s27   ;;  %p14695_p10 = por %p577_p9, %p64_p13 }
  0xf4   : > { %s11077_s30 = sshll.u32 %s730_s25, 4  ;;  %s11533_s2 = sshll.u32 %s14302_s28, 8 }
  0xf5   : > { %s17804_s14 = scalar_select %p14695_p10, 1, 0 }
  0xf6   : > { %s17805_s12 = sld [smem:[#allocation101_spill]]  ;;  %s734_s24 = scalar_lea.vmem [#allocation2], %s11077_s30 }
  0xf7   : > { %s741_s10 = sshll.u32 %s734_s24, 4  ;;  %p14705_p11 = pnand %p13636_p4, %p60_p2  ;;  %s14709_s10 = int_to_ptr.vmem [resolvable:$true] %s741_s10 }
  0xf8   : > { %s14711_s22 = scalar_lea.sflag [#allocation3], %s730_s25 }
  0xf9   : > { %p14192_p8 = pneg %p14705_p11 }
  0xfc   : > { %s14703_s4 = scalar_lea.hbm %s17805_s12, %s11533_s2  ;;  %s14195_s8 = scalar_lea.hbm %s17805_s12, 512 }
  0xfd   : > { %s14190_s15 = scalar_lea.hbm %s14703_s4, 256  ;;  %p14196_p13 = scmp.lt.u32.totalorder %s14703_s4, %s17805_s12 }
  0xfe   : > { %p14191_p12 = scmp.ne.s32.totalorder %s14703_s4, %s14190_s15  ;;  %p14197_p0 = scmp.lt.u32.totalorder %s14195_s8, %s14190_s15 }
  0xff   : > { %p14199_p5 = scmp.lt.u32.totalorder %s14190_s15, %s14703_s4 }
 0x100   : > { %p14193_p1 = pnand %p14192_p8, %p14191_p12  ;;  %p14198_p2 = por %p14197_p0, %p14196_p13 }
 0x102   : > { %p14194_p3 = pneg %p14193_p1  ;;  %p14200_p9 = por %p14199_p5, %p14198_p2 }
 0x104   : > { %p14201_p4 = pnand %p14200_p9, %p14194_p3 }
 0x106   : > { %14204 = shalt.err (!%p14201_p4)
}
 0x107   : > { %s14205_s25 = scalar_lea.vmem %s14709_s10, 256  ;;  %s14313_s30 = smov [#allocation2]  }
 0x108   : > { %p14206_p12 = scmp.ne.s32.totalorder %s14709_s10, %s14205_s25  ;;  %s14210_s2 = sshll.u32 %s14313_s30, 4  ;;  %s14211_s2 = int_to_ptr.vmem [resolvable:$false] %s14210_s2 }
 0x109   : > { %s14212_s11 = scalar_lea.vmem %s14211_s2, 512  ;;  %p14213_p6 = scmp.lt.s32.totalorder %s14709_s10, %s14211_s2 }
 0x10a   : > { %p14208_p1 = pnand %p14206_p12, %p14192_p8  ;;  %p14214_p13 = scmp.lt.s32.totalorder %s14212_s11, %s14205_s25 }
 0x10c   : > { %p14209_p10 = pneg %p14208_p1  ;;  %p14215_p0 = por %p14214_p13, %p14213_p6 }
 0x10e   : > { %p14216_p2 = pnand %p14215_p0, %p14209_p10 }
 0x110   : > { %14219 = shalt.err (!%p14216_p2)
}
 0x111   : > { %s17807_s15 = smov 8   ;;  %p17808_p8 = scmp.ne.s32.totalorder %s17789_s0, 0 }
 0x112   : > { %13624 = dma.hbm_to_vmem [thread:$0]  (!%p14705_p11), %s14703_s4, 256, %s14709_s10, %s14711_s22, %s17796_s9, %s17796_s9, %s17807_s15  }
 0x113   : > { %753 = sbr.rel (%p17808_p8) target bundleno = 4942 (0x134e), region = 116 }
 0x11a   : > { %s14745_s8 = sand.u32 1, %s14294_s26  }
 0x11b   : > { %s17650_s24 = sshll.u32 %s14745_s8, 4  ;;  %s756_s25 = scalar_lea.sflag [#allocation3], %s14745_s8 }
 0x11c   : > { %s14751_s7 = scalar_lea.vmem [#allocation2], %s17650_s24 }
 0x11d   : > { %14265 = dma.done.wait (%p14685_p7), %s756_s25, 256  }
 0x11e   : > { %14267 = vsyncadd (%p14685_p7), %s756_s25, 4294967040  ;;  %p17809_p6 = scmp.eq.s32.totalorder %s14484_s29, 0 }
 0x120   : > { %14269 = dma.done.wait (%p17809_p6), [#allocation6], 3072   ;;  %p17810_p10 = pmov %p17809_p6 }
 0x121   : > { %p17811_p11 = pmov %p17809_p6 }
 0x122   : > { %14271 = vsyncadd (%p17810_p10), [#allocation6], 4294964224 }
 0x123   : > { %14273 = dma.done.wait (%p17811_p11), [#allocation9], 2816   ;;  %p17812_p3 = pmov %p17809_p6 }
 0x125   : > { %14275 = vsyncadd (%p17812_p3), [#allocation9], 4294964480  ;;  %p17813_p5 = pmov %p17812_p3 }
 0x126   : > { %p17814_p9 = pmov %p17812_p3 }
 0x127   : > { %14277 = dma.done.wait (%p17813_p5), [#allocation12], 192  }
 0x128   : > { %14279 = vsyncadd (%p17814_p9), [#allocation12], 4294967104  ;;  %p17815_p7 = pmov %p17812_p3 }
 0x129   : > { %p17816_p4 = pmov %p17812_p3 }
 0x12a   : > { %14281 = dma.done.wait (%p17815_p7), [#allocation15], 64  }
 0x12b   : > { %14283 = vsyncadd (%p17816_p4), [#allocation15], 4294967232  ;;  %v17672_v0 = vmov 0   ;;  %v17666_v1 = vmov 1   ;;  %vm882_vm0 = vcmask 130048   ;;  %v852_v2 = vld [vmem:[%s14751_s7] sm:$0xff] }
 0x12c   : > { %13709 = vset.pattern.permute.xlu0 %v17672_v0  ;;  %13710 = vset.pattern.permute.xlu1 %v17666_v1  ;;  %v853_v3 = vld [vmem:[%s14751_s7 + $0x8] sm:$0xff]  ;;  %s17817_s9 = sld [smem:[#allocation102_spill]]  ;;  %s17818_s10 = sld [smem:[#allocation103_spill]]  ;;  %v1143_v13 = vld [vmem:[#allocation7 + $0x20] sm:$0xff]  ;;  %v17674_v18 = vmov 2   ;;  %v1145_v23 = vld [vmem:[#allocation7 + $0x30] sm:$0xff] }
 0x12d   : > { %v13055_v5 = vpack.c.bf16 %v853_v3, %v852_v2  ;;  %v1144_v14 = vld [vmem:[#allocation7 + $0x28] sm:$0xff]  ;;  %s17820_s0 = sld [smem:[#allocation104_spill]]  ;;  %v1016_v20 = vld [vmem:[#allocation7] sm:$0xff]  ;;  %v1146_v24 = vld [vmem:[#allocation7 + $0x38] sm:$0xff]  ;;  %v17678_v36 = vmov 4   ;;  %v17688_v37 = vmov 3  }
 0x12e   : > { %v14807_v15 = vpack.c.bf16 %v1144_v14, %v1143_v13  ;;  %v1017_v21 = vld [vmem:[#allocation7 + $0x8] sm:$0xff]  ;;  %v1018_v25 = vld [vmem:[#allocation7 + $0x10] sm:$0xff]  ;;  %v14845_v26 = vpack.c.bf16 %v1146_v24, %v1145_v23  ;;  %v1019_v27 = vld [vmem:[#allocation7 + $0x18] sm:$0xff]  ;;  %s17826_s22 = sld [smem:[#allocation105_spill]]  ;;  %v17660_v42 = vmov 6   ;;  %v17664_v43 = vmov 5  }
 0x12f   : > { %13056 = vmatprep.subr.bf16.mxu1 %v13055_v5  ;;  %v14841_v22 = vpack.c.bf16 %v1017_v21, %v1016_v20  ;;  %v14847_v28 = vpack.c.bf16 %v1019_v27, %v1018_v25  ;;  %v1257_v29 = vld [vmem:[#allocation7 + $0x40] sm:$0xff]  ;;  %v1258_v30 = vld [vmem:[#allocation7 + $0x48] sm:$0xff]  ;;  %v17670_v44 = vmov 7   ;;  %v17676_v45 = vmov 8   ;;  %v1259_v61 = vld [vmem:[#allocation7 + $0x50] sm:$0xff]  ;;  %s17837_s4 = sld [smem:[#allocation108_spill]] }
 0x130   : > { %13058 = vmatpush3.bf16.msra.mxu1 %v13055_v5  ;;  %17819 = vst [vmem:[#allocation26_spill] sm:$0xff] %v14807_v15  ;;  %13068 = vmatprep.subr.bf16.mxu0 %v14807_v15  ;;  %17822 = vst [vmem:[#allocation28_spill] sm:$0xff] %v14845_v26  ;;  %v1371_v31 = vld [vmem:[#allocation7 + $0x60] sm:$0xff]  ;;  %v14853_v32 = vpack.c.bf16 %v1258_v30, %v1257_v29  ;;  %v1372_v33 = vld [vmem:[#allocation7 + $0x68] sm:$0xff]  ;;  %v17684_v46 = vmov 9   ;;  %v17694_v47 = vmov 10  }
 0x131   : > { %13070 = vmatpush3.bf16.msra.mxu0 %v14807_v15  ;;  %17821 = vst [vmem:[#allocation27_spill] sm:$0xff] %v14841_v22  ;;  %13060 = vmatprep.subr.bf16.mxu1 %v14841_v22  ;;  %17823 = vst [vmem:[#allocation29_spill] sm:$0xff] %v14847_v28  ;;  %v14855_v34 = vpack.c.bf16 %v1372_v33, %v1371_v31  ;;  %v17662_v48 = vmov 12   ;;  %v17648_v49 = vmov 14   ;;  %v17658_v50 = vmov 13   ;;  %v1260_v63 = vld [vmem:[#allocation7 + $0x58] sm:$0xff] }
 0x132   : > { %v854_v4 = vld [vmem:[%s17817_s9] sm:$0xff]  ;;  %v855_v7 = vld [vmem:[%s17817_s9 + $0x8] sm:$0xff]  ;;  %v856_v9 = vld [vmem:[%s17817_s9 + $0x10] sm:$0xff]  ;;  %13072 = vmatprep.subr.bf16.mxu0 %v14845_v26  ;;  %17824 = vst [vmem:[#allocation30_spill] sm:$0xff] %v14853_v32  ;;  %vm1020_vm1 = vcmask 261120   ;;  %v14968_v13 = vpack.c.bf16 %v1260_v63, %v1259_v61  ;;  %s17734_s30 = smov 96  }
 0x133   : > { %12097 = vmatprep.mubr.msk.f32.mxu1 %vm882_vm0, %v854_v4  ;;  %v858_v6 = vld [vmem:[%s17818_s10] sm:$0xff]  ;;  %v859_v8 = vld [vmem:[%s17818_s10 + $0x8] sm:$0xff]  ;;  %v857_v10 = vld [vmem:[%s17817_s9 + $0x18] sm:$0xff]  ;;  %17825 = vst [vmem:[#allocation31_spill] sm:$0xff] %v14855_v34  ;;  %s17838_s1 = sld [smem:[#allocation106_spill]]  ;;  %s17839_s12 = sld [smem:[#allocation107_spill]] }
 0x134   : > { %864 = vperm.xlu0 %13709, %v858_v6   ;;  %985 = vperm.xlu1 %13710, %v858_v6   ;;  %v860_v11 = vld [vmem:[%s17818_s10 + $0x10] sm:$0xff]  ;;  %v861_v12 = vld [vmem:[%s17818_s10 + $0x18] sm:$0xff]  ;;  %v14812_v16 = vld [vmem:[%s17820_s0] sm:$0xff]  ;;  %17827 = vst [vmem:[#allocation32_spill] sm:$0xff] %v14968_v13  ;;  %s17892_s17 = sld [smem:[#allocation118_spill]]  ;;  %vm2807_vm6 = vcmask 64512  }
 0x135   : > { %12098 = vmatmul.mubr.msk.f32.vlgmr.msra.gmra.mrb[0].mxu1 %vm882_vm0, %v855_v7  ;;  %v14821_v17 = vld [vmem:[%s17820_s0 + $0x8] sm:$0xff]  ;;  %v14834_v19 = vld [vmem:[%s17820_s0 + $0x10] sm:$0xff]  ;;  %13074 = vmatpush3.bf16.msra.mxu0 %v14845_v26  ;;  %v14862_v35 = vld [vmem:[%s17820_s0 + $0x18] sm:$0xff]  ;;  %v17668_v7 = vmov 11   ;;  %s17936_s16 = sld [smem:[#allocation109_spill]]  ;;  %s17939_s2 = sld [smem:[#allocation110_spill]] }
 0x136   : > { %12100 = vmatprep.mubr.msk.f32.mxu1 %vm882_vm0, %v856_v9  ;;  %13062 = vmatpush3.bf16.msra.mxu1 %v14841_v22  ;;  %v14886_v38 = vld [vmem:[%s17826_s22] sm:$0xff]  ;;  %v14891_v39 = vld [vmem:[%s17826_s22 + $0x8] sm:$0xff]  ;;  %v14899_v40 = vld [vmem:[%s17826_s22 + $0x10] sm:$0xff]  ;;  %vm4522_vm7 = vcmask 1043456   ;;  %vm4119_vm8 = vcmask 523264   ;;  %vm4509_vm12 = vcmask 31744  }
 0x137   : > { %13064 = vmatprep.subr.bf16.mxu1 %v14847_v28  ;;  %13084 = vmatprep.subr.bf16.mxu0 %v14855_v34  ;;  %v14905_v41 = vld [vmem:[%s17826_s22 + $0x18] sm:$0xff]  ;;  %v1373_v2 = vld [vmem:[#allocation7 + $0x70] sm:$0xff]  ;;  %v1485_v25 = vld [vmem:[#allocation7 + $0x80] sm:$0xff]  ;;  %s17973_s19 = sld [smem:[#allocation112_spill]]  ;;  %s17974_s11 = sld [smem:[#allocation113_spill]] }
 0x138   : > { %869 = vperm.xlu0 %13709, %v859_v8   ;;  %989 = vperm.xlu1 %13710, %v859_v8   ;;  %v1374_v3 = vld [vmem:[#allocation7 + $0x78] sm:$0xff]  ;;  %v1486_v27 = vld [vmem:[#allocation7 + $0x88] sm:$0xff]  ;;  %s17976_s24 = sld [smem:[#allocation122_spill]]  ;;  %s17980_s20 = sld [smem:[#allocation115_spill]] }
 0x139   : > { %12101 = vmatmul.mubr.msk.f32.gmra.mrb[2].mxu1 %vm882_vm0, %v857_v10  ;;  %v17646_v10 = vmov 15   ;;  %v14970_v14 = vpack.c.bf16 %v1374_v3, %v1373_v2  ;;  %v14984_v31 = vpack.c.bf16 %v1486_v27, %v1485_v25  ;;  %v17652_v27 = vmov 18   ;;  %s11534_s25 = sshll.u32 %s14484_s29, 8  ;;  %s18137_s26 = sshll.u32 %s14745_s8, 4 }
 0x13a   : > { %13066 = vmatpush3.bf16.msra.mxu1 %v14847_v28  ;;  %p18141_p1 = scmp.ne.s32.totalorder %s17803_s6, 0  ;;  %s14335_s27 = smov [#allocation16]  }
 0x13b   : > { %13076 = vmatprep.subr.bf16.mxu1 %v14853_v32  ;;  %17828 = vst [vmem:[#allocation33_spill] sm:$0xff] %v14970_v14  ;;  %17829 = vst [vmem:[#allocation34_spill] sm:$0xff] %v14984_v31 }
 0x13c   : > { %874 = vperm.xlu0 %13709, %v860_v11   ;;  %13711 = vset.pattern.permute.xlu1 %v17672_v0 }
 0x13d   : > { %879 = vperm.xlu1 %13711, %v861_v12  }
 0x140   : > { %13712 = vset.pattern.permute.xlu0 %v17666_v1 }
 0x141   : > { %993 = vperm.xlu0 %13712, %v860_v11   ;;  %13713 = vset.pattern.permute.xlu1 %v17666_v1 }
 0x142   : > { %997 = vperm.xlu1 %13713, %v861_v12  }
 0x145   : > { %1233 = vperm.xlu0 %13712, %v14812_v16  }
 0x146   : > { %13714 = vset.pattern.permute.xlu1 %v17672_v0 }
 0x147   : > { %1120 = vperm.xlu1 %13714, %v14812_v16  }
 0x149   : > { %1237 = vperm.xlu0 %13712, %v14821_v17  }
 0x14b   : > { %1125 = vperm.xlu1 %13714, %v14821_v17  }
 0x14d   : > { %13716 = vset.pattern.permute.xlu0 %v17674_v18 }
 0x14e   : > { %1351 = vperm.xlu0 %13716, %v14821_v17  }
 0x14f   : > { %13715 = vset.pattern.permute.xlu1 %v17674_v18 }
 0x150   : > { %1347 = vperm.xlu1 %13715, %v14812_v16  }
 0x152   : > { %13722 = vset.pattern.permute.xlu0 %v17678_v36 }
 0x153   : > { %1575 = vperm.xlu0 %13722, %v14812_v16  }
 0x154   : > { %13717 = vset.pattern.permute.xlu1 %v17672_v0 }
 0x155   : > { %1130 = vperm.xlu1 %13717, %v14834_v19  }
 0x157   : > { %13723 = vset.pattern.permute.xlu0 %v17688_v37 }
 0x158   : > { %1461 = vperm.xlu0 %13723, %v14812_v16  }
 0x159   : > { %13718 = vset.pattern.permute.xlu1 %v17666_v1 }
 0x15a   : > { %1241 = vperm.xlu1 %13718, %v14834_v19  }
 0x15c   : > { %1465 = vperm.xlu0 %13723, %v14821_v17  }
 0x15e   : > { %13719 = vset.pattern.permute.xlu1 %v17672_v0 }
 0x15f   : > { %1135 = vperm.xlu1 %13719, %v14862_v35  }
 0x160   : > { %1469 = vperm.xlu0 %13723, %v14834_v19  }
 0x163   : > { %13720 = vset.pattern.permute.xlu1 %v17666_v1 }
 0x164   : > { %1245 = vperm.xlu1 %13720, %v14862_v35   ;;  %13727 = vset.pattern.permute.xlu0 %v17672_v0 }
 0x165   : > { %1600 = vperm.xlu0 %13727, %v14886_v38  }
 0x168   : > { %13721 = vset.pattern.permute.xlu1 %v17674_v18 }
 0x169   : > { %1355 = vperm.xlu1 %13721, %v14834_v19   ;;  %1610 = vperm.xlu0 %13727, %v14899_v40  }
 0x16d   : > { %1359 = vperm.xlu1 %13721, %v14862_v35   ;;  %13731 = vset.pattern.permute.xlu0 %v17660_v42 }
 0x16e   : > { %1838 = vperm.xlu0 %13731, %v14821_v17  }
 0x171   : > { %13724 = vset.pattern.permute.xlu1 %v17678_v36 }
 0x172   : > { %1579 = vperm.xlu1 %13724, %v14821_v17   ;;  %13732 = vset.pattern.permute.xlu0 %v17664_v43 }
 0x173   : > { %1724 = vperm.xlu0 %13732, %v14812_v16  }
 0x176   : > { %13725 = vset.pattern.permute.xlu1 %v17688_v37 }
 0x177   : > { %1473 = vperm.xlu1 %13725, %v14862_v35   ;;  %1732 = vperm.xlu0 %13732, %v14834_v19  }
 0x17b   : > { %13726 = vset.pattern.permute.xlu1 %v17678_v36  ;;  %1736 = vperm.xlu0 %13732, %v14862_v35  }
 0x17c   : > { %1583 = vperm.xlu1 %13726, %v14834_v19  }
 0x17f   : > { %13739 = vset.pattern.permute.xlu0 %v17670_v44 }
 0x180   : > { %1587 = vperm.xlu1 %13726, %v14862_v35   ;;  %1960 = vperm.xlu0 %13739, %v14862_v35  }
 0x184   : > { %13728 = vset.pattern.permute.xlu1 %v17672_v0  ;;  %13740 = vset.pattern.permute.xlu0 %v17676_v45 }
 0x185   : > { %1605 = vperm.xlu1 %13728, %v14891_v39   ;;  %2066 = vperm.xlu0 %13740, %v14821_v17  }
 0x189   : > { %1615 = vperm.xlu1 %13728, %v14905_v41   ;;  %2074 = vperm.xlu0 %13740, %v14862_v35  }
 0x18d   : > { %13729 = vset.pattern.permute.xlu1 %v17660_v42  ;;  %13744 = vset.pattern.permute.xlu0 %v17684_v46 }
 0x18e   : > { %1834 = vperm.xlu1 %13729, %v14812_v16   ;;  %2188 = vperm.xlu0 %13744, %v14862_v35  }
 0x192   : > { %13730 = vset.pattern.permute.xlu1 %v17664_v43  ;;  %13745 = vset.pattern.permute.xlu0 %v17666_v1 }
 0x193   : > { %1728 = vperm.xlu1 %13730, %v14821_v17   ;;  %2212 = vperm.xlu0 %13745, %v14905_v41  }
 0x197   : > { %13733 = vset.pattern.permute.xlu1 %v17670_v44  ;;  %13748 = vset.pattern.permute.xlu0 %v17694_v47 }
 0x198   : > { %1948 = vperm.xlu1 %13733, %v14812_v16   ;;  %2323 = vperm.xlu0 %13748, %v14821_v17  }
 0x19c   : > { %1952 = vperm.xlu1 %13733, %v14821_v17   ;;  %13750 = vset.pattern.permute.xlu0 %v17662_v48 }
 0x19d   : > { %2543 = vperm.xlu0 %13750, %v14821_v17  }
 0x1a0   : > { %13734 = vset.pattern.permute.xlu1 %v17660_v42 }
 0x1a1   : > { %1842 = vperm.xlu1 %13734, %v14834_v19   ;;  %13756 = vset.pattern.permute.xlu0 %v17648_v49 }
 0x1a2   : > { %2763 = vperm.xlu0 %13756, %v14812_v16  }
 0x1a5   : > { %13735 = vset.pattern.permute.xlu1 %v17676_v45 }
 0x1a6   : > { %2062 = vperm.xlu1 %13735, %v14812_v16   ;;  %13757 = vset.pattern.permute.xlu0 %v17658_v50 }
 0x1a7   : > { %2651 = vperm.xlu0 %13757, %v14812_v16  }
 0x1aa   : > { %13736 = vset.pattern.permute.xlu1 %v17660_v42 }
 0x1ab   : > { %1846 = vperm.xlu1 %13736, %v14862_v35   ;;  %2655 = vperm.xlu0 %13757, %v14821_v17  }
 0x1af   : > { %13737 = vset.pattern.permute.xlu1 %v17670_v44  ;;  %2659 = vperm.xlu0 %13757, %v14834_v19  }
 0x1b0   : > { %1956 = vperm.xlu1 %13737, %v14834_v19  }
 0x1b3   : > { %v986_v51 = vpop.permute.xlu1 %985  ;;  %v865_v52 = vpop.permute.xlu0 %864  ;;  %13761 = vset.pattern.permute.xlu0 %v17674_v18 }
 0x1b4   : > { %13738 = vset.pattern.permute.xlu1 %v17684_v46  ;;  %2787 = vperm.xlu0 %13761, %v14886_v38  }
 0x1b5   : > { %2176 = vperm.xlu1 %13738, %v14812_v16  }
 0x1b7   : > { %v990_v53 = vpop.permute.xlu1 %989  ;;  %v870_v54 = vpop.permute.xlu0 %869 }
 0x1b8   : > { %2795 = vperm.xlu0 %13761, %v14899_v40  }
 0x1b9   : > { %2180 = vperm.xlu1 %13738, %v14821_v17  }
 0x1bb   : > { %v875_v57 = vpop.permute.xlu0 %874 }
 0x1bc   : > { %v880_v55 = vpop.permute.xlu1 %879  ;;  %13763 = vset.pattern.permute.xlu0 %v17646_v10 }
 0x1bd   : > { %13741 = vset.pattern.permute.xlu1 %v17676_v45  ;;  %2906 = vperm.xlu0 %13763, %v14812_v16  }
 0x1be   : > { %2070 = vperm.xlu1 %13741, %v14834_v19  }
 0x1c0   : > { %v994_v20 = vpop.permute.xlu0 %993 }
 0x1c1   : > { %v998_v6 = vpop.permute.xlu1 %997  ;;  %2914 = vperm.xlu0 %13763, %v14834_v19  }
 0x1c2   : > { %13742 = vset.pattern.permute.xlu1 %v17684_v46 }
 0x1c3   : > { %2184 = vperm.xlu1 %13742, %v14834_v19  }
 0x1c6   : > { %v14986_v33 = vpop.permute.xlu1 %1120 }
 0x1c7   : > { %13743 = vset.pattern.permute.xlu1 %v17666_v1 }
 0x1c8   : > { %2200 = vperm.xlu1 %13743, %v14886_v38  }
 0x1cc   : > { %2204 = vperm.xlu1 %13743, %v14891_v39  }
 0x1d0   : > { %2208 = vperm.xlu1 %13743, %v14899_v40  }
 0x1d4   : > { %13746 = vset.pattern.permute.xlu1 %v17694_v47 }
 0x1d5   : > { %2319 = vperm.xlu1 %13746, %v14812_v16  }
 0x1d9   : > { %13747 = vset.pattern.permute.xlu1 %v17668_v7 }
 0x1da   : > { %2427 = vperm.xlu1 %13747, %v14812_v16  }
 0x1de   : > { %2431 = vperm.xlu1 %13747, %v14821_v17  }
 0x1e2   : > { %13749 = vset.pattern.permute.xlu1 %v17662_v48 }
 0x1e3   : > { %2539 = vperm.xlu1 %13749, %v14812_v16  }
 0x1e7   : > { %13751 = vset.pattern.permute.xlu1 %v17694_v47 }
 0x1e8   : > { %2327 = vperm.xlu1 %13751, %v14834_v19  }
 0x1ec   : > { %13752 = vset.pattern.permute.xlu1 %v17668_v7 }
 0x1ed   : > { %2435 = vperm.xlu1 %13752, %v14834_v19  }
 0x1f1   : > { %13753 = vset.pattern.permute.xlu1 %v17694_v47 }
 0x1f2   : > { %2331 = vperm.xlu1 %13753, %v14862_v35  }
 0x1f6   : > { %13754 = vset.pattern.permute.xlu1 %v17668_v7 }
 0x1f7   : > { %2439 = vperm.xlu1 %13754, %v14862_v35  }
 0x1fb   : > { %13755 = vset.pattern.permute.xlu1 %v17662_v48  ;;  %v1234_v48 = vpop.permute.xlu0 %1233 }
 0x1fc   : > { %2547 = vperm.xlu1 %13755, %v14834_v19  }
 0x200   : > { %2551 = vperm.xlu1 %13755, %v14862_v35  }
 0x204   : > { %13758 = vset.pattern.permute.xlu1 %v17648_v49 }
 0x205   : > { %2767 = vperm.xlu1 %13758, %v14821_v17  }
 0x208   : > { %v12099_v56 = vpop.f32.mrb[0].mxu1 }
 0x209   : > { %v967_v58 = vadd.f32 %v12099_v56, %v870_v54  ;;  %v961_v59 = vpop.f32.mrb[1].mxu1  ;;  %v15002_v54 = vpop.permute.xlu1 %1125  ;;  %13759 = vset.pattern.permute.xlu1 %v17658_v50 }
 0x20a   : > { %v962_v60 = vadd.f32 %v961_v59, %v865_v52  ;;  %v1488_v52 = vld [vmem:[#allocation7 + $0x98] sm:$0xff]  ;;  %2663 = vperm.xlu1 %13759, %v14862_v35  }
 0x20b   : > { %v1001_v62 = vmul.f32 %v990_v53, %v967_v58  ;;  %vm981_vm2 = vcmp.gt.f32.partialorder %v967_v58, 0.0 }
 0x20c   : > { %vm980_vm3 = vcmp.gt.f32.partialorder %v962_v60, 0.0  ;;  %v1000_v4 = vmul.f32 %v986_v51, %v962_v60  ;;  %v12102_v5 = vpop.f32.mrb[2].mxu1  ;;  %v1487_v51 = vld [vmem:[#allocation7 + $0x90] sm:$0xff] }
 0x20d   : > { %v977_v8 = vadd.f32 %v12102_v5, %v880_v55  ;;  %v971_v9 = vpop.f32.mrb[3].mxu1  ;;  %v1005_v21 = vsel %vm981_vm2, %v967_v58, %v1001_v62  ;;  %v14995_v53 = vpack.c.bf16 %v1488_v52, %v1487_v51  ;;  %v17644_v55 = vmov 16   ;;  %v15014_v56 = vpop.permute.xlu1 %1347  ;;  %v1625_v51 = vld [vmem:[#allocation8 + $0x18] sm:$0xff]  ;;  %v1746_v52 = vld [vmem:[#allocation8 + $0x30] sm:$0xff] }
 0x20e   : > { %v1004_v11 = vsel %vm980_vm3, %v962_v60, %v1000_v4  ;;  %v972_v12 = vadd.f32 %v971_v9, %v875_v57  ;;  %13767 = vset.pattern.permute.xlu0 %v17644_v55  ;;  %v17656_v58 = vmov 17   ;;  %13760 = vset.pattern.permute.xlu1 %v17648_v49 }
 0x20f   : > { %v1003_v23 = vmul.f32 %v998_v6, %v977_v8  ;;  %12111 = vmatprep.mubr.msk.f32.mxu1 %vm1020_vm1, %v1004_v11  ;;  %12125 = vmatprep.mubr.msk.f32.mxu0 %vm1020_vm1, %v1004_v11  ;;  %vm983_vm4 = vcmp.gt.f32.partialorder %v977_v8, 0.0  ;;  %17830 = vst [vmem:[#allocation35_spill] sm:$0xff] %v14995_v53 }
 0x210   : > { %vm982_vm5 = vcmp.gt.f32.partialorder %v972_v12, 0.0  ;;  %v1002_v24 = vmul.f32 %v994_v20, %v972_v12  ;;  %12112 = vmatmul.mubr.msk.f32.vlgmr.msra.gmra.mrb[4].mxu1 %vm1020_vm1, %v1005_v21  ;;  %12126 = vmatmul.mubr.msk.f32.vlgmr.msra.gmra.mrb[0].mxu0 %vm1020_vm1, %v1005_v21  ;;  %v1623_v20 = vld [vmem:[#allocation8 + $0x8] sm:$0xff] }
 0x211   : > { %13078 = vmatpush3.bf16.msra.mxu1 %v14853_v32  ;;  %13086 = vmatpush3.bf16.msra.mxu0 %v14855_v34  ;;  %v1007_v30 = vsel %vm983_vm4, %v977_v8, %v1003_v23  ;;  %v15024_v57 = vpop.permute.xlu1 %1130  ;;  %v17846_v32 = vmov 0  }
 0x212   : > { %v1006_v29 = vsel %vm982_vm5, %v972_v12, %v1002_v24  ;;  %13080 = vmatprep.subr.bf16.mxu1 %v14968_v13  ;;  %13088 = vmatprep.subr.bf16.mxu0 %v14970_v14  ;;  %v1622_v12 = vld [vmem:[#allocation8] sm:$0xff]  ;;  %v1745_v24 = vld [vmem:[#allocation8 + $0x28] sm:$0xff] }
 0x213   : > { %12114 = vmatprep.mubr.msk.f32.mxu1 %vm1020_vm1, %v1006_v29  ;;  %12128 = vmatprep.mubr.msk.f32.mxu0 %vm1020_vm1, %v1006_v29  ;;  %v15083_v23 = vpack.c.bf16 %v1623_v20, %v1622_v12  ;;  %v1747_v20 = vld [vmem:[#allocation8 + $0x38] sm:$0xff] }
 0x214   : > { %12115 = vmatmul.mubr.msk.f32.gmra.mrb[6].mxu1 %vm1020_vm1, %v1007_v30  ;;  %12129 = vmatmul.mubr.msk.f32.gmra.mrb[2].mxu0 %vm1020_vm1, %v1007_v30 }
 0x215   : > { %13082 = vmatpush3.bf16.msra.mxu1 %v14968_v13  ;;  %12139 = vmatprep.mubr.msk.f32.mxu1 %vm1020_vm1, %v1004_v11  ;;  %v15031_v59 = vpop.permute.xlu1 %1241  ;;  %17831 = vst [vmem:[#allocation36_spill] sm:$0xff] %v15083_v23 }
 0x216   : > { %13090 = vmatpush3.bf16.msra.mxu0 %v14970_v14  ;;  %12153 = vmatprep.mubr.msk.f32.mxu0 %vm1020_vm1, %v1004_v11 }
 0x217   : > { %13092 = vmatprep.subr.bf16.mxu1 %v14984_v31  ;;  %3017 = vperm.xlu0 %13767, %v14821_v17  }
 0x218   : > { %12140 = vmatmul.mubr.msk.f32.vlgmr.msra.gmra.mrb[8].mxu1 %vm1020_vm1, %v1005_v21  ;;  %2771 = vperm.xlu1 %13760, %v14834_v19  }
 0x219   : > { %12154 = vmatmul.mubr.msk.f32.vlgmr.msra.gmra.mrb[4].mxu0 %vm1020_vm1, %v1005_v21  ;;  %12142 = vmatprep.mubr.msk.f32.mxu1 %vm1020_vm1, %v1006_v29  ;;  %v15035_v60 = vpop.permute.xlu1 %1135 }
 0x21a   : > { %12156 = vmatprep.mubr.msk.f32.mxu0 %vm1020_vm1, %v1006_v29  ;;  %13094 = vmatpush3.bf16.msra.mxu1 %v14984_v31 }
 0x21b   : > { %13096 = vmatprep.subr.bf16.mxu1 %v14995_v53  ;;  %3025 = vperm.xlu0 %13767, %v14862_v35  }
 0x21c   : > { %12143 = vmatmul.mubr.msk.f32.gmra.mrb[10].mxu1 %vm1020_vm1, %v1007_v30  ;;  %2775 = vperm.xlu1 %13760, %v14862_v35  }
 0x21d   : > { %12157 = vmatmul.mubr.msk.f32.gmra.mrb[6].mxu0 %vm1020_vm1, %v1007_v30  ;;  %12167 = vmatprep.mubr.msk.f32.mxu1 %vm1020_vm1, %v1004_v11  ;;  %v15039_v61 = vpop.permute.xlu1 %1245 }
 0x21e   : > { %13098 = vmatpush3.bf16.msra.mxu1 %v14995_v53  ;;  %13100 = vmatprep.subr.bf16.mxu0 %v15083_v23 }
 0x21f   : > { %13771 = vset.pattern.permute.xlu0 %v17656_v58  ;;  %13102 = vmatpush3.bf16.msra.mxu0 %v15083_v23 }
 0x220   : > { %3132 = vperm.xlu0 %13771, %v14834_v19   ;;  %13762 = vset.pattern.permute.xlu1 %v17674_v18 }
 0x221   : > { %12168 = vmatmul.mubr.msk.f32.vlgmr.msra.gmra.mrb[12].mxu1 %vm1020_vm1, %v1005_v21  ;;  %v15043_v62 = vpop.permute.xlu1 %1355  ;;  %2791 = vperm.xlu1 %13762, %v14891_v39   ;;  %v1744_v21 = vld [vmem:[#allocation8 + $0x20] sm:$0xff] }
 0x222   : > { %12170 = vmatprep.mubr.msk.f32.mxu1 %vm1020_vm1, %v1006_v29  ;;  %v15085_v25 = vpack.c.bf16 %v1745_v24, %v1744_v21  ;;  %v15097_v21 = vpack.c.bf16 %v1747_v20, %v1746_v52  ;;  %v1858_v24 = vld [vmem:[#allocation8 + $0x40] sm:$0xff]  ;;  %v17654_v20 = vmov 19  }
 0x224   : > { %17832 = vst [vmem:[#allocation37_spill] sm:$0xff] %v15085_v25  ;;  %13108 = vmatprep.subr.bf16.mxu1 %v15085_v25  ;;  %17834 = vst [vmem:[#allocation39_spill] sm:$0xff] %v15097_v21  ;;  %13774 = vset.pattern.permute.xlu0 %v17654_v20 }
 0x225   : > { %12171 = vmatmul.mubr.msk.f32.gmra.mrb[14].mxu1 %vm1020_vm1, %v1007_v30  ;;  %v15048_v63 = vpop.permute.xlu1 %1359  ;;  %2799 = vperm.xlu1 %13762, %v14905_v41   ;;  %v1624_v30 = vld [vmem:[#allocation8 + $0x10] sm:$0xff] }
 0x226   : > { %v15094_v12 = vpack.c.bf16 %v1625_v51, %v1624_v30  ;;  %13110 = vmatpush3.bf16.msra.mxu1 %v15085_v25  ;;  %v1973_v30 = vld [vmem:[#allocation8 + $0x68] sm:$0xff]  ;;  %3350 = vperm.xlu0 %13774, %v14821_v17  }
 0x227   : > { %13112 = vmatprep.subr.bf16.mxu1 %v15097_v21 }
 0x228   : > { %17833 = vst [vmem:[#allocation38_spill] sm:$0xff] %v15094_v12  ;;  %13104 = vmatprep.subr.bf16.mxu0 %v15094_v12 }
 0x229   : > { %v15052_v2 = vpop.permute.xlu1 %1579  ;;  %13764 = vset.pattern.permute.xlu1 %v17646_v10  ;;  %13106 = vmatpush3.bf16.msra.mxu0 %v15094_v12 }
 0x22a   : > { %2910 = vperm.xlu1 %13764, %v14821_v17   ;;  %13114 = vmatpush3.bf16.msra.mxu1 %v15097_v21  ;;  %v17844_v21 = vmov 4  }
 0x22b   : > { %3354 = vperm.xlu0 %13774, %v14834_v19  }
 0x22d   : > { %v15055_v3 = vpop.permute.xlu1 %1473 }
 0x22e   : > { %13765 = vset.pattern.permute.xlu1 %v17644_v55 }
 0x22f   : > { %3013 = vperm.xlu1 %13765, %v14812_v16   ;;  %13777 = vset.pattern.permute.xlu0 %v17688_v37 }
 0x230   : > { %3370 = vperm.xlu0 %13777, %v14886_v38   ;;  %v15151_v38 = vld [vmem:[%s17838_s1] sm:$0xff] }
 0x231   : > { %v15060_v4 = vpop.permute.xlu1 %1583 }
 0x233   : > { %13766 = vset.pattern.permute.xlu1 %v17656_v58 }
 0x234   : > { %3124 = vperm.xlu1 %13766, %v14812_v16   ;;  %3382 = vperm.xlu0 %13777, %v14905_v41   ;;  %v3389_v41 = vld [vmem:[%s17837_s4] sm:$0xff] }
 0x235   : > { %v15064_v5 = vpop.permute.xlu1 %1587 }
 0x238   : > { %3128 = vperm.xlu1 %13766, %v14821_v17   ;;  %13781 = vset.pattern.permute.xlu0 %v17674_v18 }
 0x239   : > { %v15068_v6 = vpop.permute.xlu1 %1605 }
 0x23c   : > { %13768 = vset.pattern.permute.xlu1 %v17646_v10  ;;  %v1972_v10 = vld [vmem:[#allocation8 + $0x60] sm:$0xff] }
 0x23d   : > { %v15072_v8 = vpop.permute.xlu1 %1615  ;;  %2918 = vperm.xlu1 %13768, %v14862_v35   ;;  %v15108_v52 = vpack.c.bf16 %v1973_v30, %v1972_v10 }
 0x23f   : > { %17836 = vst [vmem:[#allocation41_spill] sm:$0xff] %v15108_v52  ;;  %13124 = vmatprep.subr.bf16.mxu1 %v15108_v52 }
 0x241   : > { %v15075_v9 = vpop.permute.xlu1 %1834  ;;  %13769 = vset.pattern.permute.xlu1 %v17644_v55  ;;  %v1859_v55 = vld [vmem:[#allocation8 + $0x48] sm:$0xff] }
 0x242   : > { %3021 = vperm.xlu1 %13769, %v14834_v19   ;;  %v15103_v49 = vpack.c.bf16 %v1859_v55, %v1858_v24 }
 0x244   : > { %17835 = vst [vmem:[#allocation40_spill] sm:$0xff] %v15103_v49  ;;  %13116 = vmatprep.subr.bf16.mxu0 %v15103_v49 }
 0x245   : > { %v15079_v11 = vpop.permute.xlu1 %1728 }
 0x246   : > { %13770 = vset.pattern.permute.xlu1 %v17652_v27 }
 0x247   : > { %3235 = vperm.xlu1 %13770, %v14812_v16  }
 0x249   : > { %v15089_v29 = vpop.permute.xlu1 %1948 }
 0x24b   : > { %3239 = vperm.xlu1 %13770, %v14821_v17  }
 0x24d   : > { %v15105_v51 = vpop.permute.xlu1 %1952 }
 0x24f   : > { %13772 = vset.pattern.permute.xlu1 %v17656_v58  ;;  %v15207_v58 = vld [vmem:[%s17839_s12 + $0x10] sm:$0xff] }
 0x250   : > { %3136 = vperm.xlu1 %13772, %v14862_v35  }
 0x251   : > { %v15116_v55 = vpop.permute.xlu1 %1842 }
 0x254   : > { %13773 = vset.pattern.permute.xlu1 %v17654_v20 }
 0x255   : > { %3346 = vperm.xlu1 %13773, %v14812_v16   ;;  %v15121_v10 = vpop.permute.xlu1 %2062  ;;  %v3390_v16 = vld [vmem:[%s17837_s4 + $0x8] sm:$0xff] }
 0x256   : > { %3599 = vrot.lane.b32.xlu0 %v3390_v16, %s17734_s30 }
 0x259   : > { %13775 = vset.pattern.permute.xlu1 %v17652_v27  ;;  %v15128_v17 = vpop.permute.xlu1 %1846 }
 0x25a   : > { %3243 = vperm.xlu1 %13775, %v14834_v19   ;;  %v3392_v19 = vld [vmem:[%s17837_s4 + $0x18] sm:$0xff] }
 0x25b   : > { %3603 = vrot.lane.b32.xlu0 %v3392_v19, %s17734_s30  ;;  %v15180_v19 = vld [vmem:[%s17838_s1 + $0x10] sm:$0xff] }
 0x25d   : > { %v15137_v24 = vpop.permute.xlu1 %1956 }
 0x25e   : > { %3247 = vperm.xlu1 %13775, %v14862_v35  }
 0x25f   : > { %3819 = vperm.xlu0 %13781, %v15151_v38  }
 0x262   : > { %13776 = vset.pattern.permute.xlu1 %v17654_v20 }
 0x263   : > { %3358 = vperm.xlu1 %13776, %v14862_v35   ;;  %v15146_v35 = vpop.permute.xlu1 %2176 }
 0x267   : > { %13778 = vset.pattern.permute.xlu1 %v17688_v37  ;;  %v15163_v30 = vpop.permute.xlu1 %2180 }
 0x268   : > { %3374 = vperm.xlu1 %13778, %v14891_v39   ;;  %v15161_v39 = vld [vmem:[%s17838_s1 + $0x18] sm:$0xff] }
 0x269   : > { %3831 = vperm.xlu0 %13781, %v15161_v39  }
 0x26b   : > { %v15174_v16 = vpop.permute.xlu1 %2070 }
 0x26c   : > { %3378 = vperm.xlu1 %13778, %v14899_v40   ;;  %v3391_v40 = vld [vmem:[%s17837_s4 + $0x10] sm:$0xff] }
 0x26d   : > { %13787 = vset.pattern.permute.xlu0 %v17688_v37 }
 0x26e   : > { %3843 = vperm.xlu0 %13787, %v15151_v38  }
 0x270   : > { %3597 = vrot.lane.b32.xlu1 %v3389_v41, %s17734_s30  ;;  %v15183_v41 = vpop.permute.xlu1 %2184 }
 0x271   : > { %13779 = vset.pattern.permute.xlu1 %v17672_v0 }
 0x272   : > { %3851 = vperm.xlu0 %13787, %v15180_v19  }
 0x274   : > { %3601 = vrot.lane.b32.xlu1 %v3391_v40, %s17734_s30  ;;  %v15191_v40 = vld [vmem:[%s17838_s1 + $0x8] sm:$0xff]  ;;  %v15195_v27 = vpop.permute.xlu1 %2200 }
 0x276   : > { %13791 = vset.pattern.permute.xlu0 %v17678_v36 }
 0x277   : > { %3879 = vperm.xlu0 %13791, %v15161_v39  }
 0x278   : > { %3772 = vperm.xlu1 %13779, %v15151_v38   ;;  %v15202_v20 = vpop.permute.xlu1 %2204 }
 0x27b   : > { %13792 = vset.pattern.permute.xlu0 %v17672_v0 }
 0x27c   : > { %13780 = vset.pattern.permute.xlu1 %v17666_v1  ;;  %3777 = vperm.xlu0 %13792, %v15191_v40   ;;  %v15212_v50 = vpop.permute.xlu1 %2208 }
 0x27d   : > { %3795 = vperm.xlu1 %13780, %v15151_v38  }
 0x280   : > { %3787 = vperm.xlu0 %13792, %v15161_v39   ;;  %v15218_v42 = vpop.permute.xlu1 %2319 }
 0x281   : > { %3799 = vperm.xlu1 %13780, %v15191_v40   ;;  %17840 = vst [vmem:[#allocation42_spill] sm:$0xff] %v15218_v42 }
 0x284   : > { %3902 = vperm.xlu0 %13792, %v15207_v58  }
 0x285   : > { %13782 = vset.pattern.permute.xlu1 %v17674_v18 }
 0x286   : > { %3823 = vperm.xlu1 %13782, %v15191_v40  }
 0x288   : > { %13795 = vset.pattern.permute.xlu0 %v17664_v43  ;;  %v15226_v43 = vpop.permute.xlu1 %2427 }
 0x289   : > { %4270 = vperm.xlu0 %13795, %v15191_v40   ;;  %17841 = vst [vmem:[#allocation43_spill] sm:$0xff] %v15226_v43 }
 0x28a   : > { %13783 = vset.pattern.permute.xlu1 %v17672_v0 }
 0x28b   : > { %3782 = vperm.xlu1 %13783, %v15180_v19  }
 0x28c   : > { %v15231_v7 = vpop.permute.xlu1 %2431 }
 0x28d   : > { %4278 = vperm.xlu0 %13795, %v15161_v39  }
 0x28f   : > { %13784 = vset.pattern.permute.xlu1 %v17666_v1  ;;  %v1238_v1 = vpop.permute.xlu0 %1237 }
 0x290   : > { %3803 = vperm.xlu1 %13784, %v15180_v19   ;;  %v15237_v0 = vpop.permute.xlu1 %2539 }
 0x291   : > { %13799 = vset.pattern.permute.xlu0 %v17670_v44  ;;  %17842 = vst [vmem:[#allocation44_spill] sm:$0xff] %v15237_v0 }
 0x292   : > { %4310 = vperm.xlu0 %13799, %v15151_v38  }
 0x293   : > { %v1352_v44 = vpop.permute.xlu0 %1351 }
 0x294   : > { %3807 = vperm.xlu1 %13784, %v15161_v39  }
 0x296   : > { %4322 = vperm.xlu0 %13799, %v15161_v39  }
 0x298   : > { %13785 = vset.pattern.permute.xlu1 %v17688_v37 }
 0x299   : > { %3847 = vperm.xlu1 %13785, %v15191_v40  }
 0x29a   : > { %13803 = vset.pattern.permute.xlu0 %v17676_v45  ;;  %v15246_v45 = vpop.permute.xlu1 %2327 }
 0x29b   : > { %4334 = vperm.xlu0 %13803, %v15151_v38   ;;  %17843 = vst [vmem:[#allocation45_spill] sm:$0xff] %v15246_v45 }
 0x29d   : > { %13786 = vset.pattern.permute.xlu1 %v17674_v18  ;;  %v15241_v18 = vpop.permute.xlu0 %1575 }
 0x29e   : > { %3827 = vperm.xlu1 %13786, %v15180_v19   ;;  %v15253_v12 = vpop.permute.xlu1 %2435 }
 0x29f   : > { %4342 = vperm.xlu0 %13803, %v15180_v19   ;;  %17845 = vst [vmem:[#allocation46_spill] sm:$0xff] %v15253_v12 }
 0x2a2   : > { %13788 = vset.pattern.permute.xlu1 %v17678_v36  ;;  %v1462_v36 = vpop.permute.xlu0 %1461 }
 0x2a3   : > { %3867 = vperm.xlu1 %13788, %v15151_v38   ;;  %13808 = vset.pattern.permute.xlu0 %v17684_v46 }
 0x2a4   : > { %4366 = vperm.xlu0 %13808, %v15180_v19  }
 0x2a6   : > { %v1466_v22 = vpop.permute.xlu0 %1465 }
 0x2a7   : > { %3871 = vperm.xlu1 %13788, %v15191_v40  }
 0x2a8   : > { %13809 = vset.pattern.permute.xlu0 %v17694_v47 }
 0x2a9   : > { %4761 = vperm.xlu0 %13809, %v15191_v40  }
 0x2ab   : > { %13789 = vset.pattern.permute.xlu1 %v17688_v37  ;;  %v15258_v37 = vld [vmem:[%s17839_s12] sm:$0xff] }
 0x2ac   : > { %3855 = vperm.xlu1 %13789, %v15161_v39  }
 0x2ad   : > { %4765 = vperm.xlu0 %13809, %v15180_v19  }
 0x2b0   : > { %13790 = vset.pattern.permute.xlu1 %v17844_v21 }
 0x2b1   : > { %3875 = vperm.xlu1 %13790, %v15180_v19  }
 0x2b5   : > { %13793 = vset.pattern.permute.xlu1 %v17846_v32 }
 0x2b6   : > { %3892 = vperm.xlu1 %13793, %v15258_v37  }
 0x2e3   : > { %v12113_v46 = vpop.f32.mrb[4].mxu1  ;;  %v12127_v25 = vpop.f32.mrb[0].mxu0 }
 0x2e4   : > { %v1139_v53 = vmul.f32 %v12113_v46, %v15002_v54  ;;  %v1249_v23 = vmul.f32 %v12127_v25, %v1238_v1  ;;  %v1099_v47 = vpop.f32.mrb[5].mxu1  ;;  %v1213_v31 = vpop.f32.mrb[1].mxu0  ;;  %v15268_v1 = vld [vmem:[%s17839_s12 + $0x8] sm:$0xff] }
 0x2e5   : > { %v1138_v14 = vmul.f32 %v14986_v33, %v1099_v47  ;;  %v1248_v13 = vmul.f32 %v1234_v48, %v1213_v31  ;;  %v17847_v31 = vmov 11   ;;  %3897 = vperm.xlu1 %13793, %v15268_v1  }
 0x2e6   : > { %v1253_v28 = vadd.f32 %v1249_v23, %v1139_v53  ;;  %13815 = vset.pattern.permute.xlu0 %v17847_v31 }
 0x2e7   : > { %v1252_v21 = vadd.f32 %v1248_v13, %v1138_v14  ;;  %v12116_v34 = vpop.f32.mrb[6].mxu1  ;;  %v12130_v26 = vpop.f32.mrb[2].mxu0  ;;  %4789 = vperm.xlu0 %13815, %v15161_v39  }
 0x2e8   : > { %v1141_v46 = vmul.f32 %v12116_v34, %v15035_v60  ;;  %v1251_v54 = vmul.f32 %v12130_v26, %v15039_v61  ;;  %v1109_v47 = vpop.f32.mrb[7].mxu1  ;;  %v1223_v48 = vpop.f32.mrb[3].mxu0  ;;  %v15282_v26 = vld [vmem:[%s17839_s12 + $0x18] sm:$0xff] }
 0x2e9   : > { %v1140_v33 = vmul.f32 %v15024_v57, %v1109_v47  ;;  %v1250_v53 = vmul.f32 %v15031_v59, %v1223_v48  ;;  %v15275_v13 = vpop.permute.xlu1 %2331  ;;  %v1470_v57 = vpop.permute.xlu0 %1469  ;;  %v17849_v48 = vmov 1   ;;  %3907 = vperm.xlu1 %13793, %v15282_v26  }
 0x2ea   : > { %17848 = vst [vmem:[#allocation47_spill] sm:$0xff] %v15275_v13  ;;  %v1255_v14 = vadd.f32 %v1251_v54, %v1141_v46 }
 0x2eb   : > { %v1254_v23 = vadd.f32 %v1250_v53, %v1140_v33  ;;  %v12141_v25 = vpop.f32.mrb[8].mxu1  ;;  %13816 = vset.pattern.permute.xlu0 %v17849_v48 }
 0x2ec   : > { %v1363_v34 = vmul.f32 %v12141_v25, %v1352_v44  ;;  %v12155_v60 = vpop.f32.mrb[4].mxu0  ;;  %v1327_v61 = vpop.f32.mrb[9].mxu1  ;;  %4386 = vperm.xlu0 %13816, %v15268_v1  }
 0x2ed   : > { %v1362_v59 = vmul.f32 %v15014_v56, %v1327_v61  ;;  %v1441_v47 = vpop.f32.mrb[5].mxu0  ;;  %v1477_v46 = vmul.f32 %v12155_v60, %v1466_v22  ;;  %v15288_v32 = vpop.permute.xlu1 %2439  ;;  %v17851_v60 = vmov 5  }
 0x2ee   : > { %v1367_v15 = vadd.f32 %v1363_v34, %v1253_v28  ;;  %v1476_v33 = vmul.f32 %v1462_v36, %v1441_v47  ;;  %17850 = vst [vmem:[#allocation48_spill] sm:$0xff] %v15288_v32  ;;  %v1601_v28 = vpop.permute.xlu0 %1600  ;;  %13794 = vset.pattern.permute.xlu1 %v17851_v60 }
 0x2ef   : > { %v1366_v54 = vadd.f32 %v1362_v59, %v1252_v21  ;;  %v12144_v53 = vpop.f32.mrb[10].mxu1  ;;  %4266 = vperm.xlu1 %13794, %v15151_v38  }
 0x2f0   : > { %v1481_v44 = vadd.f32 %v1477_v46, %v1367_v15  ;;  %v1365_v25 = vmul.f32 %v12144_v53, %v15048_v63  ;;  %v12158_v0 = vpop.f32.mrb[6].mxu0  ;;  %v1337_v12 = vpop.f32.mrb[11].mxu1  ;;  %4390 = vperm.xlu0 %13816, %v15207_v58   ;;  %v1974_v53 = vld [vmem:[#allocation8 + $0x70] sm:$0xff] }
 0x2f1   : > { %v1480_v56 = vadd.f32 %v1476_v33, %v1366_v54  ;;  %v1364_v61 = vmul.f32 %v15043_v62, %v1337_v12  ;;  %v1451_v45 = vpop.f32.mrb[7].mxu0  ;;  %v1479_v34 = vmul.f32 %v12158_v0, %v15055_v3  ;;  %v15297_v62 = vpop.permute.xlu1 %2547  ;;  %v1860_v54 = vld [vmem:[#allocation8 + $0x50] sm:$0xff]  ;;  %v17854_v33 = vmov 6  }
 0x2f2   : > { %v1369_v22 = vadd.f32 %v1365_v25, %v1255_v14  ;;  %v1478_v21 = vmul.f32 %v1470_v57, %v1451_v45  ;;  %17852 = vst [vmem:[#allocation49_spill] sm:$0xff] %v15297_v62  ;;  %v17853_v14 = vmov 12   ;;  %v1611_v3 = vpop.permute.xlu0 %1610  ;;  %v1861_v57 = vld [vmem:[#allocation8 + $0x58] sm:$0xff] }
 0x2f3   : > { %v1368_v36 = vadd.f32 %v1364_v61, %v1254_v23  ;;  %13796 = vset.pattern.permute.xlu1 %v17854_v33  ;;  %v1975_v25 = vld [vmem:[#allocation8 + $0x78] sm:$0xff] }
 0x2f4   : > { %v1483_v15 = vadd.f32 %v1479_v34, %v1369_v22  ;;  %v12169_v63 = vpop.f32.mrb[12].mxu1  ;;  %13820 = vset.pattern.permute.xlu0 %v17853_v14  ;;  %4286 = vperm.xlu1 %13796, %v15151_v38  }
 0x2f5   : > { %v1482_v59 = vadd.f32 %v1478_v21, %v1368_v36  ;;  %v1591_v47 = vmul.f32 %v12169_v63, %v15052_v2  ;;  %v1555_v46 = vpop.f32.mrb[13].mxu1  ;;  %4813 = vperm.xlu0 %13820, %v15161_v39   ;;  %v15307_v36 = vpack.c.bf16 %v1861_v57, %v1860_v54  ;;  %v15309_v21 = vpack.c.bf16 %v1975_v25, %v1974_v53 }
 0x2f6   : > { %v1590_v12 = vmul.f32 %v15241_v18, %v1555_v46  ;;  %v17858_v63 = vmov 13   ;;  %v2088_v46 = vld [vmem:[#allocation8 + $0x90] sm:$0xff]  ;;  %v15344_v54 = vpop.permute.xlu0 %1838  ;;  %v17866_v53 = vmov 14  }
 0x2f7   : > { %v1595_v0 = vadd.f32 %v1591_v47, %v1481_v44  ;;  %17855 = vst [vmem:[#allocation50_spill] sm:$0xff] %v15307_v36  ;;  %17856 = vst [vmem:[#allocation51_spill] sm:$0xff] %v15309_v21 }
 0x2f8   : > { %v1594_v45 = vadd.f32 %v1590_v12, %v1480_v56  ;;  %v12172_v23 = vpop.f32.mrb[14].mxu1  ;;  %v15311_v56 = vpop.permute.xlu1 %2551  ;;  %v2089_v12 = vld [vmem:[#allocation8 + $0x98] sm:$0xff]  ;;  %4290 = vperm.xlu1 %13796, %v15191_v40  }
 0x2f9   : > { %v1619_v2 = vadd.f32 %v15068_v6, %v1595_v0  ;;  %v1593_v18 = vmul.f32 %v12172_v23, %v15064_v5  ;;  %v1565_v61 = vpop.f32.mrb[15].mxu1  ;;  %17857 = vst [vmem:[#allocation52_spill] sm:$0xff] %v15311_v56  ;;  %13822 = vset.pattern.permute.xlu0 %v17858_v63  ;;  %v17865_v23 = vmov 7  }
 0x2fa   : > { %v1618_v22 = vadd.f32 %v1601_v28, %v1594_v45  ;;  %v1592_v44 = vmul.f32 %v15060_v4, %v1565_v61  ;;  %v2086_v4 = vld [vmem:[#allocation8 + $0x80] sm:$0xff]  ;;  %v2087_v28 = vld [vmem:[#allocation8 + $0x88] sm:$0xff]  ;;  %4833 = vperm.xlu0 %13822, %v15180_v19   ;;  %v15360_v57 = vpop.permute.xlu0 %1724 }
 0x2fb   : > { %v1597_v34 = vadd.f32 %v1593_v18, %v1483_v15  ;;  %v17868_v18 = vmov 2  }
 0x2fc   : > { %v1596_v47 = vadd.f32 %v1592_v44, %v1482_v59  ;;  %12181 = vmatprep.mubr.msk.f32.mxu0 %vm1020_vm1, %v1618_v22  ;;  %12195 = vmatprep.mubr.msk.f32.mxu1 %vm1020_vm1, %v1618_v22  ;;  %v15316_v6 = vpack.c.bf16 %v1619_v2, %v1618_v22  ;;  %v15333_v0 = vpop.permute.xlu1 %2767 }
 0x2fd   : > { %v1621_v5 = vadd.f32 %v15072_v8, %v1597_v34  ;;  %12182 = vmatmul.mubr.msk.f32.vlgmr.msra.gmra.mrb[8].mxu0 %vm1020_vm1, %v1619_v2  ;;  %12196 = vmatmul.mubr.msk.f32.vlgmr.msra.gmra.mrb[16].mxu1 %vm1020_vm1, %v1619_v2  ;;  %v15327_v8 = vpack.c.bf16 %v2087_v28, %v2086_v4  ;;  %17862 = vst [vmem:[#allocation56_spill] sm:$0xff] %v15333_v0  ;;  %v17871_v34 = vmov 8   ;;  %v17874_v28 = vmov 9  }
 0x2fe   : > { %17859 = vst [vmem:[#allocation53_spill] sm:$0xff] %v15316_v6  ;;  %v1620_v15 = vadd.f32 %v1611_v3, %v1596_v47  ;;  %13118 = vmatpush3.bf16.msra.mxu0 %v15103_v49  ;;  %13126 = vmatpush3.bf16.msra.mxu1 %v15108_v52  ;;  %v15340_v3 = vpack.c.bf16 %v2089_v12, %v2088_v46  ;;  %v15371_v61 = vpop.permute.xlu0 %1732 }
 0x2ff   : > { %13120 = vmatprep.subr.bf16.mxu0 %v15307_v36  ;;  %13128 = vmatprep.subr.bf16.mxu1 %v15309_v21  ;;  %17860 = vst [vmem:[#allocation54_spill] sm:$0xff] %v15327_v8 }
 0x300   : > { %12184 = vmatprep.mubr.msk.f32.mxu0 %vm1020_vm1, %v1620_v15  ;;  %12198 = vmatprep.mubr.msk.f32.mxu1 %vm1020_vm1, %v1620_v15  ;;  %v15329_v59 = vpack.c.bf16 %v1621_v5, %v1620_v15  ;;  %17863 = vst [vmem:[#allocation57_spill] sm:$0xff] %v15340_v3  ;;  %v15351_v45 = vpop.permute.xlu1 %2663 }
 0x301   : > { %12185 = vmatmul.mubr.msk.f32.gmra.mrb[10].mxu0 %vm1020_vm1, %v1621_v5  ;;  %12199 = vmatmul.mubr.msk.f32.gmra.mrb[18].mxu1 %vm1020_vm1, %v1621_v5  ;;  %17864 = vst [vmem:[#allocation58_spill] sm:$0xff] %v15351_v45 }
 0x302   : > { %17861 = vst [vmem:[#allocation55_spill] sm:$0xff] %v15329_v59  ;;  %13122 = vmatpush3.bf16.msra.mxu0 %v15307_v36  ;;  %12209 = vmatprep.mubr.msk.f32.mxu0 %vm1020_vm1, %v1618_v22 }
 0x303   : > { %13130 = vmatpush3.bf16.msra.mxu1 %v15309_v21  ;;  %12223 = vmatprep.mubr.msk.f32.mxu1 %vm1020_vm1, %v1618_v22 }
 0x304   : > { %13132 = vmatprep.subr.bf16.mxu0 %v15327_v8  ;;  %13797 = vset.pattern.permute.xlu1 %v17865_v23  ;;  %v15364_v25 = vpop.permute.xlu1 %2771 }
 0x305   : > { %12210 = vmatmul.mubr.msk.f32.vlgmr.msra.gmra.mrb[12].mxu0 %vm1020_vm1, %v1619_v2  ;;  %4314 = vperm.xlu1 %13797, %v15191_v40   ;;  %17867 = vst [vmem:[#allocation59_spill] sm:$0xff] %v15364_v25 }
 0x306   : > { %12224 = vmatmul.mubr.msk.f32.vlgmr.msra.gmra.mrb[20].mxu1 %vm1020_vm1, %v1619_v2  ;;  %12212 = vmatprep.mubr.msk.f32.mxu0 %vm1020_vm1, %v1620_v15 }
 0x307   : > { %12226 = vmatprep.mubr.msk.f32.mxu1 %vm1020_vm1, %v1620_v15  ;;  %13134 = vmatpush3.bf16.msra.mxu0 %v15327_v8  ;;  %v17877_v8 = vmov 10  }
 0x308   : > { %13136 = vmatprep.subr.bf16.mxu0 %v15340_v3  ;;  %13825 = vset.pattern.permute.xlu0 %v17866_v53 }
 0x309   : > { %12213 = vmatmul.mubr.msk.f32.gmra.mrb[14].mxu0 %vm1020_vm1, %v1621_v5  ;;  %4861 = vperm.xlu0 %13825, %v15161_v39  }
 0x30a   : > { %12227 = vmatmul.mubr.msk.f32.gmra.mrb[22].mxu1 %vm1020_vm1, %v1621_v5  ;;  %12237 = vmatprep.mubr.msk.f32.mxu0 %vm1020_vm1, %v1618_v22  ;;  %v15376_v22 = vpop.permute.xlu1 %2775 }
 0x30b   : > { %13138 = vmatpush3.bf16.msra.mxu0 %v15340_v3  ;;  %13798 = vset.pattern.permute.xlu1 %v17851_v60  ;;  %17869 = vst [vmem:[#allocation60_spill] sm:$0xff] %v15376_v22 }
 0x30c   : > { %4274 = vperm.xlu1 %13798, %v15180_v19  }
 0x30d   : > { %13827 = vset.pattern.permute.xlu0 %v17868_v18 }
 0x30e   : > { %12238 = vmatmul.mubr.msk.f32.vlgmr.msra.gmra.mrb[16].mxu0 %vm1020_vm1, %v1619_v2  ;;  %4881 = vperm.xlu0 %13827, %v15207_v58   ;;  %v15381_v2 = vpop.permute.xlu0 %1736  ;;  %v15383_v44 = vpop.permute.xlu1 %2791 }
 0x30f   : > { %12240 = vmatprep.mubr.msk.f32.mxu0 %vm1020_vm1, %v1620_v15  ;;  %17870 = vst [vmem:[#allocation61_spill] sm:$0xff] %v15383_v44 }
 0x310   : > { %13800 = vset.pattern.permute.xlu1 %v17854_v33 }
 0x311   : > { %4294 = vperm.xlu1 %13800, %v15180_v19  }
 0x312   : > { %12241 = vmatmul.mubr.msk.f32.gmra.mrb[18].mxu0 %vm1020_vm1, %v1621_v5  ;;  %13829 = vset.pattern.permute.xlu0 %v17849_v48  ;;  %v15387_v58 = vpop.permute.xlu0 %1960  ;;  %v15389_v47 = vpop.permute.xlu1 %2799 }
 0x313   : > { %17872 = vst [vmem:[#allocation62_spill] sm:$0xff] %v15389_v47 }
 0x315   : > { %4298 = vperm.xlu1 %13800, %v15161_v39  }
 0x316   : > { %v15393_v5 = vpop.permute.xlu0 %2066  ;;  %v15395_v4 = vpop.permute.xlu1 %2910 }
 0x317   : > { %17873 = vst [vmem:[#allocation63_spill] sm:$0xff] %v15395_v4 }
 0x319   : > { %13801 = vset.pattern.permute.xlu1 %v17871_v34 }
 0x31a   : > { %4338 = vperm.xlu1 %13801, %v15191_v40   ;;  %v15399_v15 = vpop.permute.xlu0 %2074  ;;  %v15402_v46 = vpop.permute.xlu1 %3013 }
 0x31b   : > { %17875 = vst [vmem:[#allocation64_spill] sm:$0xff] %v15402_v46 }
 0x31e   : > { %13802 = vset.pattern.permute.xlu1 %v17865_v23  ;;  %v15406_v12 = vpop.permute.xlu0 %2188  ;;  %v15408_v3 = vpop.permute.xlu1 %3124 }
 0x31f   : > { %4318 = vperm.xlu1 %13802, %v15180_v19   ;;  %17876 = vst [vmem:[#allocation65_spill] sm:$0xff] %v15408_v3 }
 0x322   : > { %v15412_v21 = vpop.permute.xlu0 %2212  ;;  %v15414_v36 = vpop.permute.xlu1 %3128 }
 0x323   : > { %13804 = vset.pattern.permute.xlu1 %v17874_v28  ;;  %17878 = vst [vmem:[#allocation66_spill] sm:$0xff] %v15414_v36 }
 0x324   : > { %4358 = vperm.xlu1 %13804, %v15151_v38  }
 0x326   : > { %v15418_v52 = vpop.permute.xlu0 %2323  ;;  %v15420_v49 = vpop.permute.xlu1 %2918 }
 0x327   : > { %17879 = vst [vmem:[#allocation67_spill] sm:$0xff] %v15420_v49 }
 0x328   : > { %4362 = vperm.xlu1 %13804, %v15191_v40  }
 0x32a   : > { %v15427_v23 = vpop.permute.xlu1 %3021 }
 0x32b   : > { %17881 = vst [vmem:[#allocation69_spill] sm:$0xff] %v15427_v23 }
 0x32c   : > { %13805 = vset.pattern.permute.xlu1 %v17871_v34  ;;  %v15424_v34 = vpop.permute.xlu0 %2543 }
 0x32d   : > { %4346 = vperm.xlu1 %13805, %v15161_v39   ;;  %17880 = vst [vmem:[#allocation68_spill] sm:$0xff] %v15424_v34 }
 0x32e   : > { %v15433_v33 = vpop.permute.xlu1 %3235 }
 0x32f   : > { %17883 = vst [vmem:[#allocation71_spill] sm:$0xff] %v15433_v33 }
 0x330   : > { %v15431_v60 = vpop.permute.xlu0 %2763 }
 0x331   : > { %13806 = vset.pattern.permute.xlu1 %v17877_v8  ;;  %17882 = vst [vmem:[#allocation70_spill] sm:$0xff] %v15431_v60 }
 0x332   : > { %4757 = vperm.xlu1 %13806, %v15151_v38  }
 0x334   : > { %v15437_v59 = vpop.permute.xlu0 %2651 }
 0x335   : > { %17884 = vst [vmem:[#allocation72_spill] sm:$0xff] %v15437_v59 }
 0x336   : > { %13807 = vset.pattern.permute.xlu1 %v17847_v31 }
 0x337   : > { %4777 = vperm.xlu1 %13807, %v15151_v38  }
 0x338   : > { %v15442_v3 = vpop.permute.xlu0 %2655 }
 0x339   : > { %17886 = vst [vmem:[#allocation74_spill] sm:$0xff] %v15442_v3 }
 0x33b   : > { %4781 = vperm.xlu1 %13807, %v15191_v40  }
 0x33c   : > { %v15449_v33 = vpop.permute.xlu0 %2659 }
 0x33d   : > { %17888 = vst [vmem:[#allocation76_spill] sm:$0xff] %v15449_v33 }
 0x33f   : > { %13810 = vset.pattern.permute.xlu1 %v17874_v28  ;;  %v15439_v28 = vpop.permute.xlu1 %3239 }
 0x340   : > { %4370 = vperm.xlu1 %13810, %v15161_v39   ;;  %17885 = vst [vmem:[#allocation73_spill] sm:$0xff] %v15439_v28  ;;  %v15456_v28 = vpop.permute.xlu0 %2787 }
 0x341   : > { %17890 = vst [vmem:[#allocation78_spill] sm:$0xff] %v15456_v28 }
 0x343   : > { %v15445_v36 = vpop.permute.xlu1 %3136 }
 0x344   : > { %13811 = vset.pattern.permute.xlu1 %v17849_v48  ;;  %17887 = vst [vmem:[#allocation75_spill] sm:$0xff] %v15445_v36  ;;  %v15475_v46 = vpop.permute.xlu0 %2795 }
 0x345   : > { %4382 = vperm.xlu1 %13811, %v15258_v37   ;;  %17894 = vst [vmem:[#allocation81_spill] sm:$0xff] %v15475_v46 }
 0x347   : > { %v15452_v23 = vpop.permute.xlu1 %3346 }
 0x348   : > { %17889 = vst [vmem:[#allocation77_spill] sm:$0xff] %v15452_v23  ;;  %v11138_v23 = vld [vmem:[%s17892_s17 + $0x10] sm:$0xff] }
 0x349   : > { %13812 = vset.pattern.permute.xlu1 %v17853_v14 }
 0x34a   : > { %4801 = vperm.xlu1 %13812, %v15151_v38  }
 0x34b   : > { %v15458_v49 = vpop.permute.xlu1 %3243 }
 0x34c   : > { %17891 = vst [vmem:[#allocation79_spill] sm:$0xff] %v15458_v49  ;;  %v11139_v49 = vld [vmem:[%s17892_s17 + $0x18] sm:$0xff] }
 0x34d   : > { %v15477_v4 = vpack.c.bf16 %v11139_v49, %v11138_v23  ;;  %v11144_v49 = vld [vmem:[%s17892_s17 + $0x20] sm:$0xff]  ;;  %v11150_v23 = vld [vmem:[%s17892_s17 + $0x30] sm:$0xff] }
 0x34e   : > { %4805 = vperm.xlu1 %13812, %v15191_v40  }
 0x34f   : > { %17895 = vst [vmem:[#allocation82_spill] sm:$0xff] %v15477_v4  ;;  %v15479_v6 = vpop.permute.xlu1 %3247  ;;  %13144 = vmatprep.subr.bf16.mxu0 %v15477_v4 }
 0x350   : > { %17896 = vst [vmem:[#allocation83_spill] sm:$0xff] %v15479_v6  ;;  %13146 = vmatpush3.bf16.msra.mxu0 %v15477_v4  ;;  %v11151_v4 = vld [vmem:[%s17892_s17 + $0x38] sm:$0xff] }
 0x352   : > { %13813 = vset.pattern.permute.xlu1 %v17877_v8  ;;  %v2220_v8 = vld [vmem:[%s17892_s17 + $0x8] sm:$0xff] }
 0x353   : > { %4769 = vperm.xlu1 %13813, %v15161_v39  }
 0x357   : > { %13814 = vset.pattern.permute.xlu1 %v17847_v31  ;;  %v2219_v31 = vld [vmem:[%s17892_s17] sm:$0xff] }
 0x358   : > { %4785 = vperm.xlu1 %13814, %v15180_v19   ;;  %v15470_v36 = vpack.c.bf16 %v2220_v8, %v2219_v31  ;;  %v15487_v31 = vpop.permute.xlu0 %2906  ;;  %v11145_v8 = vld [vmem:[%s17892_s17 + $0x28] sm:$0xff] }
 0x359   : > { %17897 = vst [vmem:[#allocation84_spill] sm:$0xff] %v15487_v31  ;;  %v15500_v6 = vpack.c.bf16 %v11145_v8, %v11144_v49  ;;  %v15506_v31 = vpack.c.bf16 %v11151_v4, %v11150_v23 }
 0x35a   : > { %17893 = vst [vmem:[#allocation80_spill] sm:$0xff] %v15470_v36  ;;  %13140 = vmatprep.subr.bf16.mxu1 %v15470_v36 }
 0x35b   : > { %13142 = vmatpush3.bf16.msra.mxu1 %v15470_v36  ;;  %v15498_v36 = vpop.permute.xlu1 %3358  ;;  %13152 = vmatprep.subr.bf16.mxu0 %v15506_v31 }
 0x35c   : > { %13817 = vset.pattern.permute.xlu1 %v17858_v63  ;;  %17898 = vst [vmem:[#allocation85_spill] sm:$0xff] %v15498_v36  ;;  %13148 = vmatprep.subr.bf16.mxu1 %v15500_v6  ;;  %v15511_v46 = vpop.permute.xlu0 %2914 }
 0x35d   : > { %4825 = vperm.xlu1 %13817, %v15151_v38   ;;  %17899 = vst [vmem:[#allocation86_spill] sm:$0xff] %v15511_v46 }
 0x35f   : > { %v15514_v49 = vpop.permute.xlu1 %3374 }
 0x360   : > { %17900 = vst [vmem:[#allocation87_spill] sm:$0xff] %v15514_v49  ;;  %v15518_v8 = vpop.permute.xlu0 %3017 }
 0x361   : > { %4829 = vperm.xlu1 %13817, %v15191_v40   ;;  %17901 = vst [vmem:[#allocation88_spill] sm:$0xff] %v15518_v8 }
 0x363   : > { %v15520_v4 = vpop.permute.xlu1 %3378 }
 0x364   : > { %17902 = vst [vmem:[#allocation89_spill] sm:$0xff] %v15520_v4  ;;  %v15524_v23 = vpop.permute.xlu0 %3025 }
 0x365   : > { %13818 = vset.pattern.permute.xlu1 %v17849_v48  ;;  %17903 = vst [vmem:[#allocation90_spill] sm:$0xff] %v15524_v23 }
 0x366   : > { %4394 = vperm.xlu1 %13818, %v15282_v26  }
 0x368   : > { %v15530_v49 = vpop.permute.xlu0 %3132 }
 0x369   : > { %17905 = vst [vmem:[#allocation92_spill] sm:$0xff] %v15530_v49 }
 0x36a   : > { %13819 = vset.pattern.permute.xlu1 %v17853_v14  ;;  %v15526_v14 = vpop.permute.xlu1 %3597 }
 0x36b   : > { %4809 = vperm.xlu1 %13819, %v15180_v19   ;;  %17904 = vst [vmem:[#allocation91_spill] sm:$0xff] %v15526_v14 }
 0x36f   : > { %13821 = vset.pattern.permute.xlu1 %v17866_v53 }
 0x370   : > { %4849 = vperm.xlu1 %13821, %v15151_v38   ;;  %v15532_v38 = vpop.permute.xlu1 %3601 }
 0x371   : > { %17906 = vst [vmem:[#allocation93_spill] sm:$0xff] %v15532_v38 }
 0x374   : > { %4853 = vperm.xlu1 %13821, %v15191_v40   ;;  %v15536_v40 = vpop.permute.xlu0 %3350 }
 0x375   : > { %17907 = vst [vmem:[#allocation94_spill] sm:$0xff] %v15536_v40 }
 0x378   : > { %13823 = vset.pattern.permute.xlu1 %v17858_v63  ;;  %v15540_v63 = vpop.permute.xlu0 %3354 }
 0x379   : > { %4837 = vperm.xlu1 %13823, %v15161_v39   ;;  %v3773_v39 = vpop.permute.xlu1 %3772  ;;  %17908 = vst [vmem:[#allocation95_spill] sm:$0xff] %v15540_v63 }
 0x37d   : > { %13824 = vset.pattern.permute.xlu1 %v17866_v53  ;;  %v3796_v53 = vpop.permute.xlu1 %3795 }
 0x37e   : > { %4857 = vperm.xlu1 %13824, %v15180_v19   ;;  %v15543_v19 = vpop.permute.xlu0 %3370 }
 0x37f   : > { %17909 = vst [vmem:[#allocation96_spill] sm:$0xff] %v15543_v19 }
 0x381   : > { %v3800_v4 = vpop.permute.xlu1 %3799 }
 0x382   : > { %13826 = vset.pattern.permute.xlu1 %v17868_v18  ;;  %v15545_v38 = vpop.permute.xlu0 %3382 }
 0x383   : > { %4873 = vperm.xlu1 %13826, %v15258_v37   ;;  %17910 = vst [vmem:[#allocation97_spill] sm:$0xff] %v15545_v38 }
 0x385   : > { %v3824_v14 = vpop.permute.xlu1 %3823 }
 0x386   : > { %v15547_v36 = vpop.permute.xlu0 %3599 }
 0x387   : > { %4877 = vperm.xlu1 %13826, %v15268_v1   ;;  %17911 = vst [vmem:[#allocation98_spill] sm:$0xff] %v15547_v36 }
 0x389   : > { %v3783_v37 = vpop.permute.xlu1 %3782 }
 0x38a   : > { %v15549_v40 = vpop.permute.xlu0 %3603 }
 0x38b   : > { %4885 = vperm.xlu1 %13826, %v15282_v26   ;;  %17912 = vst [vmem:[#allocation99_spill] sm:$0xff] %v15549_v40 }
 0x38d   : > { %v3804_v1 = vpop.permute.xlu1 %3803 }
 0x38e   : > { %v3820_v49 = vpop.permute.xlu0 %3819 }
 0x38f   : > { %13828 = vset.pattern.permute.xlu1 %v17849_v48 }
 0x391   : > { %v3808_v46 = vpop.permute.xlu1 %3807 }
 0x392   : > { %v15551_v26 = vpop.permute.xlu0 %3831 }
 0x395   : > { %v3848_v63 = vpop.permute.xlu1 %3847 }
 0x396   : > { %v3844_v23 = vpop.permute.xlu0 %3843 }
 0x399   : > { %v15553_v8 = vpop.permute.xlu1 %3827 }
 0x39a   : > { %v15555_v48 = vpop.permute.xlu0 %3851 }
 0x39d   : > { %v15557_v19 = vpop.permute.xlu1 %3867 }
 0x39e   : > { %v15559_v38 = vpop.permute.xlu0 %3879 }
 0x3a1   : > { %v15561_v18 = vpop.permute.xlu1 %3871 }
 0x3a2   : > { %v3778_v36 = vpop.permute.xlu0 %3777 }
 0x3a5   : > { %v3856_v47 = vpop.permute.xlu1 %3855 }
 0x3a6   : > { %v3788_v3 = vpop.permute.xlu0 %3787 }
 0x3a9   : > { %v15567_v13 = vpop.permute.xlu1 %3875 }
 0x3d0   : > { %v12183_v40 = vpop.f32.mrb[8].mxu0  ;;  %v12197_v25 = vpop.f32.mrb[16].mxu1 }
 0x3d1   : > { %v1740_v28 = vmul.f32 %v12183_v40, %v15079_v11  ;;  %v3791_v44 = vmul.f32 %v12183_v40, %v3778_v36  ;;  %v1850_v22 = vmul.f32 %v12197_v25, %v15344_v54  ;;  %v3811_v60 = vmul.f32 %v12197_v25, %v3800_v4  ;;  %v1704_v0 = vpop.f32.mrb[9].mxu0  ;;  %v1814_v33 = vpop.f32.mrb[17].mxu1 }
 0x3d2   : > { %v1739_v62 = vmul.f32 %v15360_v57, %v1704_v0  ;;  %v3790_v45 = vmul.f32 %v3773_v39, %v1704_v0  ;;  %v1849_v56 = vmul.f32 %v15075_v9, %v1814_v33  ;;  %v3810_v59 = vmul.f32 %v3796_v53, %v1814_v33 }
 0x3d3   : > { %v1854_v34 = vadd.f32 %v1850_v22, %v1740_v28  ;;  %v3815_v32 = vadd.f32 %v3811_v60, %v3791_v44 }
 0x3d4   : > { %v1853_v43 = vadd.f32 %v1849_v56, %v1739_v62  ;;  %v3814_v42 = vadd.f32 %v3810_v59, %v3790_v45  ;;  %v12186_v11 = vpop.f32.mrb[10].mxu0  ;;  %v12200_v36 = vpop.f32.mrb[18].mxu1 }
 0x3d5   : > { %v1742_v54 = vmul.f32 %v12186_v11, %v15381_v2  ;;  %v3793_v25 = vmul.f32 %v12186_v11, %v3788_v3  ;;  %v1852_v4 = vmul.f32 %v12200_v36, %v15128_v17  ;;  %v3813_v40 = vmul.f32 %v12200_v36, %v3808_v46  ;;  %v1714_v57 = vpop.f32.mrb[11].mxu0  ;;  %v1824_v0 = vpop.f32.mrb[19].mxu1 }
 0x3d6   : > { %v1741_v9 = vmul.f32 %v15371_v61, %v1714_v57  ;;  %v3792_v33 = vmul.f32 %v3783_v37, %v1714_v57  ;;  %v1851_v53 = vmul.f32 %v15116_v55, %v1824_v0  ;;  %v3812_v60 = vmul.f32 %v3804_v1, %v1824_v0  ;;  %v3893_v1 = vpop.permute.xlu1 %3892 }
 0x3d7   : > { %v1856_v22 = vadd.f32 %v1852_v4, %v1742_v54  ;;  %v3817_v44 = vadd.f32 %v3813_v40, %v3793_v25 }
 0x3d8   : > { %v1855_v62 = vadd.f32 %v1851_v53, %v1741_v9  ;;  %v3816_v56 = vadd.f32 %v3812_v60, %v3792_v33  ;;  %v12211_v59 = vpop.f32.mrb[12].mxu0 }
 0x3d9   : > { %v1964_v45 = vmul.f32 %v12211_v59, %v15105_v51  ;;  %v3835_v2 = vmul.f32 %v12211_v59, %v3824_v14  ;;  %v12225_v3 = vpop.f32.mrb[20].mxu1  ;;  %v1928_v28 = vpop.f32.mrb[13].mxu0 }
 0x3da   : > { %v1963_v17 = vmul.f32 %v15089_v29, %v1928_v28  ;;  %v3834_v46 = vmul.f32 %v3820_v49, %v1928_v28  ;;  %v2042_v39 = vpop.f32.mrb[21].mxu1  ;;  %v2078_v37 = vmul.f32 %v12225_v3, %v15393_v5  ;;  %v3859_v55 = vmul.f32 %v12225_v3, %v3848_v63 }
 0x3db   : > { %v1968_v11 = vadd.f32 %v1964_v45, %v1854_v34  ;;  %v3839_v61 = vadd.f32 %v3835_v2, %v3815_v32  ;;  %v2077_v25 = vmul.f32 %v15121_v10, %v2042_v39  ;;  %v3858_v4 = vmul.f32 %v3844_v23, %v2042_v39  ;;  %v3898_v2 = vpop.permute.xlu1 %3897 }
 0x3dc   : > { %v1967_v36 = vadd.f32 %v1963_v17, %v1853_v43  ;;  %v3838_v54 = vadd.f32 %v3834_v46, %v3814_v42  ;;  %v12214_v40 = vpop.f32.mrb[14].mxu0 }
 0x3dd   : > { %v2082_v51 = vadd.f32 %v2078_v37, %v1968_v11  ;;  %v3863_v14 = vadd.f32 %v3859_v55, %v3839_v61  ;;  %v1966_v57 = vmul.f32 %v12214_v40, %v15387_v58  ;;  %v3837_v29 = vmul.f32 %v12214_v40, %v15551_v26  ;;  %v12228_v49 = vpop.f32.mrb[22].mxu1  ;;  %v1938_v0 = vpop.f32.mrb[15].mxu0 }
 0x3de   : > { %v2081_v34 = vadd.f32 %v2077_v25, %v1967_v36  ;;  %v3862_v32 = vadd.f32 %v3858_v4, %v3838_v54  ;;  %v2080_v5 = vmul.f32 %v12228_v49, %v15399_v15  ;;  %v3861_v63 = vmul.f32 %v12228_v49, %v3856_v47  ;;  %v2052_v9 = vpop.f32.mrb[23].mxu1  ;;  %v3903_v4 = vpop.permute.xlu0 %3902  ;;  %v2806_v49 = vld [vmem:[%s17615_s18] sm:$0xff] }
 0x3df   : > { %v1970_v43 = vadd.f32 %v1966_v57, %v1856_v22  ;;  %v3841_v42 = vadd.f32 %v3837_v29, %v3817_v44  ;;  %v1965_v10 = vmul.f32 %v15137_v24, %v1938_v0  ;;  %v3836_v23 = vmul.f32 %v15553_v8, %v1938_v0  ;;  %v3908_v36 = vpop.permute.xlu1 %3907  ;;  %v11166_v29 = vld [vmem:[%s17615_s18 + $0x8] sm:$0xff] }
 0x3e0   : > { %v2079_v33 = vmul.f32 %v15174_v16, %v2052_v9  ;;  %v3860_v58 = vmul.f32 %v15555_v48, %v2052_v9 }
 0x3e1   : > { %v2084_v53 = vadd.f32 %v2080_v5, %v1970_v43  ;;  %v3865_v26 = vadd.f32 %v3861_v63, %v3841_v42  ;;  %v1969_v60 = vadd.f32 %v1965_v10, %v1855_v62  ;;  %v3840_v59 = vadd.f32 %v3836_v23, %v3816_v56  ;;  %v12239_v45 = vpop.f32.mrb[16].mxu0  ;;  %v11156_v62 = vld [vmem:[%s17892_s17 + $0x40] sm:$0xff]  ;;  %v15653_v5 = vld [vmem:[%s17615_s18 + $0x10] sm:$0xff] }
 0x3e2   : > { %v2192_v15 = vmul.f32 %v12239_v45, %v15163_v30  ;;  %v3883_v47 = vmul.f32 %v12239_v45, %v15561_v18  ;;  %v2156_v22 = vpop.f32.mrb[17].mxu0  ;;  %v11157_v30 = vld [vmem:[%s17892_s17 + $0x48] sm:$0xff]  ;;  %s17940_s17 = sld [smem:[#allocation111_spill]] }
 0x3e3   : > { %v2083_v44 = vadd.f32 %v2079_v33, %v1969_v60  ;;  %v3864_v3 = vadd.f32 %v3860_v58, %v3840_v59  ;;  %v2191_v24 = vmul.f32 %v15146_v35, %v2156_v22  ;;  %v3882_v8 = vmul.f32 %v15557_v19, %v2156_v22 }
 0x3e4   : > { %v2196_v16 = vadd.f32 %v2192_v15, %v2082_v51  ;;  %v3887_v28 = vadd.f32 %v3883_v47, %v3863_v14  ;;  %v15600_v40 = vpack.c.bf16 %v11157_v30, %v11156_v62 }
 0x3e5   : > { %v2195_v48 = vadd.f32 %v2191_v24, %v2081_v34  ;;  %v3886_v17 = vadd.f32 %v3882_v8, %v3862_v32  ;;  %v12242_v46 = vpop.f32.mrb[18].mxu0  ;;  %v15645_v34 = vld [vmem:[%s17615_s18 + $0x18] sm:$0xff] }
 0x3e6   : > { %v2216_v18 = vadd.f32 %v15202_v20, %v2196_v16  ;;  %v3911_v56 = vadd.f32 %v3898_v2, %v3887_v28  ;;  %v2194_v35 = vmul.f32 %v12242_v46, %v15406_v12  ;;  %v3885_v19 = vmul.f32 %v12242_v46, %v15559_v38  ;;  %v2166_v39 = vpop.f32.mrb[19].mxu0  ;;  %17913 = vst [vmem:[#allocation100_spill] sm:$0xff] %v15600_v40 }
 0x3e7   : > { %v2215_v11 = vadd.f32 %v15195_v27, %v2195_v48  ;;  %v3910_v61 = vadd.f32 %v3893_v1, %v3886_v17  ;;  %v2193_v37 = vmul.f32 %v15183_v41, %v2166_v39  ;;  %v3884_v55 = vmul.f32 %v15567_v13, %v2166_v39  ;;  %v17914_v39 = vld [vmem:[#allocation42_spill] sm:$0xff] }
 0x3e8   : > { %v2198_v54 = vadd.f32 %v2194_v35, %v2084_v53  ;;  %v3889_v25 = vadd.f32 %v3885_v19, %v3865_v26  ;;  %v4271_v26 = vpop.permute.xlu0 %4270 }
 0x3e9   : > { %v15602_v20 = vpack.c.bf16 %v3911_v56, %v3910_v61  ;;  %v2197_v51 = vadd.f32 %v2193_v37, %v2083_v44  ;;  %12247 = vmatprep.mubr.msk.f32.mxu1 %vm882_vm0, %v2215_v11  ;;  %12257 = vmatprep.mubr.msk.f32.mxu0 %vm882_vm0, %v2215_v11  ;;  %v3888_v12 = vadd.f32 %v3884_v55, %v3864_v3  ;;  %v17915_v37 = vld [vmem:[#allocation43_spill] sm:$0xff] }
 0x3ea   : > { %v2218_v27 = vadd.f32 %v15412_v21, %v2198_v54  ;;  %v3913_v38 = vadd.f32 %v3908_v36, %v3889_v25  ;;  %12248 = vmatmul.mubr.msk.f32.vlgmr.msra.gmra.mrb[24].mxu1 %vm882_vm0, %v2216_v18  ;;  %12258 = vmatmul.mubr.msk.f32.vlgmr.msra.gmra.mrb[20].mxu0 %vm882_vm0, %v2216_v18  ;;  %v15609_v41 = vpack.c.bf16 %v2216_v18, %v2215_v11 }
 0x3eb   : > { %v2217_v13 = vadd.f32 %v15212_v50, %v2197_v51  ;;  %v3912_v1 = vadd.f32 %v3903_v4, %v3888_v12  ;;  %13150 = vmatpush3.bf16.msra.mxu1 %v15500_v6  ;;  %13154 = vmatpush3.bf16.msra.mxu0 %v15506_v31  ;;  %v4267_v50 = vpop.permute.xlu1 %4266 }
 0x3ec   : > { %13156 = vmatprep.subr.bf16.mxu1 %v15600_v40  ;;  %12293 = vmatprep.subr.mxu0 %v2806_v49  ;;  %v4279_v59 = vpop.permute.xlu0 %4278 }
 0x3ed   : > { %v15615_v14 = vpack.c.bf16 %v3913_v38, %v3912_v1  ;;  %12250 = vmatprep.mubr.msk.f32.mxu1 %vm882_vm0, %v2217_v13  ;;  %12260 = vmatprep.mubr.msk.f32.mxu0 %vm882_vm0, %v2217_v13  ;;  %v15619_v21 = vpack.c.bf16 %v2218_v27, %v2217_v13 }
 0x3ee   : > { %12251 = vmatmul.mubr.msk.f32.gmra.mrb[26].mxu1 %vm882_vm0, %v2218_v27  ;;  %12261 = vmatmul.mubr.msk.f32.gmra.mrb[22].mxu0 %vm882_vm0, %v2218_v27 }
 0x3ef   : > { %12267 = vmatprep.mubr.msk.f32.mxu1 %vm882_vm0, %v2215_v11  ;;  %12277 = vmatprep.mubr.msk.f32.mxu0 %vm882_vm0, %v2215_v11  ;;  %v4287_v57 = vpop.permute.xlu1 %4286 }
 0x3f0   : > { %v4311_v2 = vpop.permute.xlu0 %4310 }
 0x3f2   : > { %12268 = vmatmul.mubr.msk.f32.vlgmr.msra.gmra.mrb[28].mxu1 %vm882_vm0, %v2216_v18  ;;  %12278 = vmatmul.mubr.msk.f32.vlgmr.msra.gmra.mrb[24].mxu0 %vm882_vm0, %v2216_v18 }
 0x3f3   : > { %12270 = vmatprep.mubr.msk.f32.mxu1 %vm882_vm0, %v2217_v13  ;;  %12280 = vmatprep.mubr.msk.f32.mxu0 %vm882_vm0, %v2217_v13  ;;  %v4291_v0 = vpop.permute.xlu1 %4290 }
 0x3f4   : > { %13158 = vmatpush3.bf16.msra.mxu1 %v15600_v40  ;;  %12294 = vmatpush3.msra.mxu0 %v2806_v49  ;;  %v15674_v47 = vpop.permute.xlu0 %4322 }
 0x3f5   : > { %12301 = vmatprep.subr.mxu1 %v11166_v29  ;;  %12309 = vmatprep.subr.mxu0 %v15653_v5 }
 0x3f6   : > { %12271 = vmatmul.mubr.msk.f32.gmra.mrb[30].mxu1 %vm882_vm0, %v2218_v27  ;;  %12281 = vmatmul.mubr.msk.f32.gmra.mrb[26].mxu0 %vm882_vm0, %v2218_v27 }
 0x3f7   : > { %12287 = vmatprep.mubr.msk.f32.mxu1 %vm882_vm0, %v2215_v11  ;;  %v15648_v32 = vpop.permute.xlu1 %4314 }
 0x3f8   : > { %v4335_v44 = vpop.permute.xlu0 %4334 }
 0x3fa   : > { %12288 = vmatmul.mubr.msk.f32.vlgmr.msra.gmra.mrb[32].mxu1 %vm882_vm0, %v2216_v18 }
 0x3fb   : > { %12290 = vmatprep.mubr.msk.f32.mxu1 %vm882_vm0, %v2217_v13  ;;  %12302 = vmatpush3.msra.mxu1 %v11166_v29  ;;  %v4275_v63 = vpop.permute.xlu1 %4274  ;;  %v17917_v29 = vld [vmem:[#allocation48_spill] sm:$0xff] }
 0x3fc   : > { %12317 = vmatprep.subr.mxu1 %v15645_v34  ;;  %v15680_v24 = vpop.permute.xlu0 %4342 }
 0x3fe   : > { %12291 = vmatmul.mubr.msk.f32.gmra.mrb[34].mxu1 %vm882_vm0, %v2218_v27 }
 0x3ff   : > { %v4295_v9 = vpop.permute.xlu1 %4294 }
 0x400   : > { %v15684_v16 = vpop.permute.xlu0 %4366 }
 0x403   : > { %v4299_v43 = vpop.permute.xlu1 %4298 }
 0x404   : > { %v15688_v48 = vpop.permute.xlu0 %4761 }
 0x407   : > { %v15656_v42 = vpop.permute.xlu1 %4338 }
 0x408   : > { %v15696_v51 = vpop.permute.xlu0 %4765 }
 0x40b   : > { %v15658_v10 = vpop.permute.xlu1 %4318 }
 0x40f   : > { %v15660_v23 = vpop.permute.xlu1 %4358 }
 0x413   : > { %v15662_v33 = vpop.permute.xlu1 %4362 }
 0x417   : > { %v15664_v58 = vpop.permute.xlu1 %4346 }
 0x41b   : > { %v15666_v53 = vpop.permute.xlu1 %4757 }
 0x41f   : > { %v15668_v60 = vpop.permute.xlu1 %4777 }
 0x423   : > { %v15670_v45 = vpop.permute.xlu1 %4781 }
 0x427   : > { %v15672_v15 = vpop.permute.xlu1 %4370 }
 0x42b   : > { %v15676_v22 = vpop.permute.xlu1 %4382 }
 0x42f   : > { %v15678_v3 = vpop.permute.xlu1 %4801 }
 0x433   : > { %v15682_v8 = vpop.permute.xlu1 %4805 }
 0x437   : > { %v15686_v28 = vpop.permute.xlu1 %4769 }
 0x43b   : > { %v15694_v4 = vpop.permute.xlu1 %4785 }
 0x4bd   : > { %v12249_v17 = vpop.f32.mrb[24].mxu1  ;;  %v12259_v46 = vpop.f32.mrb[20].mxu0 }
 0x4be   : > { %v2335_v62 = vmul.f32 %v12249_v17, %v15418_v52  ;;  %v4282_v30 = vmul.f32 %v12249_v17, %v4271_v26  ;;  %v2443_v18 = vmul.f32 %v12259_v46, %v15231_v7  ;;  %v4302_v56 = vmul.f32 %v12259_v46, %v4291_v0  ;;  %v2299_v35 = vpop.f32.mrb[25].mxu1  ;;  %v2407_v19 = vpop.f32.mrb[21].mxu0  ;;  %v17916_v7 = vld [vmem:[#allocation47_spill] sm:$0xff]  ;;  %v17918_v17 = vld [vmem:[#allocation45_spill] sm:$0xff] }
 0x4bf   : > { %v2334_v11 = vmul.f32 %v17914_v39, %v2299_v35  ;;  %v4281_v61 = vmul.f32 %v4267_v50, %v2299_v35  ;;  %v2442_v55 = vmul.f32 %v17915_v37, %v2407_v19  ;;  %v4301_v36 = vmul.f32 %v4287_v57, %v2407_v19  ;;  %v17920_v37 = vld [vmem:[#allocation68_spill] sm:$0xff] }
 0x4c0   : > { %v2447_v54 = vadd.f32 %v2443_v18, %v2335_v62  ;;  %v4306_v25 = vadd.f32 %v4302_v56, %v4282_v30  ;;  %v17919_v62 = vld [vmem:[#allocation46_spill] sm:$0xff] }
 0x4c1   : > { %v2446_v12 = vadd.f32 %v2442_v55, %v2334_v11  ;;  %v4305_v52 = vadd.f32 %v4301_v36, %v4281_v61  ;;  %v12252_v27 = vpop.f32.mrb[26].mxu1  ;;  %v12262_v38 = vpop.f32.mrb[22].mxu0 }
 0x4c2   : > { %v2337_v13 = vmul.f32 %v12252_v27, %v17916_v7  ;;  %v4284_v1 = vmul.f32 %v12252_v27, %v4279_v59  ;;  %v2445_v49 = vmul.f32 %v12262_v38, %v17917_v29  ;;  %v4304_v0 = vmul.f32 %v12262_v38, %v4299_v43  ;;  %v2309_v50 = vpop.f32.mrb[27].mxu1  ;;  %v2417_v26 = vpop.f32.mrb[23].mxu0  ;;  %v17921_v27 = vld [vmem:[#allocation44_spill] sm:$0xff] }
 0x4c3   : > { %v2336_v57 = vmul.f32 %v17918_v17, %v2309_v50  ;;  %v4283_v46 = vmul.f32 %v4275_v63, %v2309_v50  ;;  %v2444_v30 = vmul.f32 %v17919_v62, %v2417_v26  ;;  %v4303_v18 = vmul.f32 %v4295_v9, %v2417_v26  ;;  %v15705_v29 = vpop.permute.xlu1 %4825  ;;  %v17922_v9 = vld [vmem:[#allocation74_spill] sm:$0xff]  ;;  %v17923_v17 = vld [vmem:[#allocation72_spill] sm:$0xff] }
 0x4c4   : > { %v2449_v56 = vadd.f32 %v2445_v49, %v2337_v13  ;;  %v4308_v35 = vadd.f32 %v4304_v0, %v4284_v1  ;;  %v15709_v49 = vpop.permute.xlu0 %4789 }
 0x4c5   : > { %v2448_v19 = vadd.f32 %v2444_v30, %v2336_v57  ;;  %v4307_v39 = vadd.f32 %v4303_v18, %v4283_v46  ;;  %v12269_v11 = vpop.f32.mrb[28].mxu1  ;;  %v12279_v61 = vpop.f32.mrb[24].mxu0 }
 0x4c6   : > { %v2555_v55 = vmul.f32 %v12269_v11, %v17920_v37  ;;  %v4326_v59 = vmul.f32 %v12269_v11, %v15648_v32  ;;  %v2519_v36 = vpop.f32.mrb[29].mxu1  ;;  %v2631_v43 = vpop.f32.mrb[25].mxu0  ;;  %v2667_v13 = vmul.f32 %v12279_v61, %v17922_v9  ;;  %v4350_v1 = vmul.f32 %v12279_v61, %v15656_v42  ;;  %v17925_v42 = vld [vmem:[#allocation58_spill] sm:$0xff] }
 0x4c7   : > { %v2554_v38 = vmul.f32 %v17921_v27, %v2519_v36  ;;  %v4325_v7 = vmul.f32 %v4311_v2, %v2519_v36  ;;  %v2666_v57 = vmul.f32 %v17923_v17, %v2631_v43  ;;  %v4349_v32 = vmul.f32 %v4335_v44, %v2631_v43  ;;  %v17924_v2 = vld [vmem:[#allocation52_spill] sm:$0xff]  ;;  %v17926_v27 = vld [vmem:[#allocation49_spill] sm:$0xff] }
 0x4c8   : > { %v2559_v63 = vadd.f32 %v2555_v55, %v2447_v54  ;;  %v4330_v50 = vadd.f32 %v4326_v59, %v4306_v25  ;;  %v17928_v17 = vld [vmem:[#allocation56_spill] sm:$0xff] }
 0x4c9   : > { %v2558_v0 = vadd.f32 %v2554_v38, %v2446_v12  ;;  %v4329_v26 = vadd.f32 %v4325_v7, %v4305_v52  ;;  %v12272_v46 = vpop.f32.mrb[30].mxu1  ;;  %v12282_v62 = vpop.f32.mrb[26].mxu0  ;;  %v17927_v38 = vld [vmem:[#allocation76_spill] sm:$0xff] }
 0x4ca   : > { %v2671_v30 = vadd.f32 %v2667_v13, %v2559_v63  ;;  %v4354_v18 = vadd.f32 %v4350_v1, %v4330_v50  ;;  %v2557_v11 = vmul.f32 %v12272_v46, %v17924_v2  ;;  %v4328_v54 = vmul.f32 %v12272_v46, %v15674_v47  ;;  %v2529_v25 = vpop.f32.mrb[31].mxu1  ;;  %v2641_v37 = vpop.f32.mrb[27].mxu0 }
 0x4cb   : > { %v2670_v55 = vadd.f32 %v2666_v57, %v2558_v0  ;;  %v4353_v59 = vadd.f32 %v4349_v32, %v4329_v26  ;;  %v2669_v61 = vmul.f32 %v12282_v62, %v17925_v42  ;;  %v4352_v12 = vmul.f32 %v12282_v62, %v15664_v58  ;;  %v15720_v47 = vpop.permute.xlu1 %4829  ;;  %v4387_v32 = vpop.permute.xlu0 %4386 }
 0x4cc   : > { %v2561_v52 = vadd.f32 %v2557_v11, %v2449_v56  ;;  %v4332_v36 = vadd.f32 %v4328_v54, %v4308_v35  ;;  %v2556_v44 = vmul.f32 %v17926_v27, %v2529_v25  ;;  %v4327_v43 = vmul.f32 %v15658_v10, %v2529_v25  ;;  %v17929_v35 = vld [vmem:[#allocation70_spill] sm:$0xff] }
 0x4cd   : > { %v2668_v7 = vmul.f32 %v17927_v38, %v2641_v37  ;;  %v4351_v63 = vmul.f32 %v15680_v24, %v2641_v37  ;;  %v12289_v50 = vpop.f32.mrb[32].mxu1  ;;  %v17930_v37 = vld [vmem:[#allocation60_spill] sm:$0xff]  ;;  %v11181_v38 = vld [vmem:[%s17615_s18 + $0x20] sm:$0xff] }
 0x4ce   : > { %v2673_v9 = vadd.f32 %v2669_v61, %v2561_v52  ;;  %v4356_v13 = vadd.f32 %v4352_v12, %v4332_v36  ;;  %v2560_v1 = vadd.f32 %v2556_v44, %v2448_v19  ;;  %v4331_v0 = vadd.f32 %v4327_v43, %v4307_v39  ;;  %v2743_v26 = vpop.f32.mrb[33].mxu1  ;;  %v17931_v61 = vld [vmem:[#allocation61_spill] sm:$0xff]  ;;  %v17932_v12 = vld [vmem:[#allocation78_spill] sm:$0xff] }
 0x4cf   : > { %v2779_v58 = vmul.f32 %v12289_v50, %v17928_v17  ;;  %v4374_v56 = vmul.f32 %v12289_v50, %v15662_v33  ;;  %v2778_v57 = vmul.f32 %v17929_v35, %v2743_v26  ;;  %v4373_v10 = vmul.f32 %v15660_v23, %v2743_v26  ;;  %v4395_v27 = vpop.permute.xlu1 %4394  ;;  %v3394_v35 = vld [vmem:[%s17936_s16 + $0x8] sm:$0xff] }
 0x4d0   : > { %v2672_v46 = vadd.f32 %v2668_v7, %v2560_v1  ;;  %v4355_v62 = vadd.f32 %v4351_v63, %v4331_v0  ;;  %v17934_v7 = vld [vmem:[#allocation62_spill] sm:$0xff] }
 0x4d1   : > { %v2783_v24 = vadd.f32 %v2779_v58, %v2671_v30  ;;  %v2782_v2 = vadd.f32 %v2778_v57, %v2670_v55  ;;  %v4377_v11 = vadd.f32 %v4373_v10, %v4353_v59  ;;  %v4378_v54 = vadd.f32 %v4374_v56, %v4354_v18  ;;  %v12292_v25 = vpop.f32.mrb[34].mxu1  ;;  %v17933_v30 = vld [vmem:[#allocation59_spill] sm:$0xff]  ;;  %v3393_v58 = vld [vmem:[%s17936_s16] sm:$0xff]  ;;  %v3395_v57 = vld [vmem:[%s17936_s16 + $0x10] sm:$0xff] }
 0x4d2   : > { %v2781_v19 = vmul.f32 %v12292_v25, %v17930_v37  ;;  %v4376_v39 = vmul.f32 %v12292_v25, %v15672_v15  ;;  %v2753_v42 = vpop.f32.mrb[35].mxu1  ;;  %v4391_v15 = vpop.permute.xlu0 %4390  ;;  %v3396_v10 = vld [vmem:[%s17936_s16 + $0x18] sm:$0xff]  ;;  %v3726_v25 = vld [vmem:[%s17940_s17] sm:$0xff]  ;;  %v3727_v37 = vld [vmem:[%s17940_s17 + $0x8] sm:$0xff] }
 0x4d3   : > { %v2803_v33 = vadd.f32 %v17931_v61, %v2783_v24  ;;  %v2802_v52 = vadd.f32 %v17932_v12, %v2782_v2  ;;  %v4397_v23 = vadd.f32 %v15676_v22, %v4377_v11  ;;  %v4398_v36 = vadd.f32 %v4387_v32, %v4378_v54  ;;  %v17938_v32 = vld [vmem:[#allocation53_spill] sm:$0xff]  ;;  %v11203_v24 = vld [vmem:[%s17936_s16 + $0x28] sm:$0xff]  ;;  %v11204_v2 = vld [vmem:[%s17936_s16 + $0x30] sm:$0xff] }
 0x4d4   : > { %v2785_v44 = vadd.f32 %v2781_v19, %v2673_v9  ;;  %v2780_v55 = vmul.f32 %v17933_v30, %v2753_v42  ;;  %v4375_v18 = vmul.f32 %v15684_v16, %v2753_v42  ;;  %v4380_v59 = vadd.f32 %v4376_v39, %v4356_v13  ;;  %v17935_v16 = vld [vmem:[#allocation81_spill] sm:$0xff]  ;;  %v3698_v54 = vld [vmem:[%s17939_s2] sm:$0xff]  ;;  %v3699_v39 = vld [vmem:[%s17939_s2 + $0x8] sm:$0xff] }
 0x4d5   : > { %v15733_v43 = vpack.c.bf16 %v4398_v36, %v4397_v23  ;;  %12295 = vmatprep.mubr.msk.f32.mxu0 %vm2807_vm6, %v2802_v52  ;;  %12303 = vmatprep.mubr.msk.f32.mxu1 %vm2807_vm6, %v2802_v52  ;;  %v15740_v22 = vpack.c.bf16 %v2803_v33, %v2802_v52  ;;  %v11205_v11 = vld [vmem:[%s17936_s16 + $0x38] sm:$0xff]  ;;  %v3700_v42 = vld [vmem:[%s17939_s2 + $0x10] sm:$0xff]  ;;  %v17941_v12 = vmov 2   ;;  %v17943_v23 = vmov 0   ;;  %v15844_v36 = vpop.permute.xlu1 %4809 }
 0x4d6   : > { %v2805_v63 = vadd.f32 %v17934_v7, %v2785_v44  ;;  %v2784_v50 = vadd.f32 %v2780_v55, %v2672_v46  ;;  %v4400_v9 = vadd.f32 %v4395_v27, %v4380_v59  ;;  %v4379_v1 = vadd.f32 %v4375_v18, %v4355_v62  ;;  %12296 = vmatmul.mubr.msk.f32.vlgmr.msra.gmra.mrb[28].mxu0 %vm2807_vm6, %v2803_v33  ;;  %v11202_v46 = vld [vmem:[%s17936_s16 + $0x20] sm:$0xff]  ;;  %v4021_v62 = vld [vmem:[#allocation11] sm:$0xff]  ;;  %v3701_v19 = vld [vmem:[%s17939_s2 + $0x18] sm:$0xff] }
 0x4d7   : > { %12304 = vmatmul.mubr.msk.f32.vlgmr.msra.gmra.mrb[36].mxu1 %vm2807_vm6, %v2803_v33  ;;  %12310 = vmatpush3.msra.mxu0 %v15653_v5  ;;  %v3495_v5 = vld [vmem:[#allocation10 + $0x8] sm:$0xff]  ;;  %v3729_v61 = vld [vmem:[%s17940_s17 + $0x18] sm:$0xff] }
 0x4d8   : > { %v2804_v13 = vadd.f32 %v17935_v16, %v2784_v50  ;;  %v4399_v0 = vadd.f32 %v4391_v15, %v4379_v1  ;;  %12318 = vmatpush3.msra.mxu1 %v15645_v34  ;;  %12325 = vmatprep.subr.mxu0 %v11181_v38  ;;  %v3494_v34 = vld [vmem:[#allocation10] sm:$0xff]  ;;  %v17944_v18 = vld [vmem:[#allocation63_spill] sm:$0xff]  ;;  %v17946_v1 = vld [vmem:[#allocation84_spill] sm:$0xff] }
 0x4d9   : > { %13160 = vmatprep.subr.bf16.mxu1 %v15609_v41  ;;  %v15768_v56 = vpack.c.bf16 %v3495_v5, %v3494_v34  ;;  %4218 = vperm.xlu1 %13828, %v3698_v54   ;;  %v15846_v27 = vpop.permute.xlu1 %4849  ;;  %v17947_v5 = vld [vmem:[#allocation64_spill] sm:$0xff] }
 0x4da   : > { %v15749_v26 = vpack.c.bf16 %v4400_v9, %v4399_v0  ;;  %12298 = vmatprep.mubr.msk.f32.mxu0 %vm2807_vm6, %v2804_v13  ;;  %12306 = vmatprep.mubr.msk.f32.mxu1 %vm2807_vm6, %v2804_v13  ;;  %v15753_v17 = vpack.c.bf16 %v2805_v63, %v2804_v13 }
 0x4db   : > { %12299 = vmatmul.mubr.msk.f32.gmra.mrb[30].mxu0 %vm2807_vm6, %v2805_v63  ;;  %12307 = vmatmul.mubr.msk.f32.gmra.mrb[38].mxu1 %vm2807_vm6, %v2805_v63  ;;  %17937 = vst [vmem:[#allocation42_spill] sm:$0xff] %v15768_v56 }
 0x4dc   : > { %12311 = vmatprep.mubr.msk.f32.mxu0 %vm2807_vm6, %v2802_v52  ;;  %12319 = vmatprep.mubr.msk.f32.mxu1 %vm2807_vm6, %v2802_v52 }
 0x4dd   : > { %4242 = vperm.xlu1 %13828, %v3726_v25   ;;  %4222 = vperm.xlu0 %13829, %v3699_v39   ;;  %v15848_v44 = vpop.permute.xlu1 %4853 }
 0x4df   : > { %12312 = vmatmul.mubr.msk.f32.vlgmr.msra.gmra.mrb[32].mxu0 %vm2807_vm6, %v2803_v33  ;;  %12320 = vmatmul.mubr.msk.f32.vlgmr.msra.gmra.mrb[40].mxu1 %vm2807_vm6, %v2803_v33 }
 0x4e0   : > { %13162 = vmatpush3.bf16.msra.mxu1 %v15609_v41  ;;  %12314 = vmatprep.mubr.msk.f32.mxu0 %vm2807_vm6, %v2804_v13 }
 0x4e1   : > { %12322 = vmatprep.mubr.msk.f32.mxu1 %vm2807_vm6, %v2804_v13  ;;  %13164 = vmatprep.subr.bf16.mxu1 %v15619_v21  ;;  %v15850_v30 = vpop.permute.xlu1 %4837 }
 0x4e2   : > { %12326 = vmatpush3.msra.mxu0 %v11181_v38  ;;  %4246 = vperm.xlu1 %13828, %v3727_v37  }
 0x4e3   : > { %12315 = vmatmul.mubr.msk.f32.gmra.mrb[34].mxu0 %vm2807_vm6, %v2805_v63  ;;  %12323 = vmatmul.mubr.msk.f32.gmra.mrb[42].mxu1 %vm2807_vm6, %v2805_v63 }
 0x4e4   : > { %13166 = vmatpush3.bf16.msra.mxu1 %v15619_v21  ;;  %12327 = vmatprep.mubr.msk.f32.mxu0 %vm2807_vm6, %v2802_v52  ;;  %v17942_v52 = vmov 3  }
 0x4e5   : > { %13180 = vmatprep.subr.bf16.mxu1 %v15740_v22  ;;  %12341 = vmatprep.mubr.msk.f32.mxu1 %vm1020_vm1, %v3393_v58  ;;  %v15858_v34 = vpop.permute.xlu1 %4857 }
 0x4e6   : > { %13168 = vmatprep.subr.bf16.mxu0 %v15768_v56  ;;  %4230 = vperm.xlu1 %13828, %v3701_v19  }
 0x4e7   : > { %12328 = vmatmul.mubr.msk.f32.vlgmr.msra.gmra.mrb[36].mxu0 %vm2807_vm6, %v2803_v33  ;;  %12342 = vmatmul.mubr.msk.f32.vlgmr.msra.gmra.mrb[44].mxu1 %vm1020_vm1, %v3394_v35  ;;  %v3728_v33 = vld [vmem:[%s17940_s17 + $0x10] sm:$0xff] }
 0x4e8   : > { %13170 = vmatpush3.bf16.msra.mxu0 %v15768_v56  ;;  %13182 = vmatpush3.bf16.msra.mxu1 %v15740_v22 }
 0x4e9   : > { %12330 = vmatprep.mubr.msk.f32.mxu0 %vm2807_vm6, %v2804_v13  ;;  %13172 = vmatprep.subr.bf16.mxu0 %v17938_v32 }
 0x4ea   : > { %13184 = vmatprep.subr.bf16.mxu1 %v15753_v17  ;;  %12344 = vmatprep.mubr.msk.f32.mxu1 %vm1020_vm1, %v3395_v57 }
 0x4eb   : > { %12331 = vmatmul.mubr.msk.f32.gmra.mrb[38].mxu0 %vm2807_vm6, %v2805_v63  ;;  %12345 = vmatmul.mubr.msk.f32.gmra.mrb[46].mxu1 %vm1020_vm1, %v3396_v10  ;;  %v17945_v63 = vld [vmem:[#allocation88_spill] sm:$0xff] }
 0x4ec   : > { %13186 = vmatpush3.bf16.msra.mxu1 %v15753_v17  ;;  %12379 = vmatprep.mubr.msk.f32.mxu1 %vm1020_vm1, %v11202_v46 }
 0x4ed   : > { %12385 = vmatprep.subr.mxu1 %v4021_v62  ;;  %4226 = vperm.xlu0 %13829, %v3700_v42  }
 0x4ee   : > { %4254 = vperm.xlu1 %13828, %v3729_v61  }
 0x4ef   : > { %12380 = vmatmul.mubr.msk.f32.vlgmr.msra.gmra.mrb[48].mxu1 %vm1020_vm1, %v11203_v24 }
 0x4f0   : > { %12386 = vmatpush3.msra.mxu1 %v4021_v62  ;;  %12382 = vmatprep.mubr.msk.f32.mxu1 %vm1020_vm1, %v11204_v2 }
 0x4f1   : > { %13188 = vmatprep.subr.bf16.mxu1 %v15602_v20  ;;  %4250 = vperm.xlu0 %13829, %v3728_v33  }
 0x4f2   : > { %13831 = vset.pattern.permute.xlu1 %v17941_v12 }
 0x4f3   : > { %12383 = vmatmul.mubr.msk.f32.gmra.mrb[50].mxu1 %vm1020_vm1, %v11205_v11  ;;  %4713 = vperm.xlu1 %13831, %v3699_v39   ;;  %v17948_v11 = vld [vmem:[#allocation67_spill] sm:$0xff] }
 0x4f5   : > { %13830 = vset.pattern.permute.xlu0 %v17941_v12 }
 0x4f6   : > { %4709 = vperm.xlu0 %13830, %v3698_v54  }
 0x4f7   : > { %4733 = vperm.xlu1 %13831, %v3726_v25  }
 0x4fa   : > { %4737 = vperm.xlu0 %13830, %v3727_v37  }
 0x4fb   : > { %4717 = vperm.xlu1 %13831, %v3700_v42  }
 0x4fe   : > { %4721 = vperm.xlu0 %13830, %v3701_v19  }
 0x4ff   : > { %4741 = vperm.xlu1 %13831, %v3728_v33  }
 0x502   : > { %4745 = vperm.xlu0 %13830, %v3729_v61  }
 0x503   : > { %13832 = vset.pattern.permute.xlu1 %v17942_v52 }
 0x504   : > { %4898 = vperm.xlu1 %13832, %v3698_v54  }
 0x506   : > { %13833 = vset.pattern.permute.xlu0 %v17942_v52 }
 0x507   : > { %4902 = vperm.xlu0 %13833, %v3699_v39  }
 0x508   : > { %5015 = vperm.xlu1 %13832, %v3726_v25  }
 0x50b   : > { %4906 = vperm.xlu0 %13833, %v3700_v42  }
 0x50c   : > { %5019 = vperm.xlu1 %13832, %v3727_v37  }
 0x50f   : > { %5023 = vperm.xlu0 %13833, %v3728_v33  }
 0x510   : > { %4910 = vperm.xlu1 %13832, %v3701_v19  }
 0x513   : > { %13834 = vset.pattern.permute.xlu0 %v17943_v23 }
 0x514   : > { %5027 = vperm.xlu1 %13832, %v3729_v61   ;;  %3704 = vperm.xlu0 %13834, %v3698_v54  }
 0x518   : > { %13835 = vset.pattern.permute.xlu1 %v17943_v23  ;;  %3741 = vperm.xlu0 %13834, %v3727_v37  }
 0x519   : > { %3709 = vperm.xlu1 %13835, %v3699_v39  }
 0x51c   : > { %3719 = vperm.xlu0 %13834, %v3701_v19  }
 0x51d   : > { %3736 = vperm.xlu1 %13835, %v3726_v25   ;;  %v17949_v25 = vld [vmem:[#allocation90_spill] sm:$0xff] }
 0x520   : > { %3751 = vperm.xlu0 %13834, %v3729_v61  }
 0x521   : > { %3714 = vperm.xlu1 %13835, %v3700_v42   ;;  %v17950_v42 = vld [vmem:[#allocation86_spill] sm:$0xff] }
 0x525   : > { %3746 = vperm.xlu1 %13835, %v3728_v33   ;;  %v17951_v33 = vld [vmem:[#allocation69_spill] sm:$0xff] }
 0x5a9   : > { %v12297_v55 = vpop.f32.mrb[28].mxu0 }
 0x5aa   : > { %v2922_v59 = vmul.f32 %v12297_v55, %v17944_v18  ;;  %v4773_v15 = vmul.f32 %v12297_v55, %v15688_v48  ;;  %v12305_v38 = vpop.f32.mrb[36].mxu1  ;;  %v2886_v7 = vpop.f32.mrb[29].mxu0 }
 0x5ab   : > { %v3029_v50 = vmul.f32 %v12305_v38, %v17945_v63  ;;  %v4793_v9 = vmul.f32 %v12305_v38, %v15670_v45  ;;  %v2921_v16 = vmul.f32 %v17946_v1, %v2886_v7  ;;  %v4772_v13 = vmul.f32 %v15666_v53, %v2886_v7  ;;  %v2993_v0 = vpop.f32.mrb[37].mxu1  ;;  %v4814_v48 = vpop.permute.xlu0 %4813 }
 0x5ac   : > { %v3028_v58 = vmul.f32 %v17947_v5, %v2993_v0  ;;  %v4792_v35 = vmul.f32 %v15668_v60, %v2993_v0  ;;  %v15870_v38 = vpop.permute.xlu1 %4873  ;;  %v17953_v0 = vld [vmem:[#allocation65_spill] sm:$0xff] }
 0x5ad   : > { %v3033_v57 = vadd.f32 %v3029_v50, %v2922_v59  ;;  %v4797_v10 = vadd.f32 %v4793_v9, %v4773_v15  ;;  %v17952_v9 = vld [vmem:[#allocation66_spill] sm:$0xff] }
 0x5ae   : > { %v3032_v46 = vadd.f32 %v3028_v58, %v2921_v16  ;;  %v4796_v62 = vadd.f32 %v4792_v35, %v4772_v13  ;;  %v12300_v24 = vpop.f32.mrb[30].mxu0  ;;  %v12308_v2 = vpop.f32.mrb[38].mxu1  ;;  %v17954_v35 = vld [vmem:[#allocation73_spill] sm:$0xff] }
 0x5af   : > { %v2924_v45 = vmul.f32 %v12300_v24, %v17948_v11  ;;  %v4775_v54 = vmul.f32 %v12300_v24, %v15686_v28  ;;  %v3031_v53 = vmul.f32 %v12308_v2, %v17949_v25  ;;  %v4795_v37 = vmul.f32 %v12308_v2, %v15709_v49  ;;  %v2896_v19 = vpop.f32.mrb[31].mxu0  ;;  %v3003_v39 = vpop.f32.mrb[39].mxu1  ;;  %v17955_v25 = vld [vmem:[#allocation71_spill] sm:$0xff] }
 0x5b0   : > { %v2923_v61 = vmul.f32 %v17950_v42, %v2896_v19  ;;  %v4774_v60 = vmul.f32 %v15696_v51, %v2896_v19  ;;  %v3030_v55 = vmul.f32 %v17951_v33, %v3003_v39  ;;  %v4794_v18 = vmul.f32 %v15694_v4, %v3003_v39  ;;  %v4834_v11 = vpop.permute.xlu0 %4833 }
 0x5b1   : > { %v3035_v59 = vadd.f32 %v3031_v53, %v2924_v45  ;;  %v4799_v15 = vadd.f32 %v4795_v37, %v4775_v54 }
 0x5b2   : > { %v3034_v7 = vadd.f32 %v3030_v55, %v2923_v61  ;;  %v4798_v28 = vadd.f32 %v4794_v18, %v4774_v60  ;;  %v12313_v63 = vpop.f32.mrb[32].mxu0  ;;  %v12321_v50 = vpop.f32.mrb[40].mxu1  ;;  %v17956_v61 = vld [vmem:[#allocation75_spill] sm:$0xff] }
 0x5b3   : > { %v3140_v49 = vmul.f32 %v12313_v63, %v17952_v9  ;;  %v4817_v1 = vmul.f32 %v12313_v63, %v15682_v8  ;;  %v3104_v16 = vpop.f32.mrb[33].mxu0  ;;  %v3215_v13 = vpop.f32.mrb[41].mxu1  ;;  %v3251_v24 = vmul.f32 %v12321_v50, %v17954_v35  ;;  %v4841_v2 = vmul.f32 %v12321_v50, %v15720_v47  ;;  %v17957_v18 = vld [vmem:[#allocation83_spill] sm:$0xff]  ;;  %v17958_v50 = vld [vmem:[#allocation92_spill] sm:$0xff] }
 0x5b4   : > { %v3139_v51 = vmul.f32 %v17953_v0, %v3104_v16  ;;  %v4816_v5 = vmul.f32 %v15678_v3, %v3104_v16  ;;  %v3250_v53 = vmul.f32 %v17955_v25, %v3215_v13  ;;  %v4840_v37 = vmul.f32 %v15705_v29, %v3215_v13 }
 0x5b5   : > { %v3144_v58 = vadd.f32 %v3140_v49, %v3033_v57  ;;  %v4821_v4 = vadd.f32 %v4817_v1, %v4797_v10  ;;  %v4878_v49 = vpop.permute.xlu1 %4877  ;;  %v17959_v1 = vld [vmem:[#allocation79_spill] sm:$0xff] }
 0x5b6   : > { %v3143_v45 = vadd.f32 %v3139_v51, %v3032_v46  ;;  %v4820_v54 = vadd.f32 %v4816_v5, %v4796_v62  ;;  %v12316_v8 = vpop.f32.mrb[34].mxu0  ;;  %v12324_v19 = vpop.f32.mrb[42].mxu1 }
 0x5b7   : > { %v3255_v39 = vadd.f32 %v3251_v24, %v3144_v58  ;;  %v4845_v42 = vadd.f32 %v4841_v2, %v4821_v4  ;;  %v3142_v60 = vmul.f32 %v12316_v8, %v17956_v61  ;;  %v4819_v3 = vmul.f32 %v12316_v8, %v4814_v48  ;;  %v3114_v57 = vpop.f32.mrb[35].mxu0  ;;  %v3225_v10 = vpop.f32.mrb[43].mxu1  ;;  %v17960_v2 = vld [vmem:[#allocation94_spill] sm:$0xff] }
 0x5b8   : > { %v3254_v33 = vadd.f32 %v3250_v53, %v3143_v45  ;;  %v4844_v55 = vadd.f32 %v4840_v37, %v4820_v54  ;;  %v3253_v47 = vmul.f32 %v12324_v19, %v17957_v18  ;;  %v4843_v46 = vmul.f32 %v12324_v19, %v15850_v30  ;;  %v4862_v54 = vpop.permute.xlu0 %4861 }
 0x5b9   : > { %v3146_v62 = vadd.f32 %v3142_v60, %v3035_v59  ;;  %v4823_v63 = vadd.f32 %v4819_v3, %v4799_v15  ;;  %v3141_v9 = vmul.f32 %v17958_v50, %v3114_v57  ;;  %v4818_v29 = vmul.f32 %v15844_v36, %v3114_v57  ;;  %v17961_v15 = vld [vmem:[#allocation77_spill] sm:$0xff]  ;;  %v17963_v3 = vld [vmem:[#allocation55_spill] sm:$0xff] }
 0x5ba   : > { %v3252_v16 = vmul.f32 %v17959_v1, %v3225_v10  ;;  %v4842_v13 = vmul.f32 %v4834_v11, %v3225_v10  ;;  %v12329_v0 = vpop.f32.mrb[36].mxu0  ;;  %v12343_v48 = vpop.f32.mrb[44].mxu1  ;;  %v17964_v10 = vld [vmem:[#allocation87_spill] sm:$0xff] }
 0x5bb   : > { %v3257_v51 = vadd.f32 %v3253_v47, %v3146_v62  ;;  %v4847_v5 = vadd.f32 %v4843_v46, %v4823_v63  ;;  %v3145_v58 = vadd.f32 %v3141_v9, %v3034_v7  ;;  %v4822_v4 = vadd.f32 %v4818_v29, %v4798_v28  ;;  %v3326_v35 = vpop.f32.mrb[37].mxu0  ;;  %v3475_v24 = vpop.f32.mrb[45].mxu1  ;;  %v17965_v47 = vld [vmem:[#allocation96_spill] sm:$0xff]  ;;  %v17967_v29 = vld [vmem:[#allocation91_spill] sm:$0xff] }
 0x5bc   : > { %v3362_v30 = vmul.f32 %v12329_v0, %v17960_v2  ;;  %v4865_v59 = vmul.f32 %v12329_v0, %v15848_v44  ;;  %v3361_v45 = vmul.f32 %v17961_v15, %v3326_v35  ;;  %v4864_v36 = vmul.f32 %v15846_v27, %v3326_v35  ;;  %12351 = vmatprep.mubr.msk.f32.mxu0 %vm882_vm0, %v3475_v24  ;;  %v17962_v44 = vld [vmem:[#allocation85_spill] sm:$0xff]  ;;  %v17970_v35 = vld [vmem:[#allocation98_spill] sm:$0xff] }
 0x5bd   : > { %v3256_v11 = vadd.f32 %v3252_v16, %v3145_v58  ;;  %v4846_v25 = vadd.f32 %v4842_v13, %v4822_v4  ;;  %12352 = vmatmul.mubr.msk.f32.vlgmr.msra.gmra.mrb[40].mxu0 %vm882_vm0, %v12343_v48  ;;  %v17968_v16 = vld [vmem:[#allocation97_spill] sm:$0xff] }
 0x5be   : > { %v3366_v53 = vadd.f32 %v3362_v30, %v3255_v39  ;;  %v3365_v7 = vadd.f32 %v3361_v45, %v3254_v33  ;;  %v4868_v28 = vadd.f32 %v4864_v36, %v4844_v55  ;;  %13174 = vmatpush3.bf16.msra.mxu0 %v17938_v32  ;;  %v4869_v37 = vadd.f32 %v4865_v59, %v4845_v42  ;;  %v12332_v8 = vpop.f32.mrb[38].mxu0  ;;  %v12346_v19 = vpop.f32.mrb[46].mxu1  ;;  %v17966_v55 = vld [vmem:[#allocation95_spill] sm:$0xff]  ;;  %v17971_v30 = vld [vmem:[#allocation93_spill] sm:$0xff]  ;;  %v11222_v45 = vld [vmem:[%s17936_s16 + $0x40] sm:$0xff] }
 0x5bf   : > { %v3364_v61 = vmul.f32 %v12332_v8, %v17962_v44  ;;  %v4867_v60 = vmul.f32 %v12332_v8, %v4862_v54  ;;  %13176 = vmatprep.subr.bf16.mxu0 %v17963_v3  ;;  %v3336_v27 = vpop.f32.mrb[39].mxu0  ;;  %v3485_v57 = vpop.f32.mrb[47].mxu1  ;;  %v17972_v36 = vld [vmem:[#allocation99_spill] sm:$0xff]  ;;  %v11242_v8 = vld [vmem:[%s17837_s4 + $0x78] sm:$0xff] }
 0x5c0   : > { %v3386_v18 = vadd.f32 %v17964_v10, %v3366_v53  ;;  %v3385_v46 = vadd.f32 %v17965_v47, %v3365_v7  ;;  %v4888_v39 = vadd.f32 %v15870_v38, %v4868_v28  ;;  %v4889_v33 = vadd.f32 %v4878_v49, %v4869_v37  ;;  %12354 = vmatprep.mubr.msk.f32.mxu0 %vm882_vm0, %v3485_v57  ;;  %v4886_v32 = vpop.permute.xlu1 %4885  ;;  %v4882_v38 = vpop.permute.xlu0 %4881  ;;  %v11223_v54 = vld [vmem:[%s17936_s16 + $0x48] sm:$0xff]  ;;  %v11200_v53 = vld [vmem:[%s17837_s4 + $0x30] sm:$0xff]  ;;  %v11201_v7 = vld [vmem:[%s17837_s4 + $0x38] sm:$0xff] }
 0x5c1   : > { %v3368_v42 = vadd.f32 %v3364_v61, %v3257_v51  ;;  %v3363_v62 = vmul.f32 %v17966_v55, %v3336_v27  ;;  %v4866_v63 = vmul.f32 %v15858_v34, %v3336_v27  ;;  %12355 = vmatmul.mubr.msk.f32.gmra.mrb[42].mxu0 %vm882_vm0, %v12346_v19  ;;  %v4871_v50 = vadd.f32 %v4867_v60, %v4847_v5  ;;  %v17969_v34 = vld [vmem:[#allocation89_spill] sm:$0xff]  ;;  %v11240_v28 = vld [vmem:[%s17837_s4 + $0x68] sm:$0xff]  ;;  %v11241_v37 = vld [vmem:[%s17837_s4 + $0x70] sm:$0xff] }
 0x5c2   : > { %v13227_v9 = vpack.c.bf16 %v4889_v33, %v4888_v39  ;;  %13178 = vmatpush3.bf16.msra.mxu0 %v17963_v3  ;;  %12365 = vmatprep.mubr.msk.f32.mxu0 %vm1020_vm1, %v17967_v29  ;;  %v12381_v1 = vpop.f32.mrb[48].mxu1  ;;  %v13203_v49 = vpack.c.bf16 %v3386_v18, %v3385_v46 }
 0x5c3   : > { %v3388_v13 = vadd.f32 %v17968_v16, %v3368_v42  ;;  %v3367_v0 = vadd.f32 %v3363_v62, %v3256_v11  ;;  %v4891_v48 = vadd.f32 %v4886_v32, %v4871_v50  ;;  %v4870_v51 = vadd.f32 %v4866_v63, %v4846_v25  ;;  %v4002_v58 = vpop.f32.mrb[49].mxu1  ;;  %v11198_v11 = vld [vmem:[%s17837_s4 + $0x20] sm:$0xff]  ;;  %v11225_v25 = vld [vmem:[%s17936_s16 + $0x58] sm:$0xff] }
 0x5c4   : > { %12387 = vmatprep.mubr.msk.f32.mxu1 %vm2807_vm6, %v4002_v58  ;;  %13204 = vmatprep.subr.bf16.mxu0 %v13203_v49  ;;  %v15977_v19 = vpop.permute.xlu1 %4218  ;;  %v15985_v3 = vpop.permute.xlu0 %4222 }
 0x5c5   : > { %v3387_v5 = vadd.f32 %v17969_v34, %v3367_v0  ;;  %v4890_v4 = vadd.f32 %v4882_v38, %v4870_v51  ;;  %12366 = vmatmul.mubr.msk.f32.vlgmr.msra.gmra.mrb[40].mxu0 %vm1020_vm1, %v17970_v35  ;;  %12388 = vmatmul.mubr.msk.f32.vlgmr.msra.gmra.mrb[52].mxu1 %vm2807_vm6, %v12381_v1 }
 0x5c6   : > { %13190 = vmatpush3.bf16.msra.mxu1 %v15602_v20  ;;  %13206 = vmatpush3.bf16.msra.mxu0 %v13203_v49  ;;  %v12384_v24 = vpop.f32.mrb[50].mxu1  ;;  %v4508_v20 = vld [vmem:[#allocation13] sm:$0xf] }
 0x5c7   : > { %v13231_v2 = vpack.c.bf16 %v4891_v48, %v4890_v4  ;;  %12368 = vmatprep.mubr.msk.f32.mxu0 %vm1020_vm1, %v17971_v30  ;;  %13192 = vmatprep.subr.bf16.mxu1 %v15615_v14  ;;  %v13207_v59 = vpack.c.bf16 %v3388_v13, %v3387_v5  ;;  %v4012_v15 = vpop.f32.mrb[51].mxu1 }
 0x5c8   : > { %12390 = vmatprep.mubr.msk.f32.mxu1 %vm2807_vm6, %v4012_v15  ;;  %v15979_v44 = vpop.permute.xlu1 %4242  ;;  %v15989_v57 = vpop.permute.xlu0 %4226 }
 0x5c9   : > { %13208 = vmatprep.subr.bf16.mxu0 %v13207_v59  ;;  %12369 = vmatmul.mubr.msk.f32.gmra.mrb[42].mxu0 %vm1020_vm1, %v17972_v36 }
 0x5ca   : > { %13194 = vmatpush3.bf16.msra.mxu1 %v15615_v14  ;;  %13210 = vmatpush3.bf16.msra.mxu0 %v13207_v59  ;;  %v11224_v14 = vld [vmem:[%s17936_s16 + $0x50] sm:$0xff] }
 0x5cb   : > { %13196 = vmatprep.subr.bf16.mxu1 %v15609_v41  ;;  %12423 = vmatprep.mubr.msk.f32.mxu0 %vm1020_vm1, %v11222_v45 }
 0x5cc   : > { %12429 = vmatprep.subr.msk.mxu0 %vm4522_vm7, %v4508_v20  ;;  %12391 = vmatmul.mubr.msk.f32.gmra.mrb[54].mxu1 %vm2807_vm6, %v12384_v24  ;;  %v15981_v61 = vpop.permute.xlu1 %4246  ;;  %v15993_v18 = vpop.permute.xlu0 %4250 }
 0x5cd   : > { %12424 = vmatmul.mubr.msk.f32.vlgmr.msra.gmra.mrb[44].mxu0 %vm1020_vm1, %v11223_v54  ;;  %12409 = vmatprep.mubr.msk.f32.mxu1 %vm4119_vm8, %v11198_v11 }
 0x5ce   : > { %13198 = vmatpush3.bf16.msra.mxu1 %v15609_v41  ;;  %12430 = vmatpush3.msk.msra.mxu0 %vm4522_vm7, %v4508_v20  ;;  %v11199_v41 = vld [vmem:[%s17837_s4 + $0x28] sm:$0xff] }
 0x5cf   : > { %13200 = vmatprep.subr.bf16.mxu1 %v15619_v21  ;;  %13212 = vmatprep.subr.bf16.mxu0 %v15733_v43 }
 0x5d0   : > { %12426 = vmatprep.mubr.msk.f32.mxu0 %vm1020_vm1, %v11224_v14  ;;  %v15983_v60 = vpop.permute.xlu1 %4230  ;;  %v15997_v46 = vpop.permute.xlu0 %4709 }
 0x5d1   : > { %12427 = vmatmul.mubr.msk.f32.gmra.mrb[46].mxu0 %vm1020_vm1, %v11225_v25 }
 0x5d2   : > { %13202 = vmatpush3.bf16.msra.mxu1 %v15619_v21  ;;  %v11239_v21 = vld [vmem:[%s17837_s4 + $0x60] sm:$0xff] }
 0x5d3   : > { %13228 = vmatprep.subr.bf16.mxu1 %v13227_v9 }
 0x5d4   : > { %v15987_v27 = vpop.permute.xlu1 %4254  ;;  %v16001_v33 = vpop.permute.xlu0 %4737 }
 0x5d5   : > { %12410 = vmatmul.mubr.msk.f32.vlgmr.msra.gmra.mrb[52].mxu1 %vm4119_vm8, %v11199_v41 }
 0x5d6   : > { %13230 = vmatpush3.bf16.msra.mxu1 %v13227_v9  ;;  %12412 = vmatprep.mubr.msk.f32.mxu1 %vm4119_vm8, %v11200_v53 }
 0x5d7   : > { %13232 = vmatprep.subr.bf16.mxu1 %v13231_v2 }
 0x5d8   : > { %v15991_v10 = vpop.permute.xlu1 %4713  ;;  %v16005_v42 = vpop.permute.xlu0 %4721 }
 0x5d9   : > { %12413 = vmatmul.mubr.msk.f32.gmra.mrb[54].mxu1 %vm4119_vm8, %v11201_v7 }
 0x5da   : > { %13234 = vmatpush3.bf16.msra.mxu1 %v13231_v2  ;;  %12475 = vmatprep.mubr.msk.f32.mxu1 %vm4119_vm8, %v11239_v21 }
 0x5db   : > { %13236 = vmatprep.subr.bf16.mxu1 %v13203_v49 }
 0x5dc   : > { %v15995_v47 = vpop.permute.xlu1 %4733  ;;  %v16009_v62 = vpop.permute.xlu0 %4745 }
 0x5de   : > { %13238 = vmatpush3.bf16.msra.mxu1 %v13203_v49 }
 0x5df   : > { %13240 = vmatprep.subr.bf16.mxu1 %v13207_v59 }
 0x5e0   : > { %v15999_v39 = vpop.permute.xlu1 %4717  ;;  %v16013_v50 = vpop.permute.xlu0 %4902 }
 0x5e2   : > { %13242 = vmatpush3.bf16.msra.mxu1 %v13207_v59 }
 0x5e3   : > { %13252 = vmatprep.subr.bf16.mxu1 %v15768_v56 }
 0x5e4   : > { %v16003_v32 = vpop.permute.xlu1 %4741  ;;  %v16017_v29 = vpop.permute.xlu0 %4906 }
 0x5e5   : > { %12476 = vmatmul.mubr.msk.f32.vlgmr.msra.gmra.mrb[56].mxu1 %vm4119_vm8, %v11240_v28 }
 0x5e6   : > { %13254 = vmatpush3.bf16.msra.mxu1 %v15768_v56  ;;  %12478 = vmatprep.mubr.msk.f32.mxu1 %vm4119_vm8, %v11241_v37 }
 0x5e8   : > { %v16007_v55 = vpop.permute.xlu1 %4898  ;;  %v16021_v38 = vpop.permute.xlu0 %5023 }
 0x5e9   : > { %12479 = vmatmul.mubr.msk.f32.gmra.mrb[58].mxu1 %vm4119_vm8, %v11242_v8 }
 0x5ec   : > { %v16011_v63 = vpop.permute.xlu1 %5015  ;;  %v3705_v16 = vpop.permute.xlu0 %3704 }
 0x5f0   : > { %v16015_v9 = vpop.permute.xlu1 %5019  ;;  %v3742_v0 = vpop.permute.xlu0 %3741 }
 0x5f4   : > { %v16019_v1 = vpop.permute.xlu1 %4910  ;;  %v3720_v51 = vpop.permute.xlu0 %3719 }
 0x5f8   : > { %v16023_v49 = vpop.permute.xlu1 %5027  ;;  %v3752_v59 = vpop.permute.xlu0 %3751 }
 0x5fc   : > { %v3710_v13 = vpop.permute.xlu1 %3709 }
 0x600   : > { %v3737_v48 = vpop.permute.xlu1 %3736 }
 0x604   : > { %v3715_v58 = vpop.permute.xlu1 %3714 }
 0x608   : > { %v3747_v36 = vpop.permute.xlu1 %3746 }
 0x698   : > { %v12367_v34 = vpop.f32.mrb[40].mxu0 }
 0x699   : > { %v3723_v5 = vadd.f32 %v12367_v34, %v3710_v13  ;;  %v3679_v4 = vpop.f32.mrb[41].mxu0  ;;  %v11218_v13 = vld [vmem:[%s17837_s4 + $0x40] sm:$0xff] }
 0x69a   : > { %v3722_v35 = vadd.f32 %v3705_v16, %v3679_v4 }
 0x69b   : > { %vm3731_vm9 = vcmp.gt.f32.partialorder %v3723_v5, 0.0  ;;  %v3755_v24 = vmul.f32 %v3742_v0, %v3723_v5 }
 0x69c   : > { %vm3730_vm10 = vcmp.gt.f32.partialorder %v3722_v35, 0.0  ;;  %v3754_v2 = vmul.f32 %v3737_v48, %v3722_v35  ;;  %v12370_v30 = vpop.f32.mrb[42].mxu0 }
 0x69d   : > { %v3725_v15 = vadd.f32 %v12370_v30, %v3720_v51  ;;  %v3689_v45 = vpop.f32.mrb[43].mxu0  ;;  %v3759_v20 = vsel %vm3731_vm9, %v3723_v5, %v3755_v24  ;;  %v11248_v30 = vld [vmem:[%s17973_s19 + $0x28] sm:$0xff] }
 0x69e   : > { %v3724_v54 = vadd.f32 %v3715_v58, %v3689_v45  ;;  %v3758_v11 = vsel %vm3730_vm10, %v3722_v35, %v3754_v2 }
 0x69f   : > { %vm3733_vm11 = vcmp.gt.f32.partialorder %v3725_v15, 0.0  ;;  %v3757_v14 = vmul.f32 %v3752_v59, %v3725_v15  ;;  %v16025_v25 = vpack.c.bf16 %v3759_v20, %v3758_v11 }
 0x6a0   : > { %vm3732_vm13 = vcmp.gt.f32.partialorder %v3724_v54, 0.0  ;;  %v3756_v41 = vmul.f32 %v3747_v36, %v3724_v54  ;;  %v12425_v53 = vpop.f32.mrb[44].mxu0 }
 0x6a1   : > { %v4489_v7 = vpop.f32.mrb[45].mxu0  ;;  %13256 = vmatprep.subr.bf16.mxu1 %v16025_v25  ;;  %v3761_v21 = vsel %vm3733_vm11, %v3725_v15, %v3757_v14 }
 0x6a2   : > { %12431 = vmatprep.mubr.msk.f32.mxu0 %vm4509_vm12, %v4489_v7  ;;  %v3760_v28 = vsel %vm3732_vm13, %v3724_v54, %v3756_v41 }
 0x6a3   : > { %12432 = vmatmul.mubr.msk.f32.vlgmr.msra.gmra.mrb[48].mxu0 %vm4509_vm12, %v12425_v53  ;;  %v16030_v37 = vpack.c.bf16 %v3761_v21, %v3760_v28 }
 0x6a4   : > { %13214 = vmatpush3.bf16.msra.mxu0 %v15733_v43  ;;  %v12428_v8 = vpop.f32.mrb[46].mxu0 }
 0x6a5   : > { %13216 = vmatprep.subr.bf16.mxu0 %v15749_v26  ;;  %v4499_v16 = vpop.f32.mrb[47].mxu0 }
 0x6a6   : > { %12434 = vmatprep.mubr.msk.f32.mxu0 %vm4509_vm12, %v4499_v16  ;;  %v5750_v16 = vld [vmem:[%s17974_s11 + $0x8] sm:$0xff] }
 0x6a7   : > { %12435 = vmatmul.mubr.msk.f32.gmra.mrb[50].mxu0 %vm4509_vm12, %v12428_v8  ;;  %v5749_v8 = vld [vmem:[%s17974_s11] sm:$0xff]  ;;  %5760 = vperm.xlu0 %13834, %v5750_v16  }
 0x6a8   : > { %13218 = vmatpush3.bf16.msra.mxu0 %v15749_v26  ;;  %v12411_v0 = vpop.f32.mrb[52].mxu1  ;;  %12453 = vmatprep.mubr.msk.f32.mxu0 %vm4119_vm8, %v11218_v13  ;;  %v17975_v13 = vmov 1  }
 0x6a9   : > { %13220 = vmatprep.subr.bf16.mxu0 %v15740_v22  ;;  %v4234_v43 = vadd.f32 %v12411_v0, %v15985_v3  ;;  %v4198_v48 = vpop.f32.mrb[53].mxu1  ;;  %5755 = vperm.xlu1 %13835, %v5749_v8  }
 0x6aa   : > { %v4233_v51 = vadd.f32 %v15977_v19, %v4198_v48 }
 0x6ab   : > { %vm4238_vm14 = vcmp.gt.f32.partialorder %v4234_v43, 0.0  ;;  %v4258_v58 = vmul.f32 %v15981_v61, %v4234_v43  ;;  %13837 = vset.pattern.permute.xlu0 %v17975_v13 }
 0x6ac   : > { %vm4237_vm15 = vcmp.gt.f32.partialorder %v4233_v51, 0.0  ;;  %v4257_v34 = vmul.f32 %v15979_v44, %v4233_v51  ;;  %13222 = vmatpush3.bf16.msra.mxu0 %v15740_v22  ;;  %v12414_v5 = vpop.f32.mrb[54].mxu1  ;;  %v11219_v22 = vld [vmem:[%s17837_s4 + $0x48] sm:$0xff]  ;;  %v11220_v44 = vld [vmem:[%s17837_s4 + $0x50] sm:$0xff]  ;;  %5786 = vperm.xlu0 %13837, %v5750_v16  }
 0x6ad   : > { %13224 = vmatprep.subr.bf16.mxu0 %v15753_v17  ;;  %v4236_v26 = vadd.f32 %v12414_v5, %v15983_v60  ;;  %v4208_v4 = vpop.f32.mrb[55].mxu1  ;;  %v4262_v35 = vsel %vm4238_vm14, %v4234_v43, %v4258_v58  ;;  %13836 = vset.pattern.permute.xlu1 %v17975_v13 }
 0x6ae   : > { %v4235_v3 = vadd.f32 %v15989_v57, %v4208_v4  ;;  %v4261_v24 = vsel %vm4237_vm15, %v4233_v51, %v4257_v34  ;;  %5782 = vperm.xlu1 %13836, %v5749_v8  }
 0x6af   : > { %vm4240_vm2 = vcmp.gt.f32.partialorder %v4236_v26, 0.0  ;;  %v4260_v19 = vmul.f32 %v15987_v27, %v4236_v26  ;;  %v13243_v2 = vpack.c.bf16 %v4262_v35, %v4261_v24 }
 0x6b0   : > { %vm4239_vm3 = vcmp.gt.f32.partialorder %v4235_v3, 0.0  ;;  %v4259_v61 = vmul.f32 %v15993_v18, %v4235_v3  ;;  %13226 = vmatpush3.bf16.msra.mxu0 %v15753_v17  ;;  %v11221_v17 = vld [vmem:[%s17837_s4 + $0x58] sm:$0xff]  ;;  %v11247_v18 = vld [vmem:[%s17973_s19 + $0x20] sm:$0xff] }
 0x6b1   : > { %13244 = vmatprep.subr.bf16.mxu0 %v13243_v2  ;;  %v4264_v60 = vsel %vm4240_vm2, %v4236_v26, %v4260_v19 }
 0x6b2   : > { %v4263_v57 = vsel %vm4239_vm3, %v4235_v3, %v4259_v61  ;;  %13838 = vset.pattern.permute.xlu1 %v17943_v23 }
 0x6b3   : > { %12454 = vmatmul.mubr.msk.f32.vlgmr.msra.gmra.mrb[48].mxu0 %vm4119_vm8, %v11219_v22  ;;  %v13247_v27 = vpack.c.bf16 %v4264_v60, %v4263_v57  ;;  %v11275_v22 = vld [vmem:[%s17973_s19 + $0x60] sm:$0xff]  ;;  %v11278_v60 = vld [vmem:[%s17973_s19 + $0x78] sm:$0xff] }
 0x6b4   : > { %13246 = vmatpush3.bf16.msra.mxu0 %v13243_v2  ;;  %12456 = vmatprep.mubr.msk.f32.mxu0 %vm4119_vm8, %v11220_v44  ;;  %v11277_v44 = vld [vmem:[%s17973_s19 + $0x70] sm:$0xff] }
 0x6b5   : > { %13248 = vmatprep.subr.bf16.mxu0 %v13247_v27 }
 0x6b7   : > { %12457 = vmatmul.mubr.msk.f32.gmra.mrb[50].mxu0 %vm4119_vm8, %v11221_v17  ;;  %v5038_v17 = vld [vmem:[%s17973_s19] sm:$0xff] }
 0x6b8   : > { %13250 = vmatpush3.bf16.msra.mxu0 %v13247_v27  ;;  %12489 = vmatprep.mubr.msk.f32.mxu0 %vm1020_vm1, %v11247_v18  ;;  %v12477_v59 = vpop.f32.mrb[56].mxu1  ;;  %v5039_v18 = vld [vmem:[%s17973_s19 + $0x8] sm:$0xff] }
 0x6b9   : > { %v4991_v15 = vpop.f32.mrb[57].mxu1  ;;  %v4997_v45 = vadd.f32 %v12477_v59, %v16013_v50  ;;  %v5041_v59 = vld [vmem:[%s17973_s19 + $0x18] sm:$0xff] }
 0x6ba   : > { %v4992_v36 = vadd.f32 %v4991_v15, %v16007_v55  ;;  %v11249_v55 = vld [vmem:[%s17973_s19 + $0x30] sm:$0xff]  ;;  %v5644_v15 = vld [vmem:[#allocation14] sm:$0xf] }
 0x6bb   : > { %12490 = vmatmul.mubr.msk.f32.vlgmr.msra.gmra.mrb[52].mxu0 %vm1020_vm1, %v11248_v30  ;;  %v5031_v14 = vmul.f32 %v16015_v9, %v4997_v45  ;;  %vm5011_vm4 = vcmp.gt.f32.partialorder %v4997_v45, 0.0  ;;  %v5040_v30 = vld [vmem:[%s17973_s19 + $0x10] sm:$0xff] }
 0x6bc   : > { %v12480_v20 = vpop.f32.mrb[58].mxu1  ;;  %v5030_v41 = vmul.f32 %v16011_v63, %v4992_v36  ;;  %vm5010_vm5 = vcmp.gt.f32.partialorder %v4992_v36, 0.0  ;;  %12492 = vmatprep.mubr.msk.f32.mxu0 %vm1020_vm1, %v11249_v55  ;;  %v11250_v63 = vld [vmem:[%s17973_s19 + $0x38] sm:$0xff] }
 0x6bd   : > { %v5007_v54 = vadd.f32 %v12480_v20, %v16019_v1  ;;  %v5001_v11 = vpop.f32.mrb[59].mxu1 }
 0x6be   : > { %v5002_v53 = vadd.f32 %v5001_v11, %v16017_v29  ;;  %v5034_v9 = vsel %vm5010_vm5, %v4992_v36, %v5030_v41  ;;  %v5035_v29 = vsel %vm5011_vm4, %v4997_v45, %v5031_v14  ;;  %v5751_v45 = vld [vmem:[%s17974_s11 + $0x10] sm:$0xff]  ;;  %v5752_v36 = vld [vmem:[%s17974_s11 + $0x18] sm:$0xff]  ;;  %v17977_v41 = vld [vmem:[#allocation26_spill] sm:$0xff] }
 0x6bf   : > { %vm5013_vm9 = vcmp.gt.f32.partialorder %v5007_v54, 0.0  ;;  %v5033_v7 = vmul.f32 %v16023_v49, %v5007_v54  ;;  %12493 = vmatmul.mubr.msk.f32.gmra.mrb[54].mxu0 %vm1020_vm1, %v11250_v63  ;;  %v13271_v49 = vpack.c.bf16 %v5035_v29, %v5034_v9  ;;  %5765 = vperm.xlu1 %13838, %v5751_v45   ;;  %v17978_v63 = vld [vmem:[#allocation28_spill] sm:$0xff]  ;;  %v17979_v9 = vld [vmem:[#allocation31_spill] sm:$0xff]  ;;  %v5805_v29 = vld [vmem:[#allocation5] sm:$0xff] }
 0x6c0   : > { %vm5012_vm10 = vcmp.gt.f32.partialorder %v5002_v53, 0.0  ;;  %v5032_v50 = vmul.f32 %v16021_v38, %v5002_v53  ;;  %v11263_v38 = vld [vmem:[%s17973_s19 + $0x40] sm:$0xff]  ;;  %5790 = vperm.xlu0 %13837, %v5751_v45  }
 0x6c1   : > { %v5037_v21 = vsel %vm5013_vm9, %v5007_v54, %v5033_v7  ;;  %12527 = vmatprep.mubr.msk.f32.mxu0 %vm1020_vm1, %v11263_v38 }
 0x6c2   : > { %v5036_v1 = vsel %vm5012_vm10, %v5002_v53, %v5032_v50 }
 0x6c3   : > { %v13275_v28 = vpack.c.bf16 %v5037_v21, %v5036_v1  ;;  %5770 = vperm.xlu1 %13838, %v5752_v36   ;;  %v5808_v1 = vld [vmem:[%s17980_s20 + $0x8] sm:$0xff]  ;;  %v5807_v21 = vld [vmem:[%s17980_s20] sm:$0xff] }
 0x6c4   : > { %13840 = vset.pattern.permute.xlu0 %v17943_v23 }
 0x6c5   : > { %5811 = vperm.xlu0 %13840, %v5807_v21  }
 0x6c7   : > { %13839 = vset.pattern.permute.xlu1 %v17975_v13 }
 0x6c8   : > { %5794 = vperm.xlu1 %13839, %v5752_v36  }
 0x6c9   : > { %13843 = vset.pattern.permute.xlu0 %v17975_v13 }
 0x6cc   : > { %13841 = vset.pattern.permute.xlu1 %v17943_v23 }
 0x6cd   : > { %5816 = vperm.xlu1 %13841, %v5808_v1  }
 0x6d1   : > { %13842 = vset.pattern.permute.xlu1 %v17975_v13 }
 0x728   : > { %v5756_v38 = vpop.permute.xlu1 %5755 }
 0x72d   : > { %v5783_v8 = vpop.permute.xlu1 %5782 }
 0x73e   : > { %v5766_v16 = vpop.permute.xlu1 %5765 }
 0x786   : > { %v12455_v0 = vpop.f32.mrb[48].mxu0 }
 0x787   : > { %v4725_v43 = vadd.f32 %v12455_v0, %v15991_v10  ;;  %v4689_v48 = vpop.f32.mrb[49].mxu0  ;;  %v5761_v0 = vpop.permute.xlu0 %5760 }
 0x788   : > { %v4724_v51 = vadd.f32 %v15997_v46, %v4689_v48 }
 0x789   : > { %vm4729_vm11 = vcmp.gt.f32.partialorder %v4725_v43, 0.0  ;;  %v4749_v58 = vmul.f32 %v16001_v33, %v4725_v43 }
 0x78a   : > { %vm4728_vm13 = vcmp.gt.f32.partialorder %v4724_v51, 0.0  ;;  %v4748_v34 = vmul.f32 %v15995_v47, %v4724_v51  ;;  %v12458_v5 = vpop.f32.mrb[50].mxu0 }
 0x78b   : > { %v4727_v26 = vadd.f32 %v12458_v5, %v16005_v42  ;;  %v4699_v4 = vpop.f32.mrb[51].mxu0  ;;  %v4753_v35 = vsel %vm4729_vm11, %v4725_v43, %v4749_v58  ;;  %v5771_v43 = vpop.permute.xlu1 %5770 }
 0x78c   : > { %v4726_v3 = vadd.f32 %v15999_v39, %v4699_v4  ;;  %v4752_v24 = vsel %vm4728_vm13, %v4724_v51, %v4748_v34  ;;  %v11264_v39 = vld [vmem:[%s17973_s19 + $0x48] sm:$0xff]  ;;  %v5787_v51 = vpop.permute.xlu0 %5786 }
 0x78d   : > { %vm4731_vm14 = vcmp.gt.f32.partialorder %v4727_v26, 0.0  ;;  %v4751_v10 = vmul.f32 %v16009_v62, %v4727_v26  ;;  %v13263_v19 = vpack.c.bf16 %v4753_v35, %v4752_v24  ;;  %v11265_v62 = vld [vmem:[%s17973_s19 + $0x50] sm:$0xff] }
 0x78e   : > { %vm4730_vm15 = vcmp.gt.f32.partialorder %v4726_v3, 0.0  ;;  %v4750_v46 = vmul.f32 %v16003_v32, %v4726_v3  ;;  %v12491_v2 = vpop.f32.mrb[52].mxu0  ;;  %v5440_v32 = vld [vmem:[%s17976_s24] sm:$0xff] }
 0x78f   : > { %v5125_v33 = vpop.f32.mrb[53].mxu0  ;;  %13264 = vmatprep.subr.bf16.mxu0 %v13263_v19  ;;  %v4755_v61 = vsel %vm4731_vm14, %v4727_v26, %v4751_v10 }
 0x790   : > { %12499 = vmatprep.mubr.msk.f32.mxu1 %vm882_vm0, %v5125_v33  ;;  %13266 = vmatpush3.bf16.msra.mxu0 %v13263_v19  ;;  %v4754_v47 = vsel %vm4730_vm15, %v4726_v3, %v4750_v46  ;;  %v5795_v3 = vpop.permute.xlu1 %5794  ;;  %v5791_v33 = vpop.permute.xlu0 %5790 }
 0x791   : > { %12500 = vmatmul.mubr.msk.f32.vlgmr.msra.gmra.mrb[60].mxu1 %vm882_vm0, %v12491_v2  ;;  %v13267_v42 = vpack.c.bf16 %v4755_v61, %v4754_v47 }
 0x792   : > { %13258 = vmatpush3.bf16.msra.mxu1 %v16025_v25  ;;  %v11266_v25 = vld [vmem:[%s17973_s19 + $0x58] sm:$0xff]  ;;  %v12494_v57 = vpop.f32.mrb[54].mxu0 }
 0x793   : > { %13260 = vmatprep.subr.bf16.mxu1 %v16030_v37  ;;  %13268 = vmatprep.subr.bf16.mxu0 %v13267_v42  ;;  %v5135_v27 = vpop.f32.mrb[55].mxu0 }
 0x794   : > { %13270 = vmatpush3.bf16.msra.mxu0 %v13267_v42  ;;  %12502 = vmatprep.mubr.msk.f32.mxu1 %vm882_vm0, %v5135_v27  ;;  %v11299_v27 = vld [vmem:[%s17818_s10 + $0x38] sm:$0xff]  ;;  %v5812_v45 = vpop.permute.xlu0 %5811 }
 0x795   : > { %13272 = vmatprep.subr.bf16.mxu0 %v13271_v49  ;;  %12503 = vmatmul.mubr.msk.f32.gmra.mrb[62].mxu1 %vm882_vm0, %v12494_v57  ;;  %v16227_v57 = vld [vmem:[%s17820_s0 + $0x20] sm:$0xff] }
 0x796   : > { %13262 = vmatpush3.bf16.msra.mxu1 %v16030_v37  ;;  %v11276_v37 = vld [vmem:[%s17973_s19 + $0x68] sm:$0xff]  ;;  %12513 = vmatprep.mubr.msk.f32.mxu1 %vm1020_vm1, %v5038_v17 }
 0x797   : > { %12528 = vmatmul.mubr.msk.f32.vlgmr.msra.gmra.mrb[56].mxu0 %vm1020_vm1, %v11264_v39  ;;  %12533 = vmatprep.subr.mxu1 %v5440_v32  ;;  %v16237_v17 = vld [vmem:[%s17820_s0 + $0x28] sm:$0xff] }
 0x798   : > { %13274 = vmatpush3.bf16.msra.mxu0 %v13271_v49  ;;  %12530 = vmatprep.mubr.msk.f32.mxu0 %vm1020_vm1, %v11265_v62  ;;  %v11290_v49 = vld [vmem:[%s17980_s20 + $0x10] sm:$0xff] }
 0x799   : > { %13276 = vmatprep.subr.bf16.mxu0 %v13275_v28  ;;  %12514 = vmatmul.mubr.msk.f32.vlgmr.msra.gmra.mrb[60].mxu1 %vm1020_vm1, %v5039_v18  ;;  %v17981_v18 = vmov 4  }
 0x79a   : > { %12534 = vmatpush3.msra.mxu1 %v5440_v32  ;;  %12516 = vmatprep.mubr.msk.f32.mxu1 %vm1020_vm1, %v5040_v30  ;;  %v16255_v30 = vld [vmem:[%s17820_s0 + $0x30] sm:$0xff] }
 0x79b   : > { %12531 = vmatmul.mubr.msk.f32.gmra.mrb[58].mxu0 %vm1020_vm1, %v11266_v25  ;;  %12555 = vmatprep.subr.msk.mxu1 %vm4522_vm7, %v5644_v15  ;;  %v5806_v25 = vld [vmem:[#allocation5 + $0x8] sm:$0xff] }
 0x79c   : > { %13278 = vmatpush3.bf16.msra.mxu0 %v13275_v28  ;;  %12549 = vmatprep.mubr.msk.f32.mxu0 %vm1020_vm1, %v11275_v22  ;;  %v11291_v28 = vld [vmem:[%s17980_s20 + $0x18] sm:$0xff]  ;;  %v11292_v22 = vld [vmem:[%s17817_s9 + $0x20] sm:$0xff] }
 0x79d   : > { %12517 = vmatmul.mubr.msk.f32.gmra.mrb[62].mxu1 %vm1020_vm1, %v5041_v59  ;;  %5909 = vperm.xlu1 %13842, %v11290_v49   ;;  %v5817_v59 = vpop.permute.xlu1 %5816 }
 0x79e   : > { %5914 = vperm.xlu0 %13843, %v11291_v28  }
 0x79f   : > { %12550 = vmatmul.mubr.msk.f32.vlgmr.msra.gmra.mrb[60].mxu0 %vm1020_vm1, %v11276_v37  ;;  %v11296_v37 = vld [vmem:[%s17818_s10 + $0x20] sm:$0xff] }
 0x7a0   : > { %12552 = vmatprep.mubr.msk.f32.mxu0 %vm1020_vm1, %v11277_v44  ;;  %v11297_v44 = vld [vmem:[%s17818_s10 + $0x28] sm:$0xff] }
 0x7a1   : > { %13844 = vset.pattern.permute.xlu1 %v17941_v12 }
 0x7a2   : > { %13845 = vset.pattern.permute.xlu0 %v17942_v52  ;;  %5920 = vperm.xlu1 %13844, %v11290_v49  }
 0x7a3   : > { %12553 = vmatmul.mubr.msk.f32.gmra.mrb[62].mxu0 %vm1020_vm1, %v11278_v60  ;;  %5932 = vperm.xlu0 %13845, %v11290_v49   ;;  %v11298_v60 = vld [vmem:[%s17818_s10 + $0x30] sm:$0xff] }
 0x7a4   : > { %12571 = vmatprep.mubr.msk.f32.mxu0 %vm1020_vm1, %v5805_v29 }
 0x7a6   : > { %5924 = vperm.xlu1 %13844, %v11291_v28  }
 0x7a7   : > { %13848 = vset.pattern.permute.xlu0 %v17943_v23 }
 0x7a8   : > { %5960 = vperm.xlu0 %13848, %v11297_v44  }
 0x7aa   : > { %13846 = vset.pattern.permute.xlu1 %v17942_v52 }
 0x7ab   : > { %5936 = vperm.xlu1 %13846, %v11291_v28  }
 0x7ac   : > { %5965 = vperm.xlu0 %13848, %v11298_v60  }
 0x7af   : > { %13847 = vset.pattern.permute.xlu1 %v17943_v23 }
 0x7b0   : > { %5955 = vperm.xlu1 %13847, %v11296_v37   ;;  %13851 = vset.pattern.permute.xlu0 %v17975_v13 }
 0x7b1   : > { %6083 = vperm.xlu0 %13851, %v11298_v60   ;;  %v17996_v60 = vmov 15  }
 0x7b4   : > { %13849 = vset.pattern.permute.xlu1 %v17975_v13 }
 0x7b5   : > { %6075 = vperm.xlu1 %13849, %v11296_v37   ;;  %6315 = vperm.xlu0 %13851, %v16227_v57  }
 0x7b9   : > { %6079 = vperm.xlu1 %13849, %v11297_v44   ;;  %6319 = vperm.xlu0 %13851, %v16237_v17  }
 0x7bd   : > { %13850 = vset.pattern.permute.xlu1 %v17943_v23  ;;  %13855 = vset.pattern.permute.xlu0 %v17941_v12 }
 0x7be   : > { %5970 = vperm.xlu1 %13850, %v11299_v27   ;;  %6428 = vperm.xlu0 %13855, %v16237_v17  }
 0x7c2   : > { %13852 = vset.pattern.permute.xlu1 %v17975_v13  ;;  %13861 = vset.pattern.permute.xlu0 %v17981_v18 }
 0x7c3   : > { %6087 = vperm.xlu1 %13852, %v11299_v27   ;;  %6642 = vperm.xlu0 %13861, %v16227_v57  }
 0x7c7   : > { %13853 = vset.pattern.permute.xlu1 %v17943_v23  ;;  %13862 = vset.pattern.permute.xlu0 %v17942_v52 }
 0x7c8   : > { %6207 = vperm.xlu1 %13853, %v16227_v57   ;;  %6533 = vperm.xlu0 %13862, %v16227_v57  }
 0x7cc   : > { %6212 = vperm.xlu1 %13853, %v16237_v17   ;;  %6537 = vperm.xlu0 %13862, %v16237_v17  }
 0x7d0   : > { %13854 = vset.pattern.permute.xlu1 %v17941_v12  ;;  %6541 = vperm.xlu0 %13862, %v16255_v30  }
 0x7d1   : > { %6424 = vperm.xlu1 %13854, %v16227_v57  }
 0x7d4   : > { %13866 = vset.pattern.permute.xlu0 %v17943_v23 }
 0x7d5   : > { %13856 = vset.pattern.permute.xlu1 %v17943_v23 }
 0x7d6   : > { %6217 = vperm.xlu1 %13856, %v16255_v30  }
 0x7da   : > { %13857 = vset.pattern.permute.xlu1 %v17975_v13 }
 0x7db   : > { %6323 = vperm.xlu1 %13857, %v16255_v30  }
 0x7df   : > { %13858 = vset.pattern.permute.xlu1 %v17943_v23 }
 0x86a   : > { %v12529_v20 = vpop.f32.mrb[56].mxu0 }
 0x86b   : > { %v5421_v54 = vpop.f32.mrb[57].mxu0 }
 0x86c   : > { %12535 = vmatprep.mubr.msk.f32.mxu1 %vm2807_vm6, %v5421_v54 }
 0x86d   : > { %12536 = vmatmul.mubr.msk.f32.vlgmr.msra.gmra.mrb[60].mxu1 %vm2807_vm6, %v12529_v20 }
 0x86e   : > { %v12532_v11 = vpop.f32.mrb[58].mxu0  ;;  %12556 = vmatpush3.msk.msra.mxu1 %vm4522_vm7, %v5644_v15  ;;  %v5910_v15 = vpop.permute.xlu1 %5909 }
 0x86f   : > { %v5431_v14 = vpop.f32.mrb[59].mxu0  ;;  %13300 = vmatprep.subr.bf16.mxu1 %v17977_v41 }
 0x870   : > { %12538 = vmatprep.mubr.msk.f32.mxu1 %vm2807_vm6, %v5431_v14 }
 0x871   : > { %12539 = vmatmul.mubr.msk.f32.gmra.mrb[62].mxu1 %vm2807_vm6, %v12532_v11 }
 0x872   : > { %v12551_v53 = vpop.f32.mrb[60].mxu0  ;;  %v5921_v36 = vpop.permute.xlu1 %5920 }
 0x873   : > { %v5625_v7 = vpop.f32.mrb[61].mxu0 }
 0x874   : > { %12557 = vmatprep.mubr.msk.f32.mxu1 %vm4509_vm12, %v5625_v7  ;;  %v5915_v7 = vpop.permute.xlu0 %5914 }
 0x875   : > { %12558 = vmatmul.mubr.msk.f32.vlgmr.msra.gmra.mrb[60].mxu1 %vm4509_vm12, %v12551_v53 }
 0x876   : > { %v12554_v50 = vpop.f32.mrb[62].mxu0  ;;  %13302 = vmatpush3.bf16.msra.mxu1 %v17977_v41  ;;  %v13981_v41 = vld [vmem:[%s14751_s7 + $0x8] sm:$0xff] }
 0x877   : > { %v5635_v55 = vpop.f32.mrb[63].mxu0  ;;  %13304 = vmatprep.subr.bf16.mxu1 %v17978_v63 }
 0x878   : > { %12560 = vmatprep.mubr.msk.f32.mxu1 %vm4509_vm12, %v5635_v55 }
 0x879   : > { %12561 = vmatmul.mubr.msk.f32.gmra.mrb[62].mxu1 %vm4509_vm12, %v12554_v50  ;;  %v13982_v50 = vld [vmem:[%s14751_s7] sm:$0xff]  ;;  %s18013_s7 = smov 96  }
 0x87a   : > { %13306 = vmatpush3.bf16.msra.mxu1 %v17978_v63  ;;  %v5925_v63 = vpop.permute.xlu1 %5924 }
 0x87b   : > { %13316 = vmatprep.subr.bf16.mxu1 %v17979_v9 }
 0x87e   : > { %v5937_v28 = vpop.permute.xlu1 %5936 }
 0x882   : > { %v5956_v37 = vpop.permute.xlu1 %5955 }
 0x886   : > { %v6076_v44 = vpop.permute.xlu1 %6075 }
 0x88a   : > { %v6080_v27 = vpop.permute.xlu1 %6079 }
 0x948   : > { %v12559_v48 = vpop.f32.mrb[60].mxu1 }
 0x949   : > { %v5774_v58 = vadd.f32 %v12559_v48, %v5761_v0  ;;  %v5726_v34 = vpop.f32.mrb[61].mxu1 }
 0x94a   : > { %v5773_v5 = vadd.f32 %v5756_v38, %v5726_v34  ;;  %v11293_v34 = vld [vmem:[%s17817_s9 + $0x28] sm:$0xff] }
 0x94b   : > { %vm5778_vm2 = vcmp.gt.f32.partialorder %v5774_v58, 0.0  ;;  %v5798_v26 = vmul.f32 %v5787_v51, %v5774_v58 }
 0x94c   : > { %vm5777_vm3 = vcmp.gt.f32.partialorder %v5773_v5, 0.0  ;;  %v5797_v4 = vmul.f32 %v5783_v8, %v5773_v5  ;;  %v12562_v35 = vpop.f32.mrb[62].mxu1  ;;  %v5933_v8 = vpop.permute.xlu0 %5932 }
 0x94d   : > { %v5776_v24 = vadd.f32 %v12562_v35, %v5771_v43  ;;  %v5736_v10 = vpop.f32.mrb[63].mxu1  ;;  %v5802_v19 = vsel %vm5778_vm2, %v5774_v58, %v5798_v26  ;;  %v17984_v26 = vld [vmem:[#allocation27_spill] sm:$0xff]  ;;  %v17985_v35 = vld [vmem:[#allocation29_spill] sm:$0xff] }
 0x94e   : > { %v5775_v46 = vadd.f32 %v5766_v16, %v5736_v10  ;;  %v5801_v2 = vsel %vm5777_vm3, %v5773_v5, %v5797_v4  ;;  %v11294_v5 = vld [vmem:[%s17817_s9 + $0x30] sm:$0xff]  ;;  %v11295_v4 = vld [vmem:[%s17817_s9 + $0x38] sm:$0xff]  ;;  %v16305_v10 = vld [vmem:[%s17826_s22 + $0x20] sm:$0xff] }
 0x94f   : > { %vm5780_vm4 = vcmp.gt.f32.partialorder %v5776_v24, 0.0  ;;  %v5800_v61 = vmul.f32 %v5795_v3, %v5776_v24  ;;  %v13279_v47 = vpack.c.bf16 %v5802_v19, %v5801_v2  ;;  %v17986_v3 = vld [vmem:[#allocation30_spill] sm:$0xff]  ;;  %6667 = vperm.xlu0 %13866, %v16305_v10   ;;  %v16312_v19 = vld [vmem:[%s17826_s22 + $0x30] sm:$0xff]  ;;  %v17988_v2 = vmov 5  }
 0x950   : > { %vm5779_vm5 = vcmp.gt.f32.partialorder %v5775_v46, 0.0  ;;  %v5799_v42 = vmul.f32 %v5791_v33, %v5775_v46  ;;  %v16327_v33 = vld [vmem:[%s17826_s22 + $0x28] sm:$0xff] }
 0x951   : > { %13280 = vmatprep.subr.bf16.mxu0 %v13279_v47  ;;  %v5804_v39 = vsel %vm5780_vm4, %v5776_v24, %v5800_v61  ;;  %v16293_v24 = vld [vmem:[%s17820_s0 + $0x38] sm:$0xff]  ;;  %s851_s0 = scalar_lea.vmem [#allocation16], %s18137_s26 }
 0x952   : > { %13282 = vmatpush3.bf16.msra.mxu0 %v13279_v47  ;;  %v5803_v32 = vsel %vm5779_vm5, %v5775_v46, %v5799_v42  ;;  %6222 = vperm.xlu1 %13858, %v16293_v24   ;;  %v17987_v46 = vmov 6   ;;  %v16335_v61 = vld [vmem:[%s17826_s22 + $0x38] sm:$0xff]  ;;  %v17989_v47 = vmov 7   ;;  %v17990_v42 = vmov 8   ;;  %s10927_s30 = sshll.u32 %s851_s0, 4  ;;  %s17550_s30 = int_to_ptr.vmem [resolvable:$true] %s10927_s30 }
 0x953   : > { %v13283_v62 = vpack.c.bf16 %v5804_v39, %v5803_v32  ;;  %6677 = vperm.xlu0 %13866, %v16312_v19   ;;  %v17991_v39 = vmov 9   ;;  %v17992_v32 = vmov 10   ;;  %s14220_s13 = scalar_lea.vmem %s17550_s30, 256 }
 0x954   : > { %p14221_p12 = scmp.ne.s32.totalorder %s17550_s30, %s14220_s13 }
 0x955   : > { %13284 = vmatprep.subr.bf16.mxu0 %v13283_v62 }
 0x956   : > { %13286 = vmatpush3.bf16.msra.mxu0 %v13283_v62  ;;  %13859 = vset.pattern.permute.xlu1 %v17975_v13  ;;  %v17993_v62 = vmov 12   ;;  %p14222_p13 = pnand %p14221_p12, %p18141_p1 }
 0x957   : > { %6327 = vperm.xlu1 %13859, %v16293_v24   ;;  %13870 = vset.pattern.permute.xlu0 %v17987_v46 }
 0x958   : > { %6896 = vperm.xlu0 %13870, %v16237_v17   ;;  %p14223_p0 = pneg %p14222_p13 }
 0x959   : > { %12572 = vmatmul.mubr.msk.f32.vlgmr.msra.gmra.mrb[64].mxu0 %vm1020_vm1, %v5806_v25  ;;  %v17994_v25 = vmov 14  }
 0x95a   : > { %12578 = vmatprep.mubr.msk.f32.mxu0 %vm882_vm0, %v11292_v22  ;;  %v17995_v22 = vmov 13  }
 0x95b   : > { %13860 = vset.pattern.permute.xlu1 %v17941_v12 }
 0x95c   : > { %6432 = vperm.xlu1 %13860, %v16255_v30   ;;  %13871 = vset.pattern.permute.xlu0 %v17988_v2 }
 0x95d   : > { %6787 = vperm.xlu0 %13871, %v16227_v57  }
 0x960   : > { %6436 = vperm.xlu1 %13860, %v16293_v24  }
 0x961   : > { %6795 = vperm.xlu0 %13871, %v16255_v30  }
 0x964   : > { %13863 = vset.pattern.permute.xlu1 %v17981_v18 }
 0x965   : > { %6646 = vperm.xlu1 %13863, %v16237_v17   ;;  %6799 = vperm.xlu0 %13871, %v16293_v24  }
 0x969   : > { %13864 = vset.pattern.permute.xlu1 %v17942_v52  ;;  %13878 = vset.pattern.permute.xlu0 %v17989_v47 }
 0x96a   : > { %6545 = vperm.xlu1 %13864, %v16293_v24   ;;  %7013 = vperm.xlu0 %13878, %v16293_v24  }
 0x96e   : > { %13865 = vset.pattern.permute.xlu1 %v17981_v18  ;;  %13879 = vset.pattern.permute.xlu0 %v17990_v42 }
 0x96f   : > { %6650 = vperm.xlu1 %13865, %v16255_v30   ;;  %7114 = vperm.xlu0 %13879, %v16237_v17  }
 0x973   : > { %6654 = vperm.xlu1 %13865, %v16293_v24   ;;  %7122 = vperm.xlu0 %13879, %v16293_v24  }
 0x977   : > { %13867 = vset.pattern.permute.xlu1 %v17943_v23  ;;  %13883 = vset.pattern.permute.xlu0 %v17991_v39 }
 0x978   : > { %6672 = vperm.xlu1 %13867, %v16327_v33   ;;  %7231 = vperm.xlu0 %13883, %v16293_v24  }
 0x97c   : > { %6682 = vperm.xlu1 %13867, %v16335_v61   ;;  %13884 = vset.pattern.permute.xlu0 %v17975_v13 }
 0x97d   : > { %7255 = vperm.xlu0 %13884, %v16335_v61  }
 0x980   : > { %13868 = vset.pattern.permute.xlu1 %v17987_v46 }
 0x981   : > { %6892 = vperm.xlu1 %13868, %v16227_v57   ;;  %13887 = vset.pattern.permute.xlu0 %v17992_v32 }
 0x982   : > { %7364 = vperm.xlu0 %13887, %v16237_v17  }
 0x985   : > { %13869 = vset.pattern.permute.xlu1 %v17988_v2 }
 0x986   : > { %6791 = vperm.xlu1 %13869, %v16237_v17   ;;  %13889 = vset.pattern.permute.xlu0 %v17993_v62 }
 0x987   : > { %7578 = vperm.xlu0 %13889, %v16237_v17  }
 0x98a   : > { %13872 = vset.pattern.permute.xlu1 %v17989_v47 }
 0x98b   : > { %7001 = vperm.xlu1 %13872, %v16227_v57   ;;  %13895 = vset.pattern.permute.xlu0 %v17994_v25 }
 0x98c   : > { %7792 = vperm.xlu0 %13895, %v16227_v57  }
 0x98f   : > { %7005 = vperm.xlu1 %13872, %v16237_v17  }
 0x990   : > { %13896 = vset.pattern.permute.xlu0 %v17995_v22 }
 0x991   : > { %7683 = vperm.xlu0 %13896, %v16227_v57  }
 0x993   : > { %13873 = vset.pattern.permute.xlu1 %v17987_v46 }
 0x994   : > { %6900 = vperm.xlu1 %13873, %v16255_v30  }
 0x995   : > { %7687 = vperm.xlu0 %13896, %v16237_v17  }
 0x998   : > { %13874 = vset.pattern.permute.xlu1 %v17990_v42 }
 0x999   : > { %7110 = vperm.xlu1 %13874, %v16227_v57   ;;  %7691 = vperm.xlu0 %13896, %v16255_v30  }
 0x99d   : > { %13875 = vset.pattern.permute.xlu1 %v17987_v46  ;;  %13900 = vset.pattern.permute.xlu0 %v17941_v12 }
 0x99e   : > { %6904 = vperm.xlu1 %13875, %v16293_v24   ;;  %7816 = vperm.xlu0 %13900, %v16305_v10  }
 0x9a2   : > { %13876 = vset.pattern.permute.xlu1 %v17989_v47  ;;  %7824 = vperm.xlu0 %13900, %v16312_v19  }
 0x9a3   : > { %7009 = vperm.xlu1 %13876, %v16255_v30  }
 0x9a6   : > { %13902 = vset.pattern.permute.xlu0 %v17996_v60 }
 0x9a7   : > { %13877 = vset.pattern.permute.xlu1 %v17991_v39  ;;  %7933 = vperm.xlu0 %13902, %v16227_v57  }
 0x9a8   : > { %7219 = vperm.xlu1 %13877, %v16227_v57  }
 0x9ab   : > { %7941 = vperm.xlu0 %13902, %v16255_v30  }
 0x9ac   : > { %7223 = vperm.xlu1 %13877, %v16237_v17  }
 0x9b0   : > { %13880 = vset.pattern.permute.xlu1 %v17990_v42 }
 0x9b1   : > { %7118 = vperm.xlu1 %13880, %v16255_v30  }
 0x9b5   : > { %13881 = vset.pattern.permute.xlu1 %v17991_v39 }
 0x9b6   : > { %7227 = vperm.xlu1 %13881, %v16255_v30  }
 0x9ba   : > { %13882 = vset.pattern.permute.xlu1 %v17975_v13 }
 0x9bb   : > { %7243 = vperm.xlu1 %13882, %v16305_v10  }
 0x9bf   : > { %7247 = vperm.xlu1 %13882, %v16327_v33  }
 0x9c3   : > { %7251 = vperm.xlu1 %13882, %v16312_v19  }
 0x9c7   : > { %13885 = vset.pattern.permute.xlu1 %v17992_v32 }
 0x9c8   : > { %7360 = vperm.xlu1 %13885, %v16227_v57  }
 0xa2c   : > { %v12573_v20 = vpop.f32.mrb[64].mxu0 }
 0xa2d   : > { %v5897_v54 = vadd.f32 %v12573_v20, %v5817_v59  ;;  %v5891_v11 = vpop.f32.mrb[65].mxu0  ;;  %v5961_v59 = vpop.permute.xlu0 %5960 }
 0xa2e   : > { %v5892_v14 = vadd.f32 %v5891_v11, %v5812_v45  ;;  %v17997_v45 = vmov 16  }
 0xa2f   : > { %v5901_v53 = vadd.f32 %v13981_v41, %v5897_v54  ;;  %13906 = vset.pattern.permute.xlu0 %v17997_v45 }
 0xa30   : > { %v5900_v55 = vadd.f32 %v13982_v50, %v5892_v14  ;;  %8042 = vperm.xlu0 %13906, %v16237_v17  }
 0xa31   : > { %v5903_v29 = vadd.f32 %v13981_v41, %v5901_v53  ;;  %v5966_v20 = vpop.permute.xlu0 %5965 }
 0xa32   : > { %v5902_v1 = vadd.f32 %v13982_v50, %v5900_v55 }
 0xa33   : > { %v5918_v21 = vmul.f32 %v5915_v7, %v5903_v29  ;;  %v17998_v29 = vmov 11  }
 0xa34   : > { %v5917_v49 = vmul.f32 %v5910_v15, %v5902_v1  ;;  %v5971_v15 = vpop.permute.xlu1 %5970  ;;  %8050 = vperm.xlu0 %13906, %v16293_v24   ;;  %13886 = vset.pattern.permute.xlu1 %v17998_v29 }
 0xa35   : > { %v5928_v38 = vadd.f32 %v5925_v63, %v5918_v21  ;;  %7465 = vperm.xlu1 %13886, %v16227_v57  }
 0xa36   : > { %v5927_v16 = vadd.f32 %v5921_v36, %v5917_v49  ;;  %v6084_v49 = vpop.permute.xlu0 %6083 }
 0xa37   : > { %v5940_v0 = vmul.f32 %v5937_v28, %v5928_v38  ;;  %vm5930_vm9 = vcmp.gt.f32.partialorder %v5928_v38, 0.0 }
 0xa38   : > { %v5939_v43 = vmul.f32 %v5933_v8, %v5927_v16  ;;  %vm5929_vm10 = vcmp.gt.f32.partialorder %v5927_v16, 0.0  ;;  %v6088_v50 = vpop.permute.xlu1 %6087 }
 0xa39   : > { %v16267_v48 = vsel %vm5930_vm9, %v5928_v38, %v5940_v0  ;;  %v17999_v0 = vld [vmem:[#allocation32_spill] sm:$0xff]  ;;  %7469 = vperm.xlu1 %13886, %v16237_v17  }
 0xa3a   : > { %17982 = vst [vmem:[#allocation43_spill] sm:$0xff] %v16267_v48  ;;  %v16269_v51 = vsel %vm5929_vm10, %v5927_v16, %v5939_v43  ;;  %v18000_v43 = vld [vmem:[#allocation33_spill] sm:$0xff] }
 0xa3b   : > { %17983 = vst [vmem:[#allocation47_spill] sm:$0xff] %v16269_v51  ;;  %v13287_v58 = vpack.c.bf16 %v16267_v48, %v16269_v51 }
 0xa3d   : > { %13288 = vmatprep.subr.bf16.mxu0 %v13287_v58  ;;  %13888 = vset.pattern.permute.xlu1 %v17993_v62 }
 0xa3e   : > { %13290 = vmatpush3.bf16.msra.mxu0 %v13287_v58  ;;  %7574 = vperm.xlu1 %13888, %v16227_v57  }
 0xa3f   : > { %13292 = vmatprep.subr.bf16.mxu0 %v17984_v26 }
 0xa41   : > { %12579 = vmatmul.mubr.msk.f32.vlgmr.msra.gmra.mrb[66].mxu0 %vm882_vm0, %v11293_v34  ;;  %v16407_v34 = vpop.permute.xlu1 %6207 }
 0xa42   : > { %12581 = vmatprep.mubr.msk.f32.mxu0 %vm882_vm0, %v11294_v5  ;;  %13294 = vmatpush3.bf16.msra.mxu0 %v17984_v26  ;;  %v18002_v5 = vld [vmem:[#allocation36_spill] sm:$0xff] }
 0xa43   : > { %13296 = vmatprep.subr.bf16.mxu0 %v17985_v35  ;;  %13890 = vset.pattern.permute.xlu1 %v17992_v32 }
 0xa44   : > { %7368 = vperm.xlu1 %13890, %v16255_v30  }
 0xa45   : > { %12582 = vmatmul.mubr.msk.f32.gmra.mrb[68].mxu0 %vm882_vm0, %v11295_v4  ;;  %v16421_v26 = vpop.permute.xlu1 %6212  ;;  %v18003_v4 = vld [vmem:[#allocation35_spill] sm:$0xff] }
 0xa46   : > { %13298 = vmatpush3.bf16.msra.mxu0 %v17985_v35 }
 0xa47   : > { %13308 = vmatprep.subr.bf16.mxu0 %v17986_v3 }
 0xa48   : > { %13891 = vset.pattern.permute.xlu1 %v17998_v29 }
 0xa49   : > { %v16433_v35 = vpop.permute.xlu1 %6424  ;;  %7473 = vperm.xlu1 %13891, %v16255_v30  }
 0xa4d   : > { %13892 = vset.pattern.permute.xlu1 %v17992_v32 }
 0xa4e   : > { %7372 = vperm.xlu1 %13892, %v16293_v24  }
 0xa52   : > { %13893 = vset.pattern.permute.xlu1 %v17998_v29 }
 0xa53   : > { %7477 = vperm.xlu1 %13893, %v16293_v24  }
 0xa57   : > { %13894 = vset.pattern.permute.xlu1 %v17993_v62 }
 0xa58   : > { %7582 = vperm.xlu1 %13894, %v16255_v30  }
 0xa5c   : > { %7586 = vperm.xlu1 %13894, %v16293_v24  }
 0xa60   : > { %13897 = vset.pattern.permute.xlu1 %v17994_v25 }
 0xa61   : > { %7796 = vperm.xlu1 %13897, %v16237_v17  }
 0xa65   : > { %13898 = vset.pattern.permute.xlu1 %v17995_v22 }
 0xa66   : > { %7695 = vperm.xlu1 %13898, %v16293_v24  }
 0xa6a   : > { %13899 = vset.pattern.permute.xlu1 %v17994_v25 }
 0xa6b   : > { %7800 = vperm.xlu1 %13899, %v16255_v30  }
 0xa6f   : > { %7804 = vperm.xlu1 %13899, %v16293_v24  }
 0xa73   : > { %13901 = vset.pattern.permute.xlu1 %v17941_v12 }
 0xa74   : > { %7820 = vperm.xlu1 %13901, %v16327_v33  }
 0xa78   : > { %7828 = vperm.xlu1 %13901, %v16335_v61  }
 0xa7c   : > { %13903 = vset.pattern.permute.xlu1 %v17996_v60 }
 0xa7d   : > { %7937 = vperm.xlu1 %13903, %v16237_v17  }
 0xa81   : > { %13904 = vset.pattern.permute.xlu1 %v17997_v45 }
 0xa82   : > { %8038 = vperm.xlu1 %13904, %v16227_v57  }
 0xb14   : > { %v12580_v36 = vpop.f32.mrb[66].mxu0 }
 0xb15   : > { %v6057_v54 = vadd.f32 %v12580_v36, %v5961_v59  ;;  %v6051_v11 = vpop.f32.mrb[67].mxu0  ;;  %v18008_v59 = vld [vmem:[#allocation40_spill] sm:$0xff]  ;;  %v18009_v36 = vld [vmem:[#allocation41_spill] sm:$0xff] }
 0xb16   : > { %v6052_v14 = vadd.f32 %v6051_v11, %v5956_v37  ;;  %v18005_v37 = vld [vmem:[#allocation38_spill] sm:$0xff] }
 0xb17   : > { %v6091_v41 = vmul.f32 %v6080_v27, %v6057_v54  ;;  %vm6071_vm11 = vcmp.gt.f32.partialorder %v6057_v54, 0.0  ;;  %v18007_v27 = vld [vmem:[#allocation39_spill] sm:$0xff] }
 0xb18   : > { %vm6070_vm13 = vcmp.gt.f32.partialorder %v6052_v14, 0.0  ;;  %v6090_v53 = vmul.f32 %v6076_v44, %v6052_v14  ;;  %v12583_v7 = vpop.f32.mrb[68].mxu0  ;;  %v18006_v44 = vmov 17  }
 0xb19   : > { %v6067_v55 = vadd.f32 %v12583_v7, %v5971_v15  ;;  %v6061_v63 = vpop.f32.mrb[69].mxu0  ;;  %v6095_v28 = vsel %vm6071_vm11, %v6057_v54, %v6091_v41  ;;  %13910 = vset.pattern.permute.xlu0 %v18006_v44  ;;  %v16449_v15 = vpop.permute.xlu1 %6217  ;;  %13905 = vset.pattern.permute.xlu1 %v18006_v44 }
 0xb1a   : > { %v6094_v1 = vsel %vm6070_vm13, %v6052_v14, %v6090_v53  ;;  %v6062_v21 = vadd.f32 %v6061_v63, %v5966_v20  ;;  %8155 = vperm.xlu0 %13910, %v16255_v30   ;;  %v18010_v20 = vmov 19   ;;  %8147 = vperm.xlu1 %13905, %v16227_v57  }
 0xb1b   : > { %v6093_v38 = vmul.f32 %v6088_v50, %v6067_v55  ;;  %12592 = vmatprep.mubr.msk.f32.mxu0 %vm1020_vm1, %v6094_v1  ;;  %12606 = vmatprep.mubr.msk.f32.mxu1 %vm1020_vm1, %v6094_v1  ;;  %vm6073_vm14 = vcmp.gt.f32.partialorder %v6067_v55, 0.0 }
 0xb1c   : > { %vm6072_vm15 = vcmp.gt.f32.partialorder %v6062_v21, 0.0  ;;  %v6092_v8 = vmul.f32 %v6084_v49, %v6062_v21  ;;  %12593 = vmatmul.mubr.msk.f32.vlgmr.msra.gmra.mrb[70].mxu0 %vm1020_vm1, %v6095_v28  ;;  %12607 = vmatmul.mubr.msk.f32.vlgmr.msra.gmra.mrb[64].mxu1 %vm1020_vm1, %v6095_v28  ;;  %v18011_v49 = vmov 18  }
 0xb1d   : > { %13310 = vmatpush3.bf16.msra.mxu0 %v17986_v3  ;;  %13318 = vmatpush3.bf16.msra.mxu1 %v17979_v9  ;;  %v6097_v58 = vsel %vm6073_vm14, %v6067_v55, %v6093_v38  ;;  %v18001_v9 = vld [vmem:[#allocation34_spill] sm:$0xff]  ;;  %v18004_v3 = vld [vmem:[#allocation37_spill] sm:$0xff]  ;;  %v16458_v54 = vpop.permute.xlu1 %6323 }
 0xb1e   : > { %v6096_v16 = vsel %vm6072_vm15, %v6062_v21, %v6092_v8  ;;  %13312 = vmatprep.subr.bf16.mxu0 %v17999_v0  ;;  %13320 = vmatprep.subr.bf16.mxu1 %v18000_v43 }
 0xb1f   : > { %12595 = vmatprep.mubr.msk.f32.mxu0 %vm1020_vm1, %v6096_v16  ;;  %12609 = vmatprep.mubr.msk.f32.mxu1 %vm1020_vm1, %v6096_v16 }
 0xb20   : > { %12596 = vmatmul.mubr.msk.f32.gmra.mrb[72].mxu0 %vm1020_vm1, %v6097_v58  ;;  %12610 = vmatmul.mubr.msk.f32.gmra.mrb[66].mxu1 %vm1020_vm1, %v6097_v58 }
 0xb21   : > { %13314 = vmatpush3.bf16.msra.mxu0 %v17999_v0  ;;  %12620 = vmatprep.mubr.msk.f32.mxu0 %vm1020_vm1, %v6094_v1  ;;  %v16463_v11 = vpop.permute.xlu1 %6222  ;;  %v11392_v0 = vld [vmem:[%s17837_s4 + $0x80] sm:$0xff] }
 0xb22   : > { %13322 = vmatpush3.bf16.msra.mxu1 %v18000_v43  ;;  %12634 = vmatprep.mubr.msk.f32.mxu1 %vm1020_vm1, %v6094_v1 }
 0xb23   : > { %13324 = vmatprep.subr.bf16.mxu0 %v18001_v9  ;;  %13332 = vmatprep.subr.bf16.mxu1 %v18002_v5 }
 0xb24   : > { %12621 = vmatmul.mubr.msk.f32.vlgmr.msra.gmra.mrb[74].mxu0 %vm1020_vm1, %v6095_v28  ;;  %13913 = vset.pattern.permute.xlu0 %v18010_v20 }
 0xb25   : > { %12635 = vmatmul.mubr.msk.f32.vlgmr.msra.gmra.mrb[68].mxu1 %vm1020_vm1, %v6095_v28  ;;  %12623 = vmatprep.mubr.msk.f32.mxu0 %vm1020_vm1, %v6096_v16  ;;  %v16470_v14 = vpop.permute.xlu1 %6327 }
 0xb26   : > { %12637 = vmatprep.mubr.msk.f32.mxu1 %vm1020_vm1, %v6096_v16  ;;  %13326 = vmatpush3.bf16.msra.mxu0 %v18001_v9  ;;  %v16583_v9 = vld [vmem:[%s17838_s1 + $0x30] sm:$0xff] }
 0xb27   : > { %13328 = vmatprep.subr.bf16.mxu0 %v18003_v4  ;;  %13334 = vmatpush3.bf16.msra.mxu1 %v18002_v5 }
 0xb28   : > { %12624 = vmatmul.mubr.msk.f32.gmra.mrb[76].mxu0 %vm1020_vm1, %v6097_v58  ;;  %13336 = vmatprep.subr.bf16.mxu1 %v18005_v37 }
 0xb29   : > { %12638 = vmatmul.mubr.msk.f32.gmra.mrb[70].mxu1 %vm1020_vm1, %v6097_v58  ;;  %12648 = vmatprep.mubr.msk.f32.mxu0 %vm1020_vm1, %v6094_v1  ;;  %v16475_v41 = vpop.permute.xlu1 %6432 }
 0xb2a   : > { %13330 = vmatpush3.bf16.msra.mxu0 %v18003_v4  ;;  %8369 = vperm.xlu0 %13913, %v16237_v17   ;;  %v16594_v4 = vld [vmem:[%s17838_s1 + $0x28] sm:$0xff] }
 0xb2b   : > { %13340 = vmatprep.subr.bf16.mxu0 %v18004_v3  ;;  %13338 = vmatpush3.bf16.msra.mxu1 %v18005_v37 }
 0xb2c   : > { %13348 = vmatprep.subr.bf16.mxu1 %v18008_v59  ;;  %8151 = vperm.xlu1 %13905, %v16237_v17  }
 0xb2d   : > { %12649 = vmatmul.mubr.msk.f32.vlgmr.msra.gmra.mrb[78].mxu0 %vm1020_vm1, %v6095_v28 }
 0xb2e   : > { %12651 = vmatprep.mubr.msk.f32.mxu0 %vm1020_vm1, %v6096_v16  ;;  %13342 = vmatpush3.bf16.msra.mxu0 %v18004_v3 }
 0xb2f   : > { %13344 = vmatprep.subr.bf16.mxu0 %v18007_v27  ;;  %8373 = vperm.xlu0 %13913, %v16255_v30  }
 0xb30   : > { %13907 = vset.pattern.permute.xlu1 %v17996_v60 }
 0xb31   : > { %12652 = vmatmul.mubr.msk.f32.gmra.mrb[80].mxu0 %vm1020_vm1, %v6097_v58  ;;  %7945 = vperm.xlu1 %13907, %v16293_v24  }
 0xb32   : > { %13346 = vmatpush3.bf16.msra.mxu0 %v18007_v27 }
 0xb33   : > { %13356 = vmatprep.subr.bf16.mxu0 %v18009_v36  ;;  %13916 = vset.pattern.permute.xlu0 %v17942_v52 }
 0xb34   : > { %8389 = vperm.xlu0 %13916, %v16305_v10   ;;  %v16480_v10 = vpop.permute.xlu1 %6436 }
 0xb35   : > { %13908 = vset.pattern.permute.xlu1 %v17997_v45 }
 0xb36   : > { %8046 = vperm.xlu1 %13908, %v16255_v30  }
 0xb38   : > { %8401 = vperm.xlu0 %13916, %v16335_v61   ;;  %v16484_v53 = vpop.permute.xlu1 %6646 }
 0xb3a   : > { %13909 = vset.pattern.permute.xlu1 %v18011_v49 }
 0xb3b   : > { %8256 = vperm.xlu1 %13909, %v16227_v57  }
 0xb3c   : > { %13920 = vset.pattern.permute.xlu0 %v17941_v12  ;;  %v16487_v7 = vpop.permute.xlu1 %6545 }
 0xb3f   : > { %8260 = vperm.xlu1 %13909, %v16237_v17   ;;  %v11393_v17 = vld [vmem:[%s17837_s4 + $0x88] sm:$0xff] }
 0xb40   : > { %v16492_v50 = vpop.permute.xlu1 %6650  ;;  %8618 = vrot.lane.b32.xlu0 %v11393_v17, %s18013_s7 }
 0xb43   : > { %13911 = vset.pattern.permute.xlu1 %v18006_v44  ;;  %v16610_v44 = vld [vmem:[%s17839_s12 + $0x30] sm:$0xff] }
 0xb44   : > { %v16496_v55 = vpop.permute.xlu1 %6654  ;;  %8159 = vperm.xlu1 %13911, %v16293_v24  }
 0xb48   : > { %v16500_v63 = vpop.permute.xlu1 %6672  ;;  %13912 = vset.pattern.permute.xlu1 %v18010_v20 }
 0xb49   : > { %8365 = vperm.xlu1 %13912, %v16227_v57   ;;  %v11395_v57 = vld [vmem:[%s17837_s4 + $0x98] sm:$0xff] }
 0xb4a   : > { %8622 = vrot.lane.b32.xlu0 %v11395_v57, %s18013_s7 }
 0xb4c   : > { %v16504_v1 = vpop.permute.xlu1 %6682 }
 0xb4d   : > { %13914 = vset.pattern.permute.xlu1 %v18011_v49  ;;  %v6316_v49 = vpop.permute.xlu0 %6315 }
 0xb4e   : > { %8264 = vperm.xlu1 %13914, %v16255_v30  }
 0xb50   : > { %v16507_v61 = vpop.permute.xlu1 %6892 }
 0xb51   : > { %v6320_v57 = vpop.permute.xlu0 %6319 }
 0xb52   : > { %8268 = vperm.xlu1 %13914, %v16293_v24  }
 0xb54   : > { %v16511_v21 = vpop.permute.xlu1 %6791 }
 0xb56   : > { %13915 = vset.pattern.permute.xlu1 %v18010_v20 }
 0xb57   : > { %8377 = vperm.xlu1 %13915, %v16293_v24   ;;  %v16554_v24 = vld [vmem:[%s17838_s1 + $0x20] sm:$0xff] }
 0xb58   : > { %v16516_v28 = vpop.permute.xlu1 %7001  ;;  %8842 = vperm.xlu0 %13920, %v16554_v24  }
 0xb5b   : > { %13917 = vset.pattern.permute.xlu1 %v17942_v52 }
 0xb5c   : > { %v16520_v38 = vpop.permute.xlu1 %7005  ;;  %8393 = vperm.xlu1 %13917, %v16327_v33   ;;  %v16564_v33 = vld [vmem:[%s17838_s1 + $0x38] sm:$0xff] }
 0xb5d   : > { %8854 = vperm.xlu0 %13920, %v16564_v33  }
 0xb60   : > { %v16524_v60 = vpop.permute.xlu1 %6900  ;;  %8397 = vperm.xlu1 %13917, %v16312_v19   ;;  %v11394_v19 = vld [vmem:[%s17837_s4 + $0x90] sm:$0xff] }
 0xb61   : > { %13926 = vset.pattern.permute.xlu0 %v17942_v52 }
 0xb62   : > { %8866 = vperm.xlu0 %13926, %v16554_v24  }
 0xb64   : > { %v16528_v45 = vpop.permute.xlu1 %7110  ;;  %8616 = vrot.lane.b32.xlu1 %v11392_v0, %s18013_s7 }
 0xb65   : > { %13918 = vset.pattern.permute.xlu1 %v17943_v23 }
 0xb66   : > { %8874 = vperm.xlu0 %13926, %v16583_v9  }
 0xb68   : > { %v16532_v8 = vpop.permute.xlu1 %6904  ;;  %8620 = vrot.lane.b32.xlu1 %v11394_v19, %s18013_s7  ;;  %v6429_v19 = vpop.permute.xlu0 %6428  ;;  %s18139_s7 = sld [smem:[#allocation124_spill]] }
 0xb6a   : > { %13930 = vset.pattern.permute.xlu0 %v17981_v18 }
 0xb6b   : > { %8902 = vperm.xlu0 %13930, %v16564_v33  }
 0xb6c   : > { %v16540_v16 = vpop.permute.xlu1 %7009  ;;  %8795 = vperm.xlu1 %13918, %v16554_v24   ;;  %v16644_v48 = vpop.permute.xlu0 %6642 }
 0xb6d   : > { %18012 = vst [vmem:[#allocation48_spill] sm:$0xff] %v16540_v16 }
 0xb6e   : > { %s17548_s23 = scalar_lea.hbm %s18139_s7, %s11534_s25  ;;  %s14224_s25 = sshll.u32 %s14335_s27, 4  ;;  %s14225_s25 = int_to_ptr.vmem [resolvable:$false] %s14224_s25 }
 0xb6f   : > { %13931 = vset.pattern.permute.xlu0 %v17943_v23  ;;  %s14226_s26 = scalar_lea.vmem %s14225_s25, 512  ;;  %p14227_p2 = scmp.lt.s32.totalorder %s17550_s30, %s14225_s25 }
 0xb70   : > { %v16549_v30 = vpop.permute.xlu1 %7219  ;;  %13919 = vset.pattern.permute.xlu1 %v17975_v13  ;;  %8800 = vperm.xlu0 %13931, %v16594_v4   ;;  %p14228_p8 = scmp.lt.s32.totalorder %s14226_s26, %s14220_s13 }
 0xb71   : > { %18014 = vst [vmem:[#allocation45_spill] sm:$0xff] %v16549_v30  ;;  %8818 = vperm.xlu1 %13919, %v16554_v24  }
 0xb72   : > { %p14229_p6 = por %p14228_p8, %p14227_p2 }
 0xb74   : > { %v16566_v43 = vpop.permute.xlu1 %7223  ;;  %8810 = vperm.xlu0 %13931, %v16564_v33   ;;  %p14230_p10 = pnand %p14229_p6, %p14223_p0 }
 0xb75   : > { %18015 = vst [vmem:[#allocation46_spill] sm:$0xff] %v16566_v43  ;;  %8822 = vperm.xlu1 %13919, %v16594_v4  }
 0xb78   : > { %v16577_v58 = vpop.permute.xlu1 %7118  ;;  %8925 = vperm.xlu0 %13931, %v16610_v44  }
 0xb79   : > { %18016 = vst [vmem:[#allocation68_spill] sm:$0xff] %v16577_v58  ;;  %13921 = vset.pattern.permute.xlu1 %v17941_v12 }
 0xb7a   : > { %8846 = vperm.xlu1 %13921, %v16594_v4  }
 0xb7c   : > { %v16586_v5 = vpop.permute.xlu1 %7227  ;;  %13934 = vset.pattern.permute.xlu0 %v17988_v2 }
 0xb7d   : > { %18017 = vst [vmem:[#allocation44_spill] sm:$0xff] %v16586_v5  ;;  %9291 = vperm.xlu0 %13934, %v16594_v4  }
 0xb7e   : > { %13922 = vset.pattern.permute.xlu1 %v17943_v23 }
 0xb7f   : > { %8805 = vperm.xlu1 %13922, %v16583_v9  }
 0xb80   : > { %v16598_v3 = vpop.permute.xlu1 %7243 }
 0xb81   : > { %18018 = vst [vmem:[#allocation74_spill] sm:$0xff] %v16598_v3  ;;  %9299 = vperm.xlu0 %13934, %v16564_v33  }
 0xb83   : > { %13923 = vset.pattern.permute.xlu1 %v17975_v13 }
 0xb84   : > { %v16605_v37 = vpop.permute.xlu1 %7247  ;;  %8826 = vperm.xlu1 %13923, %v16583_v9  }
 0xb85   : > { %18019 = vst [vmem:[#allocation72_spill] sm:$0xff] %v16605_v37  ;;  %13938 = vset.pattern.permute.xlu0 %v17989_v47 }
 0xb86   : > { %9331 = vperm.xlu0 %13938, %v16554_v24  }
 0xb88   : > { %v16615_v27 = vpop.permute.xlu1 %7251  ;;  %8830 = vperm.xlu1 %13923, %v16564_v33  }
 0xb89   : > { %18020 = vst [vmem:[#allocation52_spill] sm:$0xff] %v16615_v27 }
 0xb8a   : > { %9343 = vperm.xlu0 %13938, %v16564_v33  }
 0xb8c   : > { %v16621_v20 = vpop.permute.xlu1 %7360  ;;  %13924 = vset.pattern.permute.xlu1 %v17942_v52 }
 0xb8d   : > { %18021 = vst [vmem:[#allocation58_spill] sm:$0xff] %v16621_v20  ;;  %8870 = vperm.xlu1 %13924, %v16594_v4  }
 0xb8e   : > { %13942 = vset.pattern.permute.xlu0 %v17990_v42 }
 0xb8f   : > { %9355 = vperm.xlu0 %13942, %v16554_v24  }
 0xb90   : > { %v16629_v17 = vpop.permute.xlu1 %7465 }
 0xb91   : > { %18022 = vst [vmem:[#allocation49_spill] sm:$0xff] %v16629_v17  ;;  %13925 = vset.pattern.permute.xlu1 %v17941_v12  ;;  %v6534_v17 = vpop.permute.xlu0 %6533 }
 0xb92   : > { %8850 = vperm.xlu1 %13925, %v16583_v9  }
 0xb93   : > { %9363 = vperm.xlu0 %13942, %v16583_v9  }
 0xb94   : > { %v16634_v0 = vpop.permute.xlu1 %7469 }
 0xb95   : > { %18023 = vst [vmem:[#allocation76_spill] sm:$0xff] %v16634_v0  ;;  %v6538_v37 = vpop.permute.xlu0 %6537 }
 0xb96   : > { %13927 = vset.pattern.permute.xlu1 %v17981_v18 }
 0xb97   : > { %8890 = vperm.xlu1 %13927, %v16554_v24   ;;  %13947 = vset.pattern.permute.xlu0 %v17991_v39 }
 0xb98   : > { %v16640_v51 = vpop.permute.xlu1 %7574  ;;  %9387 = vperm.xlu0 %13947, %v16583_v9  }
 0xb99   : > { %18024 = vst [vmem:[#allocation56_spill] sm:$0xff] %v16640_v51 }
 0xb9b   : > { %8894 = vperm.xlu1 %13927, %v16594_v4  }
 0xb9c   : > { %v16649_v56 = vpop.permute.xlu1 %7368  ;;  %13948 = vset.pattern.permute.xlu0 %v17992_v32 }
 0xb9d   : > { %18025 = vst [vmem:[#allocation70_spill] sm:$0xff] %v16649_v56  ;;  %9776 = vperm.xlu0 %13948, %v16594_v4  }
 0xb9f   : > { %13928 = vset.pattern.permute.xlu1 %v17942_v52  ;;  %v16661_v52 = vld [vmem:[%s17839_s12 + $0x20] sm:$0xff] }
 0xba0   : > { %8878 = vperm.xlu1 %13928, %v16564_v33   ;;  %v16656_v51 = vpop.permute.xlu1 %7473 }
 0xba1   : > { %18026 = vst [vmem:[#allocation60_spill] sm:$0xff] %v16656_v51  ;;  %9780 = vperm.xlu0 %13948, %v16583_v9  }
 0xba4   : > { %13929 = vset.pattern.permute.xlu1 %v17981_v18 }
 0xba5   : > { %8898 = vperm.xlu1 %13929, %v16583_v9   ;;  %13954 = vset.pattern.permute.xlu0 %v17998_v29 }
 0xba6   : > { %9804 = vperm.xlu0 %13954, %v16564_v33  }
 0xba9   : > { %13932 = vset.pattern.permute.xlu1 %v17943_v23 }
 0xbaa   : > { %8915 = vperm.xlu1 %13932, %v16661_v52   ;;  %13955 = vset.pattern.permute.xlu0 %v17975_v13 }
 0xbef   : > { %v12594_v20 = vpop.f32.mrb[70].mxu0  ;;  %v12608_v0 = vpop.f32.mrb[64].mxu1 }
 0xbf0   : > { %v6226_v56 = vmul.f32 %v12594_v20, %v16421_v26  ;;  %v6331_v40 = vmul.f32 %v12608_v0, %v6320_v57  ;;  %v6186_v27 = vpop.f32.mrb[71].mxu0  ;;  %v6295_v5 = vpop.f32.mrb[65].mxu1  ;;  %v16671_v26 = vld [vmem:[%s17839_s12 + $0x28] sm:$0xff] }
 0xbf1   : > { %v6225_v18 = vmul.f32 %v16407_v34, %v6186_v27  ;;  %v6330_v3 = vmul.f32 %v6316_v49, %v6295_v5  ;;  %8920 = vperm.xlu1 %13932, %v16671_v26  }
 0xbf2   : > { %v6335_v51 = vadd.f32 %v6331_v40, %v6226_v56 }
 0xbf3   : > { %v6334_v30 = vadd.f32 %v6330_v3, %v6225_v18  ;;  %v12597_v43 = vpop.f32.mrb[72].mxu0  ;;  %v12611_v58 = vpop.f32.mrb[66].mxu1 }
 0xbf4   : > { %v6228_v20 = vmul.f32 %v12597_v43, %v16463_v11  ;;  %v6333_v57 = vmul.f32 %v12611_v58, %v16470_v14  ;;  %v6196_v34 = vpop.f32.mrb[73].mxu0  ;;  %v6305_v5 = vpop.f32.mrb[67].mxu1  ;;  %v16685_v11 = vld [vmem:[%s17839_s12 + $0x38] sm:$0xff] }
 0xbf5   : > { %v6227_v40 = vmul.f32 %v16449_v15, %v6196_v34  ;;  %v6332_v56 = vmul.f32 %v16458_v54, %v6305_v5  ;;  %v16678_v3 = vpop.permute.xlu1 %7372  ;;  %v6542_v15 = vpop.permute.xlu0 %6541  ;;  %8930 = vperm.xlu1 %13932, %v16685_v11   ;;  %9407 = vperm.xlu0 %13955, %v16671_v26  }
 0xbf6   : > { %18027 = vst [vmem:[#allocation61_spill] sm:$0xff] %v16678_v3  ;;  %v6337_v27 = vadd.f32 %v6333_v57, %v6228_v20 }
 0xbf7   : > { %v6336_v49 = vadd.f32 %v6332_v56, %v6227_v40  ;;  %v12622_v0 = vpop.f32.mrb[74].mxu0 }
 0xbf8   : > { %v6440_v14 = vmul.f32 %v12622_v0, %v6429_v19  ;;  %v12636_v43 = vpop.f32.mrb[68].mxu1  ;;  %v6404_v58 = vpop.f32.mrb[75].mxu0 }
 0xbf9   : > { %v6439_v54 = vmul.f32 %v16433_v35, %v6404_v58  ;;  %v6513_v18 = vpop.f32.mrb[69].mxu1  ;;  %v6549_v20 = vmul.f32 %v12636_v43, %v6538_v37  ;;  %v16691_v56 = vpop.permute.xlu1 %7477  ;;  %13933 = vset.pattern.permute.xlu1 %v17988_v2 }
 0xbfa   : > { %v6444_v34 = vadd.f32 %v6440_v14, %v6335_v51  ;;  %v6548_v5 = vmul.f32 %v6534_v17, %v6513_v18  ;;  %v6668_v51 = vpop.permute.xlu0 %6667  ;;  %9411 = vperm.xlu0 %13955, %v16610_v44   ;;  %9287 = vperm.xlu1 %13933, %v16554_v24  }
 0xbfb   : > { %v6443_v57 = vadd.f32 %v6439_v54, %v6334_v30  ;;  %v12625_v40 = vpop.f32.mrb[76].mxu0 }
 0xbfc   : > { %v6553_v19 = vadd.f32 %v6549_v20, %v6444_v34  ;;  %v6442_v0 = vmul.f32 %v12625_v40, %v16480_v10  ;;  %v12639_v23 = vpop.f32.mrb[70].mxu1  ;;  %v6414_v3 = vpop.f32.mrb[77].mxu0 }
 0xbfd   : > { %v6552_v35 = vadd.f32 %v6548_v5, %v6443_v57  ;;  %v6441_v58 = vmul.f32 %v16475_v41, %v6414_v3  ;;  %v6523_v16 = vpop.f32.mrb[71].mxu1  ;;  %v6551_v14 = vmul.f32 %v12639_v23, %v16487_v7  ;;  %v16700_v41 = vpop.permute.xlu1 %7582 }
 0xbfe   : > { %v6446_v37 = vadd.f32 %v6442_v0, %v6337_v27  ;;  %v6550_v17 = vmul.f32 %v6542_v15, %v6523_v16  ;;  %13959 = vset.pattern.permute.xlu0 %v17993_v62  ;;  %v6678_v7 = vpop.permute.xlu0 %6677  ;;  %13935 = vset.pattern.permute.xlu1 %v17987_v46  ;;  %v18030_v0 = vld [vmem:[#allocation51_spill] sm:$0xff] }
 0xbff   : > { %v6445_v30 = vadd.f32 %v6441_v58, %v6336_v49  ;;  %9828 = vperm.xlu0 %13959, %v16564_v33   ;;  %9307 = vperm.xlu1 %13935, %v16554_v24  }
 0xc00   : > { %v6555_v43 = vadd.f32 %v6551_v14, %v6446_v37  ;;  %v12650_v10 = vpop.f32.mrb[78].mxu0  ;;  %v18034_v37 = vld [vmem:[#allocation57_spill] sm:$0xff] }
 0xc01   : > { %v6554_v54 = vadd.f32 %v6550_v17, %v6445_v30  ;;  %v6658_v18 = vmul.f32 %v12650_v10, %v16484_v53  ;;  %v6622_v34 = vpop.f32.mrb[79].mxu0  ;;  %v16710_v5 = vpop.permute.xlu1 %7586  ;;  %v18035_v30 = vld [vmem:[#allocation82_spill] sm:$0xff] }
 0xc02   : > { %v6657_v3 = vmul.f32 %v16644_v48, %v6622_v34  ;;  %v16742_v58 = vpop.permute.xlu0 %6896 }
 0xc03   : > { %v6662_v23 = vadd.f32 %v6658_v18, %v6553_v19  ;;  %13961 = vset.pattern.permute.xlu0 %v17995_v22  ;;  %9311 = vperm.xlu1 %13935, %v16594_v4  }
 0xc04   : > { %v6661_v16 = vadd.f32 %v6657_v3, %v6552_v35  ;;  %v12653_v27 = vpop.f32.mrb[80].mxu0  ;;  %9848 = vperm.xlu0 %13961, %v16583_v9  }
 0xc05   : > { %v6686_v49 = vadd.f32 %v16500_v63, %v6662_v23  ;;  %v6660_v53 = vmul.f32 %v12653_v27, %v16496_v55  ;;  %v6632_v15 = vpop.f32.mrb[81].mxu0 }
 0xc06   : > { %v6685_v20 = vadd.f32 %v6668_v51, %v6661_v16  ;;  %v6659_v48 = vmul.f32 %v16492_v50, %v6632_v15  ;;  %v18029_v50 = vld [vmem:[#allocation50_spill] sm:$0xff]  ;;  %v16756_v14 = vpop.permute.xlu0 %6787 }
 0xc07   : > { %v6664_v57 = vadd.f32 %v6660_v53, %v6555_v43  ;;  %13936 = vset.pattern.permute.xlu1 %v17989_v47 }
 0xc08   : > { %v6663_v40 = vadd.f32 %v6659_v48, %v6554_v54  ;;  %12662 = vmatprep.mubr.msk.f32.mxu1 %vm1020_vm1, %v6685_v20  ;;  %12676 = vmatprep.mubr.msk.f32.mxu0 %vm1020_vm1, %v6685_v20  ;;  %v16715_v19 = vpack.c.bf16 %v6686_v49, %v6685_v20 }
 0xc09   : > { %v6688_v63 = vadd.f32 %v16504_v1, %v6664_v57  ;;  %12663 = vmatmul.mubr.msk.f32.vlgmr.msra.gmra.mrb[72].mxu1 %vm1020_vm1, %v6686_v49  ;;  %12677 = vmatmul.mubr.msk.f32.vlgmr.msra.gmra.mrb[82].mxu0 %vm1020_vm1, %v6686_v49  ;;  %v16730_v1 = vpop.permute.xlu1 %7796 }
 0xc0a   : > { %18028 = vst [vmem:[#allocation78_spill] sm:$0xff] %v16715_v19  ;;  %v6687_v55 = vadd.f32 %v6678_v7, %v6663_v40  ;;  %13350 = vmatpush3.bf16.msra.mxu1 %v18008_v59  ;;  %13358 = vmatpush3.bf16.msra.mxu0 %v18009_v36  ;;  %v18032_v59 = vld [vmem:[#allocation54_spill] sm:$0xff]  ;;  %v18033_v36 = vld [vmem:[#allocation80_spill] sm:$0xff]  ;;  %v16771_v43 = vpop.permute.xlu0 %6795 }
 0xc0b   : > { %13352 = vmatprep.subr.bf16.mxu1 %v18029_v50  ;;  %13360 = vmatprep.subr.bf16.mxu0 %v18030_v0 }
 0xc0c   : > { %12665 = vmatprep.mubr.msk.f32.mxu1 %vm1020_vm1, %v6687_v55  ;;  %12679 = vmatprep.mubr.msk.f32.mxu0 %vm1020_vm1, %v6687_v55  ;;  %v16726_v35 = vpack.c.bf16 %v6688_v63, %v6687_v55 }
 0xc0d   : > { %12666 = vmatmul.mubr.msk.f32.gmra.mrb[74].mxu1 %vm1020_vm1, %v6688_v63  ;;  %12680 = vmatmul.mubr.msk.f32.gmra.mrb[84].mxu0 %vm1020_vm1, %v6688_v63  ;;  %v16746_v51 = vpop.permute.xlu1 %7695 }
 0xc0e   : > { %18031 = vst [vmem:[#allocation59_spill] sm:$0xff] %v16726_v35  ;;  %13354 = vmatpush3.bf16.msra.mxu1 %v18029_v50  ;;  %12690 = vmatprep.mubr.msk.f32.mxu1 %vm1020_vm1, %v6685_v20 }
 0xc0f   : > { %13362 = vmatpush3.bf16.msra.mxu0 %v18030_v0  ;;  %12704 = vmatprep.mubr.msk.f32.mxu0 %vm1020_vm1, %v6685_v20 }
 0xc10   : > { %13364 = vmatprep.subr.bf16.mxu1 %v18032_v59  ;;  %13372 = vmatprep.subr.bf16.mxu0 %v18033_v36 }
 0xc11   : > { %12691 = vmatmul.mubr.msk.f32.vlgmr.msra.gmra.mrb[76].mxu1 %vm1020_vm1, %v6686_v49  ;;  %9335 = vperm.xlu1 %13936, %v16594_v4   ;;  %v16760_v17 = vpop.permute.xlu1 %7800 }
 0xc12   : > { %12705 = vmatmul.mubr.msk.f32.vlgmr.msra.gmra.mrb[86].mxu0 %vm1020_vm1, %v6686_v49  ;;  %12693 = vmatprep.mubr.msk.f32.mxu1 %vm1020_vm1, %v6687_v55  ;;  %18036 = vst [vmem:[#allocation62_spill] sm:$0xff] %v16760_v17 }
 0xc13   : > { %12707 = vmatprep.mubr.msk.f32.mxu0 %vm1020_vm1, %v6687_v55  ;;  %13366 = vmatpush3.bf16.msra.mxu1 %v18032_v59 }
 0xc14   : > { %13368 = vmatprep.subr.bf16.mxu1 %v18034_v37  ;;  %13374 = vmatpush3.bf16.msra.mxu0 %v18033_v36 }
 0xc15   : > { %12694 = vmatmul.mubr.msk.f32.gmra.mrb[78].mxu1 %vm1020_vm1, %v6688_v63  ;;  %13380 = vmatprep.subr.bf16.mxu0 %v15500_v6  ;;  %v16774_v10 = vpop.permute.xlu1 %7804 }
 0xc16   : > { %12708 = vmatmul.mubr.msk.f32.gmra.mrb[88].mxu0 %vm1020_vm1, %v6688_v63  ;;  %12718 = vmatprep.mubr.msk.f32.mxu1 %vm1020_vm1, %v6685_v20  ;;  %18037 = vst [vmem:[#allocation81_spill] sm:$0xff] %v16774_v10 }
 0xc17   : > { %13370 = vmatpush3.bf16.msra.mxu1 %v18034_v37  ;;  %13937 = vset.pattern.permute.xlu1 %v17988_v2  ;;  %v16780_v2 = vpop.permute.xlu0 %6799 }
 0xc18   : > { %13376 = vmatprep.subr.bf16.mxu1 %v18035_v30  ;;  %9295 = vperm.xlu1 %13937, %v16583_v9  }
 0xc19   : > { %13964 = vset.pattern.permute.xlu0 %v17994_v25  ;;  %v16782_v54 = vpop.permute.xlu1 %7820 }
 0xc1a   : > { %12719 = vmatmul.mubr.msk.f32.vlgmr.msra.gmra.mrb[80].mxu1 %vm1020_vm1, %v6686_v49  ;;  %9876 = vperm.xlu0 %13964, %v16564_v33   ;;  %18038 = vst [vmem:[#allocation53_spill] sm:$0xff] %v16782_v54 }
 0xc1b   : > { %12721 = vmatprep.mubr.msk.f32.mxu1 %vm1020_vm1, %v6687_v55  ;;  %13378 = vmatpush3.bf16.msra.mxu1 %v18035_v30  ;;  %v16786_v18 = vpop.permute.xlu0 %7013 }
 0xc1c   : > { %13384 = vmatprep.subr.bf16.mxu1 %v15506_v31  ;;  %13939 = vset.pattern.permute.xlu1 %v17987_v46 }
 0xc1d   : > { %9315 = vperm.xlu1 %13939, %v16583_v9   ;;  %v16789_v34 = vpop.permute.xlu1 %7828 }
 0xc1e   : > { %12722 = vmatmul.mubr.msk.f32.gmra.mrb[82].mxu1 %vm1020_vm1, %v6688_v63  ;;  %13966 = vset.pattern.permute.xlu0 %v17941_v12  ;;  %18039 = vst [vmem:[#allocation63_spill] sm:$0xff] %v16789_v34 }
 0xc1f   : > { %9896 = vperm.xlu0 %13966, %v16610_v44   ;;  %v16793_v46 = vpop.permute.xlu0 %7114 }
 0xc21   : > { %9319 = vperm.xlu1 %13939, %v16564_v33   ;;  %v16796_v44 = vpop.permute.xlu1 %7937 }
 0xc22   : > { %18040 = vst [vmem:[#allocation88_spill] sm:$0xff] %v16796_v44 }
 0xc23   : > { %13968 = vset.pattern.permute.xlu0 %v17975_v13  ;;  %v16800_v3 = vpop.permute.xlu0 %7122 }
 0xc25   : > { %13940 = vset.pattern.permute.xlu1 %v17990_v42  ;;  %v16802_v23 = vpop.permute.xlu1 %8038 }
 0xc26   : > { %9359 = vperm.xlu1 %13940, %v16594_v4   ;;  %18041 = vst [vmem:[#allocation84_spill] sm:$0xff] %v16802_v23 }
 0xc27   : > { %v16805_v7 = vpop.permute.xlu0 %7231 }
 0xc29   : > { %v16807_v16 = vpop.permute.xlu1 %8147 }
 0xc2a   : > { %13941 = vset.pattern.permute.xlu1 %v17989_v47  ;;  %18042 = vst [vmem:[#allocation64_spill] sm:$0xff] %v16807_v16 }
 0xc2b   : > { %9339 = vperm.xlu1 %13941, %v16583_v9   ;;  %v16811_v47 = vpop.permute.xlu0 %7255 }
 0xc2d   : > { %v16814_v27 = vpop.permute.xlu1 %8151 }
 0xc2e   : > { %18043 = vst [vmem:[#allocation67_spill] sm:$0xff] %v16814_v27 }
 0xc2f   : > { %13943 = vset.pattern.permute.xlu1 %v17991_v39  ;;  %v16818_v49 = vpop.permute.xlu0 %7364 }
 0xc30   : > { %9379 = vperm.xlu1 %13943, %v16554_v24  }
 0xc31   : > { %v16821_v53 = vpop.permute.xlu1 %7945 }
 0xc32   : > { %18044 = vst [vmem:[#allocation90_spill] sm:$0xff] %v16821_v53 }
 0xc34   : > { %9383 = vperm.xlu1 %13943, %v16594_v4  }
 0xc35   : > { %v16826_v15 = vpop.permute.xlu1 %8046 }
 0xc36   : > { %18045 = vst [vmem:[#allocation86_spill] sm:$0xff] %v16826_v15 }
 0xc38   : > { %13944 = vset.pattern.permute.xlu1 %v17990_v42  ;;  %v16824_v42 = vpop.permute.xlu0 %7578 }
 0xc39   : > { %9367 = vperm.xlu1 %13944, %v16564_v33   ;;  %v16832_v48 = vpop.permute.xlu1 %8256 }
 0xc3a   : > { %18047 = vst [vmem:[#allocation66_spill] sm:$0xff] %v16832_v48 }
 0xc3c   : > { %v16830_v20 = vpop.permute.xlu0 %7792 }
 0xc3d   : > { %13945 = vset.pattern.permute.xlu1 %v17992_v32  ;;  %18046 = vst [vmem:[#allocation69_spill] sm:$0xff] %v16830_v20  ;;  %v16839_v40 = vpop.permute.xlu1 %8260 }
 0xc3e   : > { %9772 = vperm.xlu1 %13945, %v16554_v24   ;;  %18048 = vst [vmem:[#allocation65_spill] sm:$0xff] %v16839_v40 }
 0xc40   : > { %v16836_v57 = vpop.permute.xlu0 %7683 }
 0xc41   : > { %v16845_v63 = vpop.permute.xlu1 %8159 }
 0xc42   : > { %13946 = vset.pattern.permute.xlu1 %v17998_v29  ;;  %18049 = vst [vmem:[#allocation73_spill] sm:$0xff] %v16845_v63 }
 0xc43   : > { %9792 = vperm.xlu1 %13946, %v16554_v24  }
 0xc45   : > { %v16851_v50 = vpop.permute.xlu1 %8365 }
 0xc46   : > { %18050 = vst [vmem:[#allocation71_spill] sm:$0xff] %v16851_v50 }
 0xc47   : > { %9796 = vperm.xlu1 %13946, %v16594_v4  }
 0xc49   : > { %v16857_v59 = vpop.permute.xlu1 %8264 }
 0xc4a   : > { %18052 = vst [vmem:[#allocation83_spill] sm:$0xff] %v16857_v59 }
 0xc4b   : > { %13949 = vset.pattern.permute.xlu1 %v17991_v39  ;;  %v16843_v39 = vpop.permute.xlu0 %7687 }
 0xc4c   : > { %9391 = vperm.xlu1 %13949, %v16564_v33  }
 0xc4f   : > { %v16849_v55 = vpop.permute.xlu0 %7691 }
 0xc50   : > { %13950 = vset.pattern.permute.xlu1 %v17975_v13 }
 0xc51   : > { %9403 = vperm.xlu1 %13950, %v16661_v52  }
 0xc53   : > { %v16855_v0 = vpop.permute.xlu0 %7816 }
 0xc54   : > { %18051 = vst [vmem:[#allocation75_spill] sm:$0xff] %v16855_v0 }
 0xc55   : > { %13951 = vset.pattern.permute.xlu1 %v17993_v62 }
 0xc56   : > { %9816 = vperm.xlu1 %13951, %v16554_v24  }
 0xc57   : > { %v16861_v36 = vpop.permute.xlu0 %7824 }
 0xc58   : > { %18053 = vst [vmem:[#allocation92_spill] sm:$0xff] %v16861_v36 }
 0xc5a   : > { %9820 = vperm.xlu1 %13951, %v16594_v4  }
 0xc5e   : > { %13952 = vset.pattern.permute.xlu1 %v17992_v32  ;;  %v16864_v32 = vpop.permute.xlu1 %8268 }
 0xc5f   : > { %9784 = vperm.xlu1 %13952, %v16564_v33   ;;  %18054 = vst [vmem:[#allocation79_spill] sm:$0xff] %v16864_v32 }
 0xc62   : > { %v16870_v37 = vpop.permute.xlu1 %8377 }
 0xc63   : > { %13953 = vset.pattern.permute.xlu1 %v17998_v29  ;;  %v16868_v29 = vpop.permute.xlu0 %7933  ;;  %18056 = vst [vmem:[#allocation77_spill] sm:$0xff] %v16870_v37 }
 0xc64   : > { %9800 = vperm.xlu1 %13953, %v16583_v9   ;;  %18055 = vst [vmem:[#allocation94_spill] sm:$0xff] %v16868_v29 }
 0xc66   : > { %v16876_v35 = vpop.permute.xlu1 %8393 }
 0xc67   : > { %v16874_v30 = vpop.permute.xlu0 %7941  ;;  %18058 = vst [vmem:[#allocation55_spill] sm:$0xff] %v16876_v35 }
 0xc68   : > { %13956 = vset.pattern.permute.xlu1 %v17995_v22  ;;  %18057 = vst [vmem:[#allocation85_spill] sm:$0xff] %v16874_v30 }
 0xc69   : > { %9840 = vperm.xlu1 %13956, %v16554_v24  }
 0xc6a   : > { %v16882_v59 = vpop.permute.xlu1 %8397 }
 0xc6b   : > { %v16880_v50 = vpop.permute.xlu0 %8042  ;;  %18060 = vst [vmem:[#allocation96_spill] sm:$0xff] %v16882_v59 }
 0xc6c   : > { %18059 = vst [vmem:[#allocation87_spill] sm:$0xff] %v16880_v50 }
 0xc6d   : > { %9844 = vperm.xlu1 %13956, %v16594_v4  }
 0xc6f   : > { %v16886_v37 = vpop.permute.xlu0 %8050 }
 0xc70   : > { %18061 = vst [vmem:[#allocation95_spill] sm:$0xff] %v16886_v37 }
 0xc71   : > { %13957 = vset.pattern.permute.xlu1 %v17975_v13 }
 0xc72   : > { %9415 = vperm.xlu1 %13957, %v16685_v11  }
 0xc73   : > { %v16893_v35 = vpop.permute.xlu0 %8155 }
 0xc74   : > { %18063 = vst [vmem:[#allocation97_spill] sm:$0xff] %v16893_v35 }
 0xc76   : > { %13958 = vset.pattern.permute.xlu1 %v17993_v62  ;;  %v16889_v62 = vpop.permute.xlu1 %8616 }
 0xc77   : > { %9824 = vperm.xlu1 %13958, %v16583_v9   ;;  %18062 = vst [vmem:[#allocation91_spill] sm:$0xff] %v16889_v62 }
 0xc7b   : > { %13960 = vset.pattern.permute.xlu1 %v17994_v25 }
 0xc7c   : > { %9864 = vperm.xlu1 %13960, %v16554_v24   ;;  %v16895_v24 = vpop.permute.xlu1 %8620 }
 0xc7d   : > { %18064 = vst [vmem:[#allocation89_spill] sm:$0xff] %v16895_v24 }
 0xc80   : > { %9868 = vperm.xlu1 %13960, %v16594_v4   ;;  %v16899_v4 = vpop.permute.xlu0 %8369 }
 0xc81   : > { %18065 = vst [vmem:[#allocation98_spill] sm:$0xff] %v16899_v4 }
 0xc84   : > { %13962 = vset.pattern.permute.xlu1 %v17995_v22  ;;  %v8796_v22 = vpop.permute.xlu1 %8795 }
 0xc85   : > { %9852 = vperm.xlu1 %13962, %v16564_v33   ;;  %v16902_v33 = vpop.permute.xlu0 %8373 }
 0xc86   : > { %18066 = vst [vmem:[#allocation93_spill] sm:$0xff] %v16902_v33 }
 0xc89   : > { %13963 = vset.pattern.permute.xlu1 %v17994_v25  ;;  %v8819_v25 = vpop.permute.xlu1 %8818 }
 0xc8a   : > { %9872 = vperm.xlu1 %13963, %v16583_v9   ;;  %v16906_v9 = vpop.permute.xlu0 %8389 }
 0xc8b   : > { %18067 = vst [vmem:[#allocation99_spill] sm:$0xff] %v16906_v9 }
 0xc8d   : > { %v8823_v59 = vpop.permute.xlu1 %8822 }
 0xc8e   : > { %13965 = vset.pattern.permute.xlu1 %v17941_v12  ;;  %v16908_v24 = vpop.permute.xlu0 %8401 }
 0xc8f   : > { %9888 = vperm.xlu1 %13965, %v16661_v52   ;;  %18068 = vst [vmem:[#allocation26_spill] sm:$0xff] %v16908_v24 }
 0xc91   : > { %v8847_v62 = vpop.permute.xlu1 %8846 }
 0xc92   : > { %v16910_v35 = vpop.permute.xlu0 %8618 }
 0xc93   : > { %9892 = vperm.xlu1 %13965, %v16671_v26   ;;  %18069 = vst [vmem:[#allocation28_spill] sm:$0xff] %v16910_v35 }
 0xc95   : > { %v8806_v52 = vpop.permute.xlu1 %8805 }
 0xc96   : > { %v16912_v4 = vpop.permute.xlu0 %8622 }
 0xc97   : > { %9900 = vperm.xlu1 %13965, %v16685_v11   ;;  %18070 = vst [vmem:[#allocation31_spill] sm:$0xff] %v16912_v4 }
 0xc99   : > { %v8827_v32 = vpop.permute.xlu1 %8826 }
 0xc9a   : > { %v8843_v26 = vpop.permute.xlu0 %8842 }
 0xc9b   : > { %13967 = vset.pattern.permute.xlu1 %v17975_v13 }
 0xc9d   : > { %v8831_v63 = vpop.permute.xlu1 %8830 }
 0xc9e   : > { %v16914_v33 = vpop.permute.xlu0 %8854 }
 0xca1   : > { %v8871_v11 = vpop.permute.xlu1 %8870 }
 0xca2   : > { %v8867_v48 = vpop.permute.xlu0 %8866 }
 0xca5   : > { %v16916_v40 = vpop.permute.xlu1 %8850 }
 0xca6   : > { %v16918_v13 = vpop.permute.xlu0 %8874 }
 0xca9   : > { %v16920_v9 = vpop.permute.xlu1 %8890 }
 0xcaa   : > { %v16922_v24 = vpop.permute.xlu0 %8902 }
 0xcad   : > { %v16924_v16 = vpop.permute.xlu1 %8894 }
 0xcae   : > { %v8801_v35 = vpop.permute.xlu0 %8800 }
 0xcb1   : > { %v8879_v27 = vpop.permute.xlu1 %8878 }
 0xcb2   : > { %v8811_v34 = vpop.permute.xlu0 %8810 }
 0xcb5   : > { %v16930_v54 = vpop.permute.xlu1 %8898 }
 0xcdc   : > { %v12664_v4 = vpop.f32.mrb[72].mxu1  ;;  %v12678_v15 = vpop.f32.mrb[82].mxu0 }
 0xcdd   : > { %v6803_v30 = vmul.f32 %v12664_v4, %v16511_v21  ;;  %v8814_v37 = vmul.f32 %v12664_v4, %v8801_v35  ;;  %v6908_v53 = vmul.f32 %v12678_v15, %v16742_v58  ;;  %v8834_v23 = vmul.f32 %v12678_v15, %v8823_v59  ;;  %v6767_v29 = vpop.f32.mrb[73].mxu1  ;;  %v6872_v50 = vpop.f32.mrb[83].mxu0 }
 0xcde   : > { %v6802_v44 = vmul.f32 %v16756_v14, %v6767_v29  ;;  %v8813_v12 = vmul.f32 %v8796_v22, %v6767_v29  ;;  %v6907_v19 = vmul.f32 %v16507_v61, %v6872_v50  ;;  %v8833_v36 = vmul.f32 %v8819_v25, %v6872_v50 }
 0xcdf   : > { %v6912_v17 = vadd.f32 %v6908_v53, %v6803_v30  ;;  %v8838_v0 = vadd.f32 %v8834_v23, %v8814_v37 }
 0xce0   : > { %v6911_v10 = vadd.f32 %v6907_v19, %v6802_v44  ;;  %v8837_v20 = vadd.f32 %v8833_v36, %v8813_v12  ;;  %v12667_v21 = vpop.f32.mrb[74].mxu1  ;;  %v12681_v35 = vpop.f32.mrb[84].mxu0 }
 0xce1   : > { %v6805_v58 = vmul.f32 %v12667_v21, %v16780_v2  ;;  %v8816_v15 = vmul.f32 %v12667_v21, %v8811_v34  ;;  %v6910_v59 = vmul.f32 %v12681_v35, %v16532_v8  ;;  %v8836_v4 = vmul.f32 %v12681_v35, %v8831_v63  ;;  %v6777_v14 = vpop.f32.mrb[75].mxu1  ;;  %v6882_v29 = vpop.f32.mrb[85].mxu0 }
 0xce2   : > { %v6804_v61 = vmul.f32 %v16771_v43, %v6777_v14  ;;  %v8815_v50 = vmul.f32 %v8806_v52, %v6777_v14  ;;  %v6909_v53 = vmul.f32 %v16524_v60, %v6882_v29  ;;  %v8835_v23 = vmul.f32 %v8827_v32, %v6882_v29  ;;  %v8916_v32 = vpop.permute.xlu1 %8915 }
 0xce3   : > { %v6914_v37 = vadd.f32 %v6910_v59, %v6805_v58  ;;  %v8840_v30 = vadd.f32 %v8836_v4, %v8816_v15 }
 0xce4   : > { %v6913_v19 = vadd.f32 %v6909_v53, %v6804_v61  ;;  %v8839_v12 = vadd.f32 %v8835_v23, %v8815_v50  ;;  %v12692_v44 = vpop.f32.mrb[76].mxu1  ;;  %v18071_v50 = vld [vmem:[#allocation48_spill] sm:$0xff] }
 0xce5   : > { %v7017_v36 = vmul.f32 %v12692_v44, %v16520_v38  ;;  %v8858_v2 = vmul.f32 %v12692_v44, %v8847_v62  ;;  %v12706_v34 = vpop.f32.mrb[86].mxu0  ;;  %v6981_v22 = vpop.f32.mrb[77].mxu1  ;;  %v18072_v53 = vld [vmem:[#allocation68_spill] sm:$0xff] }
 0xce6   : > { %v7016_v8 = vmul.f32 %v16516_v28, %v6981_v22  ;;  %v8857_v63 = vmul.f32 %v8843_v26, %v6981_v22  ;;  %v7090_v25 = vpop.f32.mrb[87].mxu0  ;;  %v7126_v52 = vmul.f32 %v12706_v34, %v16793_v46  ;;  %v8882_v60 = vmul.f32 %v12706_v34, %v8871_v11  ;;  %v8921_v22 = vpop.permute.xlu1 %8920 }
 0xce7   : > { %v7021_v21 = vadd.f32 %v7017_v36, %v6912_v17  ;;  %v8862_v43 = vadd.f32 %v8858_v2, %v8838_v0  ;;  %v7125_v15 = vmul.f32 %v16528_v45, %v7090_v25  ;;  %v8881_v59 = vmul.f32 %v8867_v48, %v7090_v25  ;;  %v18074_v25 = vld [vmem:[#allocation45_spill] sm:$0xff] }
 0xce8   : > { %v7020_v35 = vadd.f32 %v7016_v8, %v6911_v10  ;;  %v8861_v58 = vadd.f32 %v8857_v63, %v8837_v20  ;;  %v12695_v4 = vpop.f32.mrb[78].mxu1  ;;  %v18073_v8 = vld [vmem:[#allocation46_spill] sm:$0xff] }
 0xce9   : > { %v7130_v38 = vadd.f32 %v7126_v52, %v7021_v21  ;;  %v8886_v62 = vadd.f32 %v8882_v60, %v8862_v43  ;;  %v7019_v14 = vmul.f32 %v12695_v4, %v16786_v18  ;;  %v8860_v28 = vmul.f32 %v12695_v4, %v16914_v33  ;;  %v12709_v26 = vpop.f32.mrb[88].mxu0  ;;  %v6991_v29 = vpop.f32.mrb[79].mxu1  ;;  %v18076_v4 = vld [vmem:[#allocation74_spill] sm:$0xff] }
 0xcea   : > { %v7129_v17 = vadd.f32 %v7125_v15, %v7020_v35  ;;  %v8885_v0 = vadd.f32 %v8881_v59, %v8861_v58  ;;  %v7128_v46 = vmul.f32 %v12709_v26, %v16800_v3  ;;  %v8884_v11 = vmul.f32 %v12709_v26, %v8879_v27  ;;  %v7100_v61 = vpop.f32.mrb[89].mxu0  ;;  %v18077_v26 = vld [vmem:[#allocation44_spill] sm:$0xff] }
 0xceb   : > { %v7023_v10 = vadd.f32 %v7019_v14, %v6914_v37  ;;  %v8864_v20 = vadd.f32 %v8860_v28, %v8840_v30  ;;  %v7018_v45 = vmul.f32 %v18071_v50, %v6991_v29  ;;  %v8859_v48 = vmul.f32 %v16916_v40, %v6991_v29  ;;  %v18079_v50 = vld [vmem:[#allocation100_spill] sm:$0xff] }
 0xcec   : > { %v7127_v23 = vmul.f32 %v18072_v53, %v7100_v61  ;;  %v8883_v18 = vmul.f32 %v16918_v13, %v7100_v61  ;;  %v17005_v53 = vld [vmem:[%s17615_s18 + $0x18] sm:$0xff] }
 0xced   : > { %v7132_v44 = vadd.f32 %v7128_v46, %v7023_v10  ;;  %v8888_v33 = vadd.f32 %v8884_v11, %v8864_v20  ;;  %v7022_v36 = vadd.f32 %v7018_v45, %v6913_v19  ;;  %v8863_v2 = vadd.f32 %v8859_v48, %v8839_v12  ;;  %v12720_v34 = vpop.f32.mrb[80].mxu1  ;;  %v18075_v19 = vld [vmem:[#allocation72_spill] sm:$0xff] }
 0xcee   : > { %v7235_v3 = vmul.f32 %v12720_v34, %v18073_v8  ;;  %v8906_v27 = vmul.f32 %v12720_v34, %v16924_v16  ;;  %v7199_v37 = vpop.f32.mrb[81].mxu1 }
 0xcef   : > { %v7131_v30 = vadd.f32 %v7127_v23, %v7022_v36  ;;  %v8887_v63 = vadd.f32 %v8883_v18, %v8863_v2  ;;  %v7234_v21 = vmul.f32 %v18074_v25, %v7199_v37  ;;  %v8905_v40 = vmul.f32 %v16920_v9, %v7199_v37 }
 0xcf0   : > { %v7239_v43 = vadd.f32 %v7235_v3, %v7130_v38  ;;  %v8910_v52 = vadd.f32 %v8906_v27, %v8886_v62  ;;  %v8931_v38 = vpop.permute.xlu1 %8930 }
 0xcf1   : > { %v7238_v13 = vadd.f32 %v7234_v21, %v7129_v17  ;;  %v8909_v60 = vadd.f32 %v8905_v40, %v8885_v0  ;;  %v12723_v35 = vpop.f32.mrb[82].mxu1  ;;  %v8926_v0 = vpop.permute.xlu0 %8925 }
 0xcf2   : > { %v7259_v12 = vadd.f32 %v18075_v19, %v7239_v43  ;;  %v8934_v58 = vadd.f32 %v8921_v22, %v8910_v52  ;;  %v7237_v15 = vmul.f32 %v12723_v35, %v16805_v7  ;;  %v8908_v59 = vmul.f32 %v12723_v35, %v16922_v24  ;;  %v7209_v16 = vpop.f32.mrb[83].mxu1 }
 0xcf3   : > { %v7258_v14 = vadd.f32 %v18076_v4, %v7238_v13  ;;  %v8933_v28 = vadd.f32 %v8916_v32, %v8909_v60  ;;  %v7236_v29 = vmul.f32 %v18077_v26, %v7209_v16  ;;  %v8907_v9 = vmul.f32 %v16930_v54, %v7209_v16  ;;  %v18078_v32 = vld [vmem:[#allocation52_spill] sm:$0xff] }
 0xcf4   : > { %v7241_v62 = vadd.f32 %v7237_v15, %v7132_v44  ;;  %v8912_v17 = vadd.f32 %v8908_v59, %v8888_v33  ;;  %v9288_v23 = vpop.permute.xlu1 %9287 }
 0xcf5   : > { %v16957_v46 = vpack.c.bf16 %v8934_v58, %v8933_v28  ;;  %v7240_v11 = vadd.f32 %v7236_v29, %v7131_v30  ;;  %12728 = vmatprep.mubr.msk.f32.mxu0 %vm882_vm0, %v7258_v14  ;;  %12738 = vmatprep.mubr.msk.f32.mxu1 %vm882_vm0, %v7258_v14  ;;  %v8911_v7 = vadd.f32 %v8907_v9, %v8887_v63  ;;  %v9292_v63 = vpop.permute.xlu0 %9291  ;;  %v18083_v29 = vld [vmem:[#allocation76_spill] sm:$0xff] }
 0xcf6   : > { %v7261_v24 = vadd.f32 %v16811_v47, %v7241_v62  ;;  %v8936_v61 = vadd.f32 %v8931_v38, %v8912_v17  ;;  %12729 = vmatmul.mubr.msk.f32.vlgmr.msra.gmra.mrb[90].mxu0 %vm882_vm0, %v7259_v12  ;;  %12739 = vmatmul.mubr.msk.f32.vlgmr.msra.gmra.mrb[84].mxu1 %vm882_vm0, %v7259_v12  ;;  %v16964_v54 = vpack.c.bf16 %v7259_v12, %v7258_v14  ;;  %v13983_v47 = vld [vmem:[%s17615_s18] sm:$0xff] }
 0xcf7   : > { %v7260_v10 = vadd.f32 %v18078_v32, %v7240_v11  ;;  %v8935_v20 = vadd.f32 %v8926_v0, %v8911_v7  ;;  %13382 = vmatpush3.bf16.msra.mxu0 %v15500_v6  ;;  %13386 = vmatpush3.bf16.msra.mxu1 %v15506_v31  ;;  %v13984_v6 = vld [vmem:[%s17615_s18 + $0x8] sm:$0xff]  ;;  %v16994_v31 = vld [vmem:[%s17615_s18 + $0x10] sm:$0xff]  ;;  %v18084_v0 = vld [vmem:[#allocation58_spill] sm:$0xff] }
 0xcf8   : > { %13388 = vmatprep.subr.bf16.mxu0 %v18079_v50  ;;  %12774 = vmatprep.subr.mxu1 %v13983_v47  ;;  %v9308_v18 = vpop.permute.xlu1 %9307 }
 0xcf9   : > { %v16973_v45 = vpack.c.bf16 %v8936_v61, %v8935_v20  ;;  %12731 = vmatprep.mubr.msk.f32.mxu0 %vm882_vm0, %v7260_v10  ;;  %12741 = vmatprep.mubr.msk.f32.mxu1 %vm882_vm0, %v7260_v10  ;;  %v16977_v48 = vpack.c.bf16 %v7261_v24, %v7260_v10  ;;  %v9300_v21 = vpop.permute.xlu0 %9299 }
 0xcfa   : > { %12732 = vmatmul.mubr.msk.f32.gmra.mrb[92].mxu0 %vm882_vm0, %v7261_v24  ;;  %12742 = vmatmul.mubr.msk.f32.gmra.mrb[86].mxu1 %vm882_vm0, %v7261_v24 }
 0xcfb   : > { %18080 = vst [vmem:[#allocation27_spill] sm:$0xff] %v16973_v45  ;;  %12748 = vmatprep.mubr.msk.f32.mxu0 %vm882_vm0, %v7258_v14  ;;  %12758 = vmatprep.mubr.msk.f32.mxu1 %vm882_vm0, %v7258_v14 }
 0xcfc   : > { %v9312_v44 = vpop.permute.xlu1 %9311 }
 0xcfd   : > { %v9332_v43 = vpop.permute.xlu0 %9331 }
 0xcfe   : > { %12749 = vmatmul.mubr.msk.f32.vlgmr.msra.gmra.mrb[94].mxu0 %vm882_vm0, %v7259_v12  ;;  %12759 = vmatmul.mubr.msk.f32.vlgmr.msra.gmra.mrb[88].mxu1 %vm882_vm0, %v7259_v12 }
 0xcff   : > { %12751 = vmatprep.mubr.msk.f32.mxu0 %vm882_vm0, %v7260_v10  ;;  %12761 = vmatprep.mubr.msk.f32.mxu1 %vm882_vm0, %v7260_v10 }
 0xd00   : > { %13390 = vmatpush3.bf16.msra.mxu0 %v18079_v50  ;;  %12775 = vmatpush3.msra.mxu1 %v13983_v47  ;;  %v9336_v33 = vpop.permute.xlu1 %9335 }
 0xd01   : > { %12782 = vmatprep.subr.mxu0 %v13984_v6  ;;  %12790 = vmatprep.subr.mxu1 %v16994_v31  ;;  %v17027_v13 = vpop.permute.xlu0 %9343 }
 0xd02   : > { %12752 = vmatmul.mubr.msk.f32.gmra.mrb[96].mxu0 %vm882_vm0, %v7261_v24  ;;  %12762 = vmatmul.mubr.msk.f32.gmra.mrb[90].mxu1 %vm882_vm0, %v7261_v24 }
 0xd03   : > { %12768 = vmatprep.mubr.msk.f32.mxu0 %vm882_vm0, %v7258_v14 }
 0xd04   : > { %v9296_v36 = vpop.permute.xlu1 %9295 }
 0xd05   : > { %v9356_v35 = vpop.permute.xlu0 %9355 }
 0xd06   : > { %12769 = vmatmul.mubr.msk.f32.vlgmr.msra.gmra.mrb[98].mxu0 %vm882_vm0, %v7259_v12 }
 0xd07   : > { %12771 = vmatprep.mubr.msk.f32.mxu0 %vm882_vm0, %v7260_v10  ;;  %12783 = vmatpush3.msra.mxu0 %v13984_v6 }
 0xd08   : > { %12798 = vmatprep.subr.mxu0 %v17005_v53  ;;  %v9316_v2 = vpop.permute.xlu1 %9315 }
 0xd09   : > { %v17033_v12 = vpop.permute.xlu0 %9363 }
 0xd0a   : > { %12772 = vmatmul.mubr.msk.f32.gmra.mrb[100].mxu0 %vm882_vm0, %v7261_v24  ;;  %v18085_v24 = vld [vmem:[#allocation49_spill] sm:$0xff] }
 0xd0c   : > { %v9320_v34 = vpop.permute.xlu1 %9319 }
 0xd0d   : > { %v17037_v15 = vpop.permute.xlu0 %9387 }
 0xd10   : > { %v17009_v22 = vpop.permute.xlu1 %9359 }
 0xd11   : > { %v17041_v16 = vpop.permute.xlu0 %9776 }
 0xd14   : > { %v17011_v8 = vpop.permute.xlu1 %9339 }
 0xd15   : > { %v17049_v47 = vpop.permute.xlu0 %9780 }
 0xd18   : > { %v17013_v3 = vpop.permute.xlu1 %9379 }
 0xd1c   : > { %v17015_v27 = vpop.permute.xlu1 %9383 }
 0xd20   : > { %v17017_v37 = vpop.permute.xlu1 %9367 }
 0xd24   : > { %v17019_v30 = vpop.permute.xlu1 %9772 }
 0xd28   : > { %v17021_v25 = vpop.permute.xlu1 %9792 }
 0xd2c   : > { %v17023_v40 = vpop.permute.xlu1 %9796 }
 0xd30   : > { %v17025_v52 = vpop.permute.xlu1 %9391 }
 0xd34   : > { %v17029_v60 = vpop.permute.xlu1 %9403 }
 0xd38   : > { %v17031_v19 = vpop.permute.xlu1 %9816 }
 0xd39   : > { %18081 = vst [vmem:[#allocation29_spill] sm:$0xff] %v17031_v19 }
 0xd3c   : > { %v17035_v58 = vpop.permute.xlu1 %9820 }
 0xd3d   : > { %18082 = vst [vmem:[#allocation30_spill] sm:$0xff] %v17035_v58 }
 0xd40   : > { %v17039_v59 = vpop.permute.xlu1 %9784 }
 0xd44   : > { %v17047_v50 = vpop.permute.xlu1 %9800 }
 0xd45   : > { %18086 = vst [vmem:[#allocation32_spill] sm:$0xff] %v17047_v50 }
 0xd48   : > { %v17057_v50 = vpop.permute.xlu1 %9840 }
 0xdc9   : > { %v12730_v4 = vpop.f32.mrb[90].mxu0  ;;  %v12740_v14 = vpop.f32.mrb[84].mxu1 }
 0xdca   : > { %v7376_v28 = vmul.f32 %v12730_v4, %v16818_v49  ;;  %v9303_v26 = vmul.f32 %v12730_v4, %v9292_v63  ;;  %v7481_v9 = vmul.f32 %v12740_v14, %v18083_v29  ;;  %v9323_v38 = vmul.f32 %v12740_v14, %v9312_v44  ;;  %v7340_v62 = vpop.f32.mrb[91].mxu0  ;;  %v7445_v17 = vpop.f32.mrb[85].mxu1  ;;  %v18087_v29 = vld [vmem:[#allocation61_spill] sm:$0xff] }
 0xdcb   : > { %v7375_v11 = vmul.f32 %v18084_v0, %v7340_v62  ;;  %v9302_v7 = vmul.f32 %v9288_v23, %v7340_v62  ;;  %v7480_v61 = vmul.f32 %v18085_v24, %v7445_v17  ;;  %v9322_v32 = vmul.f32 %v9308_v18, %v7445_v17  ;;  %v18088_v24 = vld [vmem:[#allocation70_spill] sm:$0xff] }
 0xdcc   : > { %v7485_v10 = vadd.f32 %v7481_v9, %v7376_v28  ;;  %v9327_v20 = vadd.f32 %v9323_v38, %v9303_v26  ;;  %v18089_v26 = vld [vmem:[#allocation60_spill] sm:$0xff] }
 0xdcd   : > { %v7484_v6 = vadd.f32 %v7480_v61, %v7375_v11  ;;  %v9326_v49 = vadd.f32 %v9322_v32, %v9302_v7  ;;  %v12733_v63 = vpop.f32.mrb[92].mxu0  ;;  %v12743_v4 = vpop.f32.mrb[86].mxu1 }
 0xdce   : > { %v7378_v44 = vmul.f32 %v12733_v63, %v18087_v29  ;;  %v9305_v14 = vmul.f32 %v12733_v63, %v9300_v21  ;;  %v7483_v45 = vmul.f32 %v12743_v4, %v16691_v56  ;;  %v9325_v0 = vmul.f32 %v12743_v4, %v9320_v34  ;;  %v7350_v23 = vpop.f32.mrb[93].mxu0  ;;  %v7455_v62 = vpop.f32.mrb[87].mxu1  ;;  %v18090_v34 = vld [vmem:[#allocation56_spill] sm:$0xff] }
 0xdcf   : > { %v7377_v18 = vmul.f32 %v18088_v24, %v7350_v23  ;;  %v9304_v28 = vmul.f32 %v9296_v36, %v7350_v23  ;;  %v7482_v9 = vmul.f32 %v18089_v26, %v7455_v62  ;;  %v9324_v38 = vmul.f32 %v9316_v2, %v7455_v62 }
 0xdd0   : > { %v7487_v17 = vadd.f32 %v7483_v45, %v7378_v44  ;;  %v9329_v19 = vadd.f32 %v9325_v0, %v9305_v14  ;;  %v17061_v44 = vpop.permute.xlu0 %9804 }
 0xdd1   : > { %v7486_v11 = vadd.f32 %v7482_v9, %v7377_v18  ;;  %v9328_v7 = vadd.f32 %v9324_v38, %v9304_v28  ;;  %v12750_v61 = vpop.f32.mrb[94].mxu0  ;;  %v12760_v32 = vpop.f32.mrb[88].mxu1 }
 0xdd2   : > { %v7590_v29 = vmul.f32 %v12750_v61, %v16824_v42  ;;  %v9347_v21 = vmul.f32 %v12750_v61, %v9336_v33  ;;  %v7554_v63 = vpop.f32.mrb[95].mxu0  ;;  %v7663_v56 = vpop.f32.mrb[89].mxu1  ;;  %v7699_v2 = vmul.f32 %v12760_v32, %v16843_v39  ;;  %v9371_v45 = vmul.f32 %v12760_v32, %v17009_v22 }
 0xdd3   : > { %v7589_v4 = vmul.f32 %v18090_v34, %v7554_v63  ;;  %v9346_v58 = vmul.f32 %v9332_v43, %v7554_v63  ;;  %v7698_v42 = vmul.f32 %v16836_v57, %v7663_v56  ;;  %v9370_v33 = vmul.f32 %v9356_v35, %v7663_v56 }
 0xdd4   : > { %v7594_v36 = vadd.f32 %v7590_v29, %v7485_v10  ;;  %v9351_v23 = vadd.f32 %v9347_v21, %v9327_v20  ;;  %v9408_v56 = vpop.permute.xlu0 %9407 }
 0xdd5   : > { %v7593_v14 = vadd.f32 %v7589_v4, %v7484_v6  ;;  %v9350_v0 = vadd.f32 %v9346_v58, %v9326_v49  ;;  %v12753_v62 = vpop.f32.mrb[96].mxu0  ;;  %v12763_v24 = vpop.f32.mrb[90].mxu1 }
 0xdd6   : > { %v7703_v18 = vadd.f32 %v7699_v2, %v7594_v36  ;;  %v9375_v28 = vadd.f32 %v9371_v45, %v9351_v23  ;;  %v7592_v43 = vmul.f32 %v12753_v62, %v16710_v5  ;;  %v9349_v10 = vmul.f32 %v12753_v62, %v17027_v13  ;;  %v7564_v20 = vpop.f32.mrb[97].mxu0  ;;  %v7673_v26 = vpop.f32.mrb[91].mxu1  ;;  %v18092_v45 = vld [vmem:[#allocation81_spill] sm:$0xff] }
 0xdd7   : > { %v7702_v39 = vadd.f32 %v7698_v42, %v7593_v14  ;;  %v9374_v9 = vadd.f32 %v9370_v33, %v9350_v0  ;;  %v7701_v22 = vmul.f32 %v12763_v24, %v16746_v51  ;;  %v9373_v6 = vmul.f32 %v12763_v24, %v17017_v37  ;;  %v17072_v13 = vpop.permute.xlu1 %9844 }
 0xdd8   : > { %v7596_v58 = vadd.f32 %v7592_v43, %v7487_v17  ;;  %v9353_v49 = vadd.f32 %v9349_v10, %v9329_v19  ;;  %v7591_v57 = vmul.f32 %v16700_v41, %v7564_v20  ;;  %v9348_v35 = vmul.f32 %v17011_v8, %v7564_v20  ;;  %v18091_v17 = vld [vmem:[#allocation69_spill] sm:$0xff]  ;;  %v18095_v43 = vld [vmem:[#allocation62_spill] sm:$0xff] }
 0xdd9   : > { %v7700_v38 = vmul.f32 %v16849_v55, %v7673_v26  ;;  %v9372_v5 = vmul.f32 %v17033_v12, %v7673_v26  ;;  %v12770_v61 = vpop.f32.mrb[98].mxu0 }
 0xdda   : > { %v7705_v32 = vadd.f32 %v7701_v22, %v7596_v58  ;;  %v9377_v29 = vadd.f32 %v9373_v6, %v9353_v49  ;;  %v7595_v21 = vadd.f32 %v7591_v57, %v7486_v11  ;;  %v9352_v63 = vadd.f32 %v9348_v35, %v9328_v7  ;;  %v7772_v51 = vpop.f32.mrb[99].mxu0  ;;  %v13987_v57 = vld [vmem:[%s17615_s18 + $0x20] sm:$0xff] }
 0xddb   : > { %v7808_v37 = vmul.f32 %v12770_v61, %v16730_v1  ;;  %v9395_v19 = vmul.f32 %v12770_v61, %v17015_v27  ;;  %v7807_v41 = vmul.f32 %v18091_v17, %v7772_v51  ;;  %v9394_v8 = vmul.f32 %v17013_v3, %v7772_v51  ;;  %v18093_v1 = vld [vmem:[#allocation53_spill] sm:$0xff]  ;;  %v18094_v27 = vld [vmem:[#allocation75_spill] sm:$0xff]  ;;  %v9416_v62 = vpop.permute.xlu1 %9415  ;;  %v11398_v61 = vld [vmem:[%s17936_s16 + $0x70] sm:$0xff] }
 0xddc   : > { %v7704_v55 = vadd.f32 %v7700_v38, %v7595_v21  ;;  %v9376_v34 = vadd.f32 %v9372_v5, %v9352_v63  ;;  %v18098_v5 = vld [vmem:[#allocation42_spill] sm:$0xff]  ;;  %v11433_v63 = vld [vmem:[%s17936_s16 + $0x88] sm:$0xff]  ;;  %v13988_v51 = vld [vmem:[#allocation11] sm:$0xff] }
 0xddd   : > { %v7812_v12 = vadd.f32 %v7808_v37, %v7703_v18  ;;  %v7811_v4 = vadd.f32 %v7807_v41, %v7702_v39  ;;  %v9398_v36 = vadd.f32 %v9394_v8, %v9374_v9  ;;  %v9399_v23 = vadd.f32 %v9395_v19, %v9375_v28  ;;  %v12773_v2 = vpop.f32.mrb[100].mxu0  ;;  %v18096_v39 = vld [vmem:[#allocation63_spill] sm:$0xff]  ;;  %v11432_v21 = vld [vmem:[%s17936_s16 + $0x80] sm:$0xff]  ;;  %v11434_v37 = vld [vmem:[%s17936_s16 + $0x90] sm:$0xff] }
 0xdde   : > { %v7810_v11 = vmul.f32 %v12773_v2, %v18092_v45  ;;  %v9397_v7 = vmul.f32 %v12773_v2, %v17025_v52  ;;  %v7782_v14 = vpop.f32.mrb[101].mxu0  ;;  %v9412_v52 = vpop.permute.xlu0 %9411  ;;  %v11435_v19 = vld [vmem:[%s17936_s16 + $0x98] sm:$0xff]  ;;  %v11412_v17 = vld [vmem:[%s17939_s2 + $0x20] sm:$0xff]  ;;  %v11417_v8 = vld [vmem:[%s17940_s17 + $0x28] sm:$0xff]  ;;  %v18102_v2 = vmov 0  }
 0xddf   : > { %v7832_v0 = vadd.f32 %v18093_v1, %v7812_v12  ;;  %v7831_v42 = vadd.f32 %v18094_v27, %v7811_v4  ;;  %v9418_v33 = vadd.f32 %v17029_v60, %v9398_v36  ;;  %v9419_v3 = vadd.f32 %v9408_v56, %v9399_v23  ;;  %9239 = vperm.xlu1 %13967, %v11412_v17   ;;  %v11416_v41 = vld [vmem:[%s17940_s17 + $0x20] sm:$0xff]  ;;  %v11415_v56 = vld [vmem:[%s17939_s2 + $0x38] sm:$0xff]  ;;  %v11418_v4 = vld [vmem:[%s17940_s17 + $0x30] sm:$0xff]  ;;  %v17194_v45 = vpop.permute.xlu1 %9824 }
 0xde0   : > { %v7814_v24 = vadd.f32 %v7810_v11, %v7705_v32  ;;  %v7809_v18 = vmul.f32 %v18095_v43, %v7782_v14  ;;  %v9396_v10 = vmul.f32 %v17037_v15, %v7782_v14  ;;  %v9401_v28 = vadd.f32 %v9397_v7, %v9377_v29  ;;  %v18097_v15 = vld [vmem:[#allocation92_spill] sm:$0xff]  ;;  %v11399_v32 = vld [vmem:[%s17936_s16 + $0x78] sm:$0xff]  ;;  %v18099_v29 = vld [vmem:[#allocation78_spill] sm:$0xff] }
 0xde1   : > { %v17085_v20 = vpack.c.bf16 %v9419_v3, %v9418_v33  ;;  %12776 = vmatprep.mubr.msk.f32.mxu1 %vm2807_vm6, %v7831_v42  ;;  %12784 = vmatprep.mubr.msk.f32.mxu0 %vm2807_vm6, %v7831_v42  ;;  %v17089_v26 = vpack.c.bf16 %v7832_v0, %v7831_v42  ;;  %v11419_v12 = vld [vmem:[%s17940_s17 + $0x38] sm:$0xff]  ;;  %v18100_v36 = vmov 2   ;;  %v18101_v23 = vmov 3  }
 0xde2   : > { %v7834_v9 = vadd.f32 %v18096_v39, %v7814_v24  ;;  %v7813_v60 = vadd.f32 %v7809_v18, %v7704_v55  ;;  %v9421_v22 = vadd.f32 %v9416_v62, %v9401_v28  ;;  %v9400_v6 = vadd.f32 %v9396_v10, %v9376_v34  ;;  %12777 = vmatmul.mubr.msk.f32.vlgmr.msra.gmra.mrb[92].mxu1 %vm2807_vm6, %v7832_v0  ;;  %v11413_v55 = vld [vmem:[%s17939_s2 + $0x28] sm:$0xff]  ;;  %v11414_v34 = vld [vmem:[%s17939_s2 + $0x30] sm:$0xff]  ;;  %v18105_v18 = vld [vmem:[#allocation94_spill] sm:$0xff] }
 0xde3   : > { %12785 = vmatmul.mubr.msk.f32.vlgmr.msra.gmra.mrb[102].mxu0 %vm2807_vm6, %v7832_v0  ;;  %12791 = vmatpush3.msra.mxu1 %v16994_v31  ;;  %v11396_v31 = vld [vmem:[%s17936_s16 + $0x60] sm:$0xff]  ;;  %v17196_v11 = vpop.permute.xlu1 %9864  ;;  %v18104_v62 = vld [vmem:[#allocation87_spill] sm:$0xff] }
 0xde4   : > { %v7833_v58 = vadd.f32 %v18097_v15, %v7813_v60  ;;  %v9420_v49 = vadd.f32 %v9412_v52, %v9400_v6  ;;  %12799 = vmatpush3.msra.mxu0 %v17005_v53  ;;  %12806 = vmatprep.subr.mxu1 %v13987_v57  ;;  %v11397_v53 = vld [vmem:[%s17936_s16 + $0x68] sm:$0xff] }
 0xde5   : > { %13392 = vmatprep.subr.bf16.mxu0 %v16964_v54  ;;  %9263 = vperm.xlu1 %13967, %v11416_v41  }
 0xde6   : > { %v17101_v35 = vpack.c.bf16 %v9421_v22, %v9420_v49  ;;  %12779 = vmatprep.mubr.msk.f32.mxu1 %vm2807_vm6, %v7833_v58  ;;  %12787 = vmatprep.mubr.msk.f32.mxu0 %vm2807_vm6, %v7833_v58  ;;  %v17105_v38 = vpack.c.bf16 %v7834_v9, %v7833_v58 }
 0xde7   : > { %12780 = vmatmul.mubr.msk.f32.gmra.mrb[94].mxu1 %vm2807_vm6, %v7834_v9  ;;  %12788 = vmatmul.mubr.msk.f32.gmra.mrb[104].mxu0 %vm2807_vm6, %v7834_v9  ;;  %v17198_v7 = vpop.permute.xlu1 %9868 }
 0xde8   : > { %12792 = vmatprep.mubr.msk.f32.mxu1 %vm2807_vm6, %v7831_v42  ;;  %12800 = vmatprep.mubr.msk.f32.mxu0 %vm2807_vm6, %v7831_v42 }
 0xde9   : > { %9267 = vperm.xlu1 %13967, %v11417_v8   ;;  %9243 = vperm.xlu0 %13968, %v11413_v55  }
 0xdeb   : > { %12793 = vmatmul.mubr.msk.f32.vlgmr.msra.gmra.mrb[96].mxu1 %vm2807_vm6, %v7832_v0  ;;  %12801 = vmatmul.mubr.msk.f32.vlgmr.msra.gmra.mrb[106].mxu0 %vm2807_vm6, %v7832_v0  ;;  %v17200_v14 = vpop.permute.xlu1 %9852 }
 0xdec   : > { %13394 = vmatpush3.bf16.msra.mxu0 %v16964_v54  ;;  %12795 = vmatprep.mubr.msk.f32.mxu1 %vm2807_vm6, %v7833_v58 }
 0xded   : > { %12803 = vmatprep.mubr.msk.f32.mxu0 %vm2807_vm6, %v7833_v58  ;;  %13396 = vmatprep.subr.bf16.mxu0 %v16977_v48 }
 0xdee   : > { %12807 = vmatpush3.msra.mxu1 %v13987_v57  ;;  %9251 = vperm.xlu1 %13967, %v11415_v56  }
 0xdef   : > { %12796 = vmatmul.mubr.msk.f32.gmra.mrb[98].mxu1 %vm2807_vm6, %v7834_v9  ;;  %12804 = vmatmul.mubr.msk.f32.gmra.mrb[108].mxu0 %vm2807_vm6, %v7834_v9  ;;  %v17208_v39 = vpop.permute.xlu1 %9872 }
 0xdf0   : > { %13398 = vmatpush3.bf16.msra.mxu0 %v16977_v48  ;;  %12808 = vmatprep.mubr.msk.f32.mxu1 %vm2807_vm6, %v7831_v42 }
 0xdf1   : > { %13412 = vmatprep.subr.bf16.mxu0 %v17089_v26  ;;  %12822 = vmatprep.mubr.msk.f32.mxu0 %vm1020_vm1, %v11396_v31 }
 0xdf2   : > { %13400 = vmatprep.subr.bf16.mxu1 %v18098_v5  ;;  %9247 = vperm.xlu0 %13968, %v11414_v34  }
 0xdf3   : > { %12809 = vmatmul.mubr.msk.f32.vlgmr.msra.gmra.mrb[100].mxu1 %vm2807_vm6, %v7832_v0  ;;  %12823 = vmatmul.mubr.msk.f32.vlgmr.msra.gmra.mrb[110].mxu0 %vm1020_vm1, %v11397_v53  ;;  %v18103_v0 = vld [vmem:[#allocation88_spill] sm:$0xff]  ;;  %v18107_v53 = vld [vmem:[#allocation90_spill] sm:$0xff] }
 0xdf4   : > { %13402 = vmatpush3.bf16.msra.mxu1 %v18098_v5  ;;  %13414 = vmatpush3.bf16.msra.mxu0 %v17089_v26 }
 0xdf5   : > { %12811 = vmatprep.mubr.msk.f32.mxu1 %vm2807_vm6, %v7833_v58  ;;  %13404 = vmatprep.subr.bf16.mxu1 %v18099_v29 }
 0xdf6   : > { %13416 = vmatprep.subr.bf16.mxu0 %v17105_v38  ;;  %12825 = vmatprep.mubr.msk.f32.mxu0 %vm1020_vm1, %v11398_v61 }
 0xdf7   : > { %12812 = vmatmul.mubr.msk.f32.gmra.mrb[102].mxu1 %vm2807_vm6, %v7834_v9  ;;  %12826 = vmatmul.mubr.msk.f32.gmra.mrb[112].mxu0 %vm1020_vm1, %v11399_v32  ;;  %v18106_v9 = vld [vmem:[#allocation84_spill] sm:$0xff]  ;;  %v18108_v32 = vld [vmem:[#allocation95_spill] sm:$0xff] }
 0xdf8   : > { %13418 = vmatpush3.bf16.msra.mxu0 %v17105_v38  ;;  %12860 = vmatprep.mubr.msk.f32.mxu0 %vm1020_vm1, %v11432_v21 }
 0xdf9   : > { %12866 = vmatprep.subr.mxu0 %v13988_v51  ;;  %9275 = vperm.xlu1 %13967, %v11419_v12  }
 0xdfa   : > { %9271 = vperm.xlu0 %13968, %v11418_v4  }
 0xdfb   : > { %12861 = vmatmul.mubr.msk.f32.vlgmr.msra.gmra.mrb[114].mxu0 %vm1020_vm1, %v11433_v63 }
 0xdfc   : > { %12867 = vmatpush3.msra.mxu0 %v13988_v51  ;;  %12863 = vmatprep.mubr.msk.f32.mxu0 %vm1020_vm1, %v11434_v37  ;;  %v18109_v37 = vld [vmem:[#allocation85_spill] sm:$0xff] }
 0xdfd   : > { %13420 = vmatprep.subr.bf16.mxu0 %v16957_v46  ;;  %13970 = vset.pattern.permute.xlu1 %v18100_v36 }
 0xdfe   : > { %9728 = vperm.xlu1 %13970, %v11413_v55   ;;  %13969 = vset.pattern.permute.xlu0 %v18100_v36 }
 0xdff   : > { %12864 = vmatmul.mubr.msk.f32.gmra.mrb[116].mxu0 %vm1020_vm1, %v11435_v19  ;;  %9724 = vperm.xlu0 %13969, %v11412_v17  }
 0xe02   : > { %9748 = vperm.xlu1 %13970, %v11416_v41  }
 0xe03   : > { %9752 = vperm.xlu0 %13969, %v11417_v8  }
 0xe06   : > { %9732 = vperm.xlu1 %13970, %v11414_v34  }
 0xe07   : > { %9736 = vperm.xlu0 %13969, %v11415_v56  }
 0xe0a   : > { %9756 = vperm.xlu1 %13970, %v11418_v4  }
 0xe0b   : > { %9760 = vperm.xlu0 %13969, %v11419_v12  }
 0xe0e   : > { %13971 = vset.pattern.permute.xlu1 %v18101_v23 }
 0xe0f   : > { %9913 = vperm.xlu1 %13971, %v11412_v17   ;;  %13972 = vset.pattern.permute.xlu0 %v18101_v23 }
 0xe10   : > { %9917 = vperm.xlu0 %13972, %v11413_v55  }
 0xe13   : > { %10030 = vperm.xlu1 %13971, %v11416_v41  }
 0xe14   : > { %9921 = vperm.xlu0 %13972, %v11414_v34  }
 0xe17   : > { %10034 = vperm.xlu1 %13971, %v11417_v8  }
 0xe18   : > { %10038 = vperm.xlu0 %13972, %v11418_v4  }
 0xe1b   : > { %9925 = vperm.xlu1 %13971, %v11415_v56  }
 0xe1c   : > { %13973 = vset.pattern.permute.xlu0 %v18102_v2 }
 0xe1d   : > { %8724 = vperm.xlu0 %13973, %v11412_v17   ;;  %v18110_v17 = vld [vmem:[#allocation86_spill] sm:$0xff] }
 0xe1f   : > { %10042 = vperm.xlu1 %13971, %v11419_v12  }
 0xe21   : > { %8762 = vperm.xlu0 %13973, %v11417_v8   ;;  %v18111_v8 = vld [vmem:[#allocation32_spill] sm:$0xff] }
 0xe23   : > { %13974 = vset.pattern.permute.xlu1 %v18102_v2 }
 0xe24   : > { %8729 = vperm.xlu1 %13974, %v11413_v55  }
 0xe25   : > { %8739 = vperm.xlu0 %13973, %v11415_v56  }
 0xe28   : > { %8757 = vperm.xlu1 %13974, %v11416_v41  }
 0xe29   : > { %8772 = vperm.xlu0 %13973, %v11419_v12   ;;  %v17220_v12 = vpop.permute.xlu1 %9888 }
 0xe2c   : > { %8734 = vperm.xlu1 %13974, %v11414_v34  }
 0xe30   : > { %8767 = vperm.xlu1 %13974, %v11418_v4  }
 0xeb5   : > { %v12778_v1 = vpop.f32.mrb[92].mxu1 }
 0xeb6   : > { %v7949_v27 = vmul.f32 %v12778_v1, %v18103_v0  ;;  %v9788_v42 = vmul.f32 %v12778_v1, %v17041_v16  ;;  %v12786_v33 = vpop.f32.mrb[102].mxu0  ;;  %v7913_v3 = vpop.f32.mrb[93].mxu1  ;;  %v18112_v1 = vld [vmem:[#allocation67_spill] sm:$0xff]  ;;  %v18113_v0 = vld [vmem:[#allocation30_spill] sm:$0xff] }
 0xeb7   : > { %v8054_v24 = vmul.f32 %v12786_v33, %v18104_v62  ;;  %v9808_v43 = vmul.f32 %v12786_v33, %v17023_v40  ;;  %v7948_v10 = vmul.f32 %v18105_v18, %v7913_v3  ;;  %v9787_v28 = vmul.f32 %v17019_v30, %v7913_v3  ;;  %v8018_v52 = vpop.f32.mrb[103].mxu0  ;;  %v9829_v16 = vpop.permute.xlu0 %9828  ;;  %v18114_v3 = vld [vmem:[#allocation64_spill] sm:$0xff]  ;;  %v18115_v62 = vld [vmem:[#allocation29_spill] sm:$0xff] }
 0xeb8   : > { %v8053_v60 = vmul.f32 %v18106_v9, %v8018_v52  ;;  %v9807_v22 = vmul.f32 %v17021_v25, %v8018_v52 }
 0xeb9   : > { %v8058_v6 = vadd.f32 %v8054_v24, %v7949_v27  ;;  %v9812_v15 = vadd.f32 %v9808_v43, %v9788_v42 }
 0xeba   : > { %v8057_v58 = vadd.f32 %v8053_v60, %v7948_v10  ;;  %v9811_v49 = vadd.f32 %v9807_v22, %v9787_v28  ;;  %v12781_v57 = vpop.f32.mrb[94].mxu1  ;;  %v12789_v31 = vpop.f32.mrb[104].mxu0  ;;  %v18116_v10 = vld [vmem:[#allocation65_spill] sm:$0xff] }
 0xebb   : > { %v7951_v40 = vmul.f32 %v12781_v57, %v18107_v53  ;;  %v9790_v61 = vmul.f32 %v12781_v57, %v17039_v59  ;;  %v8056_v30 = vmul.f32 %v12789_v31, %v18108_v32  ;;  %v9810_v21 = vmul.f32 %v12789_v31, %v17061_v44  ;;  %v7923_v63 = vpop.f32.mrb[95].mxu1  ;;  %v8028_v51 = vpop.f32.mrb[105].mxu0  ;;  %v18117_v57 = vld [vmem:[#allocation66_spill] sm:$0xff] }
 0xebc   : > { %v7950_v19 = vmul.f32 %v18109_v37, %v7923_v63  ;;  %v9789_v25 = vmul.f32 %v17049_v47, %v7923_v63  ;;  %v8055_v41 = vmul.f32 %v18110_v17, %v8028_v51  ;;  %v9809_v56 = vmul.f32 %v18111_v8, %v8028_v51  ;;  %v9849_v9 = vpop.permute.xlu0 %9848 }
 0xebd   : > { %v8060_v55 = vadd.f32 %v8056_v30, %v7951_v40  ;;  %v9814_v34 = vadd.f32 %v9810_v21, %v9790_v61  ;;  %v18118_v21 = vld [vmem:[#allocation73_spill] sm:$0xff] }
 0xebe   : > { %v8059_v4 = vadd.f32 %v8055_v41, %v7950_v19  ;;  %v9813_v59 = vadd.f32 %v9809_v56, %v9789_v25  ;;  %v12794_v36 = vpop.f32.mrb[96].mxu1  ;;  %v12802_v23 = vpop.f32.mrb[106].mxu0  ;;  %v18119_v25 = vld [vmem:[#allocation79_spill] sm:$0xff]  ;;  %v18120_v41 = vld [vmem:[#allocation97_spill] sm:$0xff] }
 0xebf   : > { %v8163_v44 = vmul.f32 %v12794_v36, %v18112_v1  ;;  %v9832_v27 = vmul.f32 %v12794_v36, %v18113_v0  ;;  %v8127_v42 = vpop.f32.mrb[97].mxu1  ;;  %v8236_v33 = vpop.f32.mrb[107].mxu0  ;;  %v8272_v28 = vmul.f32 %v12802_v23, %v18116_v10  ;;  %v9856_v52 = vmul.f32 %v12802_v23, %v17072_v13  ;;  %v18121_v36 = vld [vmem:[#allocation83_spill] sm:$0xff] }
 0xec0   : > { %v8162_v47 = vmul.f32 %v18114_v3, %v8127_v42  ;;  %v9831_v24 = vmul.f32 %v18115_v62, %v8127_v42  ;;  %v8271_v31 = vmul.f32 %v18117_v57, %v8236_v33  ;;  %v9855_v53 = vmul.f32 %v17057_v50, %v8236_v33  ;;  %v9893_v56 = vpop.permute.xlu1 %9892  ;;  %v18122_v62 = vld [vmem:[#allocation98_spill] sm:$0xff] }
 0xec1   : > { %v8167_v43 = vadd.f32 %v8163_v44, %v8058_v6  ;;  %v9836_v18 = vadd.f32 %v9832_v27, %v9812_v15 }
 0xec2   : > { %v8166_v60 = vadd.f32 %v8162_v47, %v8057_v58  ;;  %v9835_v22 = vadd.f32 %v9831_v24, %v9811_v49  ;;  %v12797_v40 = vpop.f32.mrb[98].mxu1  ;;  %v12805_v61 = vpop.f32.mrb[108].mxu0 }
 0xec3   : > { %v8276_v32 = vadd.f32 %v8272_v28, %v8167_v43  ;;  %v9860_v30 = vadd.f32 %v9856_v52, %v9836_v18  ;;  %v8165_v63 = vmul.f32 %v12797_v40, %v18118_v21  ;;  %v9834_v51 = vmul.f32 %v12797_v40, %v9829_v16  ;;  %v8137_v6 = vpop.f32.mrb[99].mxu1  ;;  %v8246_v15 = vpop.f32.mrb[109].mxu0  ;;  %v18126_v40 = vld [vmem:[#allocation55_spill] sm:$0xff] }
 0xec4   : > { %v8275_v37 = vadd.f32 %v8271_v31, %v8166_v60  ;;  %v9859_v19 = vadd.f32 %v9855_v53, %v9835_v22  ;;  %v8274_v13 = vmul.f32 %v12805_v61, %v18119_v25  ;;  %v9858_v58 = vmul.f32 %v12805_v61, %v17200_v14  ;;  %v9877_v43 = vpop.permute.xlu0 %9876  ;;  %v18125_v31 = vld [vmem:[#allocation59_spill] sm:$0xff] }
 0xec5   : > { %v8169_v49 = vadd.f32 %v8165_v63, %v8060_v55  ;;  %v9838_v17 = vadd.f32 %v9834_v51, %v9814_v34  ;;  %v8164_v8 = vmul.f32 %v18120_v41, %v8137_v6  ;;  %v9833_v50 = vmul.f32 %v17194_v45, %v8137_v6  ;;  %v18123_v34 = vld [vmem:[#allocation71_spill] sm:$0xff]  ;;  %v18128_v6 = vld [vmem:[#allocation93_spill] sm:$0xff] }
 0xec6   : > { %v8273_v23 = vmul.f32 %v18121_v36, %v8246_v15  ;;  %v9857_v1 = vmul.f32 %v9849_v9, %v8246_v15  ;;  %v12810_v44 = vpop.f32.mrb[100].mxu1  ;;  %v12824_v16 = vpop.f32.mrb[110].mxu0  ;;  %v18127_v21 = vld [vmem:[#allocation99_spill] sm:$0xff] }
 0xec7   : > { %v8278_v0 = vadd.f32 %v8274_v13, %v8169_v49  ;;  %v9862_v27 = vadd.f32 %v9858_v58, %v9838_v17  ;;  %v8168_v42 = vadd.f32 %v8164_v8, %v8059_v4  ;;  %v9837_v33 = vadd.f32 %v9833_v50, %v9813_v59  ;;  %v8345_v3 = vpop.f32.mrb[101].mxu1  ;;  %v8496_v47 = vpop.f32.mrb[111].mxu0  ;;  %v18129_v13 = vld [vmem:[#allocation91_spill] sm:$0xff]  ;;  %v18130_v17 = vld [vmem:[#allocation26_spill] sm:$0xff] }
 0xec8   : > { %v8381_v14 = vmul.f32 %v12810_v44, %v18122_v62  ;;  %v9880_v55 = vmul.f32 %v12810_v44, %v17198_v7  ;;  %v8380_v24 = vmul.f32 %v18123_v34, %v8345_v3  ;;  %v9879_v45 = vmul.f32 %v17196_v11, %v8345_v3  ;;  %12832 = vmatprep.mubr.msk.f32.mxu1 %vm882_vm0, %v8496_v47  ;;  %v18124_v7 = vld [vmem:[#allocation77_spill] sm:$0xff]  ;;  %v18132_v44 = vld [vmem:[#allocation28_spill] sm:$0xff]  ;;  %v11452_v47 = vld [vmem:[%s17936_s16 + $0xa0] sm:$0xff] }
 0xec9   : > { %v8277_v18 = vadd.f32 %v8273_v23, %v8168_v42  ;;  %v9861_v10 = vadd.f32 %v9857_v1, %v9837_v33  ;;  %12833 = vmatmul.mubr.msk.f32.vlgmr.msra.gmra.mrb[104].mxu1 %vm882_vm0, %v12824_v16  ;;  %v18134_v42 = vld [vmem:[#allocation27_spill] sm:$0xff]  ;;  %v11454_v34 = vld [vmem:[%s17936_s16 + $0xb0] sm:$0xff] }
 0xeca   : > { %v8385_v28 = vadd.f32 %v8381_v14, %v8276_v32  ;;  %v8384_v4 = vadd.f32 %v8380_v24, %v8275_v37  ;;  %v9883_v59 = vadd.f32 %v9879_v45, %v9859_v19  ;;  %13406 = vmatpush3.bf16.msra.mxu1 %v18099_v29  ;;  %v9884_v52 = vadd.f32 %v9880_v55, %v9860_v30  ;;  %v12813_v9 = vpop.f32.mrb[102].mxu1  ;;  %v12827_v60 = vpop.f32.mrb[112].mxu0  ;;  %v18135_v62 = vld [vmem:[#allocation31_spill] sm:$0xff]  ;;  %v11428_v14 = vld [vmem:[%s17837_s4 + $0xa0] sm:$0xff]  ;;  %v13989_v55 = vld [vmem:[#allocation13] sm:$0xf] }
 0xecb   : > { %v8383_v22 = vmul.f32 %v12813_v9, %v18124_v7  ;;  %v9882_v57 = vmul.f32 %v12813_v9, %v9877_v43  ;;  %13408 = vmatprep.subr.bf16.mxu1 %v18125_v31  ;;  %v8355_v11 = vpop.f32.mrb[103].mxu1  ;;  %v8506_v53 = vpop.f32.mrb[113].mxu0  ;;  %v11455_v24 = vld [vmem:[%s17936_s16 + $0xb8] sm:$0xff]  ;;  %v11430_v45 = vld [vmem:[%s17837_s4 + $0xb0] sm:$0xff] }
 0xecc   : > { %v8405_v61 = vadd.f32 %v18126_v40, %v8385_v28  ;;  %v8404_v63 = vadd.f32 %v18127_v21, %v8384_v4  ;;  %v9903_v32 = vadd.f32 %v17220_v12, %v9883_v59  ;;  %v9904_v51 = vadd.f32 %v9893_v56, %v9884_v52  ;;  %12835 = vmatprep.mubr.msk.f32.mxu1 %vm882_vm0, %v8506_v53  ;;  %v9901_v29 = vpop.permute.xlu1 %9900  ;;  %v9897_v12 = vpop.permute.xlu0 %9896  ;;  %v11431_v43 = vld [vmem:[%s17837_s4 + $0xb8] sm:$0xff] }
 0xecd   : > { %v8387_v30 = vadd.f32 %v8383_v22, %v8278_v0  ;;  %v8382_v15 = vmul.f32 %v18128_v6, %v8355_v11  ;;  %v9881_v37 = vmul.f32 %v17208_v39, %v8355_v11  ;;  %12836 = vmatmul.mubr.msk.f32.gmra.mrb[106].mxu1 %vm882_vm0, %v12827_v60  ;;  %v9886_v19 = vadd.f32 %v9882_v57, %v9862_v27  ;;  %v18131_v39 = vld [vmem:[#allocation96_spill] sm:$0xff]  ;;  %v18133_v27 = vld [vmem:[#allocation89_spill] sm:$0xff] }
 0xece   : > { %v13459_v25 = vpack.c.bf16 %v9904_v51, %v9903_v32  ;;  %13410 = vmatpush3.bf16.msra.mxu1 %v18125_v31  ;;  %12846 = vmatprep.mubr.msk.f32.mxu1 %vm1020_vm1, %v18129_v13  ;;  %v12862_v58 = vpop.f32.mrb[114].mxu0  ;;  %v13435_v49 = vpack.c.bf16 %v8405_v61, %v8404_v63  ;;  %v11472_v28 = vld [vmem:[%s17837_s4 + $0xf8] sm:$0xff] }
 0xecf   : > { %v8407_v41 = vadd.f32 %v18130_v17, %v8387_v30  ;;  %v8386_v8 = vadd.f32 %v8382_v15, %v8277_v18  ;;  %v9906_v50 = vadd.f32 %v9901_v29, %v9886_v19  ;;  %v9885_v56 = vadd.f32 %v9881_v37, %v9861_v10  ;;  %v9025_v36 = vpop.f32.mrb[115].mxu0  ;;  %v11470_v18 = vld [vmem:[%s17837_s4 + $0xe8] sm:$0xff]  ;;  %v11471_v10 = vld [vmem:[%s17837_s4 + $0xf0] sm:$0xff] }
 0xed0   : > { %12868 = vmatprep.mubr.msk.f32.mxu0 %vm2807_vm6, %v9025_v36  ;;  %13436 = vmatprep.subr.bf16.mxu1 %v13435_v49  ;;  %v17327_v4 = vpop.permute.xlu1 %9239 }
 0xed1   : > { %v8406_v23 = vadd.f32 %v18131_v39, %v8386_v8  ;;  %v9905_v1 = vadd.f32 %v9897_v12, %v9885_v56  ;;  %12847 = vmatmul.mubr.msk.f32.vlgmr.msra.gmra.mrb[104].mxu1 %vm1020_vm1, %v18132_v44  ;;  %12869 = vmatmul.mubr.msk.f32.vlgmr.msra.gmra.mrb[118].mxu0 %vm2807_vm6, %v12862_v58 }
 0xed2   : > { %13422 = vmatpush3.bf16.msra.mxu0 %v16957_v46  ;;  %13438 = vmatpush3.bf16.msra.mxu1 %v13435_v49  ;;  %v12865_v16 = vpop.f32.mrb[116].mxu0  ;;  %v11453_v46 = vld [vmem:[%s17936_s16 + $0xa8] sm:$0xff] }
 0xed3   : > { %v13463_v0 = vpack.c.bf16 %v9906_v50, %v9905_v1  ;;  %12849 = vmatprep.mubr.msk.f32.mxu1 %vm1020_vm1, %v18133_v27  ;;  %13424 = vmatprep.subr.bf16.mxu0 %v18134_v42  ;;  %v13439_v33 = vpack.c.bf16 %v8407_v41, %v8406_v23  ;;  %v9035_v3 = vpop.f32.mrb[117].mxu0 }
 0xed4   : > { %12871 = vmatprep.mubr.msk.f32.mxu0 %vm2807_vm6, %v9035_v3  ;;  %v17329_v59 = vpop.permute.xlu1 %9263 }
 0xed5   : > { %13440 = vmatprep.subr.bf16.mxu1 %v13439_v33  ;;  %12850 = vmatmul.mubr.msk.f32.gmra.mrb[106].mxu1 %vm1020_vm1, %v18135_v62 }
 0xed6   : > { %13426 = vmatpush3.bf16.msra.mxu0 %v18134_v42  ;;  %13442 = vmatpush3.bf16.msra.mxu1 %v13439_v33 }
 0xed7   : > { %13428 = vmatprep.subr.bf16.mxu0 %v16964_v54  ;;  %12904 = vmatprep.mubr.msk.f32.mxu1 %vm1020_vm1, %v11452_v47 }
 0xed8   : > { %12910 = vmatprep.subr.msk.mxu1 %vm4522_vm7, %v13989_v55  ;;  %12872 = vmatmul.mubr.msk.f32.gmra.mrb[120].mxu0 %vm2807_vm6, %v12865_v16  ;;  %v17331_v52 = vpop.permute.xlu1 %9267 }
 0xed9   : > { %12905 = vmatmul.mubr.msk.f32.vlgmr.msra.gmra.mrb[108].mxu1 %vm1020_vm1, %v11453_v46  ;;  %12890 = vmatprep.mubr.msk.f32.mxu0 %vm4119_vm8, %v11428_v14 }
 0xeda   : > { %13430 = vmatpush3.bf16.msra.mxu0 %v16964_v54  ;;  %12911 = vmatpush3.msk.msra.mxu1 %vm4522_vm7, %v13989_v55  ;;  %v11429_v54 = vld [vmem:[%s17837_s4 + $0xa8] sm:$0xff] }
 0xedb   : > { %13432 = vmatprep.subr.bf16.mxu0 %v16977_v48  ;;  %13444 = vmatprep.subr.bf16.mxu1 %v17085_v20 }
 0xedc   : > { %12907 = vmatprep.mubr.msk.f32.mxu1 %vm1020_vm1, %v11454_v34  ;;  %v17333_v9 = vpop.permute.xlu1 %9251 }
 0xedd   : > { %12908 = vmatmul.mubr.msk.f32.gmra.mrb[110].mxu1 %vm1020_vm1, %v11455_v24 }
 0xede   : > { %13434 = vmatpush3.bf16.msra.mxu0 %v16977_v48  ;;  %v11469_v48 = vld [vmem:[%s17837_s4 + $0xe0] sm:$0xff] }
 0xedf   : > { %13460 = vmatprep.subr.bf16.mxu0 %v13459_v25 }
 0xee0   : > { %v17337_v60 = vpop.permute.xlu1 %9275 }
 0xee1   : > { %12891 = vmatmul.mubr.msk.f32.vlgmr.msra.gmra.mrb[118].mxu0 %vm4119_vm8, %v11429_v54 }
 0xee2   : > { %13462 = vmatpush3.bf16.msra.mxu0 %v13459_v25  ;;  %12893 = vmatprep.mubr.msk.f32.mxu0 %vm4119_vm8, %v11430_v45 }
 0xee3   : > { %13464 = vmatprep.subr.bf16.mxu0 %v13463_v0 }
 0xee4   : > { %v17341_v22 = vpop.permute.xlu1 %9728 }
 0xee5   : > { %12894 = vmatmul.mubr.msk.f32.gmra.mrb[120].mxu0 %vm4119_vm8, %v11431_v43  ;;  %v11448_v43 = vld [vmem:[%s17837_s4 + $0xc0] sm:$0xff] }
 0xee6   : > { %13466 = vmatpush3.bf16.msra.mxu0 %v13463_v0  ;;  %12956 = vmatprep.mubr.msk.f32.mxu0 %vm4119_vm8, %v11469_v48 }
 0xee7   : > { %13468 = vmatprep.subr.bf16.mxu0 %v13435_v49 }
 0xee8   : > { %v17345_v31 = vpop.permute.xlu1 %9748 }
 0xeea   : > { %13470 = vmatpush3.bf16.msra.mxu0 %v13435_v49 }
 0xeeb   : > { %13472 = vmatprep.subr.bf16.mxu0 %v13439_v33 }
 0xeec   : > { %v17349_v53 = vpop.permute.xlu1 %9732 }
 0xeee   : > { %13474 = vmatpush3.bf16.msra.mxu0 %v13439_v33 }
 0xeef   : > { %13484 = vmatprep.subr.bf16.mxu0 %v18098_v5 }
 0xef0   : > { %v17353_v61 = vpop.permute.xlu1 %9756 }
 0xef1   : > { %12957 = vmatmul.mubr.msk.f32.vlgmr.msra.gmra.mrb[122].mxu0 %vm4119_vm8, %v11470_v18 }
 0xef2   : > { %13486 = vmatpush3.bf16.msra.mxu0 %v18098_v5  ;;  %12959 = vmatprep.mubr.msk.f32.mxu0 %vm4119_vm8, %v11471_v10  ;;  %v17335_v5 = vpop.permute.xlu0 %9243 }
 0xef4   : > { %v17357_v63 = vpop.permute.xlu1 %9913 }
 0xef5   : > { %12960 = vmatmul.mubr.msk.f32.gmra.mrb[124].mxu0 %vm4119_vm8, %v11472_v28 }
 0xef6   : > { %v17339_v7 = vpop.permute.xlu0 %9247 }
 0xef8   : > { %v17361_v51 = vpop.permute.xlu1 %10030 }
 0xefa   : > { %v17343_v57 = vpop.permute.xlu0 %9271 }
 0xefc   : > { %v17365_v30 = vpop.permute.xlu1 %10034 }
 0xefe   : > { %v17347_v11 = vpop.permute.xlu0 %9724 }
 0xf00   : > { %v17369_v15 = vpop.permute.xlu1 %9925 }
 0xf02   : > { %v17351_v40 = vpop.permute.xlu0 %9752 }
 0xf04   : > { %v17373_v19 = vpop.permute.xlu1 %10042 }
 0xf06   : > { %v17355_v21 = vpop.permute.xlu0 %9736 }
 0xf08   : > { %v8730_v13 = vpop.permute.xlu1 %8729 }
 0xf0a   : > { %v17359_v32 = vpop.permute.xlu0 %9760 }
 0xf0c   : > { %v8758_v12 = vpop.permute.xlu1 %8757 }
 0xf0e   : > { %v17363_v29 = vpop.permute.xlu0 %9917 }
 0xf10   : > { %v8735_v17 = vpop.permute.xlu1 %8734 }
 0xf12   : > { %v17367_v6 = vpop.permute.xlu0 %9921 }
 0xf14   : > { %v8768_v0 = vpop.permute.xlu1 %8767 }
 0xf16   : > { %v17371_v37 = vpop.permute.xlu0 %10038 }
 0xf1a   : > { %v8725_v25 = vpop.permute.xlu0 %8724 }
 0xf1e   : > { %v8763_v58 = vpop.permute.xlu0 %8762 }
 0xf22   : > { %v8740_v49 = vpop.permute.xlu0 %8739 }
 0xf26   : > { %v8773_v1 = vpop.permute.xlu0 %8772 }
 0xfa4   : > { %v12848_v41 = vpop.f32.mrb[104].mxu1 }
 0xfa5   : > { %v8743_v8 = vadd.f32 %v12848_v41, %v8730_v13  ;;  %v8698_v50 = vpop.f32.mrb[105].mxu1  ;;  %v11482_v41 = vld [vmem:[%s17973_s19 + $0xa8] sm:$0xff] }
 0xfa6   : > { %v8742_v56 = vadd.f32 %v8725_v25, %v8698_v50 }
 0xfa7   : > { %vm8752_vm2 = vcmp.gt.f32.partialorder %v8743_v8, 0.0  ;;  %v8776_v36 = vmul.f32 %v8763_v58, %v8743_v8 }
 0xfa8   : > { %vm8751_vm3 = vcmp.gt.f32.partialorder %v8742_v56, 0.0  ;;  %v8775_v39 = vmul.f32 %v8758_v12, %v8742_v56  ;;  %v12851_v23 = vpop.f32.mrb[106].mxu1 }
 0xfa9   : > { %v8745_v44 = vadd.f32 %v12851_v23, %v8740_v49  ;;  %v8708_v16 = vpop.f32.mrb[107].mxu1  ;;  %v8780_v27 = vsel %vm8752_vm2, %v8743_v8, %v8776_v36 }
 0xfaa   : > { %v8744_v42 = vadd.f32 %v8735_v17, %v8708_v16  ;;  %v8779_v33 = vsel %vm8751_vm3, %v8742_v56, %v8775_v39 }
 0xfab   : > { %vm8754_vm4 = vcmp.gt.f32.partialorder %v8745_v44, 0.0  ;;  %v8778_v3 = vmul.f32 %v8773_v1, %v8745_v44  ;;  %v17375_v47 = vpack.c.bf16 %v8780_v27, %v8779_v33 }
 0xfac   : > { %vm8753_vm5 = vcmp.gt.f32.partialorder %v8744_v42, 0.0  ;;  %v8777_v62 = vmul.f32 %v8768_v0, %v8744_v42  ;;  %v12906_v46 = vpop.f32.mrb[108].mxu1 }
 0xfad   : > { %v9510_v14 = vpop.f32.mrb[109].mxu1  ;;  %13488 = vmatprep.subr.bf16.mxu0 %v17375_v47  ;;  %v8782_v55 = vsel %vm8754_vm4, %v8745_v44, %v8778_v3  ;;  %v11522_v3 = vld [vmem:[%s17974_s11 + $0x20] sm:$0xff] }
 0xfae   : > { %12912 = vmatprep.mubr.msk.f32.mxu1 %vm4509_vm12, %v9510_v14  ;;  %v8781_v34 = vsel %vm8753_vm5, %v8744_v42, %v8777_v62  ;;  %v11523_v62 = vld [vmem:[%s17974_s11 + $0x28] sm:$0xff]  ;;  %10767 = vperm.xlu1 %13974, %v11522_v3  }
 0xfaf   : > { %12913 = vmatmul.mubr.msk.f32.vlgmr.msra.gmra.mrb[112].mxu1 %vm4509_vm12, %v12906_v46  ;;  %v17380_v24 = vpack.c.bf16 %v8782_v55, %v8781_v34  ;;  %10772 = vperm.xlu0 %13973, %v11523_v62   ;;  %v18136_v46 = vmov 1  }
 0xfb0   : > { %13446 = vmatpush3.bf16.msra.mxu1 %v17085_v20  ;;  %v12909_v54 = vpop.f32.mrb[110].mxu1 }
 0xfb1   : > { %13448 = vmatprep.subr.bf16.mxu1 %v17101_v35  ;;  %v9520_v45 = vpop.f32.mrb[111].mxu1 }
 0xfb2   : > { %12915 = vmatprep.mubr.msk.f32.mxu1 %vm4509_vm12, %v9520_v45  ;;  %13975 = vset.pattern.permute.xlu1 %v18136_v46 }
 0xfb3   : > { %12916 = vmatmul.mubr.msk.f32.gmra.mrb[114].mxu1 %vm4509_vm12, %v12909_v54  ;;  %13976 = vset.pattern.permute.xlu0 %v18136_v46 }
 0xfb4   : > { %13450 = vmatpush3.bf16.msra.mxu1 %v17101_v35  ;;  %v12892_v48 = vpop.f32.mrb[118].mxu0  ;;  %12934 = vmatprep.mubr.msk.f32.mxu1 %vm4119_vm8, %v11448_v43 }
 0xfb5   : > { %13452 = vmatprep.subr.bf16.mxu1 %v17089_v26  ;;  %v9255_v20 = vadd.f32 %v12892_v48, %v17335_v5  ;;  %v9219_v18 = vpop.f32.mrb[119].mxu0  ;;  %10794 = vperm.xlu1 %13975, %v11522_v3  }
 0xfb6   : > { %v9254_v10 = vadd.f32 %v17327_v4, %v9219_v18  ;;  %10798 = vperm.xlu0 %13976, %v11523_v62  }
 0xfb7   : > { %vm9259_vm9 = vcmp.gt.f32.partialorder %v9255_v20, 0.0  ;;  %v9279_v28 = vmul.f32 %v17331_v52, %v9255_v20 }
 0xfb8   : > { %vm9258_vm10 = vcmp.gt.f32.partialorder %v9254_v10, 0.0  ;;  %v9278_v25 = vmul.f32 %v17329_v59, %v9254_v10  ;;  %13454 = vmatpush3.bf16.msra.mxu1 %v17089_v26  ;;  %v12895_v13 = vpop.f32.mrb[120].mxu0  ;;  %v11449_v26 = vld [vmem:[%s17837_s4 + $0xc8] sm:$0xff]  ;;  %v11450_v59 = vld [vmem:[%s17837_s4 + $0xd0] sm:$0xff] }
 0xfb9   : > { %13456 = vmatprep.subr.bf16.mxu1 %v17105_v38  ;;  %v9257_v35 = vadd.f32 %v12895_v13, %v17333_v9  ;;  %v9229_v58 = vpop.f32.mrb[121].mxu0  ;;  %v9283_v12 = vsel %vm9259_vm9, %v9255_v20, %v9279_v28  ;;  %13977 = vset.pattern.permute.xlu1 %v18102_v2 }
 0xfba   : > { %v9256_v5 = vadd.f32 %v17339_v7, %v9229_v58  ;;  %v9282_v49 = vsel %vm9258_vm10, %v9254_v10, %v9278_v25 }
 0xfbb   : > { %vm9261_vm11 = vcmp.gt.f32.partialorder %v9257_v35, 0.0  ;;  %v9281_v4 = vmul.f32 %v17337_v60, %v9257_v35  ;;  %v13475_v17 = vpack.c.bf16 %v9283_v12, %v9282_v49  ;;  %v11509_v12 = vld [vmem:[%s17973_s19 + $0xe0] sm:$0xff]  ;;  %v11512_v49 = vld [vmem:[%s17973_s19 + $0xf8] sm:$0xff] }
 0xfbc   : > { %vm9260_vm13 = vcmp.gt.f32.partialorder %v9256_v5, 0.0  ;;  %v9280_v52 = vmul.f32 %v17343_v57, %v9256_v5  ;;  %13458 = vmatpush3.bf16.msra.mxu1 %v17105_v38  ;;  %v11451_v38 = vld [vmem:[%s17837_s4 + $0xd8] sm:$0xff]  ;;  %v11481_v57 = vld [vmem:[%s17973_s19 + $0xa0] sm:$0xff] }
 0xfbd   : > { %13476 = vmatprep.subr.bf16.mxu1 %v13475_v17  ;;  %v9285_v9 = vsel %vm9261_vm11, %v9257_v35, %v9281_v4 }
 0xfbe   : > { %v9284_v7 = vsel %vm9260_vm13, %v9256_v5, %v9280_v52  ;;  %v11511_v5 = vld [vmem:[%s17973_s19 + $0xf0] sm:$0xff]  ;;  %v11477_v52 = vld [vmem:[%s17973_s19 + $0x80] sm:$0xff] }
 0xfbf   : > { %12935 = vmatmul.mubr.msk.f32.vlgmr.msra.gmra.mrb[112].mxu1 %vm4119_vm8, %v11449_v26  ;;  %v13479_v60 = vpack.c.bf16 %v9285_v9, %v9284_v7  ;;  %v11478_v26 = vld [vmem:[%s17973_s19 + $0x88] sm:$0xff]  ;;  %v11480_v9 = vld [vmem:[%s17973_s19 + $0x98] sm:$0xff] }
 0xfc0   : > { %13478 = vmatpush3.bf16.msra.mxu1 %v13475_v17  ;;  %12937 = vmatprep.mubr.msk.f32.mxu1 %vm4119_vm8, %v11450_v59  ;;  %v11479_v59 = vld [vmem:[%s17973_s19 + $0x90] sm:$0xff]  ;;  %v13991_v7 = vld [vmem:[#allocation14] sm:$0xf] }
 0xfc1   : > { %13480 = vmatprep.subr.bf16.mxu1 %v13479_v60 }
 0xfc3   : > { %12938 = vmatmul.mubr.msk.f32.gmra.mrb[114].mxu1 %vm4119_vm8, %v11451_v38  ;;  %v11525_v38 = vld [vmem:[%s17974_s11 + $0x38] sm:$0xff] }
 0xfc4   : > { %13482 = vmatpush3.bf16.msra.mxu1 %v13479_v60  ;;  %12970 = vmatprep.mubr.msk.f32.mxu1 %vm1020_vm1, %v11481_v57  ;;  %v12958_v8 = vpop.f32.mrb[122].mxu0  ;;  %v11524_v60 = vld [vmem:[%s17974_s11 + $0x30] sm:$0xff] }
 0xfc5   : > { %v10006_v50 = vpop.f32.mrb[123].mxu0  ;;  %v10012_v56 = vadd.f32 %v12958_v8, %v17363_v29  ;;  %10777 = vperm.xlu1 %13977, %v11524_v60   ;;  %10802 = vperm.xlu0 %13976, %v11524_v60   ;;  %v13992_v57 = vld [vmem:[%s17980_s20 + $0x10] sm:$0xff] }
 0xfc6   : > { %v10007_v36 = vadd.f32 %v10006_v50, %v17357_v63  ;;  %v11483_v63 = vld [vmem:[%s17973_s19 + $0xb0] sm:$0xff] }
 0xfc7   : > { %12971 = vmatmul.mubr.msk.f32.vlgmr.msra.gmra.mrb[116].mxu1 %vm1020_vm1, %v11482_v41  ;;  %v10046_v44 = vmul.f32 %v17365_v30, %v10012_v56  ;;  %vm10026_vm8 = vcmp.gt.f32.partialorder %v10012_v56, 0.0  ;;  %v13993_v41 = vld [vmem:[%s17980_s20 + $0x18] sm:$0xff] }
 0xfc8   : > { %v12961_v39 = vpop.f32.mrb[124].mxu0  ;;  %v10045_v16 = vmul.f32 %v17361_v51, %v10007_v36  ;;  %vm10025_vm14 = vcmp.gt.f32.partialorder %v10007_v36, 0.0  ;;  %12973 = vmatprep.mubr.msk.f32.mxu1 %vm1020_vm1, %v11483_v63  ;;  %v11484_v51 = vld [vmem:[%s17973_s19 + $0xb8] sm:$0xff] }
 0xfc9   : > { %v10022_v23 = vadd.f32 %v12961_v39, %v17369_v15  ;;  %v10016_v1 = vpop.f32.mrb[125].mxu0  ;;  %10782 = vperm.xlu1 %13977, %v11525_v38   ;;  %13979 = vset.pattern.permute.xlu0 %v18102_v2 }
 0xfca   : > { %v10017_v0 = vadd.f32 %v10016_v1, %v17367_v6  ;;  %v10049_v30 = vsel %vm10025_vm14, %v10007_v36, %v10045_v16  ;;  %v10050_v6 = vsel %vm10026_vm8, %v10012_v56, %v10046_v44  ;;  %10821 = vperm.xlu0 %13979, %v13992_v57   ;;  %v10818_v44 = vld [vmem:[#allocation5 + $0x10] sm:$0xff] }
 0xfcb   : > { %vm10028_vm15 = vcmp.gt.f32.partialorder %v10022_v23, 0.0  ;;  %v10048_v27 = vmul.f32 %v17373_v19, %v10022_v23  ;;  %12974 = vmatmul.mubr.msk.f32.gmra.mrb[118].mxu1 %vm1020_vm1, %v11484_v51  ;;  %v13503_v19 = vpack.c.bf16 %v10050_v6, %v10049_v30 }
 0xfcc   : > { %vm10027_vm2 = vcmp.gt.f32.partialorder %v10017_v0, 0.0  ;;  %v10047_v29 = vmul.f32 %v17371_v37, %v10017_v0  ;;  %v11497_v37 = vld [vmem:[%s17973_s19 + $0xc0] sm:$0xff] }
 0xfcd   : > { %v10052_v42 = vsel %vm10028_vm15, %v10022_v23, %v10048_v27  ;;  %13008 = vmatprep.mubr.msk.f32.mxu1 %vm1020_vm1, %v11497_v37  ;;  %13978 = vset.pattern.permute.xlu1 %v18136_v46 }
 0xfce   : > { %v10051_v15 = vsel %vm10027_vm2, %v10017_v0, %v10047_v29  ;;  %10806 = vperm.xlu1 %13978, %v11525_v38  }
 0xfcf   : > { %v13507_v33 = vpack.c.bf16 %v10052_v42, %v10051_v15 }
 0xfd2   : > { %13980 = vset.pattern.permute.xlu1 %v18102_v2 }
 0xfd3   : > { %10825 = vperm.xlu1 %13980, %v13993_v41  }
0x102d   : > { %v10768_v16 = vpop.permute.xlu1 %10767 }
0x102e   : > { %v10773_v29 = vpop.permute.xlu0 %10772 }
0x1034   : > { %v10795_v0 = vpop.permute.xlu1 %10794 }
0x1035   : > { %v10799_v30 = vpop.permute.xlu0 %10798 }
0x1044   : > { %v10778_v27 = vpop.permute.xlu1 %10777 }
0x1048   : > { %v10783_v63 = vpop.permute.xlu1 %10782 }
0x104d   : > { %v10807_v3 = vpop.permute.xlu1 %10806 }
0x1092   : > { %v12936_v14 = vpop.f32.mrb[112].mxu1 }
0x1093   : > { %v9740_v55 = vadd.f32 %v12936_v14, %v17341_v22  ;;  %v9704_v34 = vpop.f32.mrb[113].mxu1 }
0x1094   : > { %v9739_v54 = vadd.f32 %v17347_v11, %v9704_v34 }
0x1095   : > { %vm9744_vm3 = vcmp.gt.f32.partialorder %v9740_v55, 0.0  ;;  %v9764_v45 = vmul.f32 %v17351_v40, %v9740_v55 }
0x1096   : > { %vm9743_vm4 = vcmp.gt.f32.partialorder %v9739_v54, 0.0  ;;  %v9763_v43 = vmul.f32 %v17345_v31, %v9739_v54  ;;  %v12939_v48 = vpop.f32.mrb[114].mxu1 }
0x1097   : > { %v9742_v20 = vadd.f32 %v12939_v48, %v17355_v21  ;;  %v9714_v18 = vpop.f32.mrb[115].mxu1  ;;  %v9768_v10 = vsel %vm9744_vm3, %v9740_v55, %v9764_v45 }
0x1098   : > { %v9741_v28 = vadd.f32 %v17349_v53, %v9714_v18  ;;  %v9767_v25 = vsel %vm9743_vm4, %v9739_v54, %v9763_v43  ;;  %v11498_v53 = vld [vmem:[%s17973_s19 + $0xc8] sm:$0xff]  ;;  %v10803_v54 = vpop.permute.xlu0 %10802 }
0x1099   : > { %vm9746_vm5 = vcmp.gt.f32.partialorder %v9742_v20, 0.0  ;;  %v9766_v22 = vmul.f32 %v17359_v32, %v9742_v20  ;;  %v13495_v13 = vpack.c.bf16 %v9768_v10, %v9767_v25  ;;  %v13990_v32 = vld [vmem:[%s17976_s24] sm:$0xff]  ;;  %v10826_v25 = vpop.permute.xlu1 %10825 }
0x109a   : > { %vm9745_vm9 = vcmp.gt.f32.partialorder %v9741_v28, 0.0  ;;  %v9765_v11 = vmul.f32 %v17353_v61, %v9741_v28  ;;  %v12972_v35 = vpop.f32.mrb[116].mxu1  ;;  %v11499_v61 = vld [vmem:[%s17973_s19 + $0xd0] sm:$0xff] }
0x109b   : > { %v10141_v40 = vpop.f32.mrb[117].mxu1  ;;  %13496 = vmatprep.subr.bf16.mxu1 %v13495_v13  ;;  %v9770_v58 = vsel %vm9746_vm5, %v9742_v20, %v9766_v22 }
0x109c   : > { %12980 = vmatprep.mubr.msk.f32.mxu0 %vm882_vm0, %v10141_v40  ;;  %13498 = vmatpush3.bf16.msra.mxu1 %v13495_v13  ;;  %v9769_v31 = vsel %vm9745_vm9, %v9741_v28, %v9765_v11  ;;  %v10819_v28 = vld [vmem:[#allocation5 + $0x18] sm:$0xff]  ;;  %v10822_v22 = vpop.permute.xlu0 %10821 }
0x109d   : > { %12981 = vmatmul.mubr.msk.f32.vlgmr.msra.gmra.mrb[126].mxu0 %vm882_vm0, %v12972_v35  ;;  %v13499_v21 = vpack.c.bf16 %v9770_v58, %v9769_v31  ;;  %v18138_v58 = vld [vmem:[#allocation43_spill] sm:$0xff] }
0x109e   : > { %13490 = vmatpush3.bf16.msra.mxu0 %v17375_v47  ;;  %v11500_v47 = vld [vmem:[%s17973_s19 + $0xd8] sm:$0xff]  ;;  %v12975_v4 = vpop.f32.mrb[118].mxu1 }
0x109f   : > { %13492 = vmatprep.subr.bf16.mxu0 %v17380_v24  ;;  %13500 = vmatprep.subr.bf16.mxu1 %v13499_v21  ;;  %v10151_v17 = vpop.f32.mrb[119].mxu1 }
0x10a0   : > { %13502 = vmatpush3.bf16.msra.mxu1 %v13499_v21  ;;  %12983 = vmatprep.mubr.msk.f32.mxu0 %vm882_vm0, %v10151_v17  ;;  %v18140_v21 = vld [vmem:[#allocation47_spill] sm:$0xff] }
0x10a1   : > { %13504 = vmatprep.subr.bf16.mxu1 %v13503_v19  ;;  %12984 = vmatmul.mubr.msk.f32.gmra.mrb[128].mxu0 %vm882_vm0, %v12975_v4 }
0x10a2   : > { %13494 = vmatpush3.bf16.msra.mxu0 %v17380_v24  ;;  %v11510_v24 = vld [vmem:[%s17973_s19 + $0xe8] sm:$0xff]  ;;  %12994 = vmatprep.mubr.msk.f32.mxu0 %vm1020_vm1, %v11477_v52 }
0x10a3   : > { %13009 = vmatmul.mubr.msk.f32.vlgmr.msra.gmra.mrb[120].mxu1 %vm1020_vm1, %v11498_v53  ;;  %13014 = vmatprep.subr.mxu0 %v13990_v32 }
0x10a4   : > { %13506 = vmatpush3.bf16.msra.mxu1 %v13503_v19  ;;  %13011 = vmatprep.mubr.msk.f32.mxu1 %vm1020_vm1, %v11499_v61 }
0x10a5   : > { %13508 = vmatprep.subr.bf16.mxu1 %v13507_v33  ;;  %12995 = vmatmul.mubr.msk.f32.vlgmr.msra.gmra.mrb[126].mxu0 %vm1020_vm1, %v11478_v26 }
0x10a6   : > { %13015 = vmatpush3.msra.mxu0 %v13990_v32  ;;  %12997 = vmatprep.mubr.msk.f32.mxu0 %vm1020_vm1, %v11479_v59 }
0x10a7   : > { %13012 = vmatmul.mubr.msk.f32.gmra.mrb[122].mxu1 %vm1020_vm1, %v11500_v47  ;;  %13036 = vmatprep.subr.msk.mxu0 %vm4522_vm7, %v13991_v7 }
0x10a8   : > { %13510 = vmatpush3.bf16.msra.mxu1 %v13507_v33  ;;  %13030 = vmatprep.mubr.msk.f32.mxu1 %vm1020_vm1, %v11509_v12 }
0x10a9   : > { %12998 = vmatmul.mubr.msk.f32.gmra.mrb[128].mxu0 %vm1020_vm1, %v11480_v9 }
0x10ab   : > { %13031 = vmatmul.mubr.msk.f32.vlgmr.msra.gmra.mrb[124].mxu1 %vm1020_vm1, %v11510_v24 }
0x10ac   : > { %13033 = vmatprep.mubr.msk.f32.mxu1 %vm1020_vm1, %v11511_v5 }
0x10af   : > { %13034 = vmatmul.mubr.msk.f32.gmra.mrb[126].mxu1 %vm1020_vm1, %v11512_v49 }
0x10b0   : > { %13052 = vmatprep.mubr.msk.f32.mxu1 %vm1020_vm1, %v10818_v44 }
0x1176   : > { %v13010_v8 = vpop.f32.mrb[120].mxu1 }
0x1177   : > { %v10437_v50 = vpop.f32.mrb[121].mxu1 }
0x1178   : > { %13016 = vmatprep.mubr.msk.f32.mxu0 %vm2807_vm6, %v10437_v50 }
0x1179   : > { %13017 = vmatmul.mubr.msk.f32.vlgmr.msra.gmra.mrb[126].mxu0 %vm2807_vm6, %v13010_v8 }
0x117a   : > { %v13013_v56 = vpop.f32.mrb[122].mxu1  ;;  %13037 = vmatpush3.msk.msra.mxu0 %vm4522_vm7, %v13991_v7 }
0x117b   : > { %v10447_v36 = vpop.f32.mrb[123].mxu1 }
0x117c   : > { %13019 = vmatprep.mubr.msk.f32.mxu0 %vm2807_vm6, %v10447_v36 }
0x117d   : > { %13020 = vmatmul.mubr.msk.f32.gmra.mrb[128].mxu0 %vm2807_vm6, %v13013_v56 }
0x117e   : > { %v13032_v2 = vpop.f32.mrb[124].mxu1 }
0x117f   : > { %v10640_v39 = vpop.f32.mrb[125].mxu1 }
0x1180   : > { %13038 = vmatprep.mubr.msk.f32.mxu0 %vm4509_vm12, %v10640_v39 }
0x1181   : > { %13039 = vmatmul.mubr.msk.f32.vlgmr.msra.gmra.mrb[126].mxu0 %vm4509_vm12, %v13032_v2 }
0x1182   : > { %v13035_v23 = vpop.f32.mrb[126].mxu1 }
0x1183   : > { %v10650_v1 = vpop.f32.mrb[127].mxu1 }
0x1184   : > { %13041 = vmatprep.mubr.msk.f32.mxu0 %vm4509_vm12, %v10650_v1 }
0x1185   : > { %13042 = vmatmul.mubr.msk.f32.gmra.mrb[128].mxu0 %vm4509_vm12, %v13035_v23 }
0x1254   : > { %v13040_v51 = vpop.f32.mrb[126].mxu0 }
0x1255   : > { %v10786_v6 = vadd.f32 %v13040_v51, %v10773_v29  ;;  %v10737_v15 = vpop.f32.mrb[127].mxu0 }
0x1256   : > { %v10785_v42 = vadd.f32 %v10768_v16, %v10737_v15 }
0x1257   : > { %vm10790_vm0 = vcmp.gt.f32.partialorder %v10786_v6, 0.0  ;;  %v10810_v19 = vmul.f32 %v10799_v30, %v10786_v6 }
0x1258   : > { %vm10789_vm6 = vcmp.gt.f32.partialorder %v10785_v42, 0.0  ;;  %v10809_v33 = vmul.f32 %v10795_v0, %v10785_v42  ;;  %v13043_v37 = vpop.f32.mrb[128].mxu0 }
0x1259   : > { %v10788_v62 = vadd.f32 %v13043_v37, %v10783_v63  ;;  %v10747_v46 = vpop.f32.mrb[129].mxu0  ;;  %v10814_v14 = vsel %vm10790_vm0, %v10786_v6, %v10810_v19 }
0x125a   : > { %v10787_v55 = vadd.f32 %v10778_v27, %v10747_v46  ;;  %v10813_v34 = vsel %vm10789_vm6, %v10785_v42, %v10809_v33 }
0x125b   : > { %vm10792_vm7 = vcmp.gt.f32.partialorder %v10788_v62, 0.0  ;;  %v10812_v45 = vmul.f32 %v10807_v3, %v10788_v62  ;;  %v13511_v43 = vpack.c.bf16 %v10814_v14, %v10813_v34 }
0x125c   : > { %vm10791_vm12 = vcmp.gt.f32.partialorder %v10787_v55, 0.0  ;;  %v10811_v48 = vmul.f32 %v10803_v54, %v10787_v55 }
0x125d   : > { %13512 = vmatprep.subr.bf16.mxu1 %v13511_v43  ;;  %v10816_v20 = vsel %vm10792_vm7, %v10788_v62, %v10812_v45 }
0x125e   : > { %13514 = vmatpush3.bf16.msra.mxu1 %v13511_v43  ;;  %v10815_v18 = vsel %vm10791_vm12, %v10787_v55, %v10811_v48 }
0x125f   : > { %v13515_v10 = vpack.c.bf16 %v10816_v20, %v10815_v18 }
0x1261   : > { %13516 = vmatprep.subr.bf16.mxu1 %v13515_v10 }
0x1262   : > { %13518 = vmatpush3.bf16.msra.mxu1 %v13515_v10 }
0x1265   : > { %13053 = vmatmul.mubr.msk.f32.vlgmr.msra.gmra.mrb[128].mxu1 %vm1020_vm1, %v10819_v28 }
0x1338   : > { %v13054_v13 = vpop.f32.mrb[128].mxu1 }
0x1339   : > { %v10906_v11 = vadd.f32 %v13054_v13, %v10826_v25  ;;  %v10900_v35 = vpop.f32.mrb[129].mxu1 }
0x133a   : > { %v10901_v40 = vadd.f32 %v10900_v35, %v10822_v22 }
0x133b   : > { %v10910_v31 = vadd.f32 %v10906_v11, %v18138_v58 }
0x133c   : > { %v10909_v53 = vadd.f32 %v10901_v40, %v18140_v21 }
0x133d   : > { %10912 = vst.msk [vmem:[%s851_s0 + $0x8] sm:$0xff] %vm1020_vm1, %v10910_v31 }
0x133e   : > { %10911 = vst.msk [vmem:[%s851_s0] sm:$0xff] %vm1020_vm1, %v10909_v53 }
0x133f   : > { %14233 = shalt.err (!%p14230_p10)
}
0x1340   : > { %s14234_s0 = scalar_lea.hbm %s17548_s23, 256  ;;  %s14238_s27 = scalar_lea.hbm %s18139_s7, 512 }
0x1341   : > { %p14235_p11 = scmp.ne.s32.totalorder %s17548_s23, %s14234_s0  ;;  %p14239_p9 = scmp.lt.u32.totalorder %s17548_s23, %s18139_s7 }
0x1342   : > { %p14240_p7 = scmp.lt.u32.totalorder %s14238_s27, %s14234_s0  ;;  %p14242_p12 = scmp.lt.u32.totalorder %s14234_s0, %s17548_s23 }
0x1343   : > { %p14236_p3 = pnand %p14235_p11, %p18141_p1 }
0x1344   : > { %p14241_p4 = por %p14240_p7, %p14239_p9 }
0x1345   : > { %p14237_p5 = pneg %p14236_p3 }
0x1346   : > { %p14243_p13 = por %p14242_p12, %p14241_p4 }
0x1348   : > { %p14244_p0 = pnand %p14243_p13, %p14237_p5 }
0x134a   : > { %14247 = shalt.err (!%p14244_p0)
}
0x134b   : > { %s14336_s13 = smov 128   ;;  %s14337_s26 = smov 8  }
0x134c   : > { %s18142_s1 = scalar_lea.sflag [#allocation4], %s14745_s8 }
0x134d   : > { %13597 = dma.vmem_to_hbm [thread:$0]  (%p18141_p1), %s17550_s30, 256, %s17548_s23, %s18142_s1, %s14336_s13, %s14336_s13, %s14337_s26  }
0x134e PF: > { %s10942_s29 = sand.u32 1, %s14290_s5   ;;  %p18143_p2 = scmp.ne.s32.totalorder %s17804_s14, 0 }
0x134f   : > { %p18144_p8 = scmp.ge.s32.totalorder %s14302_s28, 2  ;;  %s10943_s0 = scalar_lea.sflag [#allocation4], %s10942_s29 }
0x1351   : > { %p13626_p6 = pnand %p18144_p8, %p18143_p2 }
0x1353   : > { %14285 = dma.done.wait (!%p13626_p6), %s10943_s0, 256  }
0x1354   : > { %14287 = vsyncadd (!%p13626_p6), %s10943_s0, 4294967040  ;;  %s18145_s5 = sld [smem:[#allocation23_spill]]  ;;  %s18146_s26 = sld [smem:[#allocation24_spill]] }
0x1355   : > { %s18147_s27 = sld [smem:[#allocation25_spill]]  ;;  %p41_p10 = scmp.ge.s32.totalorder %s14669_s3, 4  }
0x1356   : > { %s18148_s28 = smov %s14669_s3 }
0x1357   :  { %43 = sbr.rel (!%p41_p10) target bundleno = 34 (0x22), region = 235 }
0x135e   :  { %10948 = vsyncpa [#allocation3], 1 }
0x135f   :  { %10950 = vsyncpa [#allocation3 + $0x1], 1 }
0x1360   :  { %10951 = vsyncpa [#allocation6], 1 }
0x1361   :  { %10952 = vsyncpa [#allocation9], 1 }
0x1362   :  { %10953 = vsyncpa [#allocation12], 1 }
0x1363   :  { %10954 = vsyncpa [#allocation15], 1 }
0x1364   :  { %10955 = vsyncpa [#allocation4], 1 }
0x1365   :  { %10957 = vsyncpa [#allocation4 + $0x1], 1 }

</bundles_post_ra>
